<compile_context>
chip_gen: v5e
topology: v5e:2x2
jax: 0.10.0
libtpu: 0.0.40
codegen_flags: <defaults>
</compile_context>

<pallas_src>
import functools

import jax
import jax.numpy as jnp
from jax import lax
from jax.experimental import pallas as pl
from jax.experimental.pallas import tpu as pltpu

_VMEM_LIMIT = 48 * 1024 * 1024  # explicit scoped-VMEM limit (safe on v5e/v6e/v7x)


# --------------------------------------------------------------------------------------
# Kernel A: knn-interpolate (k nearest, inverse squared distance weights) fused with the
# first Linear + ReLU of the MLP.  Grid over tiles of target (skip) points; the coarse
# source cloud (positions / batch ids / features) and the Lin1 weights stay resident.
# NOTE: size tile_m against N_src: ~4-5 live (tile_m, N_src) f32 temporaries must fit in
# VMEM (tighter on v7x's 64 MiB).
# --------------------------------------------------------------------------------------
def knn_interp_lin1_kernel(pos_t_ref, bt_ref, pos_sT_ref, bs_ref,
                           x_s_ref, x_skip_ref, w1a_ref, w1b_ref, b1_ref,
                           o_ref, *, k):
    pos_t = pos_t_ref[...]        # (TM, 3) f32 target positions
    pos_sT = pos_sT_ref[...]      # (3, N)  f32 source positions (transposed)
    bt = bt_ref[...]              # (TM, 1) i32 target batch ids
    bs = bs_ref[...]              # (1, N)  i32 source batch ids

    TM = pos_t.shape[0]
    N = pos_sT.shape[1]

    # Exact f32 squared distances (matches the reference's sum of squared differences).
    d = jnp.zeros((TM, N), jnp.float32)
    for c in range(3):
        diff = pos_t[:, c:c + 1] - pos_sT[c:c + 1, :]     # (TM, N)
        d = d + diff * diff

    BIG = jnp.float32(1e30)
    d = jnp.where(bt == bs, d, BIG)                       # exclude cross-batch pairs

    # Iterative top-k by repeated argmin.  Selected points get weight 1/clamp(d, 1e-16);
    # excluded points (cross-batch / fewer than k valid) get weight exactly 0, matching
    # 1/inf = 0 in the reference.  Denominator is accumulated in-loop (no final reduce).
    col = lax.broadcasted_iota(jnp.int32, (TM, N), 1)
    W = jnp.zeros((TM, N), jnp.float32)
    denom = jnp.zeros((TM, 1), jnp.float32)
    for _ in range(k):
        dmin = jnp.min(d, axis=1, keepdims=True)                            # XLU reduce
        sel = jnp.min(jnp.where(d == dmin, col, N), axis=1, keepdims=True)  # tie-break: low idx
        onehot = (col == sel).astype(jnp.float32)
        w = jnp.where(dmin < BIG,
                      pl.reciprocal(jnp.maximum(dmin, jnp.float32(1e-16)), approx=True),
                      jnp.float32(0.0))                                     # EUP reciprocal
        W = W + onehot * w
        denom = denom + w
        d = jnp.where(onehot > 0.0, BIG, d)                                 # drop selected
    # TODO(synk): the two lane reductions per k-iteration could be fused into a single
    # packed-key argmin if bit-exact lowest-index tie-breaking is not required.

    # Weighted average of source features: one bf16 MXU matmul (f32 accumulation),
    # normalized afterwards with an EUP reciprocal.
    numer = jnp.dot(W.astype(jnp.bfloat16), x_s_ref[...],
                    preferred_element_type=jnp.float32)                     # (TM, C_in)
    interp = numer * pl.reciprocal(denom, approx=True)

    # Fused Lin1 + ReLU; w1 is pre-split so the [interp, x_skip] concat never exists in HBM.
    h = (jnp.dot(interp.astype(jnp.bfloat16), w1a_ref[...],
                 preferred_element_type=jnp.float32)
         + jnp.dot(x_skip_ref[...], w1b_ref[...],
                   preferred_element_type=jnp.float32)
         + b1_ref[...])
    o_ref[...] = jnp.maximum(h, 0.0)


# --------------------------------------------------------------------------------------
# Kernel B: BN1 -> Lin2 -> ReLU -> BN2, single block so BatchNorm1d uses true batch
# statistics (training-mode forward, biased variance, eps=1e-5).  BN is folded into a
# per-channel scale/shift computed from one-pass sum / sum-of-squares.
# TODO(synk): for very large point counts (v7x, 64 MiB VMEM / 2 TCs) grid this over row
# tiles with a two-pass BN (accumulate sum/sumsq per tile, then normalize).
# --------------------------------------------------------------------------------------
def mlp_tail_kernel(h1_ref, g1_ref, be1_ref, w2_ref, b2_ref, g2_ref, be2_ref, o_ref):
    eps = jnp.float32(1e-5)
    inv_n = jnp.float32(1.0 / h1_ref.shape[0])

    h = h1_ref[...]                                           # (N, H1) f32, already ReLU'd
    s1 = jnp.sum(h, axis=0, keepdims=True)
    s2 = jnp.sum(h * h, axis=0, keepdims=True)
    mu = s1 * inv_n
    var = jnp.maximum(s2 * inv_n - mu * mu, 0.0)
    scale = g1_ref[...] * lax.rsqrt(var + eps)
    shift = be1_ref[...] - mu * scale
    hn = h * scale + shift

    h2 = jnp.dot(hn.astype(jnp.bfloat16), w2_ref[...],
                 preferred_element_type=jnp.float32) + b2_ref[...]
    h2 = jnp.maximum(h2, 0.0)
    s1 = jnp.sum(h2, axis=0, keepdims=True)
    s2 = jnp.sum(h2 * h2, axis=0, keepdims=True)
    mu = s1 * inv_n
    var = jnp.maximum(s2 * inv_n - mu * mu, 0.0)
    scale = g2_ref[...] * lax.rsqrt(var + eps)
    shift = be2_ref[...] - mu * scale
    o_ref[...] = h2 * scale + shift


# --------------------------------------------------------------------------------------
# Wrapper
# --------------------------------------------------------------------------------------
def fp_module_forward(x, pos, batch, x_skip, pos_skip, batch_skip, params,
                      *, k=3, tile_m=256):
    N_src, C_in = x.shape
    N_tgt, C_skip = x_skip.shape
    w1, b1, g1, be1, w2, b2, g2, be2 = params
    C_cat, H1 = w1.shape
    _, C_out = w2.shape
    assert C_cat == C_in + C_skip

    tile_m = min(tile_m, N_tgt)
    assert N_tgt % tile_m == 0 and tile_m % 8 == 0
    grid = (N_tgt // tile_m,)

    # Layout / dtype prep (cheap, outside the kernels).
    pos_t = pos_skip.astype(jnp.float32)                     # (N_tgt, 3)
    pos_sT = pos.T.astype(jnp.float32)                       # (3, N_src), resident
    bs = batch.reshape(1, N_src).astype(jnp.int32)           # (1, N_src), resident
    bt = batch_skip.reshape(N_tgt, 1).astype(jnp.int32)      # (N_tgt, 1)
    x_bf = x.astype(jnp.bfloat16)                            # resident source features
    x_skip_bf = x_skip.astype(jnp.bfloat16)
    w1a = w1[:C_in].astype(jnp.bfloat16)                     # Lin1 rows acting on interp
    w1b = w1[C_in:].astype(jnp.bfloat16)                     # Lin1 rows acting on x_skip
    w2_bf = w2.astype(jnp.bfloat16)
    b1_f = b1.reshape(1, H1).astype(jnp.float32)
    g1_f = g1.reshape(1, H1).astype(jnp.float32)
    be1_f = be1.reshape(1, H1).astype(jnp.float32)
    b2_f = b2.reshape(1, C_out).astype(jnp.float32)
    g2_f = g2.reshape(1, C_out).astype(jnp.float32)
    be2_f = be2.reshape(1, C_out).astype(jnp.float32)

    h1 = pl.pallas_call(
        functools.partial(knn_interp_lin1_kernel, k=k),
        out_shape=jax.ShapeDtypeStruct((N_tgt, H1), jnp.float32),
        grid=grid,
        in_specs=[
            pl.BlockSpec((tile_m, 3), lambda i: (i, 0)),        # target positions tile
            pl.BlockSpec((tile_m, 1), lambda i: (i, 0)),        # target batch ids tile
            pl.BlockSpec((3, N_src), lambda i: (0, 0)),         # source positions^T (resident)
            pl.BlockSpec((1, N_src), lambda i: (0, 0)),         # source batch ids (resident)
            pl.BlockSpec((N_src, C_in), lambda i: (0, 0)),      # source features bf16 (resident)
            pl.BlockSpec((tile_m, C_skip), lambda i: (i, 0)),   # skip features tile (bf16)
            pl.BlockSpec((C_in, H1), lambda i: (0, 0)),         # w1a bf16 (resident)
            pl.BlockSpec((C_skip, H1), lambda i: (0, 0)),       # w1b bf16 (resident)
            pl.BlockSpec((1, H1), lambda i: (0, 0)),            # b1 (resident)
        ],
        out_specs=pl.BlockSpec((tile_m, H1), lambda i: (i, 0)),
        compiler_params=pltpu.CompilerParams(
            dimension_semantics=("parallel",),
            vmem_limit_bytes=_VMEM_LIMIT),
    )(pos_t, bt, pos_sT, bs, x_bf, x_skip_bf, w1a, w1b, b1_f)

    full = lambda shp: pl.BlockSpec(shp, lambda: (0,) * len(shp))
    out = pl.pallas_call(
        mlp_tail_kernel,
        out_shape=jax.ShapeDtypeStruct((N_tgt, C_out), jnp.float32),
        in_specs=[
            full((N_tgt, H1)),
            full((1, H1)), full((1, H1)),
            full((H1, C_out)), full((1, C_out)), full((1, C_out)), full((1, C_out)),
        ],
        out_specs=full((N_tgt, C_out)),
        compiler_params=pltpu.CompilerParams(vmem_limit_bytes=_VMEM_LIMIT),
    )(h1, g1_f, be1_f, w2_bf, b2_f, g2_f, be2_f)

    return out, pos_skip, batch_skip


# --------------------------------------------------------------------------------------
# Pure-JAX f32 reference (module semantics) for the correctness check.
# --------------------------------------------------------------------------------------
def ref_forward(x, pos, batch, x_skip, pos_skip, batch_skip, params, k):
    d = jnp.sum((pos_skip[:, None, :] - pos[None, :, :]) ** 2, axis=-1)
    d = jnp.where(batch_skip[:, None] == batch[None, :], d, jnp.inf)
    vals, idx = lax.top_k(-d, k)
    dk = -vals
    w = 1.0 / jnp.maximum(dk, 1e-16)
    interp = jnp.sum(w[..., None] * x[idx], axis=1) / jnp.sum(w, axis=1, keepdims=True)
    h = jnp.concatenate([interp, x_skip], axis=1)

    w1, b1, g1, be1, w2, b2, g2, be2 = params
    for (W, b, g, be) in ((w1, b1, g1, be1), (w2, b2, g2, be2)):
        h = jnp.maximum(jnp.dot(h, W, precision=lax.Precision.HIGHEST) + b, 0.0)
        mu = jnp.mean(h, axis=0, keepdims=True)
        var = jnp.mean((h - mu) ** 2, axis=0, keepdims=True)
        h = (h - mu) / jnp.sqrt(var + 1e-5) * g + be
    return h


if __name__ == "__main__":
    key = jax.random.PRNGKey(0)
    ks = jax.random.split(key, 10)

    # Two point clouds; coarse (source) level feeds the fine (skip/target) level.
    N_src, C_in = 128, 16
    N_tgt, C_skip = 512, 8
    K = 3
    C_cat, H1, C_out = C_in + C_skip, 32, 16   # nn = MLP([24, 32, 16])

    x = jax.random.normal(ks[0], (N_src, C_in), jnp.float32)
    pos = jax.random.uniform(ks[1], (N_src, 3), jnp.float32)
    x_skip = jax.random.normal(ks[2], (N_tgt, C_skip), jnp.float32)
    pos_skip = jax.random.uniform(ks[3], (N_tgt, 3), jnp.float32)
    batch = jnp.concatenate([jnp.zeros(N_src // 2, jnp.int32),
                             jnp.ones(N_src // 2, jnp.int32)])
    batch_skip = jnp.concatenate([jnp.zeros(N_tgt // 2, jnp.int32),
                                  jnp.ones(N_tgt // 2, jnp.int32)])

    # Deterministic parameter init (Lin weights/bias, BN gamma/beta).
    params = (
        0.2 * jax.random.normal(ks[4], (C_cat, H1), jnp.float32),
        0.1 * jax.random.normal(ks[5], (1, H1), jnp.float32),
        jnp.ones((1, H1), jnp.float32) + 0.05 * jax.random.normal(ks[6], (1, H1), jnp.float32),
        0.05 * jax.random.normal(ks[7], (1, H1), jnp.float32),
        0.2 * jax.random.normal(ks[8], (H1, C_out), jnp.float32),
        0.1 * jax.random.normal(ks[9], (1, C_out), jnp.float32),
        jnp.ones((1, C_out), jnp.float32),
        jnp.zeros((1, C_out), jnp.float32),
    )

    out, pos_out, batch_out = fp_module_forward(
        x, pos, batch, x_skip, pos_skip, batch_skip, params, k=K, tile_m=256)
    jax.block_until_ready(out)

    ref = ref_forward(x, pos, batch, x_skip, pos_skip, batch_skip, params, K)

    assert out.shape == (N_tgt, C_out)
    assert bool(jnp.all(jnp.isfinite(out)))
    # The kernels run matmuls with bf16 operands (f32 accumulation); the reference is
    # pure f32.  Post-BatchNorm outputs have ~unit variance, so absolute error budgets
    # are meaningful: expected max |err| ~2.5e-2, mean |err| ~5e-3.
    max_err = float(jnp.max(jnp.abs(out - ref)))
    mean_err = float(jnp.mean(jnp.abs(out - ref)))
    assert max_err < 7.5e-2 and mean_err < 1.5e-2, (max_err, mean_err)

    print("KERNEL_OK")
</pallas_src>

<mosaic_0001>
module attributes {stable_mosaic.version = 11 : i64} {
  func.func @knn_interp_lin1_kernel(%arg0: i32, %arg1: memref<256x3xf32, #tpu.memory_space<vmem>>, %arg2: memref<256x1xi32, #tpu.memory_space<vmem>>, %arg3: memref<3x128xf32, #tpu.memory_space<vmem>>, %arg4: memref<1x128xi32, #tpu.memory_space<vmem>>, %arg5: memref<128x16xbf16, #tpu.memory_space<vmem>>, %arg6: memref<256x8xbf16, #tpu.memory_space<vmem>>, %arg7: memref<16x32xbf16, #tpu.memory_space<vmem>>, %arg8: memref<8x32xbf16, #tpu.memory_space<vmem>>, %arg9: memref<1x32xf32, #tpu.memory_space<vmem>>, %arg10: memref<256x32xf32, #tpu.memory_space<vmem>>) attributes {dimension_semantics = [#tpu.dimension_semantics<parallel>], iteration_bounds = array<i64: 2>, scalar_prefetch = 0 : i64, scratch_operands = 0 : i64, tpu.core_type = #tpu.core_type<tc>, window_params = [{transform_indices = @transform_0, window_bounds = array<i64: 256, 3>}, {transform_indices = @transform_1, window_bounds = array<i64: 256, 1>}, {pipeline_mode = #tpu.pipeline_mode<synchronous>, transform_indices = @transform_2, window_bounds = array<i64: 3, 128>}, {pipeline_mode = #tpu.pipeline_mode<synchronous>, transform_indices = @transform_3, window_bounds = array<i64: 1, 128>}, {pipeline_mode = #tpu.pipeline_mode<synchronous>, transform_indices = @transform_4, window_bounds = array<i64: 128, 16>}, {transform_indices = @transform_5, window_bounds = array<i64: 256, 8>}, {pipeline_mode = #tpu.pipeline_mode<synchronous>, transform_indices = @transform_6, window_bounds = array<i64: 16, 32>}, {pipeline_mode = #tpu.pipeline_mode<synchronous>, transform_indices = @transform_7, window_bounds = array<i64: 8, 32>}, {pipeline_mode = #tpu.pipeline_mode<synchronous>, transform_indices = @transform_8, window_bounds = array<i64: 1, 32>}, {transform_indices = @transform_9, window_bounds = array<i64: 256, 32>}]} {
    %c0 = arith.constant 0 : index
    %c0_0 = arith.constant 0 : index
    %0 = vector.load %arg1[%c0, %c0_0] : memref<256x3xf32, #tpu.memory_space<vmem>>, vector<256x3xf32>
    %c0_1 = arith.constant 0 : index
    %c0_2 = arith.constant 0 : index
    %1 = vector.load %arg3[%c0_1, %c0_2] : memref<3x128xf32, #tpu.memory_space<vmem>>, vector<3x128xf32>
    %c0_3 = arith.constant 0 : index
    %c0_4 = arith.constant 0 : index
    %2 = vector.load %arg2[%c0_3, %c0_4] : memref<256x1xi32, #tpu.memory_space<vmem>>, vector<256x1xi32>
    %c0_5 = arith.constant 0 : index
    %c0_6 = arith.constant 0 : index
    %3 = vector.load %arg4[%c0_5, %c0_6] : memref<1x128xi32, #tpu.memory_space<vmem>>, vector<1x128xi32>
    %cst = arith.constant 0.000000e+00 : f32
    %4 = vector.broadcast %cst : f32 to vector<256x128xf32>
    %5 = vector.extract_strided_slice %0 {offsets = [0, 0], sizes = [256, 1], strides = [1, 1]} : vector<256x3xf32> to vector<256x1xf32>
    %6 = vector.extract_strided_slice %1 {offsets = [0, 0], sizes = [1, 128], strides = [1, 1]} : vector<3x128xf32> to vector<1x128xf32>
    %7 = vector.broadcast %5 : vector<256x1xf32> to vector<256x128xf32>
    %8 = vector.broadcast %6 : vector<1x128xf32> to vector<256x128xf32>
    %9 = arith.subf %7, %8 : vector<256x128xf32>
    %10 = arith.mulf %9, %9 : vector<256x128xf32>
    %11 = arith.addf %4, %10 : vector<256x128xf32>
    %12 = vector.extract_strided_slice %0 {offsets = [0, 1], sizes = [256, 1], strides = [1, 1]} : vector<256x3xf32> to vector<256x1xf32>
    %13 = vector.extract_strided_slice %1 {offsets = [1, 0], sizes = [1, 128], strides = [1, 1]} : vector<3x128xf32> to vector<1x128xf32>
    %14 = vector.broadcast %12 : vector<256x1xf32> to vector<256x128xf32>
    %15 = vector.broadcast %13 : vector<1x128xf32> to vector<256x128xf32>
    %16 = arith.subf %14, %15 : vector<256x128xf32>
    %17 = arith.mulf %16, %16 : vector<256x128xf32>
    %18 = arith.addf %11, %17 : vector<256x128xf32>
    %19 = vector.extract_strided_slice %0 {offsets = [0, 2], sizes = [256, 1], strides = [1, 1]} : vector<256x3xf32> to vector<256x1xf32>
    %20 = vector.extract_strided_slice %1 {offsets = [2, 0], sizes = [1, 128], strides = [1, 1]} : vector<3x128xf32> to vector<1x128xf32>
    %21 = vector.broadcast %19 : vector<256x1xf32> to vector<256x128xf32>
    %22 = vector.broadcast %20 : vector<1x128xf32> to vector<256x128xf32>
    %23 = arith.subf %21, %22 : vector<256x128xf32>
    %24 = arith.mulf %23, %23 : vector<256x128xf32>
    %25 = arith.addf %18, %24 : vector<256x128xf32>
    %26 = vector.broadcast %2 : vector<256x1xi32> to vector<256x128xi32>
    %27 = vector.broadcast %3 : vector<1x128xi32> to vector<256x128xi32>
    %28 = arith.cmpi eq, %26, %27 : vector<256x128xi32>
    %cst_7 = arith.constant 1.000000e+30 : f32
    %29 = vector.broadcast %cst_7 : f32 to vector<256x128xf32>
    %30 = arith.select %28, %25, %29 : vector<256x128xi1>, vector<256x128xf32>
    %31 = tpu.iota {dimensions = array<i32: 1>} : vector<256x128xi32>
    %cst_8 = arith.constant 0.000000e+00 : f32
    %32 = vector.broadcast %cst_8 : f32 to vector<256x128xf32>
    %cst_9 = arith.constant 0.000000e+00 : f32
    %33 = vector.broadcast %cst_9 : f32 to vector<256x1xf32>
    %cst_10 = arith.constant dense<0x7F800000> : vector<256xf32>
    %34 = vector.multi_reduction <minimumf>, %30, %cst_10 [1] : vector<256x128xf32> to vector<256xf32>
    %35 = vector.shape_cast %34 : vector<256xf32> to vector<256x1xf32>
    %36 = vector.broadcast %35 : vector<256x1xf32> to vector<256x128xf32>
    %37 = arith.cmpf oeq, %30, %36 : vector<256x128xf32>
    %c128_i32 = arith.constant 128 : i32
    %38 = vector.broadcast %c128_i32 : i32 to vector<256x128xi32>
    %39 = arith.select %37, %31, %38 : vector<256x128xi1>, vector<256x128xi32>
    %cst_11 = arith.constant dense<2147483647> : vector<256xi32>
    %40 = vector.multi_reduction <minsi>, %39, %cst_11 [1] : vector<256x128xi32> to vector<256xi32>
    %41 = vector.shape_cast %40 : vector<256xi32> to vector<256x1xi32>
    %42 = vector.broadcast %41 : vector<256x1xi32> to vector<256x128xi32>
    %43 = arith.cmpi eq, %31, %42 : vector<256x128xi32>
    %44 = arith.extui %43 : vector<256x128xi1> to vector<256x128xi32>
    %45 = arith.sitofp %44 : vector<256x128xi32> to vector<256x128xf32>
    %cst_12 = arith.constant 1.000000e+30 : f32
    %46 = vector.broadcast %cst_12 : f32 to vector<256x1xf32>
    %47 = arith.cmpf olt, %35, %46 : vector<256x1xf32>
    %cst_13 = arith.constant 1.000000e-16 : f32
    %48 = vector.broadcast %cst_13 : f32 to vector<256x1xf32>
    %49 = arith.maximumf %35, %48 : vector<256x1xf32>
    %50 = tpu.reciprocal %49 {approx = true} : vector<256x1xf32> -> vector<256x1xf32>
    %cst_14 = arith.constant 0.000000e+00 : f32
    %51 = vector.broadcast %cst_14 : f32 to vector<256x1xf32>
    %52 = arith.select %47, %50, %51 : vector<256x1xi1>, vector<256x1xf32>
    %53 = vector.broadcast %52 : vector<256x1xf32> to vector<256x128xf32>
    %54 = arith.mulf %45, %53 : vector<256x128xf32>
    %55 = arith.addf %32, %54 : vector<256x128xf32>
    %56 = arith.addf %33, %52 : vector<256x1xf32>
    %cst_15 = arith.constant 0.000000e+00 : f32
    %57 = vector.broadcast %cst_15 : f32 to vector<256x128xf32>
    %58 = arith.cmpf ogt, %45, %57 : vector<256x128xf32>
    %cst_16 = arith.constant 1.000000e+30 : f32
    %59 = vector.broadcast %cst_16 : f32 to vector<256x128xf32>
    %60 = arith.select %58, %59, %30 : vector<256x128xi1>, vector<256x128xf32>
    %cst_17 = arith.constant dense<0x7F800000> : vector<256xf32>
    %61 = vector.multi_reduction <minimumf>, %60, %cst_17 [1] : vector<256x128xf32> to vector<256xf32>
    %62 = vector.shape_cast %61 : vector<256xf32> to vector<256x1xf32>
    %63 = vector.broadcast %62 : vector<256x1xf32> to vector<256x128xf32>
    %64 = arith.cmpf oeq, %60, %63 : vector<256x128xf32>
    %c128_i32_18 = arith.constant 128 : i32
    %65 = vector.broadcast %c128_i32_18 : i32 to vector<256x128xi32>
    %66 = arith.select %64, %31, %65 : vector<256x128xi1>, vector<256x128xi32>
    %cst_19 = arith.constant dense<2147483647> : vector<256xi32>
    %67 = vector.multi_reduction <minsi>, %66, %cst_19 [1] : vector<256x128xi32> to vector<256xi32>
    %68 = vector.shape_cast %67 : vector<256xi32> to vector<256x1xi32>
    %69 = vector.broadcast %68 : vector<256x1xi32> to vector<256x128xi32>
    %70 = arith.cmpi eq, %31, %69 : vector<256x128xi32>
    %71 = arith.extui %70 : vector<256x128xi1> to vector<256x128xi32>
    %72 = arith.sitofp %71 : vector<256x128xi32> to vector<256x128xf32>
    %cst_20 = arith.constant 1.000000e+30 : f32
    %73 = vector.broadcast %cst_20 : f32 to vector<256x1xf32>
    %74 = arith.cmpf olt, %62, %73 : vector<256x1xf32>
    %cst_21 = arith.constant 1.000000e-16 : f32
    %75 = vector.broadcast %cst_21 : f32 to vector<256x1xf32>
    %76 = arith.maximumf %62, %75 : vector<256x1xf32>
    %77 = tpu.reciprocal %76 {approx = true} : vector<256x1xf32> -> vector<256x1xf32>
    %cst_22 = arith.constant 0.000000e+00 : f32
    %78 = vector.broadcast %cst_22 : f32 to vector<256x1xf32>
    %79 = arith.select %74, %77, %78 : vector<256x1xi1>, vector<256x1xf32>
    %80 = vector.broadcast %79 : vector<256x1xf32> to vector<256x128xf32>
    %81 = arith.mulf %72, %80 : vector<256x128xf32>
    %82 = arith.addf %55, %81 : vector<256x128xf32>
    %83 = arith.addf %56, %79 : vector<256x1xf32>
    %cst_23 = arith.constant 0.000000e+00 : f32
    %84 = vector.broadcast %cst_23 : f32 to vector<256x128xf32>
    %85 = arith.cmpf ogt, %72, %84 : vector<256x128xf32>
    %cst_24 = arith.constant 1.000000e+30 : f32
    %86 = vector.broadcast %cst_24 : f32 to vector<256x128xf32>
    %87 = arith.select %85, %86, %60 : vector<256x128xi1>, vector<256x128xf32>
    %cst_25 = arith.constant dense<0x7F800000> : vector<256xf32>
    %88 = vector.multi_reduction <minimumf>, %87, %cst_25 [1] : vector<256x128xf32> to vector<256xf32>
    %89 = vector.shape_cast %88 : vector<256xf32> to vector<256x1xf32>
    %90 = vector.broadcast %89 : vector<256x1xf32> to vector<256x128xf32>
    %91 = arith.cmpf oeq, %87, %90 : vector<256x128xf32>
    %c128_i32_26 = arith.constant 128 : i32
    %92 = vector.broadcast %c128_i32_26 : i32 to vector<256x128xi32>
    %93 = arith.select %91, %31, %92 : vector<256x128xi1>, vector<256x128xi32>
    %cst_27 = arith.constant dense<2147483647> : vector<256xi32>
    %94 = vector.multi_reduction <minsi>, %93, %cst_27 [1] : vector<256x128xi32> to vector<256xi32>
    %95 = vector.shape_cast %94 : vector<256xi32> to vector<256x1xi32>
    %96 = vector.broadcast %95 : vector<256x1xi32> to vector<256x128xi32>
    %97 = arith.cmpi eq, %31, %96 : vector<256x128xi32>
    %98 = arith.extui %97 : vector<256x128xi1> to vector<256x128xi32>
    %99 = arith.sitofp %98 : vector<256x128xi32> to vector<256x128xf32>
    %cst_28 = arith.constant 1.000000e+30 : f32
    %100 = vector.broadcast %cst_28 : f32 to vector<256x1xf32>
    %101 = arith.cmpf olt, %89, %100 : vector<256x1xf32>
    %cst_29 = arith.constant 1.000000e-16 : f32
    %102 = vector.broadcast %cst_29 : f32 to vector<256x1xf32>
    %103 = arith.maximumf %89, %102 : vector<256x1xf32>
    %104 = tpu.reciprocal %103 {approx = true} : vector<256x1xf32> -> vector<256x1xf32>
    %cst_30 = arith.constant 0.000000e+00 : f32
    %105 = vector.broadcast %cst_30 : f32 to vector<256x1xf32>
    %106 = arith.select %101, %104, %105 : vector<256x1xi1>, vector<256x1xf32>
    %107 = vector.broadcast %106 : vector<256x1xf32> to vector<256x128xf32>
    %108 = arith.mulf %99, %107 : vector<256x128xf32>
    %109 = arith.addf %82, %108 : vector<256x128xf32>
    %110 = arith.addf %83, %106 : vector<256x1xf32>
    %111 = arith.truncf %109 : vector<256x128xf32> to vector<256x128xbf16>
    %c0_31 = arith.constant 0 : index
    %c0_32 = arith.constant 0 : index
    %112 = vector.load %arg5[%c0_31, %c0_32] : memref<128x16xbf16, #tpu.memory_space<vmem>>, vector<128x16xbf16>
    %cst_33 = arith.constant dense<0.000000e+00> : vector<256x16xf32>
    %113 = tpu.matmul %111, %112, %cst_33 {dimension_numbers = #tpu.dot_dimension_numbers<[1], [0], [0], [1], [0, 0, 1, 1], [], []>} : vector<256x128xbf16>, vector<128x16xbf16>, vector<256x16xf32> -> vector<256x16xf32>
    %114 = tpu.reciprocal %110 {approx = true} : vector<256x1xf32> -> vector<256x1xf32>
    %115 = vector.broadcast %114 : vector<256x1xf32> to vector<256x16xf32>
    %116 = arith.mulf %113, %115 : vector<256x16xf32>
    %117 = arith.truncf %116 : vector<256x16xf32> to vector<256x16xbf16>
    %c0_34 = arith.constant 0 : index
    %c0_35 = arith.constant 0 : index
    %118 = vector.load %arg7[%c0_34, %c0_35] : memref<16x32xbf16, #tpu.memory_space<vmem>>, vector<16x32xbf16>
    %cst_36 = arith.constant dense<0.000000e+00> : vector<256x32xf32>
    %119 = tpu.matmul %117, %118, %cst_36 {dimension_numbers = #tpu.dot_dimension_numbers<[1], [0], [0], [1], [0, 0, 1, 1], [], []>} : vector<256x16xbf16>, vector<16x32xbf16>, vector<256x32xf32> -> vector<256x32xf32>
    %c0_37 = arith.constant 0 : index
    %c0_38 = arith.constant 0 : index
    %120 = vector.load %arg6[%c0_37, %c0_38] : memref<256x8xbf16, #tpu.memory_space<vmem>>, vector<256x8xbf16>
    %c0_39 = arith.constant 0 : index
    %c0_40 = arith.constant 0 : index
    %121 = vector.load %arg8[%c0_39, %c0_40] : memref<8x32xbf16, #tpu.memory_space<vmem>>, vector<8x32xbf16>
    %cst_41 = arith.constant dense<0.000000e+00> : vector<256x32xf32>
    %122 = tpu.matmul %120, %121, %cst_41 {dimension_numbers = #tpu.dot_dimension_numbers<[1], [0], [0], [1], [0, 0, 1, 1], [], []>} : vector<256x8xbf16>, vector<8x32xbf16>, vector<256x32xf32> -> vector<256x32xf32>
    %123 = arith.addf %119, %122 : vector<256x32xf32>
    %c0_42 = arith.constant 0 : index
    %c0_43 = arith.constant 0 : index
    %124 = vector.load %arg9[%c0_42, %c0_43] : memref<1x32xf32, #tpu.memory_space<vmem>>, vector<1x32xf32>
    %125 = vector.broadcast %124 : vector<1x32xf32> to vector<256x32xf32>
    %126 = arith.addf %123, %125 : vector<256x32xf32>
    %cst_44 = arith.constant 0.000000e+00 : f32
    %127 = vector.broadcast %cst_44 : f32 to vector<256x32xf32>
    %128 = arith.maximumf %126, %127 : vector<256x32xf32>
    %c0_45 = arith.constant 0 : index
    %c0_46 = arith.constant 0 : index
    %129 = vector.load %arg10[%c0_45, %c0_46] : memref<256x32xf32, #tpu.memory_space<vmem>>, vector<256x32xf32>
    tpu.vector_store %arg10[%c0_45, %c0_46], %128 {strides = array<i32>} : memref<256x32xf32, #tpu.memory_space<vmem>>, vector<256x32xf32>,
    return
  }
  func.func @transform_0(%arg0: i32) -> (i32, i32) {
    %c0_i32 = arith.constant 0 : i32
    %c0_i32_0 = arith.constant 0 : i32
    return %arg0, %c0_i32 : i32, i32
  }
  func.func @transform_1(%arg0: i32) -> (i32, i32) {
    %c0_i32 = arith.constant 0 : i32
    %c0_i32_0 = arith.constant 0 : i32
    return %arg0, %c0_i32 : i32, i32
  }
  func.func @transform_2(%arg0: i32) -> (i32, i32) {
    %c0_i32 = arith.constant 0 : i32
    %c0_i32_0 = arith.constant 0 : i32
    %c0_i32_1 = arith.constant 0 : i32
    return %c0_i32, %c0_i32_0 : i32, i32
  }
  func.func @transform_3(%arg0: i32) -> (i32, i32) {
    %c0_i32 = arith.constant 0 : i32
    %c0_i32_0 = arith.constant 0 : i32
    %c0_i32_1 = arith.constant 0 : i32
    return %c0_i32, %c0_i32_0 : i32, i32
  }
  func.func @transform_4(%arg0: i32) -> (i32, i32) {
    %c0_i32 = arith.constant 0 : i32
    %c0_i32_0 = arith.constant 0 : i32
    %c0_i32_1 = arith.constant 0 : i32
    return %c0_i32, %c0_i32_0 : i32, i32
  }
  func.func @transform_5(%arg0: i32) -> (i32, i32) {
    %c0_i32 = arith.constant 0 : i32
    %c0_i32_0 = arith.constant 0 : i32
    return %arg0, %c0_i32 : i32, i32
  }
  func.func @transform_6(%arg0: i32) -> (i32, i32) {
    %c0_i32 = arith.constant 0 : i32
    %c0_i32_0 = arith.constant 0 : i32
    %c0_i32_1 = arith.constant 0 : i32
    return %c0_i32, %c0_i32_0 : i32, i32
  }
  func.func @transform_7(%arg0: i32) -> (i32, i32) {
    %c0_i32 = arith.constant 0 : i32
    %c0_i32_0 = arith.constant 0 : i32
    %c0_i32_1 = arith.constant 0 : i32
    return %c0_i32, %c0_i32_0 : i32, i32
  }
  func.func @transform_8(%arg0: i32) -> (i32, i32) {
    %c0_i32 = arith.constant 0 : i32
    %c0_i32_0 = arith.constant 0 : i32
    %c0_i32_1 = arith.constant 0 : i32
    return %c0_i32, %c0_i32_0 : i32, i32
  }
  func.func @transform_9(%arg0: i32) -> (i32, i32) {
    %c0_i32 = arith.constant 0 : i32
    %c0_i32_0 = arith.constant 0 : i32
    return %arg0, %c0_i32 : i32, i32
  }
}

</mosaic_0001>

<bundles_post_ra>
// kernel: tpu_custom_call.1
= control target key start
LH: loop header
LB: loop body
LE: loop exit
PB: predicated region body
PF: predicated region fallthrough
CT: control target
= control target key end

     0   :  { %s5586_s30 = smov 0   ;;  %s9657_s0 = inlined_call_operand.vmem [shape: f32[512,3], index: 0, kind: input, shape index: {}]   ;;  %s9658_s1 = inlined_call_operand.vmem [shape: s32[512,1], index: 1, kind: input, shape index: {}]   ;;  %s9659_s2 = inlined_call_operand.vmem [shape: f32[3,128], index: 2, kind: input, shape index: {}]   ;;  %s9660_s3 = inlined_call_operand.vmem [shape: s32[1,128], index: 3, kind: input, shape index: {}]   ;;  %s9661_s4 = inlined_call_operand.vmem [shape: bf16[128,16], index: 4, kind: input, shape index: {}]   ;;  %s9662_s5 = inlined_call_operand.vmem [shape: bf16[512,8], index: 5, kind: input, shape index: {}]   ;;  %s9663_s6 = inlined_call_operand.vmem [shape: bf16[16,32], index: 6, kind: input, shape index: {}]   ;;  %s9664_s7 = inlined_call_operand.vmem [shape: bf16[8,32], index: 7, kind: input, shape index: {}]   ;;  %s9665_s8 = inlined_call_operand.vmem [shape: f32[1,32], index: 8, kind: input, shape index: {}]   ;;  %s9666_s9 = inlined_call_operand.vmem [shape: f32[512,32], index: 9, kind: output, shape index: {}]  }
   0x1 LB: > { %s4964_s10 = sadd.s32 4294967295, %s5530_s30   ;;  %p4968_p0 = scmp.ge.s32.totalorder %s5530_s30, 1  ;;  %s5530_s30 = sphi %s5586_s30, %s19_s30  }
   0x2   : > { %p310_p1 = scmp.lt.s32.totalorder %s5530_s30, 3 }
   0x4   : > { %p311_p2 = pnand %p4968_p0, %p310_p1 }
   0x6   : > { %314 = sbr.rel (%p311_p2) target bundleno = 2565 (0xa05), region = 56 }
   0xb   : > { %s4969_s11 = sshll.u32 %s4964_s10, 5  ;;  %v5532_v0 = vmov 1   ;;  %v9667_v1 = vmov 0   ;;  %v5534_v34 = vmov 2  }
   0xc   : > { %5257 = vset.pattern.permute.xlu0 %v5532_v0  ;;  %5255 = vset.pattern.permute.xlu2 %v9667_v1  ;;  %p357_p3 = scmp.lt.s32.totalorder %s4969_s11, 63 }
   0xd   : > { %5254 = vset.pattern.permute.xlu1 %v9667_v1 }
   0xe   : > { %s10771_s11 = smov (!%p357_p3, %s4969_s11), 63 }
   0xf   : > { %s5600_s12 = sshll.u32 %s10771_s11, 3  ;;  %s4974_s25 = sshll.u32 %s10771_s11, 2 }
  0x10   : > { %s5606_s15 = scalar_lea.vmem %s9657_s0, %s5600_s12  ;;  %s5895_s18 = scalar_lea.vmem %s9658_s1, %s5600_s12 }
  0x11   : > { %v5609_v2 = vld [vmem:[%s5606_s15 + $0x20] sm:$0xff]  ;;  %v5612_v3 = vld [vmem:[%s5606_s15 + $0x10] sm:$0xff]  ;;  %v5615_v4 = vld [vmem:[%s5606_s15 + $0x8] sm:$0xff]  ;;  %s9120_s11 = scalar_lea.vmem %s9662_s5, %s4974_s25  ;;  %s9400_s16 = scalar_lea.vmem %s9666_s9, %s5600_s12 }
  0x12   : > { %469 = vperm.xlu2 %5255, %v5609_v2   ;;  %459 = vperm.xlu1 %5254, %v5612_v3   ;;  %v5621_v5 = vld [vmem:[%s5606_s15 + $0x28] sm:$0xff]  ;;  %v5624_v6 = vld [vmem:[%s5606_s15 + $0x18] sm:$0xff]  ;;  %v5627_v7 = vld [vmem:[%s5606_s15 + $0x30] sm:$0xff] }
  0x13   : > { %709 = vperm.xlu0 %5257, %v5615_v4   ;;  %v5633_v8 = vld [vmem:[%s5606_s15 + $0x40] sm:$0xff]  ;;  %v5636_v9 = vld [vmem:[%s5606_s15 + $0x38] sm:$0xff]  ;;  %v5639_v10 = vld [vmem:[%s5606_s15 + $0x48] sm:$0xff] }
  0x14   : > { %v5645_v11 = vld [vmem:[%s5606_s15 + $0x58] sm:$0xff]  ;;  %v5648_v12 = vld [vmem:[%s5606_s15 + $0x50] sm:$0xff]  ;;  %v5651_v13 = vld [vmem:[%s5606_s15 + $0x60] sm:$0xff] }
  0x15   : > { %v5657_v14 = vld [vmem:[%s5606_s15 + $0x70] sm:$0xff]  ;;  %v5660_v15 = vld [vmem:[%s5606_s15 + $0x68] sm:$0xff]  ;;  %v5663_v16 = vld [vmem:[%s5606_s15 + $0x78] sm:$0xff] }
  0x16   : > { %v5669_v17 = vld [vmem:[%s5606_s15 + $0x88] sm:$0xff]  ;;  %v5672_v18 = vld [vmem:[%s5606_s15 + $0x80] sm:$0xff]  ;;  %v5675_v19 = vld [vmem:[%s5606_s15 + $0x90] sm:$0xff] }
  0x17   : > { %v5681_v20 = vld [vmem:[%s5606_s15 + $0xa0] sm:$0xff]  ;;  %v5684_v21 = vld [vmem:[%s5606_s15 + $0x98] sm:$0xff]  ;;  %v5687_v22 = vld [vmem:[%s5606_s15 + $0xa8] sm:$0xff] }
  0x18   : > { %v5693_v23 = vld [vmem:[%s5606_s15 + $0xb8] sm:$0xff]  ;;  %v5696_v24 = vld [vmem:[%s5606_s15 + $0xb0] sm:$0xff]  ;;  %v5699_v25 = vld [vmem:[%s5606_s15 + $0xc0] sm:$0xff] }
  0x19   : > { %v5705_v26 = vld [vmem:[%s5606_s15 + $0xd0] sm:$0xff]  ;;  %v5708_v27 = vld [vmem:[%s5606_s15 + $0xc8] sm:$0xff]  ;;  %v5711_v28 = vld [vmem:[%s5606_s15 + $0xd8] sm:$0xff] }
  0x1a   : > { %474 = vperm.xlu2 %5255, %v5621_v5   ;;  %464 = vperm.xlu1 %5254, %v5624_v6   ;;  %v5717_v29 = vld [vmem:[%s5606_s15 + $0xe8] sm:$0xff]  ;;  %v5720_v30 = vld [vmem:[%s5606_s15 + $0xe0] sm:$0xff]  ;;  %v5723_v31 = vld [vmem:[%s5606_s15 + $0xf0] sm:$0xff] }
  0x1b   : > { %729 = vperm.xlu0 %5257, %v5627_v7   ;;  %v5729_v32 = vld [vmem:[%s5606_s15 + $0xf8] sm:$0xff]  ;;  %v381_v33 = vld [vmem:[%s5606_s15] sm:$0xff] }
  0x22   : > { %489 = vperm.xlu2 %5255, %v5633_v8   ;;  %484 = vperm.xlu1 %5254, %v5636_v9  }
  0x23   : > { %741 = vperm.xlu0 %5257, %v5639_v10  }
  0x2a   : > { %504 = vperm.xlu2 %5255, %v5645_v11   ;;  %499 = vperm.xlu1 %5254, %v5648_v12  }
  0x2b   : > { %753 = vperm.xlu0 %5257, %v5651_v13  }
  0x32   : > { %519 = vperm.xlu2 %5255, %v5657_v14   ;;  %514 = vperm.xlu1 %5254, %v5660_v15  }
  0x33   : > { %765 = vperm.xlu0 %5257, %v5663_v16  }
  0x3a   : > { %534 = vperm.xlu2 %5255, %v5669_v17   ;;  %529 = vperm.xlu1 %5254, %v5672_v18  }
  0x3b   : > { %777 = vperm.xlu0 %5257, %v5675_v19  }
  0x42   : > { %549 = vperm.xlu2 %5255, %v5681_v20   ;;  %544 = vperm.xlu1 %5254, %v5684_v21  }
  0x43   : > { %789 = vperm.xlu0 %5257, %v5687_v22  }
  0x4a   : > { %564 = vperm.xlu2 %5255, %v5693_v23   ;;  %559 = vperm.xlu1 %5254, %v5696_v24  }
  0x4b   : > { %801 = vperm.xlu0 %5257, %v5699_v25  }
  0x52   : > { %579 = vperm.xlu2 %5255, %v5705_v26   ;;  %574 = vperm.xlu1 %5254, %v5708_v27  }
  0x53   : > { %813 = vperm.xlu0 %5257, %v5711_v28  }
  0x5a   : > { %594 = vperm.xlu2 %5255, %v5717_v29   ;;  %589 = vperm.xlu1 %5254, %v5720_v30  }
  0x5b   : > { %825 = vperm.xlu0 %5257, %v5723_v31  }
  0x62   : > { %5256 = vset.pattern.permute.xlu2 %v5532_v0  ;;  %604 = vperm.xlu1 %5254, %v5729_v32  }
  0x63   : > { %5260 = vset.pattern.permute.xlu0 %v5534_v34  ;;  %705 = vperm.xlu2 %5256, %v381_v33  }
  0x64   : > { %934 = vperm.xlu0 %5260, %v5615_v4  }
  0x6a   : > { %5258 = vset.pattern.permute.xlu1 %v5532_v0 }
  0x6b   : > { %713 = vperm.xlu1 %5258, %v5612_v3   ;;  %717 = vperm.xlu2 %5256, %v5624_v6  }
  0x6c   : > { %954 = vperm.xlu0 %5260, %v5627_v7   ;;  %v5739_v35 = vpop.permute.xlu2 %469 }
  0x73   : > { %721 = vperm.xlu1 %5258, %v5609_v2   ;;  %725 = vperm.xlu2 %5256, %v5621_v5  }
  0x74   : > { %966 = vperm.xlu0 %5260, %v5639_v10   ;;  %v5744_v36 = vpop.permute.xlu2 %474 }
  0x7b   : > { %733 = vperm.xlu1 %5258, %v5636_v9   ;;  %737 = vperm.xlu2 %5256, %v5633_v8  }
  0x7c   : > { %978 = vperm.xlu0 %5260, %v5651_v13   ;;  %v5749_v37 = vpop.permute.xlu2 %489 }
  0x83   : > { %745 = vperm.xlu1 %5258, %v5648_v12   ;;  %749 = vperm.xlu2 %5256, %v5645_v11  }
  0x84   : > { %990 = vperm.xlu0 %5260, %v5663_v16   ;;  %v5754_v38 = vpop.permute.xlu2 %504  ;;  %v5756_v39 = vpop.permute.xlu1 %459 }
  0x85   : > { %v5772_v44 = vpop.permute.xlu0 %709 }
  0x8b   : > { %757 = vperm.xlu1 %5258, %v5660_v15   ;;  %761 = vperm.xlu2 %5256, %v5657_v14  }
  0x8c   : > { %1002 = vperm.xlu0 %5260, %v5675_v19   ;;  %v5761_v40 = vpop.permute.xlu2 %519  ;;  %v5763_v41 = vpop.permute.xlu1 %464 }
  0x8d   : > { %v5781_v47 = vpop.permute.xlu0 %729 }
  0x93   : > { %769 = vperm.xlu1 %5258, %v5672_v18   ;;  %773 = vperm.xlu2 %5256, %v5669_v17  }
  0x94   : > { %1014 = vperm.xlu0 %5260, %v5687_v22   ;;  %v5768_v42 = vpop.permute.xlu2 %534  ;;  %v5770_v43 = vpop.permute.xlu1 %484 }
  0x95   : > { %10040 = vst [vmem:[#allocation2_spill] sm:$0xff] %v5768_v42  ;;  %v5790_v50 = vpop.permute.xlu0 %741  ;;  %v439_v42 = vld [vmem:[%s5895_s18 + $0xc8] sm:$0xff] }
  0x9b   : > { %781 = vperm.xlu1 %5258, %v5684_v21   ;;  %785 = vperm.xlu2 %5256, %v5681_v20  }
  0x9c   : > { %1026 = vperm.xlu0 %5260, %v5699_v25   ;;  %v5777_v45 = vpop.permute.xlu2 %549  ;;  %v5779_v46 = vpop.permute.xlu1 %499 }
  0x9d   : > { %10041 = vst [vmem:[#allocation3_spill] sm:$0xff] %v5777_v45  ;;  %v5799_v53 = vpop.permute.xlu0 %753 }
  0xa3   : > { %793 = vperm.xlu1 %5258, %v5696_v24   ;;  %797 = vperm.xlu2 %5256, %v5693_v23  }
  0xa4   : > { %1038 = vperm.xlu0 %5260, %v5711_v28   ;;  %v5786_v48 = vpop.permute.xlu2 %564  ;;  %v5788_v49 = vpop.permute.xlu1 %514 }
  0xa5   : > { %10042 = vst [vmem:[#allocation4_spill] sm:$0xff] %v5786_v48  ;;  %v5813_v58 = vpop.permute.xlu0 %765 }
  0xa6   : > { %10048 = vst [vmem:[#allocation10_spill] sm:$0xff] %v5813_v58 }
  0xab   : > { %805 = vperm.xlu1 %5258, %v5708_v27   ;;  %809 = vperm.xlu2 %5256, %v5705_v26  }
  0xac   : > { %1050 = vperm.xlu0 %5260, %v5723_v31   ;;  %v5795_v51 = vpop.permute.xlu2 %579  ;;  %v5797_v52 = vpop.permute.xlu1 %529 }
  0xad   : > { %10043 = vst [vmem:[#allocation5_spill] sm:$0xff] %v5795_v51  ;;  %v5821_v61 = vpop.permute.xlu0 %777 }
  0xae   : > { %10044 = vst [vmem:[#allocation6_spill] sm:$0xff] %v5797_v52 }
  0xaf   : > { %10050 = vst [vmem:[#allocation12_spill] sm:$0xff] %v5821_v61 }
  0xb3   : > { %817 = vperm.xlu1 %5258, %v5720_v30   ;;  %821 = vperm.xlu2 %5256, %v5717_v29  }
  0xb4   : > { %5262 = vset.pattern.permute.xlu0 %v9667_v1  ;;  %v5804_v54 = vpop.permute.xlu2 %594  ;;  %v5806_v55 = vpop.permute.xlu1 %544 }
  0xb5   : > { %10045 = vst [vmem:[#allocation7_spill] sm:$0xff] %v5804_v54  ;;  %449 = vperm.xlu0 %5262, %v381_v33   ;;  %v5829_v0 = vpop.permute.xlu0 %789 }
  0xb6   : > { %10046 = vst [vmem:[#allocation8_spill] sm:$0xff] %v5806_v55  ;;  %v431_v55 = vld [vmem:[%s5895_s18 + $0x88] sm:$0xff] }
  0xb7   : > { %10052 = vst [vmem:[#allocation14_spill] sm:$0xff] %v5829_v0 }
  0xbb   : > { %829 = vperm.xlu1 %5258, %v5729_v32   ;;  %5259 = vset.pattern.permute.xlu2 %v5534_v34 }
  0xbc   : > { %930 = vperm.xlu2 %5259, %v381_v33   ;;  %v5809_v56 = vpop.permute.xlu1 %559 }
  0xbd   : > { %10047 = vst [vmem:[#allocation9_spill] sm:$0xff] %v5809_v56  ;;  %v5811_v57 = vpop.permute.xlu2 %705  ;;  %v5837_v33 = vpop.permute.xlu0 %801  ;;  %v417_v56 = vld [vmem:[%s5895_s18 + $0x18] sm:$0xff] }
  0xbe   : > { %10054 = vst [vmem:[#allocation16_spill] sm:$0xff] %v5837_v33  ;;  %v437_v33 = vld [vmem:[%s5895_s18 + $0xb8] sm:$0xff] }
  0xc3   : > { %5261 = vset.pattern.permute.xlu1 %v5534_v34 }
  0xc4   : > { %938 = vperm.xlu1 %5261, %v5612_v3   ;;  %942 = vperm.xlu2 %5259, %v5624_v6   ;;  %v5817_v59 = vpop.permute.xlu1 %574 }
  0xc5   : > { %10049 = vst [vmem:[#allocation11_spill] sm:$0xff] %v5817_v59  ;;  %v5819_v60 = vpop.permute.xlu2 %717  ;;  %v5851_v34 = vpop.permute.xlu0 %813 }
  0xc6   : > { %10055 = vst [vmem:[#allocation17_spill] sm:$0xff] %v5851_v34 }
  0xcc   : > { %946 = vperm.xlu1 %5261, %v5609_v2   ;;  %950 = vperm.xlu2 %5259, %v5621_v5   ;;  %v5825_v62 = vpop.permute.xlu1 %589 }
  0xcd   : > { %10051 = vst [vmem:[#allocation13_spill] sm:$0xff] %v5825_v62  ;;  %v5827_v63 = vpop.permute.xlu2 %725  ;;  %v5859_v1 = vpop.permute.xlu0 %825  ;;  %v416_v62 = vld [vmem:[%s5895_s18 + $0x10] sm:$0xff] }
  0xce   : > { %10057 = vst [vmem:[#allocation19_spill] sm:$0xff] %v5859_v1 }
  0xd4   : > { %958 = vperm.xlu1 %5261, %v5636_v9   ;;  %962 = vperm.xlu2 %5259, %v5633_v8   ;;  %v5833_v3 = vpop.permute.xlu1 %604 }
  0xd5   : > { %10053 = vst [vmem:[#allocation15_spill] sm:$0xff] %v5833_v3  ;;  %v5835_v6 = vpop.permute.xlu2 %737 }
  0xd6   : > { %v5867_v48 = vpop.permute.xlu0 %934 }
  0xdc   : > { %970 = vperm.xlu1 %5261, %v5648_v12   ;;  %974 = vperm.xlu2 %5259, %v5645_v11  }
  0xdd   : > { %v5841_v2 = vpop.permute.xlu1 %713  ;;  %v5843_v5 = vpop.permute.xlu2 %749 }
  0xde   : > { %v5875_v1 = vpop.permute.xlu0 %954 }
  0xe4   : > { %982 = vperm.xlu1 %5261, %v5660_v15   ;;  %986 = vperm.xlu2 %5259, %v5657_v14  }
  0xe5   : > { %v5847_v9 = vpop.permute.xlu1 %721  ;;  %v5849_v8 = vpop.permute.xlu2 %761 }
  0xec   : > { %994 = vperm.xlu1 %5261, %v5672_v18   ;;  %998 = vperm.xlu2 %5259, %v5669_v17  }
  0xed   : > { %v5855_v12 = vpop.permute.xlu2 %773  ;;  %v5857_v11 = vpop.permute.xlu1 %733 }
  0xee   : > { %10056 = vst [vmem:[#allocation18_spill] sm:$0xff] %v5855_v12  ;;  %v440_v12 = vld [vmem:[%s5895_s18 + $0xd0] sm:$0xff] }
  0xf4   : > { %1006 = vperm.xlu1 %5261, %v5684_v21   ;;  %1010 = vperm.xlu2 %5259, %v5681_v20  }
  0xf5   : > { %v5863_v14 = vpop.permute.xlu2 %785  ;;  %v5865_v15 = vpop.permute.xlu1 %745 }
  0xf6   : > { %10058 = vst [vmem:[#allocation20_spill] sm:$0xff] %v5863_v14 }
  0xfc   : > { %1018 = vperm.xlu1 %5261, %v5696_v24   ;;  %1022 = vperm.xlu2 %5259, %v5693_v23  }
  0xfd   : > { %v5871_v17 = vpop.permute.xlu2 %797  ;;  %v5873_v18 = vpop.permute.xlu1 %757 }
  0xfe   : > { %10059 = vst [vmem:[#allocation21_spill] sm:$0xff] %v5871_v17  ;;  %v5889_v17 = vpop.permute.xlu0 %966 }
 0x104   : > { %1030 = vperm.xlu1 %5261, %v5708_v27   ;;  %1034 = vperm.xlu2 %5259, %v5705_v26   ;;  %v414_v26 = vld [vmem:[%s5895_s18] sm:$0xff]  ;;  %v10064_v27 = vmov 0  }
 0x105   : > { %v5879_v20 = vpop.permute.xlu2 %809  ;;  %v5881_v21 = vpop.permute.xlu1 %769 }
 0x106   : > { %10060 = vst [vmem:[#allocation22_spill] sm:$0xff] %v5879_v20  ;;  %v5904_v3 = vpop.permute.xlu0 %978 }
 0x107   : > { %10061 = vst [vmem:[#allocation23_spill] sm:$0xff] %v5881_v21 }
 0x10c   : > { %1042 = vperm.xlu1 %5261, %v5720_v30   ;;  %1046 = vperm.xlu2 %5259, %v5717_v29  }
 0x10d   : > { %v5885_v24 = vpop.permute.xlu2 %821  ;;  %v5887_v23 = vpop.permute.xlu1 %781 }
 0x10e   : > { %10062 = vst [vmem:[#allocation24_spill] sm:$0xff] %v5885_v24  ;;  %v5915_v24 = vpop.permute.xlu0 %990 }
 0x10f   : > { %10063 = vst [vmem:[#allocation25_spill] sm:$0xff] %v5887_v23 }
 0x110   : > { %10067 = vst [vmem:[#allocation28_spill] sm:$0xff] %v5915_v24 }
 0x114   : > { %1054 = vperm.xlu1 %5261, %v5729_v32   ;;  %5263 = vset.pattern.permute.xlu2 %v10064_v27 }
 0x115   : > { %1155 = vperm.xlu2 %5263, %v414_v26   ;;  %v5900_v29 = vpop.permute.xlu1 %793  ;;  %v418_v26 = vld [vmem:[%s5895_s18 + $0x20] sm:$0xff] }
 0x116   : > { %10065 = vst [vmem:[#allocation26_spill] sm:$0xff] %v5900_v29  ;;  %v5902_v30 = vpop.permute.xlu2 %930  ;;  %v419_v29 = vld [vmem:[%s5895_s18 + $0x28] sm:$0xff] }
 0x11c   : > { %5264 = vset.pattern.permute.xlu1 %v10064_v27  ;;  %v5923_v27 = vpop.permute.xlu0 %1002 }
 0x11d   : > { %1161 = vperm.xlu1 %5264, %v416_v62   ;;  %1164 = vperm.xlu2 %5263, %v417_v56   ;;  %v5909_v54 = vpop.permute.xlu1 %805  ;;  %v421_v62 = vld [vmem:[%s5895_s18 + $0x38] sm:$0xff]  ;;  %v422_v56 = vld [vmem:[%s5895_s18 + $0x40] sm:$0xff]  ;;  %10069 = vst [vmem:[#allocation30_spill] sm:$0xff] %v5923_v27 }
 0x11e   : > { %10066 = vst [vmem:[#allocation27_spill] sm:$0xff] %v5909_v54  ;;  %v5911_v32 = vpop.permute.xlu2 %942 }
 0x124   : > { %v5935_v20 = vpop.permute.xlu0 %1014 }
 0x125   : > { %1167 = vperm.xlu1 %5264, %v418_v26   ;;  %1170 = vperm.xlu2 %5263, %v419_v29   ;;  %v5917_v45 = vpop.permute.xlu1 %817  ;;  %v424_v26 = vld [vmem:[%s5895_s18 + $0x50] sm:$0xff]  ;;  %v425_v29 = vld [vmem:[%s5895_s18 + $0x58] sm:$0xff]  ;;  %10071 = vst [vmem:[#allocation32_spill] sm:$0xff] %v5935_v20 }
 0x126   : > { %10068 = vst [vmem:[#allocation29_spill] sm:$0xff] %v5917_v45  ;;  %v5919_v14 = vpop.permute.xlu2 %950 }
 0x12d   : > { %1176 = vperm.xlu1 %5264, %v421_v62   ;;  %1179 = vperm.xlu2 %5263, %v422_v56   ;;  %v5925_v0 = vpop.permute.xlu1 %829  ;;  %v427_v62 = vld [vmem:[%s5895_s18 + $0x68] sm:$0xff]  ;;  %v428_v56 = vld [vmem:[%s5895_s18 + $0x70] sm:$0xff] }
 0x12e   : > { %10070 = vst [vmem:[#allocation31_spill] sm:$0xff] %v5925_v0  ;;  %v5927_v34 = vpop.permute.xlu2 %962 }
 0x135   : > { %1185 = vperm.xlu1 %5264, %v424_v26   ;;  %1188 = vperm.xlu2 %5263, %v425_v29   ;;  %v5943_v26 = vpop.permute.xlu0 %1026  ;;  %v430_v29 = vld [vmem:[%s5895_s18 + $0x80] sm:$0xff] }
 0x136   : > { %v5931_v45 = vpop.permute.xlu1 %938  ;;  %v5933_v51 = vpop.permute.xlu2 %974  ;;  %10073 = vst [vmem:[#allocation34_spill] sm:$0xff] %v5943_v26  ;;  %v436_v26 = vld [vmem:[%s5895_s18 + $0xb0] sm:$0xff] }
 0x13d   : > { %1194 = vperm.xlu1 %5264, %v427_v62   ;;  %1197 = vperm.xlu2 %5263, %v428_v56   ;;  %v433_v62 = vld [vmem:[%s5895_s18 + $0x98] sm:$0xff]  ;;  %v434_v56 = vld [vmem:[%s5895_s18 + $0xa0] sm:$0xff]  ;;  %v5953_v61 = vpop.permute.xlu0 %1038 }
 0x13e   : > { %v5939_v0 = vpop.permute.xlu1 %946  ;;  %v5941_v23 = vpop.permute.xlu2 %986  ;;  %10075 = vst [vmem:[#allocation36_spill] sm:$0xff] %v5953_v61 }
 0x13f   : > { %10072 = vst [vmem:[#allocation33_spill] sm:$0xff] %v5941_v23 }
 0x145   : > { %1203 = vperm.xlu1 %5264, %v430_v29   ;;  %1206 = vperm.xlu2 %5263, %v431_v55   ;;  %v5961_v55 = vpop.permute.xlu0 %1050 }
 0x146   : > { %v5947_v27 = vpop.permute.xlu1 %958  ;;  %v5949_v20 = vpop.permute.xlu2 %998  ;;  %10077 = vst [vmem:[#allocation38_spill] sm:$0xff] %v5961_v55 }
 0x147   : > { %10074 = vst [vmem:[#allocation35_spill] sm:$0xff] %v5949_v20 }
 0x14d   : > { %1212 = vperm.xlu1 %5264, %v433_v62   ;;  %1215 = vperm.xlu2 %5263, %v434_v56   ;;  %v413_v62 = vld [vmem:[%s9659_s2] sm:$0x7]  ;;  %v450_v61 = vpop.permute.xlu0 %449 }
 0x14e   : > { %v5955_v54 = vpop.permute.xlu1 %970  ;;  %v5957_v59 = vpop.permute.xlu2 %1010  ;;  %v5976_v55 = vperm.slane %v413_v62, 0 }
 0x14f   : > { %10076 = vst [vmem:[#allocation37_spill] sm:$0xff] %v5957_v59 }
 0x155   : > { %1221 = vperm.xlu1 %5264, %v436_v26   ;;  %1224 = vperm.xlu2 %5263, %v437_v33   ;;  %v5978_v33 = vperm.slane %v413_v62, 1  ;;  %v443_v26 = vld [vmem:[%s5895_s18 + $0xe8] sm:$0xff] }
 0x156   : > { %v5963_v29 = vpop.permute.xlu1 %982  ;;  %v5965_v20 = vpop.permute.xlu2 %1022 }
 0x157   : > { %10078 = vst [vmem:[#allocation39_spill] sm:$0xff] %v5965_v20  ;;  %v608_v20 = vsub.f32 %v450_v61, %v5976_v55  ;;  %v5995_v61 = vld [vmem:[%s9660_s3] ss:$0 sm:$0xff] }
 0x15d   : > { %1230 = vperm.xlu1 %5264, %v439_v42   ;;  %1233 = vperm.xlu2 %5263, %v440_v12   ;;  %v833_v42 = vsub.f32 %v5811_v57, %v5978_v33  ;;  %v5984_v12 = vperm.slane %v413_v62, 2 }
 0x15e   : > { %v5972_v56 = vpop.permute.xlu1 %994  ;;  %v5974_v59 = vpop.permute.xlu2 %1034 }
 0x15f   : > { %10079 = vst [vmem:[#allocation40_spill] sm:$0xff] %v5972_v56  ;;  %v640_v56 = vmul.f32 %v608_v20, %v608_v20  ;;  %v1058_v24 = vsub.f32 %v5902_v30, %v5984_v12 }
 0x160   : > { %10080 = vst [vmem:[#allocation41_spill] sm:$0xff] %v5974_v59  ;;  %v865_v59 = vmul.f32 %v833_v42, %v833_v42  ;;  %v1060_v42 = vsub.f32 %v5931_v45, %v5984_v12 }
 0x161   : > { %v1090_v23 = vmul.f32 %v1058_v24, %v1058_v24  ;;  %v835_v24 = vsub.f32 %v5841_v2, %v5978_v33  ;;  %v1061_v2 = vsub.f32 %v5911_v32, %v5984_v12  ;;  %v1063_v32 = vsub.f32 %v5919_v14, %v5984_v12  ;;  %v420_v14 = vld [vmem:[%s5895_s18 + $0x30] sm:$0xff] }
 0x162   : > { %v897_v58 = vadd.f32 %v865_v59, %v640_v56  ;;  %v610_v59 = vsub.f32 %v5756_v39, %v5976_v55  ;;  %v836_v39 = vsub.f32 %v5819_v60, %v5978_v33  ;;  %v838_v60 = vsub.f32 %v5827_v63, %v5978_v33 }
 0x165   : > { %1242 = vperm.xlu2 %5263, %v443_v26   ;;  %v1122_v26 = vadd.f32 %v1090_v23, %v897_v58  ;;  %v642_v58 = vmul.f32 %v610_v59, %v610_v59  ;;  %v867_v23 = vmul.f32 %v835_v24, %v835_v24  ;;  %v868_v24 = vmul.f32 %v836_v39, %v836_v39 }
 0x166   : > { %v5986_v21 = vpop.permute.xlu1 %1006  ;;  %v5988_v52 = vpop.permute.xlu2 %1046 }
 0x167   : > { %10081 = vst [vmem:[#allocation42_spill] sm:$0xff] %v5986_v21 }
 0x168   : > { %10082 = vst [vmem:[#allocation43_spill] sm:$0xff] %v5988_v52 }
 0x16e   : > { %v5997_v57 = vpop.permute.xlu1 %1018 }
 0x16f   : > { %10083 = vst [vmem:[#allocation44_spill] sm:$0xff] %v5997_v57  ;;  %v1156_v62 = vpop.permute.xlu2 %1155 }
 0x170   : > { %vm1251_vm0 = vcmp.eq.s32.totalorder %v1156_v62, %v5995_v61  ;;  %v899_v62 = vadd.f32 %v867_v23, %v642_v58 }
 0x171   : > { %v6000_v21 = vsel %vm1251_vm0, %v1122_v26, 1e+30  ;;  %v1092_v26 = vmul.f32 %v1060_v42, %v1060_v42 }
 0x172   : > { %1317 = vmin.xlane.f32.xlu0 %v6000_v21 }
 0x176   : > { %v6003_v20 = vpop.permute.xlu1 %1030 }
 0x177   : > { %v1165_v45 = vpop.permute.xlu2 %1164 }
 0x178   : > { %vm1254_vm2 = vcmp.eq.s32.totalorder %v1165_v45, %v5995_v61  ;;  %v438_v45 = vld [vmem:[%s5895_s18 + $0xc0] sm:$0xff] }
 0x17e   : > { %v6005_v30 = vpop.permute.xlu1 %1042 }
 0x17f   : > { %10084 = vst [vmem:[#allocation45_spill] sm:$0xff] %v6005_v30  ;;  %v611_v30 = vsub.f32 %v5763_v41, %v5976_v55  ;;  %v1093_v41 = vmul.f32 %v1061_v2, %v1061_v2  ;;  %v1171_v63 = vpop.permute.xlu2 %1170  ;;  %v423_v2 = vld [vmem:[%s5895_s18 + $0x48] sm:$0xff] }
 0x180   : > { %vm1256_vm3 = vcmp.eq.s32.totalorder %v1171_v63, %v5995_v61 }
 0x181   : > { %v643_v59 = vmul.f32 %v611_v30, %v611_v30 }
 0x183   : > { %v900_v23 = vadd.f32 %v868_v24, %v643_v59 }
 0x185   : > { %v1125_v30 = vadd.f32 %v1093_v41, %v900_v23 }
 0x186   : > { %v6011_v56 = vpop.permute.xlu1 %1054  ;;  %454 = vperm.xlu0 %5262, %v5615_v4   ;;  %v1124_v4 = vadd.f32 %v1092_v26, %v899_v62  ;;  %v1095_v26 = vmul.f32 %v1063_v32, %v1063_v32 }
 0x187   : > { %10085 = vst [vmem:[#allocation46_spill] sm:$0xff] %v6011_v56  ;;  %v6035_v42 = vsel %vm1254_vm2, %v1125_v30, 1e+30  ;;  %v6060_v59 = vpop.permute.xlu2 %1179  ;;  %v444_v30 = vld [vmem:[%s5895_s18 + $0xf0] sm:$0xff] }
 0x188   : > { %10087 = vst [vmem:[#allocation48_spill] sm:$0xff] %v6035_v42  ;;  %vm1259_vm15 = vcmp.eq.s32.totalorder %v6060_v59, %v5995_v61 }
 0x18e   : > { %479 = vperm.xlu0 %5262, %v5627_v7   ;;  %v613_v7 = vsub.f32 %v5744_v36, %v5976_v55 }
 0x18f   : > { %v1162_v56 = vpop.permute.xlu1 %1161  ;;  %v6065_v41 = vpop.permute.xlu2 %1188 }
 0x190   : > { %vm1253_vm1 = vcmp.eq.s32.totalorder %v1162_v56, %v5995_v61  ;;  %v870_v56 = vmul.f32 %v838_v60, %v838_v60  ;;  %v645_v62 = vmul.f32 %v613_v7, %v613_v7  ;;  %v441_v60 = vld [vmem:[%s5895_s18 + $0xd8] sm:$0xff]  ;;  %vm1262_vm12 = vcmp.eq.s32.totalorder %v6065_v41, %v5995_v61 }
 0x191   : > { %v6024_v58 = vsel %vm1253_vm1, %v1124_v4, 1e+30  ;;  %v435_v4 = vld [vmem:[%s5895_s18 + $0xa8] sm:$0xff] }
 0x192   : > { %10086 = vst [vmem:[#allocation47_spill] sm:$0xff] %v6024_v58  ;;  %1321 = vmin.xlane.f32.xlu2 %v6024_v58  ;;  %v902_v39 = vadd.f32 %v870_v56, %v645_v62 }
 0x196   : > { %494 = vperm.xlu0 %5262, %v5639_v10   ;;  %v1127_v10 = vadd.f32 %v1095_v26, %v902_v39 }
 0x197   : > { %v6070_v7 = vpop.permute.xlu2 %1197 }
 0x198   : > { %v6040_v36 = vsel %vm1256_vm3, %v1127_v10, 1e+30 }
 0x199   : > { %10088 = vst [vmem:[#allocation49_spill] sm:$0xff] %v6040_v36 }
 0x19a   : > { %1323 = vmin.xlane.f32.xlu2 %v6035_v42 }
 0x19e   : > { %509 = vperm.xlu0 %5262, %v5651_v13   ;;  %v415_v13 = vld [vmem:[%s5895_s18 + $0x8] sm:$0xff] }
 0x19f   : > { %v6077_v62 = vpop.permute.xlu2 %1206 }
 0x1a2   : > { %1327 = vmin.xlane.f32.xlu2 %v6040_v36 }
 0x1a6   : > { %524 = vperm.xlu0 %5262, %v5663_v16   ;;  %v426_v16 = vld [vmem:[%s5895_s18 + $0x60] sm:$0xff] }
 0x1a7   : > { %v6081_v63 = vpop.permute.xlu2 %1215 }
 0x1a8   : > { %10091 = vst [vmem:[#allocation52_spill] sm:$0xff] %v6081_v63 }
 0x1ae   : > { %539 = vperm.xlu0 %5262, %v5675_v19  }
 0x1af   : > { %v6085_v10 = vpop.permute.xlu2 %1224 }
 0x1b0   : > { %10092 = vst [vmem:[#allocation53_spill] sm:$0xff] %v6085_v10 }
 0x1b6   : > { %554 = vperm.xlu0 %5262, %v5687_v22   ;;  %v429_v22 = vld [vmem:[%s5895_s18 + $0x78] sm:$0xff] }
 0x1be   : > { %569 = vperm.xlu0 %5262, %v5699_v25  }
 0x1c6   : > { %584 = vperm.xlu0 %5262, %v5711_v28   ;;  %v432_v28 = vld [vmem:[%s5895_s18 + $0x90] sm:$0xff] }
 0x1ce   : > { %599 = vperm.xlu0 %5262, %v5723_v31  }
 0x1d6   : > { %1158 = vperm.xlu0 %5262, %v415_v13   ;;  %v1168_v13 = vpop.permute.xlu1 %1167 }
 0x1d7   : > { %vm1255_vm6 = vcmp.eq.s32.totalorder %v1168_v13, %v5995_v61  ;;  %v839_v13 = vsub.f32 %v5781_v47, %v5978_v33 }
 0x1de   : > { %1173 = vperm.xlu0 %5262, %v420_v14   ;;  %v1177_v63 = vpop.permute.xlu1 %1176 }
 0x1df   : > { %vm1258_vm4 = vcmp.eq.s32.totalorder %v1177_v63, %v5995_v61 }
 0x1e5   : > { %v6053_v19 = vpop.xlane.xlu0 %1317 }
 0x1e6   : > { %1182 = vperm.xlu0 %5262, %v423_v2   ;;  %10089 = vst [vmem:[#allocation50_spill] sm:$0xff] %v6053_v19  ;;  %v615_v2 = vsub.f32 %v5770_v43, %v5976_v55  ;;  %vm1381_vm7 = vcmp.eq.f32.partialorder %v6000_v21, %v6053_v19  ;;  %v841_v19 = vsub.f32 %v5835_v6, %v5978_v33 }
 0x1ee   : > { %1191 = vperm.xlu0 %5262, %v426_v16   ;;  %v840_v16 = vsub.f32 %v5857_v11, %v5978_v33  ;;  %v1059_v11 = vsub.f32 %v5867_v48, %v5984_v12 }
 0x1f6   : > { %1200 = vperm.xlu0 %5262, %v429_v22  }
 0x1f8   : > { %v455_v25 = vpop.permute.xlu0 %454 }
 0x1f9   : > { %v609_v22 = vsub.f32 %v455_v25, %v5976_v55 }
 0x1fb   : > { %v641_v10 = vmul.f32 %v609_v22, %v609_v22  ;;  %v612_v22 = vsub.f32 %v5739_v35, %v5976_v55 }
 0x1fe   : > { %1209 = vperm.xlu0 %5262, %v432_v28   ;;  %v647_v28 = vmul.f32 %v615_v2, %v615_v2 }
 0x200   : > { %v6057_v31 = vpop.permute.xlu0 %479 }
 0x206   : > { %1218 = vperm.xlu0 %5262, %v435_v4   ;;  %v872_v4 = vmul.f32 %v840_v16, %v840_v16 }
 0x208   : > { %v6062_v24 = vpop.permute.xlu0 %494  ;;  %v904_v52 = vadd.f32 %v872_v4, %v647_v28  ;;  %v1062_v28 = vsub.f32 %v5939_v0, %v5984_v12 }
 0x20e   : > { %1227 = vperm.xlu0 %5262, %v438_v45   ;;  %v1065_v45 = vsub.f32 %v5947_v27, %v5984_v12  ;;  %v1091_v27 = vmul.f32 %v1059_v11, %v1059_v11 }
 0x210   : > { %v6067_v23 = vpop.permute.xlu0 %509  ;;  %v1097_v43 = vmul.f32 %v1065_v45, %v1065_v45  ;;  %v1094_v45 = vmul.f32 %v1062_v28, %v1062_v28  ;;  %v871_v28 = vmul.f32 %v839_v13, %v839_v13 }
 0x212   : > { %v1129_v2 = vadd.f32 %v1097_v43, %v904_v52 }
 0x214   : > { %v6107_v16 = vsel %vm1258_vm4, %v1129_v2, 1e+30  ;;  %v614_v2 = vsub.f32 %v6057_v31, %v5976_v55 }
 0x216   : > { %1236 = vperm.xlu0 %5262, %v441_v60   ;;  %v834_v60 = vsub.f32 %v5772_v44, %v5978_v33  ;;  %v837_v44 = vsub.f32 %v5847_v9, %v5978_v33  ;;  %v1315_v9 = vlaneseq }
 0x218   : > { %v6072_v32 = vpop.permute.xlu0 %524 }
 0x21e   : > { %1245 = vperm.xlu0 %5262, %v444_v30   ;;  %v6098_v30 = vpop.permute.xlu2 %1233 }
 0x21f   : > { %10094 = vst [vmem:[#allocation55_spill] sm:$0xff] %v6098_v30 }
 0x220   : > { %v6075_v56 = vpop.permute.xlu0 %539 }
 0x226   : > { %v6115_v52 = vpop.permute.xlu2 %1242 }
 0x227   : > { %10096 = vst [vmem:[#allocation57_spill] sm:$0xff] %v6115_v52  ;;  %v873_v52 = vmul.f32 %v841_v19, %v841_v19 }
 0x228   : > { %v6079_v26 = vpop.permute.xlu0 %554 }
 0x229   : > { %10090 = vst [vmem:[#allocation51_spill] sm:$0xff] %v6079_v26  ;;  %v866_v26 = vmul.f32 %v834_v60, %v834_v60  ;;  %v6120_v60 = vand.u32 127, %v1315_v9 }
 0x22b   : > { %v898_v25 = vadd.f32 %v866_v26, %v641_v10  ;;  %v869_v26 = vmul.f32 %v837_v44, %v837_v44  ;;  %v644_v10 = vmul.f32 %v612_v22, %v612_v22  ;;  %v646_v44 = vmul.f32 %v614_v2, %v614_v2 }
 0x22d   : > { %v1123_v48 = vadd.f32 %v1091_v27, %v898_v25  ;;  %v901_v35 = vadd.f32 %v869_v26, %v644_v10  ;;  %v6130_v25 = vsel %vm1381_vm7, %v6120_v60, 128 }
 0x22e   : > { %v6125_v43 = vpop.xlane.xlu2 %1321  ;;  %v1446_v27 = vshra.s32 %v6130_v25, 16 }
 0x22f   : > { %v1126_v0 = vadd.f32 %v1094_v45, %v901_v35  ;;  %10097 = vst [vmem:[#allocation58_spill] sm:$0xff] %v6125_v43  ;;  %vm1383_vm14 = vcmp.eq.f32.partialorder %v6024_v58, %v6125_v43  ;;  %v1066_v43 = vsub.f32 %v5927_v34, %v5984_v12 }
 0x230   : > { %v6083_v39 = vpop.permute.xlu0 %569  ;;  %v6138_v22 = vcvt.s32.f32 %v1446_v27 }
 0x231   : > { %v6127_v11 = vsel %vm1255_vm6, %v1126_v0, 1e+30  ;;  %v842_v0 = vsub.f32 %v5790_v50, %v5978_v33 }
 0x232   : > { %10098 = vst [vmem:[#allocation59_spill] sm:$0xff] %v6127_v11 }
 0x233   : > { %v874_v13 = vmul.f32 %v842_v0, %v842_v0 }
 0x236   : > { %v6143_v26 = vpop.xlane.xlu2 %1323 }
 0x237   : > { %10099 = vst [vmem:[#allocation60_spill] sm:$0xff] %v6143_v26  ;;  %vm1384_vm9 = vcmp.eq.f32.partialorder %v6035_v42, %v6143_v26 }
 0x238   : > { %v6087_v14 = vpop.permute.xlu0 %584  ;;  %v6151_v45 = vsel %vm1384_vm9, %v6120_v60, 128 }
 0x239   : > { %10093 = vst [vmem:[#allocation54_spill] sm:$0xff] %v6087_v14  ;;  %v1488_v35 = vshra.s32 %v6151_v45, 16 }
 0x23b   : > { %v6159_v27 = vcvt.s32.f32 %v1488_v35  ;;  %v1069_v35 = vsub.f32 %v5933_v51, %v5984_v12 }
 0x240   : > { %v6100_v57 = vpop.permute.xlu0 %599 }
 0x241   : > { %10095 = vst [vmem:[#allocation56_spill] sm:$0xff] %v6100_v57  ;;  %v616_v57 = vsub.f32 %v5749_v37, %v5976_v55 }
 0x248   : > { %1331 = vmin.xlane.f32.xlu0 %v6107_v16  ;;  %v1159_v4 = vpop.permute.xlu0 %1158 }
 0x249   : > { %vm1252_vm5 = vcmp.eq.s32.totalorder %v1159_v4, %v5995_v61  ;;  %v1064_v4 = vsub.f32 %v5875_v1, %v5984_v12  ;;  %v617_v1 = vsub.f32 %v6062_v24, %v5976_v55 }
 0x24a   : > { %v6117_v63 = vsel %vm1252_vm5, %v1123_v48, 1e+30  ;;  %v903_v48 = vadd.f32 %v871_v28, %v646_v44  ;;  %v1067_v44 = vsub.f32 %v5889_v17, %v5984_v12 }
 0x24b   : > { %1319 = vmin.xlane.f32.xlu1 %v6117_v63  ;;  %v1096_v10 = vmul.f32 %v1064_v4, %v1064_v4  ;;  %v649_v2 = vmul.f32 %v617_v1, %v617_v1  ;;  %v6164_v4 = vpop.xlane.xlu2 %1327  ;;  %v619_v1 = vsub.f32 %v5754_v38, %v5976_v55  ;;  %v6190_v38 = vpop.permute.xlu1 %1185 }
 0x24c   : > { %10101 = vst [vmem:[#allocation62_spill] sm:$0xff] %v6164_v4  ;;  %vm1386_vm11 = vcmp.eq.f32.partialorder %v6040_v36, %v6164_v4  ;;  %v6223_v4 = vsel %vm1383_vm14, %v6120_v60, 128  ;;  %v648_v36 = vmul.f32 %v616_v57, %v616_v57  ;;  %vm1261_vm2 = vcmp.eq.s32.totalorder %v6190_v38, %v5995_v61 }
 0x24d   : > { %v1128_v47 = vadd.f32 %v1096_v10, %v903_v48  ;;  %v906_v28 = vadd.f32 %v874_v13, %v649_v2  ;;  %v6172_v10 = vsel %vm1386_vm11, %v6120_v60, 128  ;;  %v651_v13 = vmul.f32 %v619_v1, %v619_v1 }
 0x24e   : > { %v1516_v17 = vshra.s32 %v6172_v10, 16  ;;  %v905_v30 = vadd.f32 %v873_v52, %v648_v36  ;;  %v618_v36 = vsub.f32 %v5779_v46, %v5976_v55  ;;  %v843_v52 = vsub.f32 %v5865_v15, %v5978_v33 }
 0x24f   : > { %v1068_v46 = vsub.f32 %v5955_v54, %v5984_v12 }
 0x250   : > { %v1174_v9 = vpop.permute.xlu0 %1173  ;;  %v6182_v0 = vcvt.s32.f32 %v1516_v17 }
 0x251   : > { %vm1257_vm8 = vcmp.eq.s32.totalorder %v1174_v9, %v5995_v61  ;;  %v1099_v9 = vmul.f32 %v1067_v44, %v1067_v44  ;;  %v1101_v44 = vmul.f32 %v1069_v35, %v1069_v35 }
 0x252   : > { %v6148_v31 = vsel %vm1257_vm8, %v1128_v47, 1e+30  ;;  %v844_v47 = vsub.f32 %v5843_v5, %v5978_v33 }
 0x253   : > { %1325 = vmin.xlane.f32.xlu1 %v6127_v11  ;;  %10100 = vst [vmem:[#allocation61_spill] sm:$0xff] %v6148_v31  ;;  %v1131_v50 = vadd.f32 %v1099_v9, %v906_v28  ;;  %v6192_v5 = vpop.permute.xlu1 %1194 }
 0x254   : > { %v876_v2 = vmul.f32 %v844_v47, %v844_v47  ;;  %vm1264_vm3 = vcmp.eq.s32.totalorder %v6192_v5, %v5995_v61 }
 0x256   : > { %v908_v28 = vadd.f32 %v876_v2, %v651_v13 }
 0x258   : > { %v1183_v48 = vpop.permute.xlu0 %1182 }
 0x259   : > { %vm1260_vm10 = vcmp.eq.s32.totalorder %v1183_v48, %v5995_v61  ;;  %v1133_v48 = vadd.f32 %v1101_v44, %v908_v28 }
 0x25a   : > { %v6169_v24 = vsel %vm1260_vm10, %v1131_v50, 1e+30 }
 0x25b   : > { %1449 = vmin.xlane.f32.xlu1 %v6138_v22  ;;  %v6187_v9 = vsel %vm1262_vm12, %v1133_v48, 1e+30  ;;  %v6194_v51 = vpop.permute.xlu1 %1203  ;;  %vm1265_vm12 = vcmp.eq.s32.totalorder %v6070_v7, %v5995_v61  ;;  %v1515_v7 = vand.u32 65535, %v6172_v10 }
 0x25c   : > { %10102 = vst [vmem:[#allocation63_spill] sm:$0xff] %v6187_v9 }
 0x260   : > { %v6198_v17 = vpop.permute.xlu0 %1191 }
 0x261   : > { %vm1263_vm7 = vcmp.eq.s32.totalorder %v6198_v17, %v5995_v61  ;;  %v1487_v17 = vand.u32 65535, %v6151_v45 }
 0x263   : > { %1329 = vmin.xlane.f32.xlu1 %v6148_v31  ;;  %v6196_v50 = vpop.permute.xlu1 %1212  ;;  %v1489_v45 = vcvt.s32.f32 %v1487_v17 }
 0x268   : > { %v6202_v1 = vpop.permute.xlu0 %1200 }
 0x26b   : > { %1491 = vmin.xlane.f32.xlu1 %v6159_v27  ;;  %v6200_v47 = vpop.permute.xlu1 %1221 }
 0x26c   : > { %10103 = vst [vmem:[#allocation64_spill] sm:$0xff] %v6200_v47 }
 0x270   : > { %v6206_v35 = vpop.permute.xlu0 %1209 }
 0x273   : > { %1335 = vmin.xlane.f32.xlu1 %v6169_v24  ;;  %v6204_v41 = vpop.permute.xlu1 %1230 }
 0x278   : > { %v6212_v13 = vpop.permute.xlu0 %1218 }
 0x279   : > { %10105 = vst [vmem:[#allocation66_spill] sm:$0xff] %v6212_v13  ;;  %v1098_v13 = vmul.f32 %v1066_v43, %v1066_v43  ;;  %v846_v43 = vsub.f32 %v5873_v18, %v5978_v33  ;;  %v1100_v18 = vmul.f32 %v1068_v46, %v1068_v46 }
 0x27b   : > { %1519 = vmin.xlane.f32.xlu1 %v6182_v0  ;;  %v1130_v37 = vadd.f32 %v1098_v13, %v905_v30  ;;  %v621_v30 = vsub.f32 %v5788_v49, %v5976_v55 }
 0x27d   : > { %v6248_v34 = vsel %vm1259_vm15, %v1130_v37, 1e+30  ;;  %v1071_v37 = vsub.f32 %v5963_v29, %v5984_v12  ;;  %v653_v15 = vmul.f32 %v621_v30, %v621_v30  ;;  %vm1266_vm15 = vcmp.eq.s32.totalorder %v6202_v1, %v5995_v61  ;;  %v10122_v1 = vld [vmem:[#allocation40_spill] sm:$0xff] }
 0x283   : > { %1339 = vmin.xlane.f32.xlu1 %v6187_v9 }
 0x2be   : > { %v6208_v2 = vpop.xlane.xlu1 %1319 }
 0x2bf   : > { %10104 = vst [vmem:[#allocation65_spill] sm:$0xff] %v6208_v2  ;;  %vm1382_vm13 = vcmp.eq.f32.partialorder %v6117_v63, %v6208_v2  ;;  %v1474_v2 = vshra.s32 %v6223_v4, 16 }
 0x2c0   : > { %v6215_v44 = vsel %vm1382_vm13, %v6120_v60, 128 }
 0x2c1   : > { %v1460_v28 = vshra.s32 %v6215_v44, 16  ;;  %v6237_v47 = vcvt.s32.f32 %v1474_v2 }
 0x2c3   : > { %v6220_v48 = vcvt.s32.f32 %v1460_v28  ;;  %v6235_v28 = vpop.permute.xlu0 %1227 }
 0x2c5   : > { %1463 = vmin.xlane.f32.xlu2 %v6220_v48 }
 0x2c6   : > { %v6226_v26 = vpop.xlane.xlu1 %1325 }
 0x2c7   : > { %10106 = vst [vmem:[#allocation67_spill] sm:$0xff] %v6226_v26  ;;  %vm1385_vm0 = vcmp.eq.f32.partialorder %v6127_v11, %v6226_v26  ;;  %v650_v26 = vmul.f32 %v618_v36, %v618_v36  ;;  %v878_v11 = vmul.f32 %v846_v43, %v846_v43  ;;  %v1459_v43 = vand.u32 65535, %v6215_v44 }
 0x2c8   : > { %v6251_v19 = vsel %vm1385_vm0, %v6120_v60, 128  ;;  %v1473_v44 = vand.u32 65535, %v6223_v4 }
 0x2c9   : > { %v1502_v59 = vshra.s32 %v6251_v19, 16  ;;  %v910_v58 = vadd.f32 %v878_v11, %v653_v15  ;;  %v1461_v15 = vcvt.s32.f32 %v1459_v43  ;;  %v10113_v43 = vld [vmem:[#allocation33_spill] sm:$0xff] }
 0x2cb   : > { %v6246_v6 = vpop.permute.xlu0 %1236  ;;  %v6277_v49 = vcvt.s32.f32 %v1502_v59 }
 0x2cc   : > { %10107 = vst [vmem:[#allocation68_spill] sm:$0xff] %v6246_v6  ;;  %v1103_v6 = vmul.f32 %v1071_v37, %v1071_v37 }
 0x2cd   : > { %1477 = vmin.xlane.f32.xlu2 %v6237_v47 }
 0x2ce   : > { %v6240_v42 = vpop.xlane.xlu1 %1449  ;;  %v1135_v29 = vadd.f32 %v1103_v6, %v910_v58  ;;  %v620_v6 = vsub.f32 %v6067_v23, %v5976_v55 }
 0x2cf   : > { %vm1451_vm5 = vcmp.eq.f32.partialorder %v6138_v22, %v6240_v42  ;;  %v845_v22 = vsub.f32 %v5799_v53, %v5978_v33 }
 0x2d0   : > { %v6287_v59 = vsel %vm1264_vm3, %v1135_v29, 1e+30 }
 0x2d1   : > { %10109 = vst [vmem:[#allocation70_spill] sm:$0xff] %v6287_v59 }
 0x2d3   : > { %v6281_v14 = vpop.permute.xlu0 %1245 }
 0x2d5   : > { %1333 = vmin.xlane.f32.xlu2 %v6248_v34 }
 0x2d6   : > { %v6254_v57 = vpop.xlane.xlu1 %1329 }
 0x2d7   : > { %10108 = vst [vmem:[#allocation69_spill] sm:$0xff] %v6254_v57  ;;  %vm1387_vm1 = vcmp.eq.f32.partialorder %v6148_v31, %v6254_v57  ;;  %v875_v31 = vmul.f32 %v843_v52, %v843_v52  ;;  %v1445_v52 = vand.u32 65535, %v6130_v25 }
 0x2d8   : > { %v6268_v2 = vsel %vm1387_vm1, %v6120_v60, 128 }
 0x2d9   : > { %v1530_v13 = vshra.s32 %v6268_v2, 16  ;;  %v907_v54 = vadd.f32 %v875_v31, %v650_v26  ;;  %v1447_v58 = vcvt.s32.f32 %v1445_v52 }
 0x2db   : > { %v6275_v57 = vcvt.s32.f32 %v1530_v13  ;;  %v1132_v36 = vadd.f32 %v1100_v18, %v907_v54  ;;  %v6294_v26 = vpop.xlane.xlu0 %1331  ;;  %v1452_v11 = vsel %vm1451_vm5, %v1447_v58, inf  ;;  %v652_v13 = vmul.f32 %v620_v6, %v620_v6 }
 0x2dc   : > { %10110 = vst [vmem:[#allocation71_spill] sm:$0xff] %v6294_v26  ;;  %vm1388_vm4 = vcmp.eq.f32.partialorder %v6107_v16, %v6294_v26  ;;  %v877_v18 = vmul.f32 %v845_v22, %v845_v22  ;;  %v1070_v54 = vsub.f32 %v5904_v3, %v5984_v12  ;;  %v847_v6 = vsub.f32 %v5849_v8, %v5978_v33  ;;  %v10115_v8 = vld [vmem:[#allocation10_spill] sm:$0xff] }
 0x2dd   : > { %1533 = vmin.xlane.f32.xlu0 %v6275_v57  ;;  %1505 = vmin.xlane.f32.xlu2 %v6277_v49  ;;  %v6289_v30 = vsel %vm1261_vm2, %v1132_v36, 1e+30  ;;  %v6301_v31 = vsel %vm1388_vm4, %v6120_v60, 128  ;;  %v1072_v22 = vsub.f32 %v10113_v43, %v5984_v12  ;;  %vm1267_vm2 = vcmp.eq.s32.totalorder %v6194_v51, %v5995_v61 }
 0x2de   : > { %v1544_v38 = vshra.s32 %v6301_v31, 16  ;;  %v6307_v25 = vpop.xlane.xlu1 %1491  ;;  %v909_v23 = vadd.f32 %v877_v18, %v652_v13  ;;  %v1102_v36 = vmul.f32 %v1070_v54, %v1070_v54  ;;  %v623_v13 = vsub.f32 %v6072_v32, %v5976_v55 }
 0x2df   : > { %vm1493_vm10 = vcmp.eq.f32.partialorder %v6159_v27, %v6307_v25  ;;  %v848_v27 = vsub.f32 %v10115_v8, %v5978_v33  ;;  %v879_v54 = vmul.f32 %v847_v6, %v847_v6  ;;  %v10117_v6 = vld [vmem:[#allocation28_spill] sm:$0xff]  ;;  %vm1268_vm4 = vcmp.eq.s32.totalorder %v6077_v62, %v5995_v61 }
 0x2e0   : > { %v6304_v5 = vcvt.s32.f32 %v1544_v38  ;;  %v1134_v52 = vadd.f32 %v1102_v36, %v909_v23  ;;  %v655_v36 = vmul.f32 %v623_v13, %v623_v13  ;;  %v1073_v43 = vsub.f32 %v10117_v6, %v5984_v12 }
 0x2e1   : > { %v880_v17 = vmul.f32 %v848_v27, %v848_v27  ;;  %v632_v51 = vsub.f32 %v6083_v39, %v5976_v55  ;;  %v9694_v62 = vmov 0.0  }
 0x2e2   : > { %v6333_v58 = vsel %vm1263_vm7, %v1134_v52, 1e+30 }
 0x2e3   : > { %10112 = vst [vmem:[#allocation73_spill] sm:$0xff] %v6333_v58 }
 0x2e5   : > { %1343 = vmin.xlane.f32.xlu0 %v6287_v59  ;;  %1337 = vmin.xlane.f32.xlu2 %v6289_v30 }
 0x2e6   : > { %v6314_v46 = vpop.xlane.xlu1 %1335 }
 0x2e7   : > { %10111 = vst [vmem:[#allocation72_spill] sm:$0xff] %v6314_v46  ;;  %vm1390_vm8 = vcmp.eq.f32.partialorder %v6169_v24, %v6314_v46 }
 0x2e8   : > { %v6336_v4 = vsel %vm1390_vm8, %v6120_v60, 128  ;;  %vm1275_vm8 = vcmp.eq.s32.totalorder %v6235_v28, %v5995_v61  ;;  %v10137_v28 = vld [vmem:[#allocation12_spill] sm:$0xff] }
 0x2e9   : > { %v1572_v38 = vshra.s32 %v6336_v4, 16 }
 0x2eb   : > { %v6353_v18 = vcvt.s32.f32 %v1572_v38 }
 0x2ed   : > { %1453 = vmin.xlane.f32.xlu2 %v1452_v11 }
 0x2ee   : > { %v6331_v3 = vpop.xlane.xlu1 %1519 }
 0x2ef   : > { %vm1521_vm0 = vcmp.eq.f32.partialorder %v6182_v0, %v6331_v3 }
 0x2f5   : > { %1547 = vmin.xlane.f32.xlu2 %v6304_v5 }
 0x2f6   : > { %v6364_v52 = vpop.xlane.xlu1 %1339 }
 0x2f7   : > { %10116 = vst [vmem:[#allocation10_spill] sm:$0xff] %v6364_v52  ;;  %vm1392_vm13 = vcmp.eq.f32.partialorder %v6187_v9, %v6364_v52 }
 0x338   : > { %v6316_v37 = vpop.xlane.xlu2 %1463 }
 0x339   : > { %vm1465_vm6 = vcmp.eq.f32.partialorder %v6220_v48, %v6316_v37  ;;  %v1475_v48 = vcvt.s32.f32 %v1473_v44  ;;  %v1104_v44 = vmul.f32 %v1072_v22, %v1072_v22 }
 0x33a   : > { %v1466_v29 = vsel %vm1465_vm6, %v1461_v15, inf }
 0x33b   : > { %1467 = vmin.xlane.f32.xlu1 %v1466_v29  ;;  %v1494_v29 = vsel %vm1493_vm10, %v1489_v45, inf  ;;  %v1105_v45 = vmul.f32 %v1073_v43, %v1073_v43  ;;  %vm1276_vm10 = vcmp.eq.s32.totalorder %v6204_v41, %v5995_v61 }
 0x340   : > { %v6327_v53 = vpop.xlane.xlu2 %1477 }
 0x341   : > { %vm1479_vm9 = vcmp.eq.f32.partialorder %v6237_v47, %v6327_v53  ;;  %v622_v47 = vsub.f32 %v5761_v40, %v5976_v55 }
 0x342   : > { %v1480_v11 = vsel %vm1479_vm9, %v1475_v48, inf  ;;  %v1501_v48 = vand.u32 65535, %v6251_v19 }
 0x343   : > { %1341 = vmin.xlane.f32.xlu1 %v6333_v58  ;;  %1481 = vmin.xlane.f32.xlu2 %v1480_v11  ;;  %v654_v23 = vmul.f32 %v622_v47, %v622_v47  ;;  %v912_v47 = vadd.f32 %v880_v17, %v655_v36  ;;  %v1074_v17 = vsub.f32 %v10122_v1, %v5984_v12  ;;  %v1456_v1 = vcvt.f32.s32 %v6240_v42 }
 0x344   : > { %v1503_v19 = vcvt.s32.f32 %v1501_v48 }
 0x345   : > { %v911_v38 = vadd.f32 %v879_v54, %v654_v23  ;;  %v6383_v54 = vsel %vm1392_vm13, %v6120_v60, 128 }
 0x347   : > { %v1136_v13 = vadd.f32 %v1104_v44, %v911_v38  ;;  %v10120_v44 = vld [vmem:[#allocation23_spill] sm:$0xff]  ;;  %v1517_v38 = vcvt.s32.f32 %v1515_v7  ;;  %v1529_v7 = vand.u32 65535, %v6268_v2 }
 0x348   : > { %v6351_v15 = vpop.xlane.xlu2 %1333  ;;  %v849_v36 = vsub.f32 %v10120_v44, %v5978_v33  ;;  %v10126_v44 = vld [vmem:[#allocation35_spill] sm:$0xff] }
 0x349   : > { %10114 = vst [vmem:[#allocation33_spill] sm:$0xff] %v6351_v15  ;;  %vm1389_vm11 = vcmp.eq.f32.partialorder %v6248_v34, %v6351_v15  ;;  %v6380_v8 = vsel %vm1265_vm12, %v1136_v13, 1e+30  ;;  %v1522_v13 = vsel %vm1521_vm0, %v1517_v38, inf }
 0x34a   : > { %v6360_v40 = vsel %vm1389_vm11, %v6120_v60, 128  ;;  %10118 = vst [vmem:[#allocation28_spill] sm:$0xff] %v6380_v8  ;;  %vm1269_vm11 = vcmp.eq.s32.totalorder %v6206_v35, %v5995_v61 }
 0x34b   : > { %1495 = vmin.xlane.f32.xlu1 %v1494_v29  ;;  %1575 = vmin.xlane.f32.xlu2 %v6353_v18  ;;  %v1558_v32 = vshra.s32 %v6360_v40, 16  ;;  %v1137_v29 = vadd.f32 %v1105_v45, %v912_v47  ;;  %v881_v47 = vmul.f32 %v849_v36, %v849_v36  ;;  %v1075_v36 = vsub.f32 %v10126_v44, %v5984_v12 }
 0x34c   : > { %v1457_v44 = vshll.u32 %v1456_v1, 16 }
 0x34d   : > { %v6367_v11 = vcvt.s32.f32 %v1558_v32  ;;  %v1600_v32 = vshra.s32 %v6383_v54, 16  ;;  %v6394_v48 = vsel %vm1266_vm15, %v1137_v29, 1e+30  ;;  %vm1270_vm15 = vcmp.eq.s32.totalorder %v6196_v50, %v5995_v61  ;;  %v10151_v50 = vld [vmem:[#allocation22_spill] sm:$0xff] }
 0x34f   : > { %1561 = vmin.xlane.f32.xlu0 %v6367_v11  ;;  %v6403_v6 = vcvt.s32.f32 %v1600_v32 }
 0x350   : > { %v6376_v22 = vpop.xlane.xlu2 %1505  ;;  %v6414_v29 = vpop.xlane.xlu0 %1533 }
 0x351   : > { %vm1507_vm14 = vcmp.eq.f32.partialorder %v6277_v49, %v6376_v22  ;;  %v10119_v49 = vld [vmem:[#allocation6_spill] sm:$0xff]  ;;  %vm1535_vm3 = vcmp.eq.f32.partialorder %v6275_v57, %v6414_v29  ;;  %v1543_v57 = vand.u32 65535, %v6301_v31 }
 0x352   : > { %v1508_v27 = vsel %vm1507_vm14, %v1503_v19, inf  ;;  %v624_v23 = vsub.f32 %v10119_v49, %v5976_v55  ;;  %10121 = vst [vmem:[#allocation6_spill] sm:$0xff] %v6394_v48  ;;  %v10124_v19 = vld [vmem:[#allocation18_spill] sm:$0xff] }
 0x353   : > { %1345 = vmin.xlane.f32.xlu1 %v6380_v8  ;;  %1509 = vmin.xlane.f32.xlu2 %v1508_v27  ;;  %v850_v45 = vsub.f32 %v10124_v19, %v5978_v33  ;;  %v1106_v27 = vmul.f32 %v1074_v17, %v1074_v17  ;;  %v10125_v49 = vld [vmem:[#allocation2_spill] sm:$0xff] }
 0x354   : > { %v656_v43 = vmul.f32 %v624_v23, %v624_v23  ;;  %v625_v23 = vsub.f32 %v10125_v49, %v5976_v55  ;;  %v1531_v49 = vcvt.s32.f32 %v1529_v7  ;;  %v10128_v7 = vld [vmem:[#allocation16_spill] sm:$0xff] }
 0x355   : > { %v882_v19 = vmul.f32 %v850_v45, %v850_v45 }
 0x356   : > { %v913_v38 = vadd.f32 %v881_v47, %v656_v43  ;;  %v657_v52 = vmul.f32 %v625_v23, %v625_v23  ;;  %v1536_v43 = vsel %vm1535_vm3, %v1531_v49, inf }
 0x357   : > { %1347 = vmin.xlane.f32.xlu0 %v6394_v48 }
 0x358   : > { %v6401_v10 = vpop.xlane.xlu2 %1337  ;;  %v1138_v17 = vadd.f32 %v1106_v27, %v913_v38  ;;  %v914_v47 = vadd.f32 %v882_v19, %v657_v52  ;;  %v10132_v38 = vld [vmem:[#allocation34_spill] sm:$0xff] }
 0x359   : > { %10123 = vst [vmem:[#allocation23_spill] sm:$0xff] %v6401_v10  ;;  %vm1391_vm1 = vcmp.eq.f32.partialorder %v6289_v30, %v6401_v10  ;;  %v1107_v10 = vmul.f32 %v1075_v36, %v1075_v36  ;;  %v1545_v36 = vcvt.s32.f32 %v1543_v57  ;;  %v1082_v19 = vsub.f32 %v10132_v38, %v5984_v12  ;;  %v10138_v38 = vld [vmem:[#allocation30_spill] sm:$0xff] }
 0x35a   : > { %v6411_v0 = vsel %vm1391_vm1, %v6120_v60, 128  ;;  %v6429_v42 = vsel %vm1267_vm2, %v1138_v17, 1e+30  ;;  %v10133_v17 = vld [vmem:[#allocation27_spill] sm:$0xff] }
 0x35b   : > { %1523 = vmin.xlane.f32.xlu1 %v1522_v13  ;;  %1603 = vmin.xlane.f32.xlu2 %v6403_v6  ;;  %v1586_v32 = vshra.s32 %v6411_v0, 16  ;;  %10127 = vst [vmem:[#allocation40_spill] sm:$0xff] %v6429_v42  ;;  %v1139_v27 = vadd.f32 %v1107_v10, %v914_v47  ;;  %v10131_v10 = vld [vmem:[#allocation11_spill] sm:$0xff]  ;;  %v858_v49 = vsub.f32 %v10133_v17, %v5978_v33 }
 0x35c   : > { %v633_v1 = vsub.f32 %v10131_v10, %v5976_v55 }
 0x35d   : > { %v6422_v13 = vcvt.s32.f32 %v1586_v32  ;;  %v857_v32 = vsub.f32 %v10128_v7, %v5978_v33  ;;  %v6440_v23 = vsel %vm1268_vm4, %v1139_v27, 1e+30 }
 0x35e   : > { %10129 = vst [vmem:[#allocation18_spill] sm:$0xff] %v6440_v23  ;;  %v665_v47 = vmul.f32 %v633_v1, %v633_v1 }
 0x35f   : > { %1589 = vmin.xlane.f32.xlu0 %v6422_v13  ;;  %v889_v31 = vmul.f32 %v857_v32, %v857_v32  ;;  %v626_v32 = vsub.f32 %v6075_v56, %v5976_v55 }
 0x360   : > { %v1454_v2 = vpop.xlane.xlu2 %1453 }
 0x361   : > { %v1455_v46 = vcvt.f32.s32 %v1454_v2 }
 0x363   : > { %v1458_v45 = vadd.s32 %v1457_v44, %v1455_v46  ;;  %1349 = vmin.xlane.f32.xlu1 %v6429_v42  ;;  %1537 = vmin.xlane.f32.xlu2 %v1536_v43  ;;  %v664_v46 = vmul.f32 %v632_v51, %v632_v51  ;;  %v6456_v43 = vpop.xlane.xlu0 %1343  ;;  %v890_v51 = vmul.f32 %v858_v49, %v858_v49 }
 0x364   : > { %10134 = vst [vmem:[#allocation35_spill] sm:$0xff] %v6456_v43  ;;  %vm1394_vm9 = vcmp.eq.f32.partialorder %v6287_v59, %v6456_v43 }
 0x365   : > { %vm1893_vm5 = vcmp.eq.s32.totalorder %v6120_v60, %v1458_v45  ;;  %v921_v44 = vadd.f32 %v889_v31, %v664_v46  ;;  %v1114_v45 = vmul.f32 %v1082_v19, %v1082_v19  ;;  %v6474_v46 = vsel %vm1394_vm9, %v6120_v60, 128 }
 0x366   : > { %v6448_v39 = vsel %vm1893_vm5, 1.0, %v9694_v62  ;;  %v922_v31 = vadd.f32 %v890_v51, %v665_v47  ;;  %v1628_v56 = vshra.s32 %v6474_v46, 16  ;;  %v1076_v19 = vsub.f32 %v10138_v38, %v5984_v12  ;;  %v442_v47 = vld [vmem:[%s5895_s18 + $0xe0] sm:$0xff] }
 0x367   : > { %1351 = vmin.xlane.f32.xlu0 %v6440_v23  ;;  %10130 = vst [vmem:[#allocation2_spill] sm:$0xff] %v6448_v39  ;;  %vm2213_vm7 = vcmp.gt.f32.partialorder %v6448_v39, 0.0  ;;  %v1146_v27 = vadd.f32 %v1114_v45, %v921_v44  ;;  %v445_v45 = vld [vmem:[%s5895_s18 + $0xf8] sm:$0xff]  ;;  %v1470_v51 = vcvt.f32.s32 %v6316_v37 }
 0x368   : > { %v6443_v52 = vpop.xlane.xlu2 %1547  ;;  %v6466_v57 = vsel %vm2213_vm7, 1e+30, %v6000_v21  ;;  %v658_v21 = vmul.f32 %v626_v32, %v626_v32  ;;  %v6487_v49 = vcvt.s32.f32 %v1628_v56  ;;  %v1108_v44 = vmul.f32 %v1076_v19, %v1076_v19  ;;  %v10145_v19 = vld [vmem:[#allocation25_spill] sm:$0xff] }
 0x369   : > { %vm1549_vm6 = vcmp.eq.f32.partialorder %v6304_v5, %v6443_v52  ;;  %v1083_v5 = vsub.f32 %v6003_v20, %v5984_v12  ;;  %10135 = vst [vmem:[#allocation16_spill] sm:$0xff] %v6466_v57  ;;  %v6471_v20 = vsel %vm1275_vm8, %v1146_v27, 1e+30 }
 0x36a   : > { %v1550_v2 = vsel %vm1549_vm6, %v1545_v36, inf  ;;  %10136 = vst [vmem:[#allocation11_spill] sm:$0xff] %v6471_v20  ;;  %v851_v36 = vsub.f32 %v10137_v28, %v5978_v33 }
 0x36b   : > { %1551 = vmin.xlane.f32.xlu1 %v1550_v2  ;;  %v1115_v7 = vmul.f32 %v1083_v5, %v1083_v5 }
 0x36c   : > { %v883_v1 = vmul.f32 %v851_v36, %v851_v36 }
 0x36d   : > { %v1147_v10 = vadd.f32 %v1115_v7, %v922_v31  ;;  %v1471_v7 = vshll.u32 %v1470_v51, 16 }
 0x36e   : > { %v915_v17 = vadd.f32 %v883_v1, %v658_v21  ;;  %v10144_v1 = vld [vmem:[#allocation8_spill] sm:$0xff] }
 0x36f   : > { %2277 = vmin.xlane.f32.xlu0 %v6466_v57  ;;  %v6484_v2 = vsel %vm1276_vm10, %v1147_v10, 1e+30  ;;  %v1484_v10 = vcvt.f32.s32 %v6327_v53  ;;  %v627_v38 = vsub.f32 %v10144_v1, %v5976_v55 }
 0x370   : > { %10139 = vst [vmem:[#allocation34_spill] sm:$0xff] %v6484_v2  ;;  %v1140_v41 = vadd.f32 %v1108_v44, %v915_v17  ;;  %v10146_v44 = vld [vmem:[#allocation42_spill] sm:$0xff] }
 0x371   : > { %v659_v51 = vmul.f32 %v627_v38, %v627_v38 }
 0x372   : > { %v6492_v5 = vsel %vm1269_vm11, %v1140_v41, 1e+30  ;;  %v1077_v41 = vsub.f32 %v10146_v44, %v5984_v12  ;;  %v10149_v44 = vmov 0.0  }
 0x373   : > { %1365 = vmin.xlane.f32.xlu1 %v6471_v20  ;;  %10140 = vst [vmem:[#allocation27_spill] sm:$0xff] %v6492_v5 }
 0x377   : > { %1367 = vmin.xlane.f32.xlu0 %v6484_v2 }
 0x37b   : > { %1631 = vmin.xlane.f32.xlu1 %v6487_v49 }
 0x37f   : > { %1353 = vmin.xlane.f32.xlu0 %v6492_v5 }
 0x394   : > { %1239 = vperm.xlu1 %5264, %v442_v47   ;;  %v1485_v47 = vshll.u32 %v1484_v10, 16 }
 0x39c   : > { %1248 = vperm.xlu1 %5264, %v445_v45  }
 0x3ae   : > { %v1468_v27 = vpop.xlane.xlu1 %1467 }
 0x3af   : > { %v1469_v32 = vcvt.f32.s32 %v1468_v27 }
 0x3b1   : > { %v1472_v28 = vadd.s32 %v1471_v7, %v1469_v32  ;;  %v1557_v7 = vand.u32 65535, %v6360_v40 }
 0x3b3   : > { %vm1894_vm12 = vcmp.eq.s32.totalorder %v6120_v60, %v1472_v28  ;;  %v1109_v28 = vmul.f32 %v1077_v41, %v1077_v41 }
 0x3b4   : > { %v6500_v36 = vsel %vm1894_vm12, 1.0, %v9694_v62 }
 0x3b5   : > { %10141 = vst [vmem:[#allocation12_spill] sm:$0xff] %v6500_v36  ;;  %vm2214_vm13 = vcmp.gt.f32.partialorder %v6500_v36, 0.0 }
 0x3b6   : > { %v6503_v35 = vpop.xlane.xlu1 %1341  ;;  %v6506_v31 = vsel %vm2214_vm13, 1e+30, %v6117_v63  ;;  %v1482_v37 = vpop.xlane.xlu2 %1481  ;;  %v852_v63 = vsub.f32 %v10145_v19, %v5978_v33  ;;  %v1559_v19 = vcvt.s32.f32 %v1557_v7  ;;  %v10152_v7 = vld [vmem:[#allocation5_spill] sm:$0xff] }
 0x3b7   : > { %10142 = vst [vmem:[#allocation30_spill] sm:$0xff] %v6503_v35  ;;  %vm1393_vm14 = vcmp.eq.f32.partialorder %v6333_v58, %v6503_v35  ;;  %2279 = vmin.xlane.f32.xlu2 %v6506_v31  ;;  %v1483_v17 = vcvt.f32.s32 %v1482_v37  ;;  %v1498_v37 = vcvt.f32.s32 %v6307_v25  ;;  %v859_v25 = vsub.f32 %v10151_v50, %v5978_v33  ;;  %v10163_v35 = vld [vmem:[#allocation51_spill] sm:$0xff] }
 0x3b8   : > { %10143 = vst [vmem:[#allocation74_spill] sm:$0xff] %v6506_v31  ;;  %v6512_v21 = vsel %vm1393_vm14, %v6120_v60, 128  ;;  %v884_v27 = vmul.f32 %v852_v63, %v852_v63 }
 0x3b9   : > { %v1614_v56 = vshra.s32 %v6512_v21, 16  ;;  %v1486_v32 = vadd.s32 %v1485_v47, %v1483_v17  ;;  %v1499_v61 = vshll.u32 %v1498_v37, 16  ;;  %v1571_v47 = vand.u32 65535, %v6336_v4  ;;  %v10155_v4 = vld [vmem:[#allocation47_spill] sm:$0xff] }
 0x3ba   : > { %v916_v1 = vadd.f32 %v884_v27, %v659_v51  ;;  %v891_v37 = vmul.f32 %v859_v25, %v859_v25 }
 0x3bb   : > { %v6522_v45 = vcvt.s32.f32 %v1614_v56  ;;  %vm1895_vm1 = vcmp.eq.s32.totalorder %v6120_v60, %v1486_v32  ;;  %v10153_v32 = vld [vmem:[#allocation41_spill] sm:$0xff] }
 0x3bc   : > { %v1141_v10 = vadd.f32 %v1109_v28, %v916_v1  ;;  %v6541_v41 = vsel %vm1895_vm1, 1.0, %v10149_v44  ;;  %v1084_v28 = vsub.f32 %v10153_v32, %v5984_v12 }
 0x3bd   : > { %10150 = vst [vmem:[#allocation42_spill] sm:$0xff] %v6541_v41  ;;  %vm2215_vm3 = vcmp.gt.f32.partialorder %v6541_v41, 0.0 }
 0x3be   : > { %v1496_v53 = vpop.xlane.xlu1 %1495  ;;  %v6534_v38 = vpop.xlane.xlu2 %1575  ;;  %v6538_v17 = vsel %vm1270_vm15, %v1141_v10, 1e+30  ;;  %v1573_v10 = vcvt.s32.f32 %v1571_v47 }
 0x3bf   : > { %1617 = vmin.xlane.f32.xlu2 %v6522_v45  ;;  %v1497_v56 = vcvt.f32.s32 %v1496_v53  ;;  %10148 = vst [vmem:[#allocation25_spill] sm:$0xff] %v6538_v17  ;;  %v634_v53 = vsub.f32 %v10152_v7, %v5976_v55  ;;  %vm1577_vm4 = vcmp.eq.f32.partialorder %v6353_v18, %v6534_v38  ;;  %v10157_v18 = vld [vmem:[#allocation54_spill] sm:$0xff] }
 0x3c0   : > { %v635_v25 = vsub.f32 %v10157_v18, %v5976_v55 }
 0x3c1   : > { %v1500_v51 = vadd.s32 %v1499_v61, %v1497_v56  ;;  %v666_v56 = vmul.f32 %v634_v53, %v634_v53  ;;  %v1116_v61 = vmul.f32 %v1084_v28, %v1084_v28  ;;  %v10160_v53 = vld [vmem:[#allocation17_spill] sm:$0xff] }
 0x3c2   : > { %v6526_v62 = vpop.xlane.xlu0 %1561  ;;  %v860_v28 = vsub.f32 %v10160_v53, %v5978_v33  ;;  %v629_v53 = vsub.f32 %v10163_v35, %v5976_v55  ;;  %v10169_v35 = vld [vmem:[#allocation3_spill] sm:$0xff] }
 0x3c3   : > { %vm1563_vm0 = vcmp.eq.f32.partialorder %v6367_v11, %v6526_v62  ;;  %vm1896_vm5 = vcmp.eq.s32.totalorder %v6120_v60, %v1500_v51  ;;  %v923_v7 = vadd.f32 %v891_v37, %v666_v56  ;;  %v10159_v51 = vld [vmem:[#allocation55_spill] sm:$0xff]  ;;  %v667_v56 = vmul.f32 %v635_v25, %v635_v25  ;;  %v10167_v25 = vld [vmem:[#allocation14_spill] sm:$0xff] }
 0x3c4   : > { %v1564_v40 = vsel %vm1563_vm0, %v1559_v19, inf  ;;  %v6577_v47 = vsel %vm1896_vm5, 1.0, %v10149_v44  ;;  %v628_v36 = vsub.f32 %v10169_v35, %v5976_v55 }
 0x3c5   : > { %1565 = vmin.xlane.f32.xlu0 %v1564_v40  ;;  %v6565_v40 = vsel %vm2215_vm3, 1e+30, %v10155_v4  ;;  %10158 = vst [vmem:[#allocation41_spill] sm:$0xff] %v6577_v47  ;;  %v6582_v4 = vld [vmem:[%s9660_s3] ss:$0 sm:$0xff]  ;;  %v1148_v37 = vadd.f32 %v1116_v61, %v923_v7  ;;  %vm2216_vm8 = vcmp.gt.f32.partialorder %v6577_v47, 0.0  ;;  %v661_v47 = vmul.f32 %v629_v53, %v629_v53 }
 0x3c6   : > { %v6536_v63 = vpop.xlane.xlu1 %1345  ;;  %10156 = vst [vmem:[#allocation5_spill] sm:$0xff] %v6565_v40  ;;  %v6574_v32 = vpop.xlane.xlu2 %1509  ;;  %vm1277_vm6 = vcmp.eq.s32.totalorder %v10159_v51, %v6582_v4  ;;  %v892_v51 = vmul.f32 %v860_v28, %v860_v28  ;;  %v10165_v7 = vld [vmem:[#allocation48_spill] sm:$0xff] }
 0x3c7   : > { %10147 = vst [vmem:[#allocation8_spill] sm:$0xff] %v6536_v63  ;;  %vm1395_vm2 = vcmp.eq.f32.partialorder %v6380_v8, %v6536_v63  ;;  %1355 = vmin.xlane.f32.xlu2 %v6538_v17  ;;  %v10162_v63 = vld [vmem:[#allocation36_spill] sm:$0xff]  ;;  %v6606_v43 = vsel %vm2216_vm8, 1e+30, %v10165_v7 }
 0x3c8   : > { %v6549_v11 = vsel %vm1395_vm2, %v6120_v60, 128  ;;  %10166 = vst [vmem:[#allocation55_spill] sm:$0xff] %v6606_v43  ;;  %v924_v26 = vadd.f32 %v892_v51, %v667_v56  ;;  %v10168_v28 = vld [vmem:[#allocation20_spill] sm:$0xff] }
 0x3c9   : > { %v1642_v27 = vshra.s32 %v6549_v11, 16  ;;  %v853_v41 = vsub.f32 %v10168_v28, %v5978_v33  ;;  %v10172_v56 = vld [vmem:[#allocation32_spill] sm:$0xff]  ;;  %v10173_v28 = vld [vmem:[#allocation37_spill] sm:$0xff] }
 0x3ca   : > { %v6558_v1 = vpop.xlane.xlu0 %1347  ;;  %v1079_v51 = vsub.f32 %v10172_v56, %v5984_v12 }
 0x3cb   : > { %10154 = vst [vmem:[#allocation22_spill] sm:$0xff] %v6558_v1  ;;  %v6560_v19 = vcvt.s32.f32 %v1642_v27  ;;  %v1578_v27 = vsel %vm1577_vm4, %v1573_v10, inf  ;;  %vm1396_vm7 = vcmp.eq.f32.partialorder %v6394_v48, %v6558_v1  ;;  %v1085_v1 = vsub.f32 %v10162_v63, %v5984_v12  ;;  %v10170_v48 = vld [vmem:[#allocation68_spill] sm:$0xff] }
 0x3cc   : > { %v6596_v18 = vsel %vm1396_vm7, %v6120_v60, 128  ;;  %vm1278_vm9 = vcmp.eq.s32.totalorder %v10170_v48, %v6582_v4  ;;  %v885_v48 = vmul.f32 %v853_v41, %v853_v41  ;;  %v1111_v59 = vmul.f32 %v1079_v51, %v1079_v51 }
 0x3cd   : > { %1645 = vmin.xlane.f32.xlu1 %v6560_v19  ;;  %2281 = vmin.xlane.f32.xlu0 %v6565_v40  ;;  %v1656_v15 = vshra.s32 %v6596_v18, 16  ;;  %v1117_v63 = vmul.f32 %v1085_v1, %v1085_v1  ;;  %v1078_v1 = vsub.f32 %v10173_v28, %v5984_v12  ;;  %v660_v28 = vmul.f32 %v628_v36, %v628_v36 }
 0x3ce   : > { %v6570_v50 = vpop.xlane.xlu1 %1523  ;;  %v6614_v39 = vpop.xlane.xlu2 %1603 }
 0x3cf   : > { %1579 = vmin.xlane.f32.xlu2 %v1578_v27  ;;  %v6593_v27 = vsel %vm1277_vm6, %v1148_v37, 1e+30  ;;  %v854_v37 = vsub.f32 %v10167_v25, %v5978_v33  ;;  %v6622_v8 = vcvt.s32.f32 %v1656_v15  ;;  %v1149_v53 = vadd.f32 %v1117_v63, %v924_v26  ;;  %v10175_v26 = vld [vmem:[#allocation66_spill] sm:$0xff] }
 0x3d0   : > { %10161 = vst [vmem:[#allocation47_spill] sm:$0xff] %v6593_v27  ;;  %v1110_v9 = vmul.f32 %v1078_v1, %v1078_v1  ;;  %vm1272_vm11 = vcmp.eq.s32.totalorder %v10175_v26, %v6582_v4  ;;  %v1526_v63 = vcvt.f32.s32 %v6331_v3  ;;  %v917_v41 = vadd.f32 %v885_v48, %v660_v28 }
 0x3d1   : > { %v886_v7 = vmul.f32 %v854_v37, %v854_v37  ;;  %v6636_v15 = vsel %vm1278_vm9, %v1149_v53, 1e+30  ;;  %v1512_v53 = vcvt.f32.s32 %v6376_v22  ;;  %v1525_v36 = vcvt.f32.s32 %v6570_v50 }
 0x3d2   : > { %v6590_v10 = vpop.xlane.xlu0 %1589  ;;  %10174 = vst [vmem:[#allocation36_spill] sm:$0xff] %v6636_v15  ;;  %v1540_v26 = vcvt.f32.s32 %v6414_v29  ;;  %v1511_v3 = vcvt.f32.s32 %v6574_v32  ;;  %vm1605_vm13 = vcmp.eq.f32.partialorder %v6403_v6, %v6614_v39  ;;  %v1627_v32 = vand.u32 65535, %v6474_v46 }
 0x3d3   : > { %v918_v35 = vadd.f32 %v886_v7, %v661_v47  ;;  %v10176_v7 = vld [vmem:[#allocation52_spill] sm:$0xff]  ;;  %v1513_v22 = vshll.u32 %v1512_v53, 16  ;;  %vm1591_vm14 = vcmp.eq.f32.partialorder %v6422_v13, %v6590_v10 }
 0x3d4   : > { %vm1271_vm12 = vcmp.eq.s32.totalorder %v10176_v7, %v6582_v4  ;;  %v1629_v53 = vcvt.s32.f32 %v1627_v32  ;;  %v10181_v13 = vld [vmem:[#allocation24_spill] sm:$0xff]  ;;  %v10190_v32 = vld [vmem:[#allocation9_spill] sm:$0xff] }
 0x3d5   : > { %1369 = vmin.xlane.f32.xlu0 %v6593_v27  ;;  %v1143_v47 = vadd.f32 %v1111_v59, %v918_v35  ;;  %v1599_v35 = vand.u32 65535, %v6383_v54  ;;  %v862_v46 = vsub.f32 %v10181_v13, %v5978_v33 }
 0x3d6   : > { %v6603_v61 = vpop.xlane.xlu1 %1349  ;;  %v1538_v51 = vpop.xlane.xlu2 %1537 }
 0x3d7   : > { %10164 = vst [vmem:[#allocation54_spill] sm:$0xff] %v6603_v61  ;;  %2283 = vmin.xlane.f32.xlu2 %v6606_v43  ;;  %v6650_v1 = vsel %vm1272_vm11, %v1143_v47, 1e+30  ;;  %v1539_v50 = vcvt.f32.s32 %v1538_v51  ;;  %v1601_v29 = vcvt.s32.f32 %v1599_v35  ;;  %vm1397_vm9 = vcmp.eq.f32.partialorder %v6429_v42, %v6603_v61 }
 0x3d8   : > { %10177 = vst [vmem:[#allocation51_spill] sm:$0xff] %v6650_v1 }
 0x3d9   : > { %v1606_v54 = vsel %vm1605_vm13, %v1601_v29, inf }
 0x3da   : > { %v6620_v25 = vpop.xlane.xlu0 %1351 }
 0x3db   : > { %10171 = vst [vmem:[#allocation17_spill] sm:$0xff] %v6620_v25  ;;  %vm1398_vm10 = vcmp.eq.f32.partialorder %v6440_v23, %v6620_v25  ;;  %v1527_v23 = vshll.u32 %v1526_v63, 16  ;;  %v1541_v63 = vshll.u32 %v1540_v26, 16 }
 0x3dc   : > { %v6632_v37 = vsel %vm1398_vm10, %v6120_v60, 128 }
 0x3dd   : > { %1659 = vmin.xlane.f32.xlu0 %v6622_v8  ;;  %v1684_v56 = vshra.s32 %v6632_v37, 16  ;;  %v1528_v28 = vadd.s32 %v1527_v23, %v1525_v36  ;;  %v1542_v47 = vadd.s32 %v1541_v63, %v1539_v50 }
 0x3de   : > { %v6634_v58 = vpop.xlane.xlu1 %1551 }
 0x3df   : > { %1371 = vmin.xlane.f32.xlu2 %v6636_v15  ;;  %v6640_v25 = vcvt.s32.f32 %v1684_v56  ;;  %v1142_v56 = vadd.f32 %v1110_v9, %v917_v41  ;;  %v1585_v9 = vand.u32 65535, %v6411_v0  ;;  %v1514_v41 = vadd.s32 %v1513_v22, %v1511_v3  ;;  %v10184_v3 = vld [vmem:[#allocation43_spill] sm:$0xff] }
 0x3e0   : > { %vm1898_vm15 = vcmp.eq.s32.totalorder %v6120_v60, %v1528_v28  ;;  %vm1899_vm2 = vcmp.eq.s32.totalorder %v6120_v60, %v1542_v47  ;;  %v1087_v35 = vsub.f32 %v10184_v3, %v5984_v12  ;;  %v894_v22 = vmul.f32 %v862_v46, %v862_v46  ;;  %v10186_v28 = vld [vmem:[#allocation49_spill] sm:$0xff] }
 0x3e1   : > { %1687 = vmin.xlane.f32.xlu1 %v6640_v25  ;;  %v6657_v59 = vsel %vm1271_vm12, %v1142_v56, 1e+30  ;;  %v1587_v23 = vcvt.s32.f32 %v1585_v9  ;;  %vm1897_vm0 = vcmp.eq.s32.totalorder %v6120_v60, %v1514_v41  ;;  %v6672_v6 = vsel %vm1898_vm15, 1.0, %v10149_v44  ;;  %v10183_v56 = vld [vmem:[#allocation7_spill] sm:$0xff]  ;;  %v10194_v46 = vld [vmem:[#allocation57_spill] sm:$0xff] }
 0x3e2   : > { %10179 = vst [vmem:[#allocation14_spill] sm:$0xff] %v6657_v59  ;;  %v6680_v51 = vsel %vm1897_vm0, 1.0, %v10149_v44  ;;  %vm2218_vm3 = vcmp.gt.f32.partialorder %v6672_v6, 0.0  ;;  %v637_v26 = vsub.f32 %v10183_v56, %v5976_v55  ;;  %v1119_v63 = vmul.f32 %v1087_v35, %v1087_v35  ;;  %v10188_v41 = vld [vmem:[#allocation59_spill] sm:$0xff] }
 0x3e3   : > { %v1592_v7 = vsel %vm1591_vm14, %v1587_v23, inf  ;;  %10180 = vst [vmem:[#allocation20_spill] sm:$0xff] %v6672_v6  ;;  %vm2217_vm4 = vcmp.gt.f32.partialorder %v6680_v51, 0.0  ;;  %v6692_v50 = vsel %vm2218_vm3, 1e+30, %v10186_v28  ;;  %v630_v47 = vsub.f32 %v10190_v32, %v5976_v55  ;;  %v10191_v23 = vld [vmem:[#allocation26_spill] sm:$0xff] }
 0x3e4   : > { %10182 = vst [vmem:[#allocation3_spill] sm:$0xff] %v6680_v51  ;;  %v669_v9 = vmul.f32 %v637_v26, %v637_v26  ;;  %v6697_v29 = vsel %vm2217_vm4, 1e+30, %v10188_v41  ;;  %vm1280_vm6 = vcmp.eq.s32.totalorder %v10194_v46, %v6582_v4  ;;  %v6712_v26 = vpop.xlane.xlu0 %2277  ;;  %v10198_v41 = vld [vmem:[#allocation29_spill] sm:$0xff]  ;;  %vm1281_vm4 = vcmp.eq.s32.totalorder %v6281_v14, %v6582_v4 }
 0x3e5   : > { %1359 = vmin.xlane.f32.xlu0 %v6650_v1  ;;  %10187 = vst [vmem:[#allocation32_spill] sm:$0xff] %v6692_v50  ;;  %v662_v35 = vmul.f32 %v630_v47, %v630_v47  ;;  %v861_v32 = vsub.f32 %v10198_v41, %v5978_v33  ;;  %v10200_v46 = vld [vmem:[#allocation45_spill] sm:$0xff]  ;;  %v1554_v47 = vcvt.f32.s32 %v6443_v52  ;;  %vm2341_vm12 = vcmp.eq.f32.partialorder %v6466_v57, %v6712_v26 }
 0x3e6   : > { %v6655_v48 = vpop.xlane.xlu1 %1365  ;;  %10189 = vst [vmem:[#allocation37_spill] sm:$0xff] %v6697_v29  ;;  %v6777_v61 = vsel %vm2341_vm12, %v6120_v60, 128 }
 0x3e7   : > { %10178 = vst [vmem:[#allocation48_spill] sm:$0xff] %v6655_v48  ;;  %1357 = vmin.xlane.f32.xlu2 %v6657_v59  ;;  %v893_v6 = vmul.f32 %v861_v32, %v861_v32  ;;  %vm1405_vm8 = vcmp.eq.f32.partialorder %v6471_v20, %v6655_v48 }
 0x3e8   : > { %10196 = vst [vmem:[#allocation52_spill] sm:$0xff] %v6712_v26  ;;  %v6738_v52 = vsel %vm1405_vm8, %v6120_v60, 128 }
 0x3ed   : > { %1607 = vmin.xlane.f32.xlu0 %v1606_v54  ;;  %v926_v54 = vadd.f32 %v894_v22, %v669_v9  ;;  %v10197_v22 = vld [vmem:[#allocation13_spill] sm:$0xff] }
 0x3ee   : > { %v6669_v0 = vpop.xlane.xlu1 %1631  ;;  %v636_v28 = vsub.f32 %v10197_v22, %v5976_v55 }
 0x3ef   : > { %1593 = vmin.xlane.f32.xlu2 %v1592_v7  ;;  %vm1633_vm1 = vcmp.eq.f32.partialorder %v6487_v49, %v6669_v0  ;;  %v6688_v49 = vsel %vm1899_vm2, 1.0, %v10149_v44  ;;  %v855_v7 = vsub.f32 %v10191_v23, %v5978_v33  ;;  %v1151_v3 = vadd.f32 %v1119_v63, %v926_v54  ;;  %v10201_v63 = vld [vmem:[#allocation64_spill] sm:$0xff] }
 0x3f0   : > { %v1634_v36 = vsel %vm1633_vm1, %v1629_v53, inf  ;;  %10185 = vst [vmem:[#allocation68_spill] sm:$0xff] %v6688_v49  ;;  %vm2219_vm5 = vcmp.gt.f32.partialorder %v6688_v49, 0.0  ;;  %v10192_v53 = vld [vmem:[#allocation61_spill] sm:$0xff]  ;;  %v1086_v49 = vsub.f32 %v10200_v46, %v5984_v12  ;;  %vm1273_vm7 = vcmp.eq.s32.totalorder %v10201_v63, %v6582_v4 }
 0x3f1   : > { %1635 = vmin.xlane.f32.xlu1 %v1634_v36  ;;  %v6705_v13 = vsel %vm2219_vm5, 1e+30, %v10192_v53  ;;  %v10195_v36 = vld [vmem:[#allocation44_spill] sm:$0xff]  ;;  %v887_v9 = vmul.f32 %v855_v7, %v855_v7  ;;  %v6718_v23 = vsel %vm1280_vm6, %v1151_v3, 1e+30  ;;  %v10202_v3 = vld [vmem:[#allocation15_spill] sm:$0xff] }
 0x3f2   : > { %10193 = vst [vmem:[#allocation66_spill] sm:$0xff] %v6705_v13  ;;  %v1080_v56 = vsub.f32 %v10195_v36, %v5984_v12  ;;  %v668_v36 = vmul.f32 %v636_v28, %v636_v28  ;;  %v1118_v54 = vmul.f32 %v1086_v49, %v1086_v49  ;;  %v639_v22 = vsub.f32 %v10202_v3, %v5976_v55  ;;  %v10203_v28 = vld [vmem:[#allocation31_spill] sm:$0xff] }
 0x3f3   : > { %10199 = vst [vmem:[#allocation24_spill] sm:$0xff] %v6718_v23  ;;  %v919_v51 = vadd.f32 %v887_v9, %v662_v35  ;;  %v864_v35 = vsub.f32 %v10203_v28, %v5978_v33  ;;  %v6733_v9 = vpop.xlane.xlu0 %1367  ;;  %v1555_v46 = vshll.u32 %v1554_v47, 16  ;;  %v6750_v47 = vsel %vm1397_vm9, %v6120_v60, 128 }
 0x3f4   : > { %v1112_v53 = vmul.f32 %v1080_v56, %v1080_v56  ;;  %v1553_v56 = vcvt.f32.s32 %v6634_v58  ;;  %v925_v41 = vadd.f32 %v893_v6, %v668_v36  ;;  %10204 = vst [vmem:[#allocation7_spill] sm:$0xff] %v6733_v9  ;;  %v1782_v36 = vshra.s32 %v6738_v52, 16 }
 0x3f5   : > { %2287 = vmin.xlane.f32.xlu0 %v6692_v50  ;;  %v671_v63 = vmul.f32 %v639_v22, %v639_v22  ;;  %v10209_v22 = vld [vmem:[#allocation4_spill] sm:$0xff]  ;;  %vm1406_vm2 = vcmp.eq.f32.partialorder %v6484_v2, %v6733_v9  ;;  %v10219_v9 = vld [vmem:[#allocation19_spill] sm:$0xff] }
 0x3f6   : > { %v1144_v7 = vadd.f32 %v1112_v53, %v919_v51  ;;  %v10206_v51 = vld [vmem:[#allocation46_spill] sm:$0xff]  ;;  %v1150_v49 = vadd.f32 %v1118_v54, %v925_v41  ;;  %v1556_v53 = vadd.s32 %v1555_v46, %v1553_v56  ;;  %v6753_v48 = vcvt.s32.f32 %v1782_v36  ;;  %v10208_v54 = vld [vmem:[#allocation21_spill] sm:$0xff]  ;;  %v10210_v46 = vld [vmem:[#allocation39_spill] sm:$0xff] }
 0x3f7   : > { %2285 = vmin.xlane.f32.xlu2 %v6697_v29  ;;  %v1089_v58 = vsub.f32 %v10206_v51, %v5984_v12  ;;  %v1670_v51 = vshra.s32 %v6750_v47, 16  ;;  %v856_v56 = vsub.f32 %v10208_v54, %v5978_v33  ;;  %v6823_v57 = vsel %vm1406_vm2, %v6120_v60, 128 }
 0x3f8   : > { %v6735_v32 = vsel %vm1273_vm7, %v1144_v7, 1e+30  ;;  %v896_v7 = vmul.f32 %v864_v35, %v864_v35  ;;  %vm1900_vm11 = vcmp.eq.s32.totalorder %v6120_v60, %v1556_v53  ;;  %v631_v35 = vsub.f32 %v10209_v22, %v5976_v55 }
 0x3f9   : > { %2289 = vmin.xlane.f32.xlu1 %v6705_v13  ;;  %10205 = vst [vmem:[#allocation43_spill] sm:$0xff] %v6735_v32  ;;  %v1121_v28 = vmul.f32 %v1089_v58, %v1089_v58  ;;  %v1081_v58 = vsub.f32 %v10210_v46, %v5984_v12  ;;  %v6769_v53 = vsel %vm1900_vm11, 1.0, %v10149_v44 }
 0x3fa   : > { %v928_v41 = vadd.f32 %v896_v7, %v671_v63  ;;  %10212 = vst [vmem:[#allocation9_spill] sm:$0xff] %v6769_v53  ;;  %v6772_v63 = vcvt.s32.f32 %v1670_v51  ;;  %v888_v7 = vmul.f32 %v856_v56, %v856_v56  ;;  %vm2220_vm15 = vcmp.gt.f32.partialorder %v6769_v53, 0.0 }
 0x3fb   : > { %v2406_v51 = vshra.s32 %v6777_v61, 16  ;;  %v6786_v56 = vsel %vm2220_vm15, 1e+30, %v6107_v16  ;;  %v863_v53 = vsub.f32 %v10219_v9, %v5978_v33 }
 0x3fc   : > { %v1153_v36 = vadd.f32 %v1121_v28, %v928_v41  ;;  %v663_v28 = vmul.f32 %v631_v35, %v631_v35  ;;  %v1113_v41 = vmul.f32 %v1081_v58, %v1081_v58  ;;  %10214 = vst [vmem:[#allocation61_spill] sm:$0xff] %v6786_v56 }
 0x3fd   : > { %1375 = vmin.xlane.f32.xlu0 %v6718_v23 }
 0x3fe   : > { %v920_v22 = vadd.f32 %v888_v7, %v663_v28 }
 0x405   : > { %1361 = vmin.xlane.f32.xlu0 %v6735_v32 }
 0x406   : > { %v1240_v6 = vpop.permute.xlu1 %1239 }
 0x407   : > { %vm1279_vm10 = vcmp.eq.s32.totalorder %v1240_v6, %v6582_v4  ;;  %v6766_v6 = vpop.xlane.xlu0 %1353 }
 0x408   : > { %v6747_v3 = vsel %vm1279_vm10, %v1150_v49, 1e+30  ;;  %10211 = vst [vmem:[#allocation59_spill] sm:$0xff] %v6766_v6  ;;  %vm1399_vm14 = vcmp.eq.f32.partialorder %v6492_v5, %v6766_v6  ;;  %v6794_v6 = vcvt.s32.f32 %v2406_v51  ;;  %v1613_v51 = vand.u32 65535, %v6512_v21  ;;  %v10218_v21 = vld [vmem:[#allocation56_spill] sm:$0xff] }
 0x409   : > { %10207 = vst [vmem:[#allocation49_spill] sm:$0xff] %v6747_v3  ;;  %1373 = vmin.xlane.f32.xlu2 %v6747_v3  ;;  %v6789_v46 = vsel %vm1399_vm14, %v6120_v60, 128 }
 0x40a   : > { %v1698_v35 = vshra.s32 %v6789_v46, 16 }
 0x40c   : > { %v6801_v16 = vcvt.s32.f32 %v1698_v35 }
 0x40d   : > { %1785 = vmin.xlane.f32.xlu0 %v6753_v48 }
 0x40e   : > { %v1249_v49 = vpop.permute.xlu1 %1248 }
 0x40f   : > { %vm1282_vm13 = vcmp.eq.s32.totalorder %v1249_v49, %v6582_v4  ;;  %v10215_v49 = vld [vmem:[#allocation53_spill] sm:$0xff] }
 0x410   : > { %v6774_v54 = vsel %vm1282_vm13, %v1153_v36, 1e+30  ;;  %vm1274_vm0 = vcmp.eq.s32.totalorder %v10215_v49, %v6582_v4  ;;  %v1145_v36 = vadd.f32 %v1113_v41, %v920_v22  ;;  %v1568_v4 = vcvt.f32.s32 %v6526_v62 }
 0x411   : > { %10213 = vst [vmem:[#allocation26_spill] sm:$0xff] %v6774_v54  ;;  %1673 = vmin.xlane.f32.xlu2 %v6772_v63  ;;  %1379 = vmin.xlane.f32.xlu1 %v6774_v54  ;;  %v1655_v62 = vand.u32 65535, %v6596_v18 }
 0x412   : > { %v6797_v58 = vsel %vm1274_vm0, %v1145_v36, 1e+30  ;;  %v1615_v36 = vcvt.s32.f32 %v1613_v51 }
 0x413   : > { %10216 = vst [vmem:[#allocation57_spill] sm:$0xff] %v6797_v58  ;;  %v1657_v18 = vcvt.s32.f32 %v1655_v62 }
 0x415   : > { %2291 = vmin.xlane.f32.xlu0 %v6786_v56 }
 0x419   : > { %1363 = vmin.xlane.f32.xlu2 %v6797_v58  ;;  %2409 = vmin.xlane.f32.xlu1 %v6794_v6 }
 0x41d   : > { %1701 = vmin.xlane.f32.xlu0 %v6801_v16 }
 0x42a   : > { %v6804_v7 = vpop.xlane.xlu2 %2279 }
 0x42b   : > { %10217 = vst [vmem:[#allocation44_spill] sm:$0xff] %v6804_v7  ;;  %vm2342_vm1 = vcmp.eq.f32.partialorder %v6506_v31, %v6804_v7  ;;  %v1796_v31 = vshra.s32 %v6823_v57, 16 }
 0x42c   : > { %v6809_v28 = vsel %vm2342_vm1, %v6120_v60, 128 }
 0x42d   : > { %v2420_v41 = vshra.s32 %v6809_v28, 16  ;;  %v6832_v51 = vcvt.s32.f32 %v1796_v31 }
 0x42f   : > { %v6813_v22 = vcvt.s32.f32 %v2420_v41  ;;  %v638_v41 = vsub.f32 %v10218_v21, %v5976_v55 }
 0x431   : > { %2423 = vmin.xlane.f32.xlu0 %v6813_v22  ;;  %v670_v7 = vmul.f32 %v638_v41, %v638_v41 }
 0x432   : > { %v6818_v49 = vpop.xlane.xlu2 %1617 }
 0x433   : > { %vm1619_vm3 = vcmp.eq.f32.partialorder %v6522_v45, %v6818_v49  ;;  %v895_v45 = vmul.f32 %v863_v53, %v863_v53 }
 0x434   : > { %v1620_v35 = vsel %vm1619_vm3, %v1615_v36, inf  ;;  %v10221_v36 = vld [vmem:[#allocation38_spill] sm:$0xff] }
 0x435   : > { %1621 = vmin.xlane.f32.xlu2 %v1620_v35  ;;  %v1088_v2 = vsub.f32 %v10221_v36, %v5984_v12  ;;  %v927_v35 = vadd.f32 %v895_v45, %v670_v7  ;;  %v1569_v45 = vshll.u32 %v1568_v4, 16 }
 0x437   : > { %v1120_v20 = vmul.f32 %v1088_v2, %v1088_v2 }
 0x438   : > { %v1566_v26 = vpop.xlane.xlu0 %1565 }
 0x439   : > { %v1152_v31 = vadd.f32 %v1120_v20, %v927_v35  ;;  %v1567_v21 = vcvt.f32.s32 %v1566_v26 }
 0x43a   : > { %v6830_v5 = vpop.xlane.xlu2 %1355 }
 0x43b   : > { %10220 = vst [vmem:[#allocation13_spill] sm:$0xff] %v6830_v5  ;;  %vm1400_vm5 = vcmp.eq.f32.partialorder %v6538_v17, %v6830_v5  ;;  %v6849_v53 = vsel %vm1281_vm4, %v1152_v31, 1e+30  ;;  %v1582_v31 = vcvt.f32.s32 %v6534_v38 }
 0x43c   : > { %10223 = vst [vmem:[#allocation45_spill] sm:$0xff] %v6849_v53  ;;  %v6852_v2 = vsel %vm1400_vm5, %v6120_v60, 128 }
 0x43d   : > { %1799 = vmin.xlane.f32.xlu2 %v6832_v51  ;;  %v1712_v20 = vshra.s32 %v6852_v2, 16 }
 0x43f   : > { %v6866_v36 = vcvt.s32.f32 %v1712_v20  ;;  %v1641_v20 = vand.u32 65535, %v6549_v11 }
 0x440   : > { %v6837_v55 = vpop.xlane.xlu0 %2281  ;;  %v6877_v4 = vpop.xlane.xlu1 %1645 }
 0x441   : > { %10222 = vst [vmem:[#allocation29_spill] sm:$0xff] %v6837_v55  ;;  %vm2343_vm6 = vcmp.eq.f32.partialorder %v6565_v40, %v6837_v55  ;;  %vm1647_vm10 = vcmp.eq.f32.partialorder %v6560_v19, %v6877_v4 }
 0x442   : > { %v1580_v33 = vpop.xlane.xlu2 %1579  ;;  %v6846_v9 = vsel %vm2343_vm6, %v6120_v60, 128 }
 0x443   : > { %v2434_v12 = vshra.s32 %v6846_v9, 16  ;;  %v1581_v5 = vcvt.f32.s32 %v1580_v33 }
 0x445   : > { %1377 = vmin.xlane.f32.xlu2 %v6849_v53  ;;  %v6855_v14 = vcvt.s32.f32 %v2434_v12  ;;  %v1570_v12 = vadd.s32 %v1569_v45, %v1567_v21  ;;  %v1583_v21 = vshll.u32 %v1582_v31, 16  ;;  %v1643_v45 = vcvt.s32.f32 %v1641_v20 }
 0x447   : > { %2437 = vmin.xlane.f32.xlu1 %v6855_v14  ;;  %vm1901_vm11 = vcmp.eq.s32.totalorder %v6120_v60, %v1570_v12  ;;  %v1648_v31 = vsel %vm1647_vm10, %v1643_v45, inf }
 0x448   : > { %v6860_v7 = vpop.xlane.xlu0 %1369 }
 0x449   : > { %10224 = vst [vmem:[#allocation64_spill] sm:$0xff] %v6860_v7  ;;  %vm1407_vm8 = vcmp.eq.f32.partialorder %v6593_v27, %v6860_v7  ;;  %v6899_v7 = vsel %vm1901_vm11, 1.0, %v10149_v44 }
 0x44a   : > { %v6862_v41 = vpop.xlane.xlu2 %2283  ;;  %v6885_v38 = vsel %vm1407_vm8, %v6120_v60, 128  ;;  %10227 = vst [vmem:[#allocation46_spill] sm:$0xff] %v6899_v7  ;;  %vm2221_vm13 = vcmp.gt.f32.partialorder %v6899_v7, 0.0 }
 0x44b   : > { %10225 = vst [vmem:[#allocation15_spill] sm:$0xff] %v6862_v41  ;;  %vm2344_vm7 = vcmp.eq.f32.partialorder %v6606_v43, %v6862_v41  ;;  %v1810_v62 = vshra.s32 %v6885_v38, 16 }
 0x44c   : > { %v6869_v35 = vsel %vm2344_vm7, %v6120_v60, 128 }
 0x44d   : > { %1715 = vmin.xlane.f32.xlu2 %v6866_v36  ;;  %v2448_v26 = vshra.s32 %v6869_v35, 16  ;;  %v6904_v19 = vcvt.s32.f32 %v1810_v62 }
 0x44f   : > { %v6880_v40 = vcvt.s32.f32 %v2448_v26  ;;  %v1584_v26 = vadd.s32 %v1583_v21, %v1581_v5 }
 0x450   : > { %v6882_v43 = vpop.xlane.xlu0 %1659 }
 0x451   : > { %2451 = vmin.xlane.f32.xlu0 %v6880_v40  ;;  %vm1661_vm9 = vcmp.eq.f32.partialorder %v6622_v8, %v6882_v43  ;;  %vm1902_vm14 = vcmp.eq.s32.totalorder %v6120_v60, %v1584_v26 }
 0x452   : > { %v6893_v11 = vpop.xlane.xlu2 %1371  ;;  %v1662_v33 = vsel %vm1661_vm9, %v1657_v18, inf  ;;  %v6917_v18 = vsel %vm2221_vm13, 1e+30, %v6248_v34  ;;  %v6920_v21 = vsel %vm1902_vm14, 1.0, %v10149_v44 }
 0x453   : > { %10226 = vst [vmem:[#allocation31_spill] sm:$0xff] %v6893_v11  ;;  %vm1408_vm12 = vcmp.eq.f32.partialorder %v6636_v15, %v6893_v11  ;;  %1663 = vmin.xlane.f32.xlu1 %v1662_v33  ;;  %vm2222_vm1 = vcmp.gt.f32.partialorder %v6920_v21, 0.0 }
 0x454   : > { %v6902_v8 = vsel %vm1408_vm12, %v6120_v60, 128  ;;  %10230 = vst [vmem:[#allocation39_spill] sm:$0xff] %v6917_v18 }
 0x455   : > { %1649 = vmin.xlane.f32.xlu2 %v1648_v31  ;;  %v1824_v5 = vshra.s32 %v6902_v8, 16  ;;  %10231 = vst [vmem:[#allocation53_spill] sm:$0xff] %v6920_v21 }
 0x457   : > { %v6928_v45 = vcvt.s32.f32 %v1824_v5 }
 0x458   : > { %v6909_v12 = vpop.xlane.xlu0 %1359 }
 0x459   : > { %10228 = vst [vmem:[#allocation21_spill] sm:$0xff] %v6909_v12  ;;  %vm1402_vm15 = vcmp.eq.f32.partialorder %v6650_v1, %v6909_v12  ;;  %1813 = vmin.xlane.f32.xlu0 %v6904_v19  ;;  %v6938_v12 = vsel %vm2222_vm1, 1e+30, %v6169_v24  ;;  %v1596_v1 = vcvt.f32.s32 %v6590_v10  ;;  %v1610_v10 = vcvt.f32.s32 %v6614_v39 }
 0x45a   : > { %v6914_v20 = vpop.xlane.xlu2 %1357  ;;  %v6923_v33 = vsel %vm1402_vm15, %v6120_v60, 128  ;;  %10232 = vst [vmem:[#allocation56_spill] sm:$0xff] %v6938_v12 }
 0x45b   : > { %10229 = vst [vmem:[#allocation4_spill] sm:$0xff] %v6914_v20  ;;  %vm1401_vm0 = vcmp.eq.f32.partialorder %v6657_v59, %v6914_v20  ;;  %2293 = vmin.xlane.f32.xlu1 %v6917_v18  ;;  %v1740_v34 = vshra.s32 %v6923_v33, 16  ;;  %v1597_v41 = vshll.u32 %v1596_v1, 16  ;;  %v1611_v1 = vshll.u32 %v1610_v10, 16 }
 0x45c   : > { %v6931_v26 = vsel %vm1401_vm0, %v6120_v60, 128 }
 0x45d   : > { %1827 = vmin.xlane.f32.xlu2 %v6928_v45  ;;  %v1726_v62 = vshra.s32 %v6931_v26, 16  ;;  %v6941_v20 = vcvt.s32.f32 %v1740_v34 }
 0x45f   : > { %v6944_v11 = vcvt.s32.f32 %v1726_v62 }
 0x460   : > { %v1608_v31 = vpop.xlane.xlu0 %1607 }
 0x461   : > { %2295 = vmin.xlane.f32.xlu0 %v6938_v12 }
 0x462   : > { %v1594_v5 = vpop.xlane.xlu2 %1593 }
 0x463   : > { %1743 = vmin.xlane.f32.xlu1 %v6941_v20 }
 0x465   : > { %1729 = vmin.xlane.f32.xlu2 %v6944_v11 }
 0x468   : > { %v6947_v21 = vpop.xlane.xlu0 %2287 }
 0x469   : > { %10233 = vst [vmem:[#allocation19_spill] sm:$0xff] %v6947_v21  ;;  %vm2346_vm2 = vcmp.eq.f32.partialorder %v6692_v50, %v6947_v21  ;;  %v1595_v50 = vcvt.f32.s32 %v1594_v5 }
 0x46a   : > { %v6951_v7 = vpop.xlane.xlu2 %2285  ;;  %v6954_v24 = vsel %vm2346_vm2, %v6120_v60, 128 }
 0x46b   : > { %10234 = vst [vmem:[#allocation38_spill] sm:$0xff] %v6951_v7  ;;  %vm2345_vm3 = vcmp.eq.f32.partialorder %v6697_v29, %v6951_v7  ;;  %v2476_v34 = vshra.s32 %v6954_v24, 16  ;;  %v6970_v29 = vpop.xlane.xlu1 %1687  ;;  %v1683_v7 = vand.u32 65535, %v6632_v37  ;;  %v1598_v21 = vadd.s32 %v1597_v41, %v1595_v50 }
 0x46c   : > { %v6960_v62 = vsel %vm2345_vm3, %v6120_v60, 128  ;;  %vm1689_vm4 = vcmp.eq.f32.partialorder %v6640_v25, %v6970_v29 }
 0x46d   : > { %v6963_v59 = vcvt.s32.f32 %v2476_v34  ;;  %v2462_v55 = vshra.s32 %v6960_v62, 16  ;;  %v1685_v5 = vcvt.s32.f32 %v1683_v7  ;;  %vm1903_vm5 = vcmp.eq.s32.totalorder %v6120_v60, %v1598_v21 }
 0x46e   : > { %v6980_v17 = vsel %vm1903_vm5, 1.0, %v10149_v44  ;;  %v1669_v21 = vand.u32 65535, %v6750_v47 }
 0x46f   : > { %2479 = vmin.xlane.f32.xlu2 %v6963_v59  ;;  %v6967_v27 = vcvt.s32.f32 %v2462_v55  ;;  %v1609_v55 = vcvt.f32.s32 %v1608_v31  ;;  %v1690_v34 = vsel %vm1689_vm4, %v1685_v5, inf  ;;  %10236 = vst [vmem:[#allocation76_spill] sm:$0xff] %v6980_v17  ;;  %vm2223_vm7 = vcmp.gt.f32.partialorder %v6980_v17, 0.0 }
 0x470   : > { %v6973_v15 = vpop.xlane.xlu0 %1375  ;;  %v6994_v7 = vsel %vm2223_vm7, 1e+30, %v6289_v30  ;;  %v1671_v30 = vcvt.s32.f32 %v1669_v21 }
 0x471   : > { %2465 = vmin.xlane.f32.xlu0 %v6967_v27  ;;  %10235 = vst [vmem:[#allocation75_spill] sm:$0xff] %v6973_v15  ;;  %v1612_v37 = vadd.s32 %v1611_v1, %v1609_v55  ;;  %vm1410_vm9 = vcmp.eq.f32.partialorder %v6718_v23, %v6973_v15  ;;  %v10241_v1 = vld [vmem:[#allocation63_spill] sm:$0xff] }
 0x472   : > { %10239 = vst [vmem:[#allocation79_spill] sm:$0xff] %v6994_v7  ;;  %v7013_v55 = vsel %vm1410_vm9, %v6120_v60, 128 }
 0x473   : > { %vm1904_vm8 = vcmp.eq.s32.totalorder %v6120_v60, %v1612_v37  ;;  %v1636_v5 = vpop.xlane.xlu1 %1635 }
 0x474   : > { %v7007_v10 = vsel %vm1904_vm8, 1.0, %v10149_v44  ;;  %v1637_v23 = vcvt.f32.s32 %v1636_v5 }
 0x475   : > { %10240 = vst [vmem:[#allocation80_spill] sm:$0xff] %v7007_v10  ;;  %vm2224_vm11 = vcmp.gt.f32.partialorder %v7007_v10, 0.0 }
 0x476   : > { %v7018_v37 = vsel %vm2224_vm11, 1e+30, %v10241_v1 }
 0x477   : > { %10242 = vst [vmem:[#allocation63_spill] sm:$0xff] %v7018_v37 }
 0x478   : > { %v6991_v50 = vpop.xlane.xlu0 %1361 }
 0x479   : > { %1691 = vmin.xlane.f32.xlu0 %v1690_v34  ;;  %10238 = vst [vmem:[#allocation78_spill] sm:$0xff] %v6991_v50  ;;  %vm1403_vm12 = vcmp.eq.f32.partialorder %v6735_v32, %v6991_v50 }
 0x47a   : > { %v7035_v1 = vsel %vm1403_vm12, %v6120_v60, 128 }
 0x47b   : > { %v7038_v15 = vpop.xlane.xlu1 %2289 }
 0x47c   : > { %v6982_v42 = vpop.xlane.xlu2 %1373  ;;  %10244 = vst [vmem:[#allocation82_spill] sm:$0xff] %v7038_v15  ;;  %vm2347_vm14 = vcmp.eq.f32.partialorder %v6705_v13, %v7038_v15 }
 0x47d   : > { %10237 = vst [vmem:[#allocation77_spill] sm:$0xff] %v6982_v42  ;;  %vm1409_vm6 = vcmp.eq.f32.partialorder %v6747_v3, %v6982_v42  ;;  %v1754_v42 = vshra.s32 %v7035_v1, 16 }
 0x47e   : > { %v6988_v39 = vsel %vm1409_vm6, %v6120_v60, 128 }
 0x47f   : > { %v1838_v25 = vshra.s32 %v6988_v39, 16  ;;  %v7049_v10 = vcvt.s32.f32 %v1754_v42 }
 0x480   : > { %v7015_v34 = vpop.xlane.xlu0 %1785 }
 0x481   : > { %v6996_v41 = vcvt.s32.f32 %v1838_v25  ;;  %2297 = vmin.xlane.f32.xlu0 %v6994_v7  ;;  %v1852_v25 = vshra.s32 %v7013_v55, 16  ;;  %vm1787_vm0 = vcmp.eq.f32.partialorder %v6753_v48, %v7015_v34 }
 0x483   : > { %1841 = vmin.xlane.f32.xlu2 %v6996_v41  ;;  %v7028_v21 = vcvt.s32.f32 %v1852_v25 }
 0x484   : > { %v7004_v31 = vpop.xlane.xlu2 %1673 }
 0x485   : > { %vm1675_vm10 = vcmp.eq.f32.partialorder %v6772_v63, %v7004_v31 }
 0x486   : > { %v1676_v47 = vsel %vm1675_vm10, %v1671_v30, inf }
 0x487   : > { %1677 = vmin.xlane.f32.xlu1 %v1676_v47 }
 0x488   : > { %v7046_v25 = vpop.xlane.xlu0 %2291 }
 0x489   : > { %10245 = vst [vmem:[#allocation83_spill] sm:$0xff] %v7046_v25  ;;  %vm2348_vm15 = vcmp.eq.f32.partialorder %v6786_v56, %v7046_v25  ;;  %v7070_v25 = vpop.xlane.xlu1 %1379 }
 0x48a   : > { %v7061_v32 = vsel %vm2348_vm15, %v6120_v60, 128  ;;  %10248 = vst [vmem:[#allocation86_spill] sm:$0xff] %v7070_v25  ;;  %vm1412_vm2 = vcmp.eq.f32.partialorder %v6774_v54, %v7070_v25  ;;  %v1823_v54 = vand.u32 65535, %v6902_v8 }
 0x48b   : > { %2299 = vmin.xlane.f32.xlu2 %v7018_v37  ;;  %v2504_v42 = vshra.s32 %v7061_v32, 16 }
 0x48c   : > { %v7024_v63 = vpop.xlane.xlu2 %1363 }
 0x48d   : > { %10243 = vst [vmem:[#allocation81_spill] sm:$0xff] %v7024_v63  ;;  %vm1404_vm13 = vcmp.eq.f32.partialorder %v6797_v58, %v7024_v63  ;;  %v1781_v63 = vand.u32 65535, %v6738_v52  ;;  %v7067_v48 = vcvt.s32.f32 %v2504_v42  ;;  %v1697_v42 = vand.u32 65535, %v6789_v46 }
 0x48e   : > { %v7031_v30 = vsel %vm1404_vm13, %v6120_v60, 128 }
 0x48f   : > { %v1768_v47 = vshra.s32 %v7031_v30, 16  ;;  %1855 = vmin.xlane.f32.xlu1 %v7028_v21  ;;  %v1783_v17 = vcvt.s32.f32 %v1781_v63  ;;  %10247 = vst [vmem:[#allocation85_spill] sm:$0xff] %v7067_v48 }
 0x490   : > { %v7078_v3 = vpop.xlane.xlu0 %1701 }
 0x491   : > { %v7040_v50 = vcvt.s32.f32 %v1768_v47  ;;  %v7056_v47 = vsel %vm2347_vm14, %v6120_v60, 128  ;;  %v1788_v58 = vsel %vm1787_vm0, %v1783_v17, inf  ;;  %v1795_v17 = vand.u32 65535, %v6823_v57 }
 0x492   : > { %v2490_v13 = vshra.s32 %v7056_v47, 16  ;;  %v1624_v57 = vcvt.f32.s32 %v6818_v49  ;;  %vm1703_vm3 = vcmp.eq.f32.partialorder %v6801_v16, %v7078_v3  ;;  %v7096_v49 = vsel %vm1412_vm2, %v6120_v60, 128 }
 0x493   : > { %1771 = vmin.xlane.f32.xlu0 %v7040_v50  ;;  %v1797_v15 = vcvt.s32.f32 %v1795_v17 }
 0x494   : > { %v7064_v52 = vcvt.s32.f32 %v2490_v13  ;;  %v1638_v13 = vcvt.f32.s32 %v6669_v0  ;;  %v1699_v0 = vcvt.s32.f32 %v1697_v42  ;;  %v1711_v42 = vand.u32 65535, %v6852_v2 }
 0x496   : > { %10246 = vst [vmem:[#allocation84_spill] sm:$0xff] %v7064_v52  ;;  %v1704_v46 = vsel %vm1703_vm3, %v1699_v0, inf }
 0x497   : > { %1757 = vmin.xlane.f32.xlu1 %v7049_v10 }
 0x49b   : > { %1789 = vmin.xlane.f32.xlu0 %v1788_v58 }
 0x49f   : > { %2493 = vmin.xlane.f32.xlu1 %v7064_v52  ;;  %v1639_v52 = vshll.u32 %v1638_v13, 16 }
 0x4a3   : > { %2507 = vmin.xlane.f32.xlu0 %v7067_v48  ;;  %v7081_v48 = vpop.xlane.xlu1 %2409 }
 0x4a4   : > { %v7099_v16 = vpop.xlane.xlu0 %2423 }
 0x4a8   : > { %v1622_v56 = vpop.xlane.xlu2 %1621 }
 0x4a9   : > { %v1623_v17 = vcvt.f32.s32 %v1622_v56 }
 0x4b0   : > { %v7073_v63 = vpop.xlane.xlu2 %1799 }
 0x4b1   : > { %vm1801_vm1 = vcmp.eq.f32.partialorder %v6832_v51, %v7073_v63  ;;  %v1640_v51 = vadd.s32 %v1639_v52, %v1637_v23  ;;  %v1880_v52 = vshra.s32 %v7096_v49, 16 }
 0x4b2   : > { %v1802_v58 = vsel %vm1801_vm1, %v1797_v15, inf }
 0x4b3   : > { %1803 = vmin.xlane.f32.xlu2 %v1802_v58  ;;  %v1625_v58 = vshll.u32 %v1624_v57, 16  ;;  %vm1906_vm5 = vcmp.eq.s32.totalorder %v6120_v60, %v1640_v51  ;;  %v1713_v57 = vcvt.s32.f32 %v1711_v42 }
 0x4b5   : > { %v1626_v23 = vadd.s32 %v1625_v58, %v1623_v17 }
 0x4b7   : > { %vm1905_vm7 = vcmp.eq.s32.totalorder %v6120_v60, %v1626_v23  ;;  %v1809_v23 = vand.u32 65535, %v6885_v38  ;;  %v1652_v38 = vcvt.f32.s32 %v6877_v4 }
 0x4b8   : > { %v7088_v15 = vpop.xlane.xlu2 %1377  ;;  %v7124_v17 = vsel %vm1905_vm7, 1.0, %v10149_v44 }
 0x4b9   : > { %10249 = vst [vmem:[#allocation87_spill] sm:$0xff] %v7088_v15  ;;  %vm1411_vm4 = vcmp.eq.f32.partialorder %v6849_v53, %v7088_v15  ;;  %v7114_v15 = vcvt.s32.f32 %v1880_v52  ;;  %vm2225_vm9 = vcmp.gt.f32.partialorder %v7124_v17, 0.0  ;;  %v10254_v52 = vld [vmem:[#allocation73_spill] sm:$0xff]  ;;  %v1653_v4 = vshll.u32 %v1652_v38, 16 }
 0x4ba   : > { %v7093_v5 = vsel %vm1411_vm4, %v6120_v60, 128  ;;  %v7106_v0 = vpop.xlane.xlu1 %2437  ;;  %10251 = vst [vmem:[#allocation89_spill] sm:$0xff] %v7124_v17  ;;  %vm2425_vm4 = vcmp.eq.f32.partialorder %v6813_v22, %v7099_v16  ;;  %v2447_v22 = vand.u32 65535, %v6869_v35 }
 0x4bb   : > { %1705 = vmin.xlane.f32.xlu2 %v1704_v46  ;;  %v1866_v13 = vshra.s32 %v7093_v5, 16  ;;  %v7112_v46 = vsel %vm1906_vm5, 1.0, %v10149_v44  ;;  %vm2411_vm5 = vcmp.eq.f32.partialorder %v6794_v6, %v7081_v48  ;;  %v2461_v6 = vand.u32 65535, %v6960_v62 }
 0x4bc   : > { %10250 = vst [vmem:[#allocation88_spill] sm:$0xff] %v7112_v46  ;;  %vm2226_vm8 = vcmp.gt.f32.partialorder %v7112_v46, 0.0  ;;  %v1811_v46 = vcvt.s32.f32 %v1809_v23  ;;  %v1825_v23 = vcvt.s32.f32 %v1823_v54  ;;  %v1725_v54 = vand.u32 65535, %v6931_v26 }
 0x4bd   : > { %v7102_v56 = vcvt.s32.f32 %v1866_v13  ;;  %v10252_v13 = vld [vmem:[#allocation70_spill] sm:$0xff] }
 0x4be   : > { %v7127_v42 = vsel %vm2226_vm8, 1e+30, %v10252_v13  ;;  %v1666_v13 = vcvt.f32.s32 %v6882_v43  ;;  %vm2439_vm8 = vcmp.eq.f32.partialorder %v6855_v14, %v7106_v0 }
 0x4bf   : > { %1869 = vmin.xlane.f32.xlu0 %v7102_v56  ;;  %10253 = vst [vmem:[#allocation70_spill] sm:$0xff] %v7127_v42 }
 0x4c0   : > { %v7109_v25 = vpop.xlane.xlu2 %1715 }
 0x4c1   : > { %vm1717_vm6 = vcmp.eq.f32.partialorder %v6866_v36, %v7109_v25 }
 0x4c2   : > { %v1718_v2 = vsel %vm1717_vm6, %v1713_v57, inf  ;;  %v7133_v57 = vsel %vm2225_vm9, 1e+30, %v10254_v52 }
 0x4c3   : > { %1883 = vmin.xlane.f32.xlu2 %v7114_v15  ;;  %1719 = vmin.xlane.f32.xlu1 %v1718_v2  ;;  %10255 = vst [vmem:[#allocation73_spill] sm:$0xff] %v7133_v57 }
 0x4c4   : > { %v7121_v51 = vpop.xlane.xlu0 %2451 }
 0x4c5   : > { %vm2453_vm7 = vcmp.eq.f32.partialorder %v6880_v40, %v7121_v51 }
 0x4c6   : > { %v1664_v58 = vpop.xlane.xlu1 %1663 }
 0x4c7   : > { %2303 = vmin.xlane.f32.xlu0 %v7127_v42  ;;  %v1665_v52 = vcvt.f32.s32 %v1664_v58 }
 0x4c8   : > { %v1650_v36 = vpop.xlane.xlu2 %1649 }
 0x4c9   : > { %v1651_v42 = vcvt.f32.s32 %v1650_v36 }
 0x4cb   : > { %2301 = vmin.xlane.f32.xlu1 %v7133_v57 }
 0x4cc   : > { %v7136_v2 = vpop.xlane.xlu0 %1813 }
 0x4cd   : > { %10256 = vst [vmem:[#allocation90_spill] sm:$0xff] %v7136_v2  ;;  %vm1815_vm10 = vcmp.eq.f32.partialorder %v6904_v19, %v7136_v2  ;;  %v1667_v19 = vshll.u32 %v1666_v13, 16  ;;  %v1739_v13 = vand.u32 65535, %v6923_v33 }
 0x4ce   : > { %v7142_v53 = vpop.xlane.xlu1 %2293  ;;  %v1816_v17 = vsel %vm1815_vm10, %v1811_v46, inf }
 0x4cf   : > { %vm2349_vm11 = vcmp.eq.f32.partialorder %v6917_v18, %v7142_v53  ;;  %1817 = vmin.xlane.f32.xlu0 %v1816_v17  ;;  %v1668_v17 = vadd.s32 %v1667_v19, %v1665_v52  ;;  %v1654_v18 = vadd.s32 %v1653_v4, %v1651_v42  ;;  %v10261_v4 = vld [vmem:[#allocation6_spill] sm:$0xff] }
 0x4d0   : > { %v7147_v57 = vpop.xlane.xlu2 %1827  ;;  %v7150_v8 = vsel %vm2349_vm11, %v6120_v60, 128 }
 0x4d1   : > { %vm1829_vm12 = vcmp.eq.f32.partialorder %v6928_v45, %v7147_v57  ;;  %v2518_v43 = vshra.s32 %v7150_v8, 16  ;;  %vm1908_vm14 = vcmp.eq.s32.totalorder %v6120_v60, %v1668_v17  ;;  %vm1907_vm1 = vcmp.eq.s32.totalorder %v6120_v60, %v1654_v18 }
 0x4d2   : > { %v1830_v46 = vsel %vm1829_vm12, %v1825_v23, inf  ;;  %v1727_v23 = vcvt.s32.f32 %v1725_v54  ;;  %v7182_v19 = vsel %vm1907_vm1, 1.0, %v10149_v44 }
 0x4d3   : > { %1831 = vmin.xlane.f32.xlu2 %v1830_v46  ;;  %v7155_v2 = vcvt.s32.f32 %v2518_v43  ;;  %v1741_v43 = vcvt.s32.f32 %v1739_v13  ;;  %10257 = vst [vmem:[#allocation91_spill] sm:$0xff] %v7182_v19  ;;  %v7185_v46 = vsel %vm1908_vm14, 1.0, %v10149_v44  ;;  %vm2227_vm2 = vcmp.gt.f32.partialorder %v7182_v19, 0.0 }
 0x4d4   : > { %v7157_v58 = vpop.xlane.xlu0 %2295  ;;  %10258 = vst [vmem:[#allocation92_spill] sm:$0xff] %v7185_v46  ;;  %vm2228_vm3 = vcmp.gt.f32.partialorder %v7185_v46, 0.0  ;;  %v10292_v46 = vld [vmem:[#allocation65_spill] sm:$0xff] }
 0x4d5   : > { %vm2350_vm13 = vcmp.eq.f32.partialorder %v6938_v12, %v7157_v58  ;;  %2521 = vmin.xlane.f32.xlu1 %v7155_v2  ;;  %v7196_v17 = vsel %vm2228_vm3, 1e+30, %v10261_v4  ;;  %v2433_v4 = vand.u32 65535, %v6846_v9 }
 0x4d6   : > { %v7163_v45 = vpop.xlane.xlu1 %1743  ;;  %v7166_v36 = vsel %vm2350_vm13, %v6120_v60, 128  ;;  %10262 = vst [vmem:[#allocation6_spill] sm:$0xff] %v7196_v17 }
 0x4d7   : > { %v2532_v38 = vshra.s32 %v7166_v36, 16  ;;  %vm1745_vm0 = vcmp.eq.f32.partialorder %v6941_v20, %v7163_v45  ;;  %v10259_v20 = vld [vmem:[#allocation28_spill] sm:$0xff] }
 0x4d8   : > { %v7170_v52 = vpop.xlane.xlu2 %1729  ;;  %v1746_v33 = vsel %vm1745_vm0, %v1741_v43, inf  ;;  %v7193_v18 = vsel %vm2227_vm2, 1e+30, %v10259_v20  ;;  %v2449_v20 = vcvt.s32.f32 %v2447_v22  ;;  %v1680_v22 = vcvt.f32.s32 %v7004_v31 }
 0x4d9   : > { %v7173_v26 = vcvt.s32.f32 %v2532_v38  ;;  %vm1731_vm15 = vcmp.eq.f32.partialorder %v6944_v11, %v7170_v52  ;;  %v2419_v11 = vand.u32 65535, %v6809_v28  ;;  %10260 = vst [vmem:[#allocation28_spill] sm:$0xff] %v7193_v18  ;;  %v2405_v38 = vand.u32 65535, %v6777_v61 }
 0x4da   : > { %v1732_v42 = vsel %vm1731_vm15, %v1727_v23, inf  ;;  %v2475_v23 = vand.u32 65535, %v6954_v24  ;;  %v2454_v24 = vsel %vm2453_vm7, %v2449_v20, inf }
 0x4db   : > { %2535 = vmin.xlane.f32.xlu0 %v7173_v26  ;;  %1733 = vmin.xlane.f32.xlu2 %v1732_v42  ;;  %v2421_v54 = vcvt.s32.f32 %v2419_v11  ;;  %v2407_v43 = vcvt.s32.f32 %v2405_v38  ;;  %v1837_v38 = vand.u32 65535, %v6988_v39 }
 0x4dd   : > { %1747 = vmin.xlane.f32.xlu1 %v1746_v33  ;;  %v2426_v28 = vsel %vm2425_vm4, %v2421_v54, inf  ;;  %v2477_v33 = vcvt.s32.f32 %v2475_v23  ;;  %v2412_v11 = vsel %vm2411_vm5, %v2407_v43, inf  ;;  %v2463_v54 = vcvt.s32.f32 %v2461_v6 }
 0x4de   : > { %v1839_v62 = vcvt.s32.f32 %v1837_v38  ;;  %v1694_v6 = vcvt.f32.s32 %v6970_v29 }
 0x4e2   : > { %v7200_v13 = vpop.xlane.xlu2 %2479 }
 0x4e3   : > { %2305 = vmin.xlane.f32.xlu0 %v7193_v18  ;;  %2307 = vmin.xlane.f32.xlu2 %v7196_v17  ;;  %vm2481_vm6 = vcmp.eq.f32.partialorder %v6963_v59, %v7200_v13  ;;  %v2435_v59 = vcvt.s32.f32 %v2433_v4 }
 0x4e4   : > { %v7204_v42 = vpop.xlane.xlu0 %2465  ;;  %v2482_v61 = vsel %vm2481_vm6, %v2477_v33, inf }
 0x4e5   : > { %2427 = vmin.xlane.f32.xlu1 %v2426_v28  ;;  %vm2467_vm9 = vcmp.eq.f32.partialorder %v6967_v27, %v7204_v42  ;;  %v2440_v40 = vsel %vm2439_vm8, %v2435_v59, inf  ;;  %v1767_v59 = vand.u32 65535, %v7031_v30 }
 0x4e6   : > { %v2468_v28 = vsel %vm2467_vm9, %v2463_v54, inf }
 0x4e7   : > { %v1769_v29 = vcvt.s32.f32 %v1767_v59 }
 0x4eb   : > { %2413 = vmin.xlane.f32.xlu2 %v2412_v11  ;;  %2483 = vmin.xlane.f32.xlu0 %v2482_v61  ;;  %v1681_v61 = vshll.u32 %v1680_v22, 16  ;;  %v1753_v22 = vand.u32 65535, %v7035_v1 }
 0x4ec   : > { %v1692_v35 = vpop.xlane.xlu0 %1691 }
 0x4ed   : > { %2455 = vmin.xlane.f32.xlu1 %v2454_v24  ;;  %v1693_v38 = vcvt.f32.s32 %v1692_v35 }
 0x4f3   : > { %2441 = vmin.xlane.f32.xlu2 %v2440_v40 }
 0x4f4   : > { %v7220_v23 = vpop.xlane.xlu0 %2297 }
 0x4f5   : > { %10263 = vst [vmem:[#allocation93_spill] sm:$0xff] %v7220_v23  ;;  %2469 = vmin.xlane.f32.xlu1 %v2468_v28  ;;  %vm2351_vm10 = vcmp.eq.f32.partialorder %v6994_v7, %v7220_v23 }
 0x4f6   : > { %v7224_v9 = vpop.xlane.xlu2 %1841  ;;  %v7227_v14 = vsel %vm2351_vm10, %v6120_v60, 128 }
 0x4f7   : > { %vm1843_vm11 = vcmp.eq.f32.partialorder %v6996_v41, %v7224_v9  ;;  %v2546_v27 = vshra.s32 %v7227_v14, 16  ;;  %v1851_v41 = vand.u32 65535, %v7013_v55 }
 0x4f8   : > { %v1844_v43 = vsel %vm1843_vm11, %v1839_v62, inf }
 0x4f9   : > { %v7233_v39 = vcvt.s32.f32 %v2546_v27  ;;  %v1853_v54 = vcvt.s32.f32 %v1851_v41  ;;  %v1695_v27 = vshll.u32 %v1694_v6, 16  ;;  %v2489_v6 = vand.u32 65535, %v7056_v47 }
 0x4fa   : > { %v1678_v33 = vpop.xlane.xlu1 %1677 }
 0x4fb   : > { %1845 = vmin.xlane.f32.xlu2 %v1844_v43  ;;  %v1679_v11 = vcvt.f32.s32 %v1678_v33  ;;  %2549 = vmin.xlane.f32.xlu0 %v7233_v39  ;;  %v1696_v35 = vadd.s32 %v1695_v27, %v1693_v38  ;;  %v2491_v38 = vcvt.s32.f32 %v2489_v6  ;;  %v10270_v27 = vld [vmem:[#allocation18_spill] sm:$0xff] }
 0x4fd   : > { %v1682_v24 = vadd.s32 %v1681_v61, %v1679_v11  ;;  %v1755_v11 = vcvt.s32.f32 %v1753_v22  ;;  %v10266_v61 = vld [vmem:[#allocation40_spill] sm:$0xff]  ;;  %vm1910_vm2 = vcmp.eq.s32.totalorder %v6120_v60, %v1696_v35 }
 0x4fe   : > { %v7236_v20 = vpop.xlane.xlu2 %2299 }
 0x4ff   : > { %10264 = vst [vmem:[#allocation94_spill] sm:$0xff] %v7236_v20  ;;  %vm2352_vm12 = vcmp.eq.f32.partialorder %v7018_v37, %v7236_v20  ;;  %vm1909_vm13 = vcmp.eq.s32.totalorder %v6120_v60, %v1682_v24  ;;  %v2531_v37 = vand.u32 65535, %v7166_v36 }
 0x500   : > { %v7242_v4 = vsel %vm2352_vm12, %v6120_v60, 128  ;;  %v7258_v30 = vsel %vm1909_vm13, 1.0, %v10149_v44 }
 0x501   : > { %v2560_v31 = vshra.s32 %v7242_v4, 16  ;;  %10265 = vst [vmem:[#allocation95_spill] sm:$0xff] %v7258_v30  ;;  %vm2229_vm0 = vcmp.gt.f32.partialorder %v7258_v30, 0.0  ;;  %v2533_v36 = vcvt.s32.f32 %v2531_v37  ;;  %v1750_v37 = vcvt.f32.s32 %v7163_v45 }
 0x502   : > { %v7247_v40 = vpop.xlane.xlu1 %1855  ;;  %v7270_v24 = vsel %vm2229_vm0, 1e+30, %v10266_v61 }
 0x503   : > { %v7249_v28 = vcvt.s32.f32 %v2560_v31  ;;  %vm1857_vm14 = vcmp.eq.f32.partialorder %v7028_v21, %v7247_v40  ;;  %v1792_v21 = vcvt.f32.s32 %v7015_v34  ;;  %10267 = vst [vmem:[#allocation40_spill] sm:$0xff] %v7270_v24  ;;  %v7275_v34 = vsel %vm1910_vm2, 1.0, %v10149_v44 }
 0x504   : > { %v1858_v55 = vsel %vm1857_vm14, %v1853_v54, inf  ;;  %10268 = vst [vmem:[#allocation96_spill] sm:$0xff] %v7275_v34  ;;  %vm2230_vm3 = vcmp.gt.f32.partialorder %v7275_v34, 0.0 }
 0x505   : > { %2563 = vmin.xlane.f32.xlu2 %v7249_v28  ;;  %1859 = vmin.xlane.f32.xlu1 %v1858_v55  ;;  %v1793_v41 = vshll.u32 %v1792_v21, 16  ;;  %v10269_v55 = vld [vmem:[#allocation84_spill] sm:$0xff] }
 0x506   : > { %v7255_v62 = vpop.xlane.xlu0 %1771 }
 0x507   : > { %vm1773_vm15 = vcmp.eq.f32.partialorder %v7040_v50, %v7255_v62 }
 0x508   : > { %v1774_v43 = vsel %vm1773_vm15, %v1769_v29, inf  ;;  %v7286_v29 = vsel %vm2230_vm3, 1e+30, %v10270_v27 }
 0x509   : > { %1775 = vmin.xlane.f32.xlu0 %v1774_v43  ;;  %10271 = vst [vmem:[#allocation84_spill] sm:$0xff] %v7286_v29 }
 0x50a   : > { %v7265_v33 = vpop.xlane.xlu1 %1757 }
 0x50b   : > { %vm1759_vm1 = vcmp.eq.f32.partialorder %v7049_v10, %v7265_v33  ;;  %v2503_v10 = vand.u32 65535, %v7061_v32  ;;  %v10272_v32 = vld [vmem:[#allocation85_spill] sm:$0xff] }
 0x50c   : > { %v1760_v50 = vsel %vm1759_vm1, %v1755_v11, inf  ;;  %v10274_v11 = vld [vmem:[#allocation11_spill] sm:$0xff] }
 0x50d   : > { %2309 = vmin.xlane.f32.xlu2 %v7270_v24  ;;  %1761 = vmin.xlane.f32.xlu1 %v1760_v50  ;;  %v2505_v35 = vcvt.s32.f32 %v2503_v10 }
 0x50e   : > { %v1790_v1 = vpop.xlane.xlu0 %1789 }
 0x50f   : > { %v1791_v31 = vcvt.f32.s32 %v1790_v1  ;;  %v1806_v1 = vcvt.f32.s32 %v7073_v63 }
 0x511   : > { %v1794_v59 = vadd.s32 %v1793_v41, %v1791_v31  ;;  %v1807_v31 = vshll.u32 %v1806_v1, 16  ;;  %v1722_v1 = vcvt.f32.s32 %v7109_v25 }
 0x512   : > { %v7280_v54 = vpop.xlane.xlu1 %2493 }
 0x513   : > { %vm2495_vm4 = vcmp.eq.f32.partialorder %v10269_v55, %v7280_v54  ;;  %vm1917_vm5 = vcmp.eq.s32.totalorder %v6120_v60, %v1794_v59  ;;  %v1865_v59 = vand.u32 65535, %v7093_v5 }
 0x514   : > { %v2496_v22 = vsel %vm2495_vm4, %v2491_v38, inf  ;;  %v7294_v43 = vsel %vm1917_vm5, 1.0, %v10149_v44  ;;  %v1708_v38 = vcvt.f32.s32 %v7078_v3 }
 0x515   : > { %2311 = vmin.xlane.f32.xlu1 %v7286_v29  ;;  %2497 = vmin.xlane.f32.xlu0 %v2496_v22  ;;  %10273 = vst [vmem:[#allocation18_spill] sm:$0xff] %v7294_v43  ;;  %vm2237_vm7 = vcmp.gt.f32.partialorder %v7294_v43, 0.0  ;;  %v1867_v27 = vcvt.s32.f32 %v1865_v59  ;;  %v1879_v22 = vand.u32 65535, %v7096_v49 }
 0x516   : > { %v7289_v47 = vpop.xlane.xlu0 %2507  ;;  %v7298_v61 = vsel %vm2237_vm7, 1e+30, %v10274_v11 }
 0x517   : > { %vm2509_vm6 = vcmp.eq.f32.partialorder %v10272_v32, %v7289_v47  ;;  %10275 = vst [vmem:[#allocation85_spill] sm:$0xff] %v7298_v61  ;;  %v1709_v32 = vshll.u32 %v1708_v38, 16  ;;  %v1881_v5 = vcvt.s32.f32 %v1879_v22 }
 0x518   : > { %v2510_v21 = vsel %vm2509_vm6, %v2505_v35, inf }
 0x519   : > { %2511 = vmin.xlane.f32.xlu2 %v2510_v21 }
 0x51d   : > { %2325 = vmin.xlane.f32.xlu0 %v7298_v61 }
 0x526   : > { %v1804_v50 = vpop.xlane.xlu2 %1803 }
 0x527   : > { %v1805_v41 = vcvt.f32.s32 %v1804_v50 }
 0x529   : > { %v1808_v10 = vadd.s32 %v1807_v31, %v1805_v41  ;;  %v10279_v31 = vld [vmem:[#allocation70_spill] sm:$0xff] }
 0x52b   : > { %vm1918_vm9 = vcmp.eq.s32.totalorder %v6120_v60, %v1808_v10 }
 0x52c   : > { %v7313_v3 = vsel %vm1918_vm9, 1.0, %v10149_v44 }
 0x52d   : > { %10277 = vst [vmem:[#allocation97_spill] sm:$0xff] %v7313_v3  ;;  %vm2238_vm11 = vcmp.gt.f32.partialorder %v7313_v3, 0.0  ;;  %v10288_v3 = vld [vmem:[#allocation90_spill] sm:$0xff] }
 0x52e   : > { %v1706_v6 = vpop.xlane.xlu2 %1705  ;;  %v1820_v43 = vcvt.f32.s32 %v10288_v3 }
 0x52f   : > { %v1707_v35 = vcvt.f32.s32 %v1706_v6  ;;  %v10280_v6 = vld [vmem:[#allocation34_spill] sm:$0xff] }
 0x530   : > { %v7325_v59 = vsel %vm2238_vm11, 1e+30, %v10280_v6  ;;  %v10286_v6 = vld [vmem:[#allocation27_spill] sm:$0xff]  ;;  %vm1990_vm11 = vcmp.lt.f32.partialorder %v10292_v46, 1e+30 }
 0x531   : > { %v1710_v50 = vadd.s32 %v1709_v32, %v1707_v35  ;;  %10281 = vst [vmem:[#allocation34_spill] sm:$0xff] %v7325_v59  ;;  %v10284_v35 = vld [vmem:[#allocation73_spill] sm:$0xff] }
 0x532   : > { %v7304_v55 = vpop.xlane.xlu0 %1869 }
 0x533   : > { %vm1871_vm8 = vcmp.eq.f32.partialorder %v7102_v56, %v7304_v55  ;;  %vm1911_vm13 = vcmp.eq.s32.totalorder %v6120_v60, %v1710_v50 }
 0x534   : > { %v1872_v63 = vsel %vm1871_vm8, %v1867_v27, inf  ;;  %v7335_v27 = vsel %vm1911_vm13, 1.0, %v10149_v44 }
 0x535   : > { %1873 = vmin.xlane.f32.xlu2 %v1872_v63  ;;  %10283 = vst [vmem:[#allocation100_spill] sm:$0xff] %v7335_v27  ;;  %vm2231_vm15 = vcmp.gt.f32.partialorder %v7335_v27, 0.0  ;;  %v10289_v27 = vld [vmem:[#allocation60_spill] sm:$0xff] }
 0x536   : > { %v1720_v21 = vpop.xlane.xlu1 %1719  ;;  %v7310_v11 = vpop.xlane.xlu2 %1883  ;;  %vm1992_vm8 = vcmp.lt.f32.partialorder %v10289_v27, 1e+30 }
 0x537   : > { %10276 = vst [vmem:[#allocation11_spill] sm:$0xff] %v7310_v11  ;;  %vm1885_vm10 = vcmp.eq.f32.partialorder %v7114_v15, %v7310_v11  ;;  %v1721_v41 = vcvt.f32.s32 %v1720_v21  ;;  %v1723_v15 = vshll.u32 %v1722_v1, 16 }
 0x538   : > { %v1886_v49 = vsel %vm1885_vm10, %v1881_v5, inf  ;;  %v1834_v5 = vcvt.f32.s32 %v7147_v57  ;;  %v2024_v57 = vmax.f32 %v10289_v27, 1e-16 }
 0x539   : > { %1887 = vmin.xlane.f32.xlu1 %v1886_v49  ;;  %v1724_v22 = vadd.s32 %v1723_v15, %v1721_v41  ;;  %v10285_v49 = vld [vmem:[#allocation50_spill] sm:$0xff]  ;;  %v7353_v15 = vsel %vm2231_vm15, 1e+30, %v10286_v6 }
 0x53a   : > { %v7319_v56 = vpop.xlane.xlu0 %2303  ;;  %v2021_v1 = vmax.f32 %v10285_v49, 1e-16  ;;  %10287 = vst [vmem:[#allocation50_spill] sm:$0xff] %v7353_v15  ;;  %v1835_v19 = vshll.u32 %v1834_v5, 16  ;;  %v1736_v5 = vcvt.f32.s32 %v7170_v52  ;;  %vm1989_vm6 = vcmp.lt.f32.partialorder %v10285_v49, 1e+30 }
 0x53b   : > { %10278 = vst [vmem:[#allocation98_spill] sm:$0xff] %v7319_v56  ;;  %vm2354_vm12 = vcmp.eq.f32.partialorder %v10279_v31, %v7319_v56  ;;  %vm1912_vm0 = vcmp.eq.s32.totalorder %v6120_v60, %v1724_v22  ;;  %v10291_v22 = vld [vmem:[#allocation62_spill] sm:$0xff] }
 0x53c   : > { %v7328_v10 = vsel %vm2354_vm12, %v6120_v60, 128  ;;  %v7361_v34 = vsel %vm1912_vm0, 1.0, %v10149_v44  ;;  %v2026_v30 = vmax.f32 %v10291_v22, 1e-16  ;;  %5267 = vrcp.f32 %v2021_v1 }
 0x53d   : > { %2327 = vmin.xlane.f32.xlu2 %v7325_v59  ;;  %v2588_v25 = vshra.s32 %v7328_v10, 16  ;;  %10290 = vst [vmem:[#allocation27_spill] sm:$0xff] %v7361_v34  ;;  %vm2232_vm2 = vcmp.gt.f32.partialorder %v7361_v34, 0.0  ;;  %5269 = vrcp.f32 %v2024_v57  ;;  %v1737_v52 = vshll.u32 %v1736_v5, 16 }
 0x53e   : > { %v7332_v38 = vpop.xlane.xlu1 %2301  ;;  %5271 = vrcp.f32 %v2026_v30  ;;  %vm1994_vm9 = vcmp.lt.f32.partialorder %v10291_v22, 1e+30 }
 0x53f   : > { %10282 = vst [vmem:[#allocation99_spill] sm:$0xff] %v7332_v38  ;;  %vm2353_vm14 = vcmp.eq.f32.partialorder %v10284_v35, %v7332_v38  ;;  %v7339_v63 = vcvt.s32.f32 %v2588_v25  ;;  %v2517_v25 = vand.u32 65535, %v7150_v8  ;;  %v2022_v8 = vmax.f32 %v10292_v46, 1e-16 }
 0x540   : > { %v7342_v32 = vsel %vm2353_vm14, %v6120_v60, 128  ;;  %v1821_v38 = vshll.u32 %v1820_v43, 16 }
 0x541   : > { %2591 = vmin.xlane.f32.xlu0 %v7339_v63  ;;  %v2574_v21 = vshra.s32 %v7342_v32, 16  ;;  %v2519_v3 = vcvt.s32.f32 %v2517_v25  ;;  %5273 = vrcp.f32 %v2022_v8 }
 0x542   : > { %v1818_v41 = vpop.xlane.xlu0 %1817 }
 0x543   : > { %v7348_v50 = vcvt.s32.f32 %v2574_v21  ;;  %v1819_v35 = vcvt.f32.s32 %v1818_v41  ;;  %v10293_v41 = vld [vmem:[#allocation25_spill] sm:$0xff] }
 0x544   : > { %v7374_v25 = vsel %vm2232_vm2, 1e+30, %v10293_v41 }
 0x545   : > { %2313 = vmin.xlane.f32.xlu2 %v7353_v15  ;;  %2577 = vmin.xlane.f32.xlu1 %v7348_v50  ;;  %v1822_v1 = vadd.s32 %v1821_v38, %v1819_v35  ;;  %10294 = vst [vmem:[#allocation90_spill] sm:$0xff] %v7374_v25  ;;  %v10298_v38 = vld [vmem:[#allocation44_spill] sm:$0xff] }
 0x546   : > { %v1832_v21 = vpop.xlane.xlu2 %1831  ;;  %v2982_v35 = vmax.f32 %v10298_v38, 1e-16  ;;  %vm2950_vm2 = vcmp.lt.f32.partialorder %v10298_v38, 1e+30 }
 0x547   : > { %v1833_v6 = vcvt.f32.s32 %v1832_v21  ;;  %vm1919_vm5 = vcmp.eq.s32.totalorder %v6120_v60, %v1822_v1 }
 0x548   : > { %v7365_v31 = vpop.xlane.xlu1 %2521  ;;  %v7395_v49 = vsel %vm1919_vm5, 1.0, %v10149_v44 }
 0x549   : > { %v1836_v56 = vadd.s32 %v1835_v19, %v1833_v6  ;;  %vm2523_vm1 = vcmp.eq.f32.partialorder %v7155_v2, %v7365_v31  ;;  %v5268_v2 = vpop.eup %5267  ;;  %v10295_v19 = vld [vmem:[#allocation58_spill] sm:$0xff]  ;;  %10301 = vst [vmem:[#allocation25_spill] sm:$0xff] %v7395_v49  ;;  %vm2239_vm12 = vcmp.gt.f32.partialorder %v7395_v49, 0.0 }
 0x54a   : > { %v2524_v7 = vsel %vm2523_vm1, %v2519_v3, inf  ;;  %v2023_v43 = vmax.f32 %v10295_v19, 1e-16  ;;  %v7388_v41 = vsel %vm1989_vm6, %v5268_v2, 0.0 }
 0x54b   : > { %2525 = vmin.xlane.f32.xlu0 %v2524_v7  ;;  %vm1920_vm3 = vcmp.eq.s32.totalorder %v6120_v60, %v1836_v56  ;;  %v5270_v56 = vpop.eup %5269  ;;  %10299 = vst [vmem:[#allocation65_spill] sm:$0xff] %v7388_v41 }
 0x54c   : > { %v7381_v30 = vsel %vm1920_vm3, 1.0, %v10149_v44  ;;  %v5272_v3 = vpop.eup %5271  ;;  %5275 = vrcp.f32 %v2023_v43  ;;  %v7400_v45 = vsel %vm1992_vm8, %v5270_v56, 0.0  ;;  %v10305_v43 = vld [vmem:[#allocation36_spill] sm:$0xff] }
 0x54d   : > { %2315 = vmin.xlane.f32.xlu1 %v7374_v25  ;;  %10297 = vst [vmem:[#allocation62_spill] sm:$0xff] %v7381_v30  ;;  %vm2240_vm7 = vcmp.gt.f32.partialorder %v7381_v30, 0.0  ;;  %v5274_v1 = vpop.eup %5273  ;;  %5277 = vrcp.f32 %v2982_v35 }
 0x54e   : > { %v7378_v57 = vpop.xlane.xlu0 %2535  ;;  %v1734_v21 = vpop.xlane.xlu2 %1733  ;;  %10303 = vst [vmem:[#allocation58_spill] sm:$0xff] %v7400_v45  ;;  %v7405_v27 = vsel %vm2240_vm7, 1e+30, %v10305_v43  ;;  %v7411_v22 = vsel %vm1990_vm11, %v5274_v1, 0.0  ;;  %v10313_v43 = vld [vmem:[#allocation47_spill] sm:$0xff] }
 0x54f   : > { %10296 = vst [vmem:[#allocation60_spill] sm:$0xff] %v7378_v57  ;;  %v1735_v7 = vcvt.f32.s32 %v1734_v21  ;;  %vm2537_vm4 = vcmp.eq.f32.partialorder %v7173_v26, %v7378_v57  ;;  %v10300_v26 = vld [vmem:[#allocation67_spill] sm:$0xff]  ;;  %v10302_v21 = vld [vmem:[#allocation52_spill] sm:$0xff]  ;;  %v7429_v30 = vsel %vm2239_vm12, 1e+30, %v10313_v43  ;;  %v2416_v43 = vcvt.f32.s32 %v7081_v48 }
 0x550   : > { %v1748_v6 = vpop.xlane.xlu1 %1747  ;;  %v2538_v8 = vsel %vm2537_vm4, %v2533_v36, inf  ;;  %v2025_v5 = vmax.f32 %v10300_v26, 1e-16  ;;  %v2981_v2 = vmax.f32 %v10302_v21, 1e-16  ;;  %10306 = vst [vmem:[#allocation67_spill] sm:$0xff] %v7405_v27 }
 0x551   : > { %v1738_v34 = vadd.s32 %v1737_v52, %v1735_v7  ;;  %2539 = vmin.xlane.f32.xlu2 %v2538_v8  ;;  %v1749_v36 = vcvt.f32.s32 %v1748_v6  ;;  %v7402_v52 = vsel %vm1994_vm9, %v5272_v3, 0.0  ;;  %v2430_v7 = vcvt.f32.s32 %v7099_v16  ;;  %10307 = vst [vmem:[#allocation52_spill] sm:$0xff] %v7411_v22 }
 0x552   : > { %10304 = vst [vmem:[#allocation44_spill] sm:$0xff] %v7402_v52  ;;  %v1751_v8 = vshll.u32 %v1750_v37, 16  ;;  %5279 = vrcp.f32 %v2025_v5  ;;  %v7425_v16 = vpop.eup %5275  ;;  %v10312_v37 = vld [vmem:[#allocation15_spill] sm:$0xff]  ;;  %vm2949_vm0 = vcmp.lt.f32.partialorder %v10302_v21, 1e+30  ;;  %v2417_v38 = vshll.u32 %v2416_v43, 16 }
 0x553   : > { %vm1913_vm10 = vcmp.eq.s32.totalorder %v6120_v60, %v1738_v34  ;;  %v10308_v34 = vld [vmem:[#allocation19_spill] sm:$0xff]  ;;  %5281 = vrcp.f32 %v2981_v2  ;;  %v2984_v5 = vmax.f32 %v10312_v37, 1e-16  ;;  %10314 = vst [vmem:[#allocation15_spill] sm:$0xff] %v7429_v30  ;;  %vm2952_vm5 = vcmp.lt.f32.partialorder %v10312_v37, 1e+30 }
 0x554   : > { %v2986_v56 = vmax.f32 %v10308_v34, 1e-16  ;;  %v7419_v3 = vsel %vm1913_vm10, 1.0, %v10149_v44  ;;  %v1752_v46 = vadd.s32 %v1751_v8, %v1749_v36  ;;  %v2431_v36 = vshll.u32 %v2430_v7, 16 }
 0x555   : > { %2331 = vmin.xlane.f32.xlu1 %v7405_v27  ;;  %10311 = vst [vmem:[#allocation101_spill] sm:$0xff] %v7419_v3  ;;  %vm2233_vm15 = vcmp.gt.f32.partialorder %v7419_v3, 0.0  ;;  %v10318_v3 = vld [vmem:[#allocation29_spill] sm:$0xff]  ;;  %vm2954_vm6 = vcmp.lt.f32.partialorder %v10308_v34, 1e+30 }
 0x556   : > { %v7414_v6 = vpop.xlane.xlu0 %2305  ;;  %v7416_v35 = vpop.xlane.xlu2 %2307  ;;  %5283 = vrcp.f32 %v2986_v56  ;;  %vm1914_vm1 = vcmp.eq.s32.totalorder %v6120_v60, %v1752_v46  ;;  %v2983_v27 = vmax.f32 %v10318_v3, 1e-16  ;;  %v10319_v56 = vld [vmem:[#allocation14_spill] sm:$0xff]  ;;  %vm1991_vm10 = vcmp.lt.f32.partialorder %v10295_v19, 1e+30 }
 0x557   : > { %10309 = vst [vmem:[#allocation36_spill] sm:$0xff] %v7414_v6  ;;  %vm2355_vm13 = vcmp.eq.f32.partialorder %v7193_v18, %v7414_v6  ;;  %vm2356_vm14 = vcmp.eq.f32.partialorder %v7196_v17, %v7416_v35  ;;  %v5278_v17 = vpop.eup %5277  ;;  %v2486_v6 = vcvt.f32.s32 %v7200_v13  ;;  %v7453_v23 = vsel %vm2233_vm15, 1e+30, %v10319_v56  ;;  %v10321_v13 = vld [vmem:[#allocation38_spill] sm:$0xff] }
 0x558   : > { %10310 = vst [vmem:[#allocation19_spill] sm:$0xff] %v7416_v35  ;;  %v2428_v1 = vpop.xlane.xlu1 %2427  ;;  %v7432_v49 = vsel %vm2355_vm13, %v6120_v60, 128  ;;  %v7435_v2 = vsel %vm2356_vm14, %v6120_v60, 128  ;;  %5285 = vrcp.f32 %v2984_v5  ;;  %vm1993_vm11 = vcmp.lt.f32.partialorder %v10300_v26, 1e+30  ;;  %v10340_v19 = vld [vmem:[#allocation42_spill] sm:$0xff] }
 0x559   : > { %10315 = vst [vmem:[#allocation47_spill] sm:$0xff] %v7432_v49  ;;  %v2429_v8 = vcvt.f32.s32 %v2428_v1  ;;  %2329 = vmin.xlane.f32.xlu2 %v7429_v30  ;;  %v2602_v18 = vshra.s32 %v7432_v49, 16  ;;  %v2616_v7 = vshra.s32 %v7435_v2, 16  ;;  %v7447_v1 = vpop.eup %5279  ;;  %v2458_v49 = vcvt.f32.s32 %v7121_v51 }
 0x55a   : > { %10316 = vst [vmem:[#allocation102_spill] sm:$0xff] %v7435_v2  ;;  %v5282_v48 = vpop.eup %5281  ;;  %v7464_v51 = vsel %vm1914_vm1, 1.0, %v10149_v44  ;;  %5287 = vrcp.f32 %v2983_v27  ;;  %v2444_v27 = vcvt.f32.s32 %v7106_v0  ;;  %vm2951_vm12 = vcmp.lt.f32.partialorder %v10318_v3, 1e+30 }
 0x55b   : > { %v2432_v35 = vadd.s32 %v2431_v36, %v2429_v8  ;;  %v7443_v20 = vcvt.s32.f32 %v2602_v18  ;;  %10320 = vst [vmem:[#allocation29_spill] sm:$0xff] %v7453_v23  ;;  %v2985_v18 = vmax.f32 %v10321_v13, 1e-16  ;;  %v7459_v36 = vsel %vm2950_vm2, %v5278_v17, 0.0 }
 0x55c   : > { %10322 = vst [vmem:[#allocation14_spill] sm:$0xff] %v7459_v36  ;;  %v2487_v8 = vshll.u32 %v2486_v6, 16  ;;  %v7469_v25 = vcvt.s32.f32 %v2616_v7  ;;  %v10324_v6 = vld [vmem:[#allocation12_spill] sm:$0xff]  ;;  %v7477_v46 = vsel %vm2949_vm0, %v5282_v48, 0.0  ;;  %vm2234_vm4 = vcmp.gt.f32.partialorder %v7464_v51, 0.0 }
 0x55d   : > { %10317 = vst [vmem:[#allocation103_spill] sm:$0xff] %v7443_v20  ;;  %2605 = vmin.xlane.f32.xlu0 %v7443_v20  ;;  %2317 = vmin.xlane.f32.xlu1 %v7453_v23  ;;  %vm2854_vm3 = vcmp.eq.s32.totalorder %v6120_v60, %v2432_v35  ;;  %v5284_v35 = vpop.eup %5283  ;;  %v2118_v43 = vmul.f32 %v10324_v6, %v7411_v22  ;;  %v2459_v23 = vshll.u32 %v2458_v49, 16  ;;  %5289 = vrcp.f32 %v2985_v18  ;;  %v10333_v6 = vld [vmem:[#allocation41_spill] sm:$0xff] }
 0x55e   : > { %v2484_v12 = vpop.xlane.xlu0 %2483  ;;  %v2414_v2 = vpop.xlane.xlu2 %2413  ;;  %10323 = vst [vmem:[#allocation38_spill] sm:$0xff] %v7464_v51  ;;  %v7467_v5 = vsel %vm2854_vm3, 1.0, %v10149_v44  ;;  %v7497_v34 = vsel %vm2954_vm6, %v5284_v35, 0.0  ;;  %v2472_v18 = vcvt.f32.s32 %v7204_v42  ;;  %vm2953_vm14 = vcmp.lt.f32.partialorder %v10321_v13, 1e+30 }
 0x55f   : > { %v2485_v56 = vcvt.f32.s32 %v2484_v12  ;;  %v2415_v20 = vcvt.f32.s32 %v2414_v2  ;;  %v3078_v17 = vmul.f32 %v7467_v5, %v7459_v36  ;;  %10325 = vst [vmem:[#allocation12_spill] sm:$0xff] %v7477_v46  ;;  %v5286_v49 = vpop.eup %5285 }
 0x560   : > { %v2456_v30 = vpop.xlane.xlu1 %2455  ;;  %10329 = vst [vmem:[#allocation105_spill] sm:$0xff] %v7497_v34  ;;  %v7515_v35 = vsel %vm2952_vm5, %v5286_v49, 0.0 }
 0x561   : > { %v2488_v11 = vadd.s32 %v2487_v8, %v2485_v56  ;;  %v2418_v57 = vadd.s32 %v2417_v38, %v2415_v20  ;;  %v2457_v12 = vcvt.f32.s32 %v2456_v30  ;;  %2619 = vmin.xlane.f32.xlu2 %v7469_v25  ;;  %v7483_v2 = vadd.f32 %v3078_v17, %v2118_v43  ;;  %v10327_v20 = vld [vmem:[#allocation51_spill] sm:$0xff]  ;;  %v10331_v8 = vld [vmem:[#allocation20_spill] sm:$0xff] }
 0x562   : > { %v7489_v30 = vsel %vm2234_vm4, 1e+30, %v10327_v20  ;;  %v2122_v56 = vmul.f32 %v10331_v8, %v7402_v52  ;;  %v2120_v43 = vmul.f32 %v10333_v6, %v7400_v45  ;;  %v2473_v52 = vshll.u32 %v2472_v18, 16 }
 0x563   : > { %10326 = vst [vmem:[#allocation104_spill] sm:$0xff] %v7483_v2  ;;  %v2460_v21 = vadd.s32 %v2459_v23, %v2457_v12  ;;  %vm2853_vm7 = vcmp.eq.s32.totalorder %v6120_v60, %v2418_v57  ;;  %vm2858_vm8 = vcmp.eq.s32.totalorder %v6120_v60, %v2488_v11  ;;  %v5288_v11 = vpop.eup %5287  ;;  %v10330_v57 = vld [vmem:[#allocation2_spill] sm:$0xff]  ;;  %v2445_v12 = vshll.u32 %v2444_v27, 16 }
 0x564   : > { %10328 = vst [vmem:[#allocation51_spill] sm:$0xff] %v7489_v30  ;;  %v7492_v7 = vsel %vm2853_vm7, 1.0, %v10149_v44  ;;  %v7495_v48 = vsel %vm2858_vm8, 1.0, %v10149_v44  ;;  %v2117_v38 = vmul.f32 %v10330_v57, %v7388_v41  ;;  %v5290_v57 = vpop.eup %5289  ;;  %v2545_v27 = vand.u32 65535, %v7227_v14 }
 0x565   : > { %2319 = vmin.xlane.f32.xlu0 %v7489_v30  ;;  %vm2856_vm9 = vcmp.eq.s32.totalorder %v6120_v60, %v2460_v21  ;;  %v3077_v0 = vmul.f32 %v7492_v7, %v7477_v46  ;;  %v3082_v23 = vmul.f32 %v7495_v48, %v7497_v34  ;;  %10332 = vst [vmem:[#allocation2_spill] sm:$0xff] %v7515_v35  ;;  %v7536_v18 = vsel %vm1993_vm11, %v7447_v1, 0.0 }
 0x566   : > { %v2442_v17 = vpop.xlane.xlu2 %2441  ;;  %v7511_v42 = vsel %vm2856_vm9, 1.0, %v10149_v44  ;;  %10338 = vst [vmem:[#allocation108_spill] sm:$0xff] %v7536_v18  ;;  %v7554_v1 = vsel %vm2953_vm14, %v5290_v57, 0.0 }
 0x567   : > { %v2443_v21 = vcvt.f32.s32 %v2442_v17  ;;  %v3080_v20 = vmul.f32 %v7511_v42, %v7515_v35  ;;  %v7521_v46 = vadd.f32 %v3077_v0, %v2117_v38  ;;  %v7523_v8 = vadd.f32 %v3082_v23, %v2122_v56  ;;  %10342 = vst [vmem:[#allocation42_spill] sm:$0xff] %v7554_v1  ;;  %v10359_v35 = vld [vmem:[#allocation57_spill] sm:$0xff] }
 0x568   : > { %v2470_v34 = vpop.xlane.xlu1 %2469  ;;  %v7533_v0 = vsel %vm1991_vm10, %v7425_v16, 0.0  ;;  %v7541_v23 = vsel %vm2951_vm12, %v5288_v11, 0.0  ;;  %v2547_v38 = vcvt.s32.f32 %v2545_v27 }
 0x569   : > { %10334 = vst [vmem:[#allocation20_spill] sm:$0xff] %v7521_v46  ;;  %v2446_v41 = vadd.s32 %v2445_v12, %v2443_v21  ;;  %v2471_v36 = vcvt.f32.s32 %v2470_v34  ;;  %v7525_v37 = vadd.f32 %v3080_v20, %v2120_v43  ;;  %v2119_v26 = vmul.f32 %v10340_v19, %v7533_v0 }
 0x56a   : > { %10335 = vst [vmem:[#allocation41_spill] sm:$0xff] %v7523_v8  ;;  %v2559_v21 = vand.u32 65535, %v7242_v4  ;;  %v1862_v20 = vcvt.f32.s32 %v7247_v40 }
 0x56b   : > { %10336 = vst [vmem:[#allocation106_spill] sm:$0xff] %v7525_v37  ;;  %v2474_v49 = vadd.s32 %v2473_v52, %v2471_v36  ;;  %vm2855_vm13 = vcmp.eq.s32.totalorder %v6120_v60, %v2446_v41  ;;  %v10341_v41 = vld [vmem:[#allocation3_spill] sm:$0xff]  ;;  %v1848_v36 = vcvt.f32.s32 %v7224_v9 }
 0x56c   : > { %10337 = vst [vmem:[#allocation107_spill] sm:$0xff] %v7533_v0  ;;  %v7539_v34 = vsel %vm2855_vm13, 1.0, %v10149_v44  ;;  %v2121_v52 = vmul.f32 %v10341_v41, %v7536_v18 }
 0x56d   : > { %10339 = vst [vmem:[#allocation109_spill] sm:$0xff] %v7541_v23  ;;  %vm2857_vm15 = vcmp.eq.s32.totalorder %v6120_v60, %v2474_v49  ;;  %v3079_v14 = vmul.f32 %v7539_v34, %v7541_v23  ;;  %v1849_v12 = vshll.u32 %v1848_v36, 16  ;;  %v2561_v49 = vcvt.s32.f32 %v2559_v21 }
 0x56e   : > { %v1846_v3 = vpop.xlane.xlu2 %1845  ;;  %v7552_v16 = vsel %vm2857_vm15, 1.0, %v10149_v44  ;;  %v7557_v11 = vpop.xlane.xlu0 %2549 }
 0x56f   : > { %v3081_v13 = vmul.f32 %v7552_v16, %v7554_v1  ;;  %v7561_v56 = vadd.f32 %v3079_v14, %v2119_v26  ;;  %vm2551_vm0 = vcmp.eq.f32.partialorder %v7233_v39, %v7557_v11  ;;  %v1847_v17 = vcvt.f32.s32 %v1846_v3 }
 0x570   : > { %v2552_v6 = vsel %vm2551_vm0, %v2547_v38, inf  ;;  %v1863_v39 = vshll.u32 %v1862_v20, 16  ;;  %v1778_v14 = vcvt.f32.s32 %v7255_v62  ;;  %v1764_v3 = vcvt.f32.s32 %v7265_v33  ;;  %v10347_v62 = vld [vmem:[#allocation71_spill] sm:$0xff]  ;;  %v10348_v33 = vld [vmem:[#allocation24_spill] sm:$0xff]  ;;  %v10350_v20 = vld [vmem:[#allocation49_spill] sm:$0xff] }
 0x571   : > { %10343 = vst [vmem:[#allocation3_spill] sm:$0xff] %v7561_v56  ;;  %v7565_v43 = vadd.f32 %v3081_v13, %v2121_v52  ;;  %2553 = vmin.xlane.f32.xlu2 %v2552_v6  ;;  %v1850_v9 = vadd.s32 %v1849_v12, %v1847_v17  ;;  %v2028_v13 = vmax.f32 %v10347_v62, 1e-16  ;;  %vm1996_vm13 = vcmp.lt.f32.partialorder %v10347_v62, 1e+30 }
 0x572   : > { %v1779_v36 = vshll.u32 %v1778_v14, 16  ;;  %v1765_v21 = vshll.u32 %v1764_v3, 16  ;;  %v10353_v14 = vld [vmem:[#allocation69_spill] sm:$0xff] }
 0x573   : > { %10344 = vst [vmem:[#allocation110_spill] sm:$0xff] %v7565_v43  ;;  %vm1921_vm2 = vcmp.eq.s32.totalorder %v6120_v60, %v1850_v9  ;;  %5291 = vrcp.f32 %v2028_v13  ;;  %vm1995_vm15 = vcmp.lt.f32.partialorder %v10353_v14, 1e+30 }
 0x574   : > { %v7576_v52 = vsel %vm1921_vm2, 1.0, %v10149_v44 }
 0x575   : > { %10345 = vst [vmem:[#allocation111_spill] sm:$0xff] %v7576_v52  ;;  %vm2241_vm4 = vcmp.gt.f32.partialorder %v7576_v52, 0.0 }
 0x578   : > { %v7569_v57 = vpop.xlane.xlu2 %2563  ;;  %v1860_v27 = vpop.xlane.xlu1 %1859 }
 0x579   : > { %vm2565_vm1 = vcmp.eq.f32.partialorder %v7249_v28, %v7569_v57  ;;  %v1861_v19 = vcvt.f32.s32 %v1860_v27 }
 0x57a   : > { %v2566_v26 = vsel %vm2565_vm1, %v2561_v49, inf  ;;  %v7595_v49 = vsel %vm2241_vm4, 1e+30, %v10350_v20  ;;  %vm3176_vm4 = vcmp.gt.f32.partialorder %v7511_v42, 0.0  ;;  %v2587_v42 = vand.u32 65535, %v7328_v10 }
 0x57b   : > { %2567 = vmin.xlane.f32.xlu1 %v2566_v26  ;;  %v1864_v41 = vadd.s32 %v1863_v39, %v1861_v19  ;;  %10351 = vst [vmem:[#allocation24_spill] sm:$0xff] %v7595_v49  ;;  %v10352_v39 = vld [vmem:[#allocation82_spill] sm:$0xff] }
 0x57c   : > { %v1776_v4 = vpop.xlane.xlu0 %1775  ;;  %v2987_v19 = vmax.f32 %v10352_v39, 1e-16  ;;  %vm2955_vm14 = vcmp.lt.f32.partialorder %v10352_v39, 1e+30 }
 0x57d   : > { %v1777_v40 = vcvt.f32.s32 %v1776_v4  ;;  %vm1922_vm3 = vcmp.eq.s32.totalorder %v6120_v60, %v1864_v41  ;;  %v2027_v41 = vmax.f32 %v10353_v14, 1e-16  ;;  %v10365_v14 = vld [vmem:[#allocation68_spill] sm:$0xff] }
 0x57e   : > { %v7581_v28 = vsel %vm1922_vm3, 1.0, %v10149_v44  ;;  %5293 = vrcp.f32 %v2987_v19  ;;  %vm3174_vm3 = vcmp.gt.f32.partialorder %v7467_v5, 0.0 }
 0x57f   : > { %10346 = vst [vmem:[#allocation112_spill] sm:$0xff] %v7581_v28  ;;  %vm2242_vm5 = vcmp.gt.f32.partialorder %v7581_v28, 0.0  ;;  %v1780_v17 = vadd.s32 %v1779_v36, %v1777_v40  ;;  %v10354_v40 = vld [vmem:[#allocation83_spill] sm:$0xff]  ;;  %5295 = vrcp.f32 %v2027_v41 }
 0x580   : > { %v7584_v38 = vpop.xlane.xlu2 %2309  ;;  %v1762_v6 = vpop.xlane.xlu1 %1761  ;;  %v7591_v12 = vsel %vm2242_vm5, 1e+30, %v10348_v33  ;;  %v2988_v3 = vmax.f32 %v10354_v40, 1e-16  ;;  %vm2956_vm0 = vcmp.lt.f32.partialorder %v10354_v40, 1e+30 }
 0x581   : > { %vm2357_vm6 = vcmp.eq.f32.partialorder %v7270_v24, %v7584_v38  ;;  %10349 = vst [vmem:[#allocation71_spill] sm:$0xff] %v7591_v12  ;;  %v1763_v9 = vcvt.f32.s32 %v1762_v6  ;;  %2335 = vmin.xlane.f32.xlu0 %v7591_v12  ;;  %vm1916_vm7 = vcmp.eq.s32.totalorder %v6120_v60, %v1780_v17  ;;  %v2500_v6 = vcvt.f32.s32 %v7280_v54  ;;  %v10366_v40 = vld [vmem:[#allocation9_spill] sm:$0xff] }
 0x582   : > { %v7598_v27 = vsel %vm2357_vm6, %v6120_v60, 128  ;;  %5297 = vrcp.f32 %v2988_v3  ;;  %v2514_v17 = vcvt.f32.s32 %v7289_v47  ;;  %vm3177_vm5 = vcmp.gt.f32.partialorder %v7552_v16, 0.0 }
 0x583   : > { %2333 = vmin.xlane.f32.xlu1 %v7595_v49  ;;  %v2630_v26 = vshra.s32 %v7598_v27, 16  ;;  %v1766_v4 = vadd.s32 %v1765_v21, %v1763_v9  ;;  %v7616_v21 = vsel %vm1916_vm7, 1.0, %v10149_v44  ;;  %v10357_v9 = vld [vmem:[#allocation43_spill] sm:$0xff]  ;;  %v2501_v19 = vshll.u32 %v2500_v6, 16 }
 0x584   : > { %10356 = vst [vmem:[#allocation82_spill] sm:$0xff] %v7616_v21  ;;  %vm2236_vm11 = vcmp.gt.f32.partialorder %v7616_v21, 0.0  ;;  %v2573_v16 = vand.u32 65535, %v7342_v32  ;;  %v2528_v32 = vcvt.f32.s32 %v7365_v31  ;;  %v10376_v31 = vld [vmem:[#allocation72_spill] sm:$0xff] }
 0x585   : > { %v7605_v36 = vcvt.s32.f32 %v2630_v26  ;;  %vm1915_vm8 = vcmp.eq.s32.totalorder %v6120_v60, %v1766_v4  ;;  %v5292_v4 = vpop.eup %5291 }
 0x586   : > { %v7612_v33 = vsel %vm1915_vm8, 1.0, %v10149_v44  ;;  %v5294_v18 = vpop.eup %5293 }
 0x587   : > { %2633 = vmin.xlane.f32.xlu2 %v7605_v36  ;;  %10355 = vst [vmem:[#allocation49_spill] sm:$0xff] %v7612_v33  ;;  %vm2235_vm9 = vcmp.gt.f32.partialorder %v7612_v33, 0.0  ;;  %v5296_v6 = vpop.eup %5295 }
 0x588   : > { %v7619_v13 = vpop.xlane.xlu1 %2311  ;;  %v2498_v54 = vpop.xlane.xlu0 %2497  ;;  %v7622_v20 = vsel %vm2235_vm9, 1e+30, %v10357_v9  ;;  %v2515_v9 = vshll.u32 %v2514_v17, 16  ;;  %v7644_v17 = vsel %vm1996_vm13, %v5292_v4, 0.0  ;;  %v7656_v62 = vsel %vm1995_vm15, %v5296_v6, 0.0 }
 0x589   : > { %10358 = vst [vmem:[#allocation69_spill] sm:$0xff] %v7622_v20  ;;  %vm2358_vm10 = vcmp.eq.f32.partialorder %v7286_v29, %v7619_v13  ;;  %v2499_v26 = vcvt.f32.s32 %v2498_v54  ;;  %2321 = vmin.xlane.f32.xlu0 %v7622_v20  ;;  %v7635_v54 = vsel %vm2236_vm11, 1e+30, %v10359_v35  ;;  %v5298_v45 = vpop.eup %5297  ;;  %v2123_v4 = vmul.f32 %v10365_v14, %v7656_v62 }
 0x58a   : > { %v7628_v41 = vsel %vm2358_vm10, %v6120_v60, 128  ;;  %10360 = vst [vmem:[#allocation83_spill] sm:$0xff] %v7635_v54  ;;  %vm3173_vm11 = vcmp.gt.f32.partialorder %v7492_v7, 0.0  ;;  %v2529_v7 = vshll.u32 %v2528_v32, 16  ;;  %vm2957_vm13 = vcmp.lt.f32.partialorder %v7142_v53, 1e+30 }
 0x58b   : > { %v2502_v47 = vadd.s32 %v2501_v19, %v2499_v26  ;;  %v2644_v1 = vshra.s32 %v7628_v41, 16  ;;  %10361 = vst [vmem:[#allocation43_spill] sm:$0xff] %v7644_v17 }
 0x58c   : > { %v2512_v3 = vpop.xlane.xlu2 %2511  ;;  %10363 = vst [vmem:[#allocation113_spill] sm:$0xff] %v7656_v62 }
 0x58d   : > { %v2513_v23 = vcvt.f32.s32 %v2512_v3  ;;  %v7632_v0 = vcvt.s32.f32 %v2644_v1  ;;  %vm2859_vm12 = vcmp.eq.s32.totalorder %v6120_v60, %v2502_v47  ;;  %v7647_v1 = vsel %vm2955_vm14, %v5294_v18, 0.0 }
 0x58e   : > { %v7642_v26 = vsel %vm2859_vm12, 1.0, %v10149_v44  ;;  %10362 = vst [vmem:[#allocation57_spill] sm:$0xff] %v7647_v1  ;;  %v7661_v18 = vsel %vm2956_vm0, %v5298_v45, 0.0  ;;  %v2124_v47 = vmul.f32 %v10366_v40, %v7644_v17  ;;  %v10369_v45 = vld [vmem:[#allocation74_spill] sm:$0xff]  ;;  %v10370_v40 = vld [vmem:[#allocation55_spill] sm:$0xff]  ;;  %vm3175_vm14 = vcmp.gt.f32.partialorder %v7539_v34, 0.0 }
 0x58f   : > { %v2516_v19 = vadd.s32 %v2515_v9, %v2513_v23  ;;  %2323 = vmin.xlane.f32.xlu2 %v7635_v54  ;;  %2647 = vmin.xlane.f32.xlu1 %v7632_v0  ;;  %v3083_v23 = vmul.f32 %v7642_v26, %v7647_v1  ;;  %10364 = vst [vmem:[#allocation114_spill] sm:$0xff] %v7661_v18  ;;  %v7681_v14 = vsel %vm3174_vm3, 1e+30, %v10369_v45  ;;  %v7686_v62 = vsel %vm3176_vm4, 1e+30, %v10370_v40  ;;  %v10373_v40 = vld [vmem:[#allocation33_spill] sm:$0xff] }
 0x590   : > { %v7651_v35 = vpop.xlane.xlu0 %2325  ;;  %v2589_v45 = vcvt.s32.f32 %v2587_v42  ;;  %vm1997_vm12 = vcmp.lt.f32.partialorder %v10373_v40, 1e+30  ;;  %vm3178_vm0 = vcmp.gt.f32.partialorder %v7495_v48, 0.0  ;;  %vm1998_vm3 = vcmp.lt.f32.partialorder %v10376_v31, 1e+30  ;;  %v10388_v48 = vld [vmem:[#allocation53_spill] sm:$0xff] }
 0x591   : > { %vm2860_vm1 = vcmp.eq.s32.totalorder %v6120_v60, %v2516_v19  ;;  %vm2365_vm2 = vcmp.eq.f32.partialorder %v7298_v61, %v7651_v35  ;;  %v7672_v19 = vadd.f32 %v3083_v23, %v2123_v4  ;;  %v10371_v4 = vld [vmem:[#allocation37_spill] sm:$0xff] }
 0x592   : > { %v5016_v39 = vsel %vm2860_vm1, 1.0, %v10149_v44  ;;  %v7668_v3 = vsel %vm2365_vm2, %v6120_v60, 128  ;;  %vm2958_vm1 = vcmp.lt.f32.partialorder %v7157_v58, 1e+30 }
 0x593   : > { %v3084_v9 = vmul.f32 %v5016_v39, %v7661_v18  ;;  %v2742_v6 = vshra.s32 %v7668_v3, 16  ;;  %10367 = vst [vmem:[#allocation68_spill] sm:$0xff] %v7672_v19  ;;  %vm3180_vm6 = vcmp.gt.f32.partialorder %v5016_v39, 0.0  ;;  %v2029_v18 = vmax.f32 %v10373_v40, 1e-16 }
 0x595   : > { %v7674_v1 = vadd.f32 %v3084_v9, %v2124_v47  ;;  %v7676_v22 = vcvt.s32.f32 %v2742_v6  ;;  %v7693_v47 = vsel %vm3177_vm5, 1e+30, %v10371_v4  ;;  %v2989_v4 = vmax.f32 %v7142_v53, 1e-16 }
 0x596   : > { %5299 = vrcp.f32 %v2029_v18  ;;  %vm3179_vm5 = vcmp.gt.f32.partialorder %v7642_v26, 0.0 }
 0x597   : > { %10368 = vst [vmem:[#allocation9_spill] sm:$0xff] %v7674_v1  ;;  %2745 = vmin.xlane.f32.xlu0 %v7676_v22  ;;  %v10374_v1 = vld [vmem:[#allocation61_spill] sm:$0xff]  ;;  %5301 = vrcp.f32 %v2989_v4  ;;  %v2030_v4 = vmax.f32 %v10376_v31, 1e-16 }
 0x598   : > { %v7709_v19 = vsel %vm3180_vm6, 1e+30, %v10374_v1 }
 0x59c   : > { %v5300_v8 = vpop.eup %5299 }
 0x59d   : > { %v5302_v46 = vpop.eup %5301 }
 0x59f   : > { %3239 = vmin.xlane.f32.xlu0 %v7681_v14 }
 0x5a7   : > { %3243 = vmin.xlane.f32.xlu0 %v7686_v62 }
 0x5a8   : > { %v7689_v23 = vpop.xlane.xlu2 %1873 }
 0x5a9   : > { %v1875_v33 = vcvt.f32.s32 %v7689_v23  ;;  %v7759_v23 = vsel %vm2957_vm13, %v5302_v46, 0.0 }
 0x5aa   : > { %10382 = vst [vmem:[#allocation33_spill] sm:$0xff] %v7759_v23 }
 0x5ac   : > { %v7695_v5 = vpop.xlane.xlu1 %1887 }
 0x5ad   : > { %v1889_v53 = vcvt.f32.s32 %v7695_v5 }
 0x5af   : > { %3245 = vmin.xlane.f32.xlu0 %v7693_v47 }
 0x5b0   : > { %v7698_v9 = vpop.xlane.xlu2 %2327 }
 0x5b1   : > { %10372 = vst [vmem:[#allocation74_spill] sm:$0xff] %v7698_v9  ;;  %vm2366_vm8 = vcmp.eq.f32.partialorder %v7325_v59, %v7698_v9  ;;  %v2556_v59 = vcvt.f32.s32 %v7557_v11 }
 0x5b2   : > { %v7729_v18 = vsel %vm2366_vm8, %v6120_v60, 128 }
 0x5b4   : > { %v7701_v6 = vpop.xlane.xlu0 %2591 }
 0x5b5   : > { %vm2593_vm7 = vcmp.eq.f32.partialorder %v7339_v63, %v7701_v6  ;;  %v2575_v63 = vcvt.s32.f32 %v2573_v16 }
 0x5b6   : > { %v2594_v17 = vsel %vm2593_vm7, %v2589_v45, inf  ;;  %v2990_v45 = vmax.f32 %v7157_v58, 1e-16 }
 0x5b7   : > { %2595 = vmin.xlane.f32.xlu1 %v2594_v17  ;;  %3251 = vmin.xlane.f32.xlu0 %v7709_v19 }
 0x5b8   : > { %v7714_v10 = vpop.xlane.xlu1 %2577  ;;  %v7716_v39 = vpop.xlane.xlu2 %2313  ;;  %5303 = vrcp.f32 %v2990_v45 }
 0x5b9   : > { %10375 = vst [vmem:[#allocation55_spill] sm:$0xff] %v7716_v39  ;;  %vm2359_vm9 = vcmp.eq.f32.partialorder %v7353_v15, %v7716_v39  ;;  %vm2579_vm10 = vcmp.eq.f32.partialorder %v7348_v50, %v7714_v10  ;;  %v10377_v50 = vld [vmem:[#allocation16_spill] sm:$0xff]  ;;  %5305 = vrcp.f32 %v2030_v4  ;;  %v2570_v39 = vcvt.f32.s32 %v7569_v57 }
 0x5ba   : > { %v7724_v17 = vsel %vm2359_vm9, %v6120_v60, 128  ;;  %v2580_v1 = vsel %vm2579_vm10, %v2575_v63, inf  ;;  %v7736_v56 = vsel %vm3173_vm11, 1e+30, %v10377_v50  ;;  %v2756_v63 = vshra.s32 %v7729_v18, 16 }
 0x5bb   : > { %v2658_v42 = vshra.s32 %v7724_v17, 16  ;;  %2581 = vmin.xlane.f32.xlu2 %v2580_v1  ;;  %v1876_v1 = vcvt.f32.s32 %v7304_v55  ;;  %v7744_v50 = vsel %vm1997_vm12, %v5300_v8, 0.0  ;;  %v10381_v55 = vld [vmem:[#allocation46_spill] sm:$0xff] }
 0x5bc   : > { %10379 = vst [vmem:[#allocation37_spill] sm:$0xff] %v7744_v50  ;;  %v7747_v32 = vcvt.s32.f32 %v2756_v63  ;;  %v2125_v40 = vmul.f32 %v10381_v55, %v7744_v50 }
 0x5bd   : > { %v7732_v16 = vcvt.s32.f32 %v2658_v42  ;;  %v10378_v42 = vld [vmem:[#allocation60_spill] sm:$0xff]  ;;  %v1877_v45 = vshll.u32 %v1876_v1, 16 }
 0x5be   : > { %v2526_v43 = vpop.xlane.xlu0 %2525  ;;  %v2542_v2 = vcvt.f32.s32 %v10378_v42  ;;  %v5304_v1 = vpop.eup %5303 }
 0x5bf   : > { %v2527_v37 = vcvt.f32.s32 %v2526_v43  ;;  %3237 = vmin.xlane.f32.xlu1 %v7736_v56  ;;  %2661 = vmin.xlane.f32.xlu0 %v7732_v16  ;;  %v10380_v43 = vld [vmem:[#allocation11_spill] sm:$0xff]  ;;  %v5306_v46 = vpop.eup %5305 }
 0x5c0   : > { %v1890_v28 = vcvt.f32.s32 %v10380_v43  ;;  %v2543_v4 = vshll.u32 %v2542_v2, 16  ;;  %v7778_v5 = vsel %vm1998_vm3, %v5306_v46, 0.0 }
 0x5c1   : > { %v2530_v21 = vadd.s32 %v2529_v7, %v2527_v37  ;;  %v10383_v7 = vld [vmem:[#allocation5_spill] sm:$0xff]  ;;  %10386 = vst [vmem:[#allocation16_spill] sm:$0xff] %v7778_v5 }
 0x5c2   : > { %v7765_v42 = vsel %vm3175_vm14, 1e+30, %v10383_v7  ;;  %v1891_v43 = vshll.u32 %v1890_v28, 16  ;;  %v7776_v28 = vsel %vm2958_vm1, %v5304_v1, 0.0 }
 0x5c3   : > { %vm2861_vm15 = vcmp.eq.s32.totalorder %v6120_v60, %v2530_v21  ;;  %2759 = vmin.xlane.f32.xlu2 %v7747_v32  ;;  %v1878_v21 = vadd.s32 %v1877_v45, %v1875_v33  ;;  %10385 = vst [vmem:[#allocation72_spill] sm:$0xff] %v7776_v28 }
 0x5c4   : > { %v2540_v8 = vpop.xlane.xlu2 %2539  ;;  %v7757_v37 = vsel %vm2861_vm15, 1.0, %v10149_v44  ;;  %v1892_v2 = vadd.s32 %v1891_v43, %v1889_v53  ;;  %v10391_v53 = vld [vmem:[#allocation15_spill] sm:$0xff]  ;;  %v10395_v43 = vld [vmem:[#allocation90_spill] sm:$0xff] }
 0x5c5   : > { %v2541_v63 = vcvt.f32.s32 %v2540_v8  ;;  %v3085_v34 = vmul.f32 %v7757_v37, %v7759_v23  ;;  %vm1923_vm4 = vcmp.eq.s32.totalorder %v6120_v60, %v1878_v21  ;;  %v2126_v8 = vmul.f32 %v10388_v48, %v7778_v5  ;;  %v10401_v23 = vld [vmem:[#allocation102_spill] sm:$0xff] }
 0x5c6   : > { %vm1924_vm7 = vcmp.eq.s32.totalorder %v6120_v60, %v1892_v2  ;;  %v10397_v2 = vld [vmem:[#allocation45_spill] sm:$0xff] }
 0x5c7   : > { %v2544_v55 = vadd.s32 %v2543_v4, %v2541_v63  ;;  %3241 = vmin.xlane.f32.xlu1 %v7765_v42  ;;  %v7768_v50 = vadd.f32 %v3085_v34, %v2125_v40  ;;  %v10387_v40 = vld [vmem:[#allocation32_spill] sm:$0xff]  ;;  %v7790_v4 = vpop.xlane.xlu1 %2315  ;;  %v7795_v63 = vsel %vm1923_vm4, 1.0, %v10149_v44  ;;  %v10393_v34 = vld [vmem:[#allocation66_spill] sm:$0xff] }
 0x5c8   : > { %v7781_v45 = vsel %vm3178_vm0, 1e+30, %v10387_v40  ;;  %10390 = vst [vmem:[#allocation11_spill] sm:$0xff] %v7790_v4  ;;  %v7802_v21 = vsel %vm3179_vm5, 1e+30, %v10393_v34  ;;  %vm2360_vm8 = vcmp.eq.f32.partialorder %v10395_v43, %v7790_v4  ;;  %vm2243_vm9 = vcmp.gt.f32.partialorder %v7795_v63, 0.0 }
 0x5c9   : > { %10384 = vst [vmem:[#allocation61_spill] sm:$0xff] %v7768_v50  ;;  %vm2862_vm2 = vcmp.eq.s32.totalorder %v6120_v60, %v2544_v55  ;;  %v7812_v55 = vsel %vm1924_vm7, 1.0, %v10149_v44  ;;  %v7817_v40 = vsel %vm2243_vm9, 1e+30, %v10397_v2  ;;  %vm3181_vm0 = vcmp.gt.f32.partialorder %v7757_v37, 0.0  ;;  %v10413_v37 = vld [vmem:[#allocation10_spill] sm:$0xff] }
 0x5ca   : > { %v5018_v33 = vsel %vm2862_vm2, 1.0, %v10149_v44  ;;  %10392 = vst [vmem:[#allocation46_spill] sm:$0xff] %v7795_v63  ;;  %vm2244_vm10 = vcmp.gt.f32.partialorder %v7812_v55, 0.0  ;;  %vm2000_vm7 = vcmp.lt.f32.partialorder %v10413_v37, 1e+30 }
 0x5cb   : > { %v3086_v58 = vmul.f32 %v5018_v33, %v7776_v28  ;;  %3247 = vmin.xlane.f32.xlu2 %v7781_v45  ;;  %10396 = vst [vmem:[#allocation32_spill] sm:$0xff] %v7812_v55  ;;  %vm3182_vm11 = vcmp.gt.f32.partialorder %v5018_v33, 0.0  ;;  %v2615_v28 = vand.u32 65535, %v10401_v23  ;;  %v10405_v33 = vld [vmem:[#allocation93_spill] sm:$0xff]  ;;  %v10406_v23 = vld [vmem:[#allocation47_spill] sm:$0xff] }
 0x5cc   : > { %v7788_v31 = vpop.xlane.xlu2 %2329  ;;  %10398 = vst [vmem:[#allocation53_spill] sm:$0xff] %v7817_v40  ;;  %v2991_v15 = vmax.f32 %v10405_v33, 1e-16  ;;  %vm2959_vm3 = vcmp.lt.f32.partialorder %v10405_v33, 1e+30  ;;  %v10417_v33 = vld [vmem:[#allocation76_spill] sm:$0xff] }
 0x5cd   : > { %10389 = vst [vmem:[#allocation60_spill] sm:$0xff] %v7788_v31  ;;  %vm2367_vm6 = vcmp.eq.f32.partialorder %v10391_v53, %v7788_v31  ;;  %v7804_v7 = vadd.f32 %v3086_v58, %v2126_v8  ;;  %v7821_v58 = vsel %vm2360_vm8, %v6120_v60, 128  ;;  %v10399_v8 = vld [vmem:[#allocation26_spill] sm:$0xff]  ;;  %v2617_v52 = vcvt.s32.f32 %v2615_v28  ;;  %v10407_v53 = vld [vmem:[#allocation67_spill] sm:$0xff] }
 0x5ce   : > { %v7799_v26 = vsel %vm2367_vm6, %v6120_v60, 128  ;;  %v7828_v34 = vsel %vm2244_vm10, 1e+30, %v10399_v8  ;;  %v10404_v8 = vld [vmem:[#allocation23_spill] sm:$0xff] }
 0x5cf   : > { %10394 = vst [vmem:[#allocation5_spill] sm:$0xff] %v7804_v7  ;;  %3249 = vmin.xlane.f32.xlu1 %v7802_v21  ;;  %v2770_v1 = vshra.s32 %v7799_v26, 16  ;;  %v7837_v50 = vpop.xlane.xlu1 %2331  ;;  %v10403_v7 = vld [vmem:[#allocation56_spill] sm:$0xff]  ;;  %v2031_v63 = vmax.f32 %v10404_v8, 1e-16 }
 0x5d0   : > { %v7825_v48 = vpop.xlane.xlu0 %2605  ;;  %10400 = vst [vmem:[#allocation66_spill] sm:$0xff] %v7828_v34  ;;  %v7842_v55 = vsel %vm3182_vm11, 1e+30, %v10403_v7  ;;  %vm2368_vm13 = vcmp.eq.f32.partialorder %v10407_v53, %v7837_v50  ;;  %vm1999_vm2 = vcmp.lt.f32.partialorder %v10404_v8, 1e+30 }
 0x5d1   : > { %v7814_v46 = vcvt.s32.f32 %v2770_v1  ;;  %v2672_v1 = vshra.s32 %v7821_v58, 16  ;;  %10402 = vst [vmem:[#allocation45_spill] sm:$0xff] %v7837_v50  ;;  %5307 = vrcp.f32 %v2031_v63  ;;  %v7857_v28 = vsel %vm2368_vm13, %v6120_v60, 128 }
 0x5d2   : > { %5309 = vrcp.f32 %v2991_v15  ;;  %v2784_v43 = vshra.s32 %v7857_v28, 16 }
 0x5d3   : > { %2337 = vmin.xlane.f32.xlu2 %v7817_v40  ;;  %2773 = vmin.xlane.f32.xlu0 %v7814_v46  ;;  %v7835_v5 = vcvt.s32.f32 %v2672_v1  ;;  %v2601_v1 = vand.u32 65535, %v10406_v23 }
 0x5d4   : > { %v7832_v2 = vpop.xlane.xlu2 %2619  ;;  %v7882_v31 = vcvt.s32.f32 %v2784_v43 }
 0x5d5   : > { %vm2621_vm12 = vcmp.eq.f32.partialorder %v7469_v25, %v7832_v2  ;;  %v10408_v25 = vld [vmem:[#allocation103_spill] sm:$0xff]  ;;  %v2603_v51 = vcvt.s32.f32 %v2601_v1 }
 0x5d6   : > { %v2622_v61 = vsel %vm2621_vm12, %v2617_v52, inf  ;;  %vm2607_vm14 = vcmp.eq.f32.partialorder %v10408_v25, %v7825_v48  ;;  %v2557_v52 = vshll.u32 %v2556_v59, 16  ;;  %v10411_v1 = vld [vmem:[#allocation39_spill] sm:$0xff]  ;;  %v2032_v59 = vmax.f32 %v10413_v37, 1e-16 }
 0x5d7   : > { %2339 = vmin.xlane.f32.xlu1 %v7828_v34  ;;  %v7862_v63 = vpop.xlane.xlu1 %2317  ;;  %v5308_v25 = vpop.eup %5307  ;;  %v7868_v53 = vsel %vm3181_vm0, 1e+30, %v10411_v1 }
 0x5d8   : > { %v7853_v7 = vpop.xlane.xlu0 %2319  ;;  %10410 = vst [vmem:[#allocation102_spill] sm:$0xff] %v7862_v63  ;;  %v5310_v50 = vpop.eup %5309  ;;  %v7879_v1 = vsel %vm1999_vm2, %v5308_v25, 0.0 }
 0x5d9   : > { %10409 = vst [vmem:[#allocation26_spill] sm:$0xff] %v7853_v7  ;;  %vm2362_vm15 = vcmp.eq.f32.partialorder %v7489_v30, %v7853_v7  ;;  %v10412_v30 = vld [vmem:[#allocation94_spill] sm:$0xff]  ;;  %v7884_v4 = vsel %vm2959_vm3, %v5310_v50, 0.0 }
 0x5da   : > { %v7865_v15 = vsel %vm2362_vm15, %v6120_v60, 128  ;;  %10415 = vst [vmem:[#allocation56_spill] sm:$0xff] %v7879_v1  ;;  %vm2960_vm5 = vcmp.lt.f32.partialorder %v10412_v30, 1e+30 }
 0x5db   : > { %2675 = vmin.xlane.f32.xlu2 %v7835_v5  ;;  %3255 = vmin.xlane.f32.xlu0 %v7842_v55  ;;  %10416 = vst [vmem:[#allocation23_spill] sm:$0xff] %v7884_v4 }
 0x5df   : > { %2623 = vmin.xlane.f32.xlu1 %v2622_v61  ;;  %v2608_v61 = vsel %vm2607_vm14, %v2603_v51, inf  ;;  %v2992_v51 = vmax.f32 %v10412_v30, 1e-16  ;;  %v2629_v30 = vand.u32 65535, %v7598_v27 }
 0x5e1   : > { %5311 = vrcp.f32 %v2992_v51 }
 0x5e2   : > { %5313 = vrcp.f32 %v2032_v59 }
 0x5e3   : > { %2609 = vmin.xlane.f32.xlu2 %v2608_v61  ;;  %v10414_v61 = vld [vmem:[#allocation29_spill] sm:$0xff] }
 0x5e4   : > { %v2554_v23 = vpop.xlane.xlu2 %2553  ;;  %vm2361_vm1 = vcmp.eq.f32.partialorder %v10414_v61, %v7862_v63 }
 0x5e5   : > { %v2555_v11 = vcvt.f32.s32 %v2554_v23  ;;  %v2700_v23 = vshra.s32 %v7865_v15, 16  ;;  %v7888_v61 = vsel %vm2361_vm1, %v6120_v60, 128 }
 0x5e6   : > { %v2686_v57 = vshra.s32 %v7888_v61, 16 }
 0x5e7   : > { %3253 = vmin.xlane.f32.xlu1 %v7868_v53  ;;  %v2558_v7 = vadd.s32 %v2557_v52, %v2555_v11  ;;  %v2127_v52 = vmul.f32 %v10417_v33, %v7879_v1  ;;  %v7898_v50 = vcvt.s32.f32 %v2700_v23  ;;  %v2571_v11 = vshll.u32 %v2570_v39, 16  ;;  %v5312_v63 = vpop.eup %5311 }
 0x5e8   : > { %v7904_v33 = vcvt.s32.f32 %v2686_v57  ;;  %v5314_v1 = vpop.eup %5313  ;;  %v7910_v23 = vsel %vm2960_vm5, %v5312_v63, 0.0 }
 0x5e9   : > { %vm2863_vm4 = vcmp.eq.s32.totalorder %v6120_v60, %v2558_v7  ;;  %10419 = vst [vmem:[#allocation47_spill] sm:$0xff] %v7910_v23 }
 0x5ea   : > { %v7891_v8 = vsel %vm2863_vm4, 1.0, %v10149_v44 }
 0x5eb   : > { %2787 = vmin.xlane.f32.xlu2 %v7882_v31  ;;  %v3087_v43 = vmul.f32 %v7891_v8, %v7884_v4  ;;  %vm3183_vm15 = vcmp.gt.f32.partialorder %v7891_v8, 0.0  ;;  %v2741_v8 = vand.u32 65535, %v7668_v3  ;;  %v10439_v3 = vld [vmem:[#allocation99_spill] sm:$0xff] }
 0x5ec   : > { %vm2961_vm5 = vcmp.lt.f32.partialorder %v10439_v3, 1e+30 }
 0x5ed   : > { %v7901_v25 = vadd.f32 %v3087_v43, %v2127_v52  ;;  %v7916_v43 = vsel %vm2000_vm7, %v5314_v1, 0.0 }
 0x5ee   : > { %v2568_v7 = vpop.xlane.xlu1 %2567  ;;  %10421 = vst [vmem:[#allocation39_spill] sm:$0xff] %v7916_v43 }
 0x5ef   : > { %10418 = vst [vmem:[#allocation93_spill] sm:$0xff] %v7901_v25  ;;  %v2569_v51 = vcvt.f32.s32 %v2568_v7  ;;  %2703 = vmin.xlane.f32.xlu1 %v7898_v50 }
 0x5f1   : > { %v2572_v9 = vadd.s32 %v2571_v11, %v2569_v51  ;;  %v2631_v51 = vcvt.s32.f32 %v2629_v30 }
 0x5f3   : > { %vm2864_vm6 = vcmp.eq.s32.totalorder %v6120_v60, %v2572_v9  ;;  %2689 = vmin.xlane.f32.xlu2 %v7904_v33  ;;  %v10423_v9 = vld [vmem:[#allocation80_spill] sm:$0xff] }
 0x5f4   : > { %v5020_v59 = vsel %vm2864_vm6, 1.0, %v10149_v44  ;;  %v7913_v39 = vpop.xlane.xlu0 %2335  ;;  %v2128_v57 = vmul.f32 %v10423_v9, %v7916_v43 }
 0x5f5   : > { %10420 = vst [vmem:[#allocation103_spill] sm:$0xff] %v7913_v39  ;;  %v3088_v52 = vmul.f32 %v5020_v59, %v7910_v23  ;;  %vm2370_vm9 = vcmp.eq.f32.partialorder %v7591_v12, %v7913_v39  ;;  %vm3184_vm12 = vcmp.gt.f32.partialorder %v5020_v59, 0.0  ;;  %v10437_v39 = vld [vmem:[#allocation30_spill] sm:$0xff] }
 0x5f6   : > { %v7918_v7 = vpop.xlane.xlu1 %2333  ;;  %v7940_v9 = vsel %vm2370_vm9, %v6120_v60, 128  ;;  %vm2001_vm4 = vcmp.lt.f32.partialorder %v10437_v39, 1e+30 }
 0x5f7   : > { %10422 = vst [vmem:[#allocation94_spill] sm:$0xff] %v7918_v7  ;;  %vm2369_vm8 = vcmp.eq.f32.partialorder %v7595_v49, %v7918_v7  ;;  %v7931_v1 = vadd.f32 %v3088_v52, %v2128_v57  ;;  %v2643_v52 = vand.u32 65535, %v7628_v41  ;;  %v2812_v57 = vshra.s32 %v7940_v9, 16 }
 0x5f8   : > { %v7926_v63 = vsel %vm2369_vm8, %v6120_v60, 128  ;;  %v2598_v7 = vcvt.f32.s32 %v7701_v6 }
 0x5f9   : > { %v2798_v37 = vshra.s32 %v7926_v63, 16  ;;  %10424 = vst [vmem:[#allocation10_spill] sm:$0xff] %v7931_v1  ;;  %v2645_v30 = vcvt.s32.f32 %v2643_v52 }
 0x5fa   : > { %v7933_v11 = vpop.xlane.xlu2 %2633 }
 0x5fb   : > { %vm2635_vm10 = vcmp.eq.f32.partialorder %v7605_v36, %v7933_v11  ;;  %v7937_v27 = vcvt.s32.f32 %v2798_v37  ;;  %v7951_v37 = vcvt.s32.f32 %v2812_v57 }
 0x5fc   : > { %v2636_v4 = vsel %vm2635_vm10, %v2631_v51, inf  ;;  %v7943_v23 = vpop.xlane.xlu0 %2321 }
 0x5fd   : > { %2801 = vmin.xlane.f32.xlu2 %v7937_v27  ;;  %2637 = vmin.xlane.f32.xlu1 %v2636_v4  ;;  %10425 = vst [vmem:[#allocation76_spill] sm:$0xff] %v7943_v23  ;;  %vm2363_vm11 = vcmp.eq.f32.partialorder %v7622_v20, %v7943_v23  ;;  %v10427_v4 = vld [vmem:[#allocation63_spill] sm:$0xff] }
 0x5fe   : > { %v7954_v51 = vsel %vm2363_vm11, %v6120_v60, 128  ;;  %v7959_v43 = vsel %vm3184_vm12, 1e+30, %v10427_v4  ;;  %v10435_v20 = vld [vmem:[#allocation35_spill] sm:$0xff] }
 0x5ff   : > { %10426 = vst [vmem:[#allocation80_spill] sm:$0xff] %v7954_v51  ;;  %v2714_v52 = vshra.s32 %v7954_v51, 16  ;;  %v2034_v12 = vmax.f32 %v10435_v20, 1e-16  ;;  %vm2002_vm1 = vcmp.lt.f32.partialorder %v10435_v20, 1e+30 }
 0x601   : > { %5315 = vrcp.f32 %v2034_v12 }
 0x602   : > { %v7949_v36 = vpop.xlane.xlu1 %2647  ;;  %v7963_v59 = vpop.xlane.xlu2 %2323 }
 0x603   : > { %vm2649_vm13 = vcmp.eq.f32.partialorder %v7632_v0, %v7949_v36  ;;  %10428 = vst [vmem:[#allocation63_spill] sm:$0xff] %v7963_v59  ;;  %vm2364_vm14 = vcmp.eq.f32.partialorder %v7635_v54, %v7963_v59  ;;  %v7971_v0 = vcvt.s32.f32 %v2714_v52  ;;  %v2743_v52 = vcvt.s32.f32 %v2741_v8  ;;  %v10436_v59 = vld [vmem:[#allocation98_spill] sm:$0xff] }
 0x604   : > { %v2650_v41 = vsel %vm2649_vm13, %v2645_v30, inf  ;;  %v7974_v4 = vsel %vm2364_vm14, %v6120_v60, 128  ;;  %v10431_v30 = vld [vmem:[#allocation79_spill] sm:$0xff]  ;;  %v2994_v23 = vmax.f32 %v10436_v59, 1e-16  ;;  %v2599_v8 = vshll.u32 %v2598_v7, 16 }
 0x605   : > { %3259 = vmin.xlane.f32.xlu2 %v7959_v43  ;;  %2815 = vmin.xlane.f32.xlu1 %v7951_v37  ;;  %10429 = vst [vmem:[#allocation115_spill] sm:$0xff] %v7971_v0  ;;  %v7977_v1 = vsel %vm3183_vm15, 1e+30, %v10431_v30  ;;  %vm2962_vm2 = vcmp.lt.f32.partialorder %v10436_v59, 1e+30 }
 0x606   : > { %2651 = vmin.xlane.f32.xlu0 %v2650_v41  ;;  %10430 = vst [vmem:[#allocation116_spill] sm:$0xff] %v7974_v4  ;;  %v2728_v41 = vshra.s32 %v7974_v4, 16  ;;  %5317 = vrcp.f32 %v2994_v23 }
 0x608   : > { %v7984_v54 = vcvt.s32.f32 %v2728_v41  ;;  %v2033_v41 = vmax.f32 %v10437_v39, 1e-16 }
 0x60a   : > { %v7969_v57 = vpop.xlane.xlu0 %2745  ;;  %10433 = vst [vmem:[#allocation117_spill] sm:$0xff] %v7984_v54  ;;  %5319 = vrcp.f32 %v2033_v41 }
 0x60b   : > { %vm2747_vm0 = vcmp.eq.f32.partialorder %v7676_v22, %v7969_v57 }
 0x60c   : > { %v2748_v49 = vsel %vm2747_vm0, %v2743_v52, inf  ;;  %v5316_v52 = vpop.eup %5315 }
 0x60d   : > { %2717 = vmin.xlane.f32.xlu1 %v7971_v0  ;;  %v5318_v24 = vpop.eup %5317  ;;  %v8001_v12 = vsel %vm2002_vm1, %v5316_v52, 0.0  ;;  %v2755_v52 = vand.u32 65535, %v7729_v18 }
 0x60e   : > { %3257 = vmin.xlane.f32.xlu0 %v7977_v1  ;;  %10440 = vst [vmem:[#allocation98_spill] sm:$0xff] %v8001_v12  ;;  %v8008_v41 = vsel %vm2962_vm2, %v5318_v24, 0.0 }
 0x60f   : > { %10441 = vst [vmem:[#allocation30_spill] sm:$0xff] %v8008_v41  ;;  %v2757_v39 = vcvt.s32.f32 %v2755_v52 }
 0x612   : > { %v7982_v25 = vpop.xlane.xlu0 %3239 }
 0x613   : > { %10432 = vst [vmem:[#allocation79_spill] sm:$0xff] %v7982_v25  ;;  %vm3302_vm1 = vcmp.eq.f32.partialorder %v7681_v14, %v7982_v25 }
 0x614   : > { %v8127_v14 = vsel %vm3302_vm1, %v6120_v60, 128 }
 0x616   : > { %2731 = vmin.xlane.f32.xlu0 %v7984_v54  ;;  %v2993_v54 = vmax.f32 %v10439_v3, 1e-16 }
 0x618   : > { %5321 = vrcp.f32 %v2993_v54  ;;  %v5320_v54 = vpop.eup %5319 }
 0x619   : > { %v8024_v24 = vsel %vm2001_vm4, %v5320_v54, 0.0 }
 0x61a   : > { %v7990_v30 = vpop.xlane.xlu0 %3243  ;;  %10446 = vst [vmem:[#allocation120_spill] sm:$0xff] %v8024_v24 }
 0x61b   : > { %10434 = vst [vmem:[#allocation118_spill] sm:$0xff] %v7990_v30 }
 0x61e   : > { %2749 = vmin.xlane.f32.xlu0 %v2748_v49  ;;  %v2584_v49 = vcvt.f32.s32 %v7714_v10  ;;  %v10442_v10 = vld [vmem:[#allocation88_spill] sm:$0xff]  ;;  %v5322_v59 = vpop.eup %5321 }
 0x620   : > { %v2585_v23 = vshll.u32 %v2584_v49, 16 }
 0x622   : > { %v7996_v29 = vpop.xlane.xlu0 %3245 }
 0x623   : > { %10438 = vst [vmem:[#allocation35_spill] sm:$0xff] %v7996_v29 }
 0x62a   : > { %v2596_v22 = vpop.xlane.xlu1 %2595 }
 0x62b   : > { %v2597_v4 = vcvt.f32.s32 %v2596_v22  ;;  %v8012_v22 = vpop.xlane.xlu0 %3251 }
 0x62c   : > { %10443 = vst [vmem:[#allocation99_spill] sm:$0xff] %v8012_v22 }
 0x62d   : > { %v2600_v0 = vadd.s32 %v2599_v8, %v2597_v4  ;;  %v2130_v4 = vmul.f32 %v10442_v10, %v8001_v12  ;;  %v8029_v10 = vsel %vm2961_vm5, %v5322_v59, 0.0 }
 0x62e   : > { %v2582_v6 = vpop.xlane.xlu2 %2581  ;;  %10447 = vst [vmem:[#allocation121_spill] sm:$0xff] %v8029_v10 }
 0x62f   : > { %vm2866_vm3 = vcmp.eq.s32.totalorder %v6120_v60, %v2600_v0  ;;  %v2583_v51 = vcvt.f32.s32 %v2582_v6 }
 0x630   : > { %v8006_v7 = vsel %vm2866_vm3, 1.0, %v10149_v44 }
 0x631   : > { %v3090_v20 = vmul.f32 %v8006_v7, %v8008_v41  ;;  %v2586_v8 = vadd.s32 %v2585_v23, %v2583_v51  ;;  %v10448_v51 = vld [vmem:[#allocation89_spill] sm:$0xff]  ;;  %vm3186_vm12 = vcmp.gt.f32.partialorder %v8006_v7, 0.0  ;;  %v2769_v7 = vand.u32 65535, %v7799_v26 }
 0x632   : > { %v8016_v0 = vpop.xlane.xlu1 %3237  ;;  %v2129_v23 = vmul.f32 %v10448_v51, %v8024_v24 }
 0x633   : > { %10444 = vst [vmem:[#allocation88_spill] sm:$0xff] %v8016_v0  ;;  %v8019_v49 = vadd.f32 %v3090_v20, %v2130_v4  ;;  %vm2865_vm6 = vcmp.eq.s32.totalorder %v6120_v60, %v2586_v8  ;;  %v8043_v59 = vpop.xlane.xlu0 %2661  ;;  %v2657_v8 = vand.u32 65535, %v7724_v17 }
 0x634   : > { %v8027_v6 = vsel %vm2865_vm6, 1.0, %v10149_v44  ;;  %10452 = vst [vmem:[#allocation124_spill] sm:$0xff] %v8043_v59  ;;  %vm2663_vm8 = vcmp.eq.f32.partialorder %v7732_v16, %v8043_v59  ;;  %v10464_v59 = vld [vmem:[#allocation70_spill] sm:$0xff] }
 0x635   : > { %10445 = vst [vmem:[#allocation119_spill] sm:$0xff] %v8019_v49  ;;  %v3089_v18 = vmul.f32 %v8027_v6, %v8029_v10  ;;  %v2659_v10 = vcvt.s32.f32 %v2657_v8  ;;  %v10462_v49 = vld [vmem:[#allocation8_spill] sm:$0xff]  ;;  %vm3185_vm14 = vcmp.gt.f32.partialorder %v8027_v6, 0.0 }
 0x636   : > { %v8035_v4 = vpop.xlane.xlu2 %2759  ;;  %vm2003_vm3 = vcmp.lt.f32.partialorder %v10462_v49, 1e+30 }
 0x637   : > { %10449 = vst [vmem:[#allocation89_spill] sm:$0xff] %v8035_v4  ;;  %vm2761_vm7 = vcmp.eq.f32.partialorder %v7747_v32, %v8035_v4  ;;  %v8039_v3 = vadd.f32 %v3089_v18, %v2129_v23  ;;  %v2664_v52 = vsel %vm2663_vm8, %v2659_v10, inf  ;;  %v10457_v18 = vld [vmem:[#allocation22_spill] sm:$0xff]  ;;  %v2671_v10 = vand.u32 65535, %v7821_v58 }
 0x638   : > { %v2762_v54 = vsel %vm2761_vm7, %v2757_v39, inf  ;;  %v2036_v17 = vmax.f32 %v10457_v18, 1e-16  ;;  %v8087_v4 = vsel %vm3186_vm12, 1e+30, %v10464_v59  ;;  %vm3301_vm7 = vcmp.eq.f32.partialorder %v7736_v56, %v8016_v0  ;;  %v10526_v0 = vld [vmem:[#allocation31_spill] sm:$0xff] }
 0x639   : > { %10450 = vst [vmem:[#allocation122_spill] sm:$0xff] %v8039_v3  ;;  %2763 = vmin.xlane.f32.xlu2 %v2762_v54  ;;  %v10459_v54 = vld [vmem:[#allocation19_spill] sm:$0xff]  ;;  %v2035_v3 = vmax.f32 %v10462_v49, 1e-16  ;;  %v2673_v58 = vcvt.s32.f32 %v2671_v10  ;;  %vm2004_vm13 = vcmp.lt.f32.partialorder %v10457_v18, 1e+30  ;;  %vm3304_vm8 = vcmp.eq.f32.partialorder %v7686_v62, %v7990_v30 }
 0x63a   : > { %v8041_v20 = vpop.xlane.xlu1 %3241  ;;  %v2996_v8 = vmax.f32 %v10459_v54, 1e-16  ;;  %5323 = vrcp.f32 %v2036_v17  ;;  %vm2964_vm15 = vcmp.lt.f32.partialorder %v10459_v54, 1e+30  ;;  %v10473_v49 = vld [vmem:[#allocation91_spill] sm:$0xff]  ;;  %v8161_v56 = vsel %vm3304_vm8, %v6120_v60, 128 }
 0x63b   : > { %10451 = vst [vmem:[#allocation123_spill] sm:$0xff] %v8041_v20  ;;  %vm3303_vm12 = vcmp.eq.f32.partialorder %v7765_v42, %v8041_v20 }
 0x63c   : > { %5325 = vrcp.f32 %v2996_v8 }
 0x63d   : > { %5327 = vrcp.f32 %v2035_v3 }
 0x63e   : > { %v8048_v51 = vpop.xlane.xlu2 %3247 }
 0x63f   : > { %10453 = vst [vmem:[#allocation125_spill] sm:$0xff] %v8048_v51 }
 0x641   : > { %2665 = vmin.xlane.f32.xlu2 %v2664_v52 }
 0x642   : > { %v8050_v24 = vpop.xlane.xlu1 %3249 }
 0x643   : > { %10454 = vst [vmem:[#allocation126_spill] sm:$0xff] %v8050_v24 }
 0x646   : > { %v8052_v32 = vpop.xlane.xlu2 %2337 }
 0x647   : > { %10455 = vst [vmem:[#allocation127_spill] sm:$0xff] %v8052_v32  ;;  %vm2371_vm9 = vcmp.eq.f32.partialorder %v7817_v40, %v8052_v32  ;;  %v2626_v40 = vcvt.f32.s32 %v7832_v2 }
 0x648   : > { %v8057_v23 = vsel %vm2371_vm9, %v6120_v60, 128 }
 0x649   : > { %10456 = vst [vmem:[#allocation128_spill] sm:$0xff] %v8057_v23  ;;  %v2826_v16 = vshra.s32 %v8057_v23, 16  ;;  %v2627_v8 = vshll.u32 %v2626_v40, 16  ;;  %v8095_v40 = vpop.xlane.xlu0 %2773 }
 0x64a   : > { %v8060_v39 = vpop.xlane.xlu1 %2339  ;;  %vm2775_vm2 = vcmp.eq.f32.partialorder %v7814_v46, %v8095_v40 }
 0x64b   : > { %10458 = vst [vmem:[#allocation22_spill] sm:$0xff] %v8060_v39  ;;  %vm2372_vm10 = vcmp.eq.f32.partialorder %v7828_v34, %v8060_v39  ;;  %v8070_v41 = vcvt.s32.f32 %v2826_v16  ;;  %v10463_v39 = vld [vmem:[#allocation36_spill] sm:$0xff] }
 0x64c   : > { %v8068_v52 = vsel %vm2372_vm10, %v6120_v60, 128  ;;  %v2995_v23 = vmax.f32 %v10463_v39, 1e-16  ;;  %vm2963_vm4 = vcmp.lt.f32.partialorder %v10463_v39, 1e+30  ;;  %vm3306_vm10 = vcmp.eq.f32.partialorder %v7781_v45, %v8048_v51 }
 0x64d   : > { %10460 = vst [vmem:[#allocation19_spill] sm:$0xff] %v8068_v52  ;;  %v2840_v12 = vshra.s32 %v8068_v52, 16  ;;  %2829 = vmin.xlane.f32.xlu0 %v8070_v41 }
 0x64e   : > { %10461 = vst [vmem:[#allocation129_spill] sm:$0xff] %v8070_v41  ;;  %v8076_v32 = vpop.xlane.xlu2 %2675  ;;  %v5324_v41 = vpop.eup %5323  ;;  %5329 = vrcp.f32 %v2995_v23 }
 0x64f   : > { %v8078_v34 = vcvt.s32.f32 %v2840_v12  ;;  %vm2677_vm11 = vcmp.eq.f32.partialorder %v7835_v5, %v8076_v32  ;;  %v2612_v12 = vcvt.f32.s32 %v7825_v48  ;;  %v5326_v10 = vpop.eup %5325  ;;  %v8092_v5 = vsel %vm2004_vm13, %v5324_v41, 0.0  ;;  %v10467_v41 = vld [vmem:[#allocation92_spill] sm:$0xff] }
 0x650   : > { %v2678_v16 = vsel %vm2677_vm11, %v2673_v58, inf  ;;  %10465 = vst [vmem:[#allocation8_spill] sm:$0xff] %v8092_v5  ;;  %v8102_v18 = vsel %vm2964_vm15, %v5326_v10, 0.0  ;;  %v5328_v58 = vpop.eup %5327  ;;  %v2132_v6 = vmul.f32 %v10467_v41, %v8092_v5  ;;  %vm3305_vm13 = vcmp.eq.f32.partialorder %v7693_v47, %v7996_v29 }
 0x651   : > { %2843 = vmin.xlane.f32.xlu2 %v8078_v34  ;;  %2679 = vmin.xlane.f32.xlu1 %v2678_v16  ;;  %v2613_v3 = vshll.u32 %v2612_v12, 16  ;;  %10466 = vst [vmem:[#allocation36_spill] sm:$0xff] %v8102_v18  ;;  %v10468_v16 = vld [vmem:[#allocation73_spill] sm:$0xff]  ;;  %v2783_v12 = vand.u32 65535, %v7857_v28  ;;  %vm3308_vm15 = vcmp.eq.f32.partialorder %v7709_v19, %v8012_v22  ;;  %v2682_v30 = vcvt.f32.s32 %v8076_v32 }
 0x652   : > { %v2624_v17 = vpop.xlane.xlu1 %2623  ;;  %v8107_v54 = vsel %vm3185_vm14, 1e+30, %v10468_v16  ;;  %vm3307_vm14 = vcmp.eq.f32.partialorder %v7802_v21, %v8050_v24  ;;  %v8219_v5 = vsel %vm3308_vm15, %v6120_v60, 128  ;;  %v2048_v32 = vmax.f32 %v10526_v0, 1e-16 }
 0x653   : > { %v2625_v2 = vcvt.f32.s32 %v2624_v17  ;;  %v2785_v41 = vcvt.s32.f32 %v2783_v12  ;;  %v8214_v21 = vsel %vm3307_vm14, %v6120_v60, 128 }
 0x654   : > { %v5330_v17 = vpop.eup %5329 }
 0x655   : > { %v2628_v52 = vadd.s32 %v2627_v8, %v2625_v2  ;;  %3263 = vmin.xlane.f32.xlu0 %v8087_v4  ;;  %v2771_v2 = vcvt.s32.f32 %v2769_v7  ;;  %v2699_v7 = vand.u32 65535, %v7865_v15 }
 0x656   : > { %v2610_v48 = vpop.xlane.xlu2 %2609 }
 0x657   : > { %vm2868_vm0 = vcmp.eq.s32.totalorder %v6120_v60, %v2628_v52  ;;  %v2611_v59 = vcvt.f32.s32 %v2610_v48  ;;  %v8122_v48 = vsel %vm2003_vm3, %v5328_v58, 0.0  ;;  %v2776_v46 = vsel %vm2775_vm2, %v2771_v2, inf }
 0x658   : > { %v8100_v23 = vsel %vm2868_vm0, 1.0, %v10149_v44  ;;  %10471 = vst [vmem:[#allocation73_spill] sm:$0xff] %v8122_v48  ;;  %v2131_v28 = vmul.f32 %v10473_v49, %v8122_v48  ;;  %v3408_v49 = vshra.s32 %v8161_v56, 16  ;;  %vm2965_vm0 = vcmp.lt.f32.partialorder %v7584_v38, 1e+30 }
 0x659   : > { %v3092_v52 = vmul.f32 %v8100_v23, %v8102_v18  ;;  %v2614_v26 = vadd.s32 %v2613_v3, %v2611_v59  ;;  %3261 = vmin.xlane.f32.xlu1 %v8107_v54  ;;  %v8132_v59 = vsel %vm2963_vm4, %v5330_v17, 0.0  ;;  %v2701_v17 = vcvt.s32.f32 %v2699_v7  ;;  %v10475_v7 = vld [vmem:[#allocation54_spill] sm:$0xff] }
 0x65a   : > { %v8116_v8 = vpop.xlane.xlu1 %3253  ;;  %10472 = vst [vmem:[#allocation130_spill] sm:$0xff] %v8132_v59  ;;  %vm3188_vm2 = vcmp.gt.f32.partialorder %v8100_v23, 0.0  ;;  %vm2005_vm3 = vcmp.lt.f32.partialorder %v10475_v7, 1e+30 }
 0x65b   : > { %10469 = vst [vmem:[#allocation70_spill] sm:$0xff] %v8116_v8  ;;  %v8120_v10 = vadd.f32 %v3092_v52, %v2132_v6  ;;  %vm2867_vm5 = vcmp.eq.s32.totalorder %v6120_v60, %v2614_v26  ;;  %v3380_v6 = vshra.s32 %v8127_v14, 16  ;;  %v8156_v26 = vsel %vm3301_vm7, %v6120_v60, 128 }
 0x65c   : > { %v8130_v3 = vsel %vm2867_vm5, 1.0, %v10149_v44  ;;  %vm3309_vm4 = vcmp.eq.f32.partialorder %v7868_v53, %v8116_v8  ;;  %vm2966_vm7 = vcmp.lt.f32.partialorder %v7619_v13, 1e+30 }
 0x65d   : > { %10470 = vst [vmem:[#allocation92_spill] sm:$0xff] %v8120_v10  ;;  %2777 = vmin.xlane.f32.xlu0 %v2776_v46  ;;  %v3091_v39 = vmul.f32 %v8130_v3, %v8132_v59  ;;  %v8158_v2 = vcvt.s32.f32 %v3380_v6  ;;  %v2997_v46 = vmax.f32 %v7584_v38, 1e-16  ;;  %v8186_v6 = vcvt.s32.f32 %v3408_v49 }
 0x65e   : > { %v8139_v58 = vpop.xlane.xlu2 %2787  ;;  %v2998_v59 = vmax.f32 %v7619_v13, 1e-16  ;;  %v8256_v10 = vsel %vm3309_vm4, %v6120_v60, 128 }
 0x65f   : > { %vm2789_vm6 = vcmp.eq.f32.partialorder %v7882_v31, %v8139_v58  ;;  %v8144_v16 = vadd.f32 %v3091_v39, %v2131_v28  ;;  %v2685_v31 = vand.u32 65535, %v7888_v61  ;;  %v3366_v61 = vshra.s32 %v8156_v26, 16 }
 0x660   : > { %v2790_v52 = vsel %vm2789_vm6, %v2785_v41, inf  ;;  %v8176_v28 = vsel %vm3306_vm10, %v6120_v60, 128  ;;  %v2037_v39 = vmax.f32 %v10475_v7, 1e-16  ;;  %5331 = vrcp.f32 %v2997_v46 }
 0x661   : > { %10474 = vst [vmem:[#allocation91_spill] sm:$0xff] %v8144_v16  ;;  %2791 = vmin.xlane.f32.xlu2 %v2790_v52  ;;  %v8181_v41 = vcvt.s32.f32 %v3366_v61  ;;  %v3436_v42 = vshra.s32 %v8176_v28, 16  ;;  %v2640_v52 = vcvt.f32.s32 %v7933_v11  ;;  %v8201_v11 = vpop.xlane.xlu0 %3255 }
 0x662   : > { %v8150_v15 = vpop.xlane.xlu1 %2703  ;;  %5333 = vrcp.f32 %v2037_v39  ;;  %10476 = vst [vmem:[#allocation54_spill] sm:$0xff] %v8201_v11  ;;  %v10477_v39 = vld [vmem:[#allocation17_spill] sm:$0xff]  ;;  %vm3310_vm5 = vcmp.eq.f32.partialorder %v7842_v55, %v8201_v11 }
 0x663   : > { %vm2705_vm9 = vcmp.eq.f32.partialorder %v7898_v50, %v8150_v15  ;;  %v2687_v50 = vcvt.s32.f32 %v2685_v31  ;;  %v2641_v61 = vshll.u32 %v2640_v52, 16  ;;  %5335 = vrcp.f32 %v2998_v59 }
 0x664   : > { %v2706_v12 = vsel %vm2705_vm9, %v2701_v17, inf  ;;  %v8191_v17 = vsel %vm3305_vm13, %v6120_v60, 128  ;;  %v3464_v59 = vshra.s32 %v8219_v5, 16  ;;  %vm2006_vm6 = vcmp.lt.f32.partialorder %v10477_v39, 1e+30 }
 0x665   : > { %2707 = vmin.xlane.f32.xlu1 %v2706_v12  ;;  %3383 = vmin.xlane.f32.xlu0 %v8158_v2  ;;  %v8196_v12 = vcvt.s32.f32 %v3436_v42  ;;  %v2038_v42 = vmax.f32 %v10477_v39, 1e-16  ;;  %v8262_v55 = vsel %vm3310_vm5, %v6120_v60, 128  ;;  %v3478_v39 = vshra.s32 %v8256_v10, 16 }
 0x666   : > { %v8166_v62 = vpop.xlane.xlu2 %2689  ;;  %v3492_v13 = vshra.s32 %v8262_v55, 16  ;;  %vm3187_vm13 = vcmp.gt.f32.partialorder %v8130_v3, 0.0 }
 0x667   : > { %vm2691_vm11 = vcmp.eq.f32.partialorder %v7904_v33, %v8166_v62  ;;  %v8184_v33 = vsel %vm3303_vm12, %v6120_v60, 128  ;;  %5337 = vrcp.f32 %v2038_v42 }
 0x668   : > { %v2692_v45 = vsel %vm2691_vm11, %v2687_v50, inf  ;;  %v3394_v47 = vshra.s32 %v8184_v33, 16  ;;  %v3422_v50 = vshra.s32 %v8191_v17, 16 }
 0x669   : > { %2693 = vmin.xlane.f32.xlu2 %v2692_v45  ;;  %v5332_v45 = vpop.eup %5331 }
 0x66a   : > { %v8210_v52 = vcvt.s32.f32 %v3394_v47  ;;  %v5334_v18 = vpop.eup %5333  ;;  %v8223_v19 = vsel %vm2965_vm0, %v5332_v45, 0.0  ;;  %v2654_v47 = vcvt.f32.s32 %v7949_v36  ;;  %v10480_v36 = vld [vmem:[#allocation95_spill] sm:$0xff]  ;;  %v10481_v45 = vld [vmem:[#allocation6_spill] sm:$0xff] }
 0x66b   : > { %10478 = vst [vmem:[#allocation17_spill] sm:$0xff] %v8223_v19  ;;  %v8243_v16 = vsel %vm3188_vm2, 1e+30, %v10481_v45  ;;  %v5336_v53 = vpop.eup %5335 }
 0x66c   : > { %v2655_v7 = vshll.u32 %v2654_v47, 16  ;;  %v8258_v47 = vcvt.s32.f32 %v3464_v59 }
 0x66d   : > { %3369 = vmin.xlane.f32.xlu1 %v8181_v41  ;;  %3411 = vmin.xlane.f32.xlu0 %v8186_v6  ;;  %v5338_v8 = vpop.eup %5337 }
 0x66e   : > { %v8278_v59 = vsel %vm2006_vm6, %v5338_v8, 0.0 }
 0x66f   : > { %10485 = vst [vmem:[#allocation133_spill] sm:$0xff] %v8278_v59 }
 0x670   : > { %v2638_v31 = vpop.xlane.xlu1 %2637  ;;  %v8203_v49 = vpop.xlane.xlu2 %2801 }
 0x671   : > { %v2639_v46 = vcvt.f32.s32 %v2638_v31  ;;  %3439 = vmin.xlane.f32.xlu2 %v8196_v12  ;;  %v8216_v31 = vcvt.s32.f32 %v3422_v50  ;;  %v3450_v50 = vshra.s32 %v8214_v21, 16  ;;  %vm2803_vm8 = vcmp.eq.f32.partialorder %v7937_v27, %v8203_v49 }
 0x673   : > { %v2642_v48 = vadd.s32 %v2641_v61, %v2639_v46  ;;  %v8235_v61 = vsel %vm2005_vm3, %v5334_v18, 0.0 }
 0x674   : > { %10479 = vst [vmem:[#allocation131_spill] sm:$0xff] %v8235_v61  ;;  %v2133_v46 = vmul.f32 %v10480_v36, %v8235_v61  ;;  %v2797_v36 = vand.u32 65535, %v7926_v63 }
 0x675   : > { %vm2869_vm1 = vcmp.eq.s32.totalorder %v6120_v60, %v2642_v48  ;;  %3397 = vmin.xlane.f32.xlu1 %v8210_v52  ;;  %3425 = vmin.xlane.f32.xlu0 %v8216_v31 }
 0x676   : > { %v8229_v38 = vsel %vm2869_vm1, 1.0, %v10149_v44  ;;  %v2799_v63 = vcvt.s32.f32 %v2797_v36  ;;  %v8290_v36 = vcvt.s32.f32 %v3478_v39  ;;  %vm2973_vm1 = vcmp.lt.f32.partialorder %v7651_v35, 1e+30 }
 0x677   : > { %v3093_v48 = vmul.f32 %v8229_v38, %v8223_v19  ;;  %v8250_v19 = vcvt.s32.f32 %v3450_v50  ;;  %vm3189_vm14 = vcmp.gt.f32.partialorder %v8229_v38, 0.0 }
 0x678   : > { %v8248_v18 = vpop.xlane.xlu2 %3259  ;;  %10489 = vst [vmem:[#allocation135_spill] sm:$0xff] %v8290_v36  ;;  %v8294_v8 = vpop.xlane.xlu1 %2815 }
 0x679   : > { %v2652_v23 = vpop.xlane.xlu0 %2651  ;;  %3267 = vmin.xlane.f32.xlu2 %v8243_v16  ;;  %10482 = vst [vmem:[#allocation95_spill] sm:$0xff] %v8248_v18  ;;  %v8253_v61 = vadd.f32 %v3093_v48, %v2133_v46  ;;  %vm3312_vm10 = vcmp.eq.f32.partialorder %v7959_v43, %v8248_v18  ;;  %v8276_v48 = vsel %vm2966_vm7, %v5336_v53, 0.0  ;;  %v10486_v46 = vld [vmem:[#allocation96_spill] sm:$0xff]  ;;  %vm2817_vm11 = vcmp.eq.f32.partialorder %v7951_v37, %v8294_v8 }
 0x67a   : > { %v2653_v42 = vcvt.f32.s32 %v2652_v23  ;;  %10484 = vst [vmem:[#allocation132_spill] sm:$0xff] %v8276_v48  ;;  %v2134_v43 = vmul.f32 %v10486_v46, %v8278_v59  ;;  %v8286_v23 = vsel %vm3312_vm10, %v6120_v60, 128  ;;  %v2811_v46 = vand.u32 65535, %v7940_v9 }
 0x67b   : > { %10483 = vst [vmem:[#allocation6_spill] sm:$0xff] %v8253_v61 }
 0x67c   : > { %v2656_v45 = vadd.s32 %v2655_v7, %v2653_v42  ;;  %10487 = vst [vmem:[#allocation96_spill] sm:$0xff] %v8286_v23  ;;  %v2804_v42 = vsel %vm2803_vm8, %v2799_v63, inf  ;;  %v10492_v63 = vld [vmem:[#allocation48_spill] sm:$0xff] }
 0x67d   : > { %3453 = vmin.xlane.f32.xlu1 %v8250_v19  ;;  %3467 = vmin.xlane.f32.xlu0 %v8258_v47  ;;  %vm2013_vm0 = vcmp.lt.f32.partialorder %v10492_v63, 1e+30 }
 0x67e   : > { %vm2870_vm9 = vcmp.eq.s32.totalorder %v6120_v60, %v2656_v45  ;;  %v8296_v45 = vcvt.s32.f32 %v3492_v13  ;;  %v3005_v13 = vmax.f32 %v7651_v35, 1e-16  ;;  %v10501_v35 = vld [vmem:[#allocation117_spill] sm:$0xff] }
 0x67f   : > { %v8274_v50 = vsel %vm2870_vm9, 1.0, %v10149_v44 }
 0x680   : > { %v3094_v27 = vmul.f32 %v8274_v50, %v8276_v48  ;;  %v3520_v48 = vshra.s32 %v8286_v23, 16  ;;  %v8321_v61 = vpop.xlane.xlu1 %2717  ;;  %vm3190_vm3 = vcmp.gt.f32.partialorder %v8274_v50, 0.0  ;;  %v10506_v50 = vld [vmem:[#allocation89_spill] sm:$0xff] }
 0x681   : > { %v8288_v7 = vpop.xlane.xlu0 %3257  ;;  %2805 = vmin.xlane.f32.xlu2 %v2804_v42  ;;  %v2045_v42 = vmax.f32 %v10492_v63, 1e-16 }
 0x682   : > { %10488 = vst [vmem:[#allocation134_spill] sm:$0xff] %v8288_v7  ;;  %v8292_v53 = vadd.f32 %v3094_v27, %v2134_v43  ;;  %v8302_v59 = vcvt.s32.f32 %v3520_v48  ;;  %vm3311_vm12 = vcmp.eq.f32.partialorder %v7977_v1, %v8288_v7  ;;  %v2813_v27 = vcvt.s32.f32 %v2811_v46  ;;  %v10493_v43 = vld [vmem:[#allocation28_spill] sm:$0xff] }
 0x683   : > { %5339 = vrcp.f32 %v2045_v42  ;;  %v8315_v48 = vsel %vm3311_vm12, %v6120_v60, 128  ;;  %v8318_v37 = vsel %vm3187_vm13, 1e+30, %v10493_v43  ;;  %v10494_v1 = vld [vmem:[#allocation80_spill] sm:$0xff]  ;;  %v10495_v42 = vld [vmem:[#allocation115_spill] sm:$0xff] }
 0x684   : > { %10490 = vst [vmem:[#allocation136_spill] sm:$0xff] %v8292_v53  ;;  %v2818_v9 = vsel %vm2817_vm11, %v2813_v27, inf  ;;  %5341 = vrcp.f32 %v3005_v13  ;;  %v2752_v53 = vcvt.f32.s32 %v7969_v57  ;;  %v2713_v3 = vand.u32 65535, %v10494_v1  ;;  %v10498_v1 = vld [vmem:[#allocation116_spill] sm:$0xff] }
 0x685   : > { %3481 = vmin.xlane.f32.xlu1 %v8290_v36  ;;  %3495 = vmin.xlane.f32.xlu0 %v8296_v45  ;;  %10491 = vst [vmem:[#allocation137_spill] sm:$0xff] %v8302_v59  ;;  %v3506_v46 = vshra.s32 %v8315_v48, 16  ;;  %vm2719_vm15 = vcmp.eq.f32.partialorder %v10495_v42, %v8321_v61  ;;  %v2727_v42 = vand.u32 65535, %v10498_v1  ;;  %v10505_v1 = vld [vmem:[#allocation74_spill] sm:$0xff]  ;;  %v2696_v36 = vcvt.f32.s32 %v8166_v62 }
 0x686   : > { %v2753_v13 = vshll.u32 %v2752_v53, 16  ;;  %v2715_v57 = vcvt.s32.f32 %v2713_v3  ;;  %vm2974_vm6 = vcmp.lt.f32.partialorder %v10505_v1, 1e+30  ;;  %v10547_v62 = vld [vmem:[#allocation62_spill] sm:$0xff] }
 0x687   : > { %v8333_v24 = vcvt.s32.f32 %v3506_v46  ;;  %v10500_v46 = vld [vmem:[#allocation18_spill] sm:$0xff] }
 0x688   : > { %v2720_v38 = vsel %vm2719_vm15, %v2715_v57, inf  ;;  %v10504_v57 = vld [vmem:[#allocation7_spill] sm:$0xff] }
 0x689   : > { %v8307_v39 = vpop.xlane.xlu0 %2731  ;;  %3523 = vmin.xlane.f32.xlu2 %v8302_v59  ;;  %v5340_v11 = vpop.eup %5339  ;;  %vm2014_vm5 = vcmp.lt.f32.partialorder %v10504_v57, 1e+30 }
 0x68a   : > { %v5342_v7 = vpop.eup %5341  ;;  %v8339_v53 = vsel %vm2013_vm0, %v5340_v11, 0.0  ;;  %vm2733_vm4 = vcmp.eq.f32.partialorder %v10501_v35, %v8307_v39  ;;  %v2729_v11 = vcvt.s32.f32 %v2727_v42 }
 0x68b   : > { %10497 = vst [vmem:[#allocation48_spill] sm:$0xff] %v8339_v53 }
 0x68d   : > { %2819 = vmin.xlane.f32.xlu1 %v2818_v9  ;;  %3265 = vmin.xlane.f32.xlu0 %v8318_v37  ;;  %v10496_v9 = vld [vmem:[#allocation40_spill] sm:$0xff] }
 0x68e   : > { %v8330_v43 = vsel %vm3189_vm14, 1e+30, %v10496_v9  ;;  %v10503_v9 = vld [vmem:[#allocation84_spill] sm:$0xff] }
 0x691   : > { %v2750_v27 = vpop.xlane.xlu0 %2749  ;;  %3269 = vmin.xlane.f32.xlu2 %v8330_v43 }
 0x692   : > { %v2751_v18 = vcvt.f32.s32 %v2750_v27  ;;  %v2141_v27 = vmul.f32 %v10500_v46, %v8339_v53  ;;  %v3006_v46 = vmax.f32 %v10505_v1, 1e-16  ;;  %v10507_v53 = vld [vmem:[#allocation59_spill] sm:$0xff] }
 0x693   : > { %v2039_v35 = vmax.f32 %v10507_v53, 1e-16  ;;  %vm2007_vm8 = vcmp.lt.f32.partialorder %v10507_v53, 1e+30  ;;  %v10518_v53 = vld [vmem:[#allocation11_spill] sm:$0xff] }
 0x694   : > { %v2754_v22 = vadd.s32 %v2753_v13, %v2751_v18  ;;  %v8345_v18 = vsel %vm2973_vm1, %v5342_v7, 0.0  ;;  %v8357_v13 = vsel %vm3190_vm3, 1e+30, %v10503_v9  ;;  %v2734_v7 = vsel %vm2733_vm4, %v2729_v11, inf  ;;  %v10509_v11 = vld [vmem:[#allocation124_spill] sm:$0xff] }
 0x695   : > { %2721 = vmin.xlane.f32.xlu1 %v2720_v38  ;;  %3509 = vmin.xlane.f32.xlu0 %v8333_v24  ;;  %10499 = vst [vmem:[#allocation28_spill] sm:$0xff] %v8345_v18  ;;  %v2046_v38 = vmax.f32 %v10504_v57, 1e-16  ;;  %vm2968_vm14 = vcmp.lt.f32.partialorder %v10518_v53, 1e+30 }
 0x696   : > { %vm2877_vm2 = vcmp.eq.s32.totalorder %v6120_v60, %v2754_v22 }
 0x697   : > { %v8343_v3 = vsel %vm2877_vm2, 1.0, %v10149_v44  ;;  %5343 = vrcp.f32 %v2046_v38  ;;  %vm2016_vm2 = vcmp.lt.f32.partialorder %v10526_v0, 1e+30  ;;  %v3379_v0 = vand.u32 65535, %v8127_v14 }
 0x698   : > { %v3101_v63 = vmul.f32 %v8343_v3, %v8345_v18  ;;  %5345 = vrcp.f32 %v3006_v46  ;;  %v2766_v18 = vcvt.f32.s32 %v10506_v50  ;;  %v10512_v50 = vld [vmem:[#allocation97_spill] sm:$0xff] }
 0x699   : > { %5347 = vrcp.f32 %v2039_v35 }
 0x69a   : > { %v8354_v22 = vadd.f32 %v3101_v63, %v2141_v27  ;;  %v10508_v63 = vld [vmem:[#allocation55_spill] sm:$0xff] }
 0x69b   : > { %v2999_v42 = vmax.f32 %v10508_v63, 1e-16  ;;  %vm2967_vm9 = vcmp.lt.f32.partialorder %v10508_v63, 1e+30 }
 0x69c   : > { %10502 = vst [vmem:[#allocation80_spill] sm:$0xff] %v8354_v22  ;;  %v2767_v22 = vshll.u32 %v2766_v18, 16 }
 0x69d   : > { %3271 = vmin.xlane.f32.xlu1 %v8357_v13  ;;  %2735 = vmin.xlane.f32.xlu0 %v2734_v7  ;;  %v5344_v29 = vpop.eup %5343  ;;  %5349 = vrcp.f32 %v2999_v42  ;;  %v2668_v7 = vcvt.f32.s32 %v10509_v11 }
 0x69e   : > { %v5346_v20 = vpop.eup %5345  ;;  %v8369_v38 = vsel %vm2014_vm5, %v5344_v29, 0.0 }
 0x69f   : > { %10510 = vst [vmem:[#allocation115_spill] sm:$0xff] %v8369_v38  ;;  %v8374_v18 = vsel %vm2974_vm6, %v5346_v20, 0.0  ;;  %v2669_v1 = vshll.u32 %v2668_v7, 16  ;;  %v10516_v7 = vld [vmem:[#allocation100_spill] sm:$0xff] }
 0x6a0   : > { %10511 = vst [vmem:[#allocation40_spill] sm:$0xff] %v8374_v18 }
 0x6ac   : > { %v2764_v27 = vpop.xlane.xlu2 %2763 }
 0x6ad   : > { %v2765_v9 = vcvt.f32.s32 %v2764_v27 }
 0x6af   : > { %v2768_v51 = vadd.s32 %v2767_v22, %v2765_v9  ;;  %v2142_v22 = vmul.f32 %v10512_v50, %v8369_v38  ;;  %v5348_v9 = vpop.eup %5347 }
 0x6b0   : > { %v8385_v20 = vsel %vm2007_vm8, %v5348_v9, 0.0 }
 0x6b1   : > { %vm2878_vm7 = vcmp.eq.s32.totalorder %v6120_v60, %v2768_v51  ;;  %v5350_v51 = vpop.eup %5349  ;;  %10514 = vst [vmem:[#allocation18_spill] sm:$0xff] %v8385_v20 }
 0x6b2   : > { %v8372_v46 = vsel %vm2878_vm7, 1.0, %v10149_v44  ;;  %v8390_v50 = vsel %vm2967_vm9, %v5350_v51, 0.0 }
 0x6b3   : > { %v3102_v57 = vmul.f32 %v8372_v46, %v8374_v18  ;;  %10515 = vst [vmem:[#allocation117_spill] sm:$0xff] %v8390_v50  ;;  %v10521_v18 = vld [vmem:[#allocation19_spill] sm:$0xff] }
 0x6b4   : > { %v2666_v35 = vpop.xlane.xlu2 %2665  ;;  %v2839_v38 = vand.u32 65535, %v10521_v18  ;;  %v10525_v18 = vld [vmem:[#allocation64_spill] sm:$0xff] }
 0x6b5   : > { %v2667_v27 = vcvt.f32.s32 %v2666_v35  ;;  %v8380_v42 = vadd.f32 %v3102_v57, %v2142_v22  ;;  %v2135_v22 = vmul.f32 %v10516_v7, %v8385_v20  ;;  %v10517_v35 = vld [vmem:[#allocation128_spill] sm:$0xff]  ;;  %v10523_v7 = vld [vmem:[#allocation129_spill] sm:$0xff]  ;;  %v2047_v20 = vmax.f32 %v10525_v18, 1e-16 }
 0x6b6   : > { %vm2015_vm1 = vcmp.lt.f32.partialorder %v10525_v18, 1e+30 }
 0x6b7   : > { %10513 = vst [vmem:[#allocation116_spill] sm:$0xff] %v8380_v42  ;;  %v2670_v29 = vadd.s32 %v2669_v1, %v2667_v27  ;;  %v2825_v1 = vand.u32 65535, %v10517_v35  ;;  %v3000_v27 = vmax.f32 %v10518_v53, 1e-16 }
 0x6b9   : > { %vm2871_vm10 = vcmp.eq.s32.totalorder %v6120_v60, %v2670_v29  ;;  %v10520_v29 = vld [vmem:[#allocation13_spill] sm:$0xff]  ;;  %v2827_v51 = vcvt.s32.f32 %v2825_v1  ;;  %5351 = vrcp.f32 %v3000_v27 }
 0x6ba   : > { %v8388_v11 = vsel %vm2871_vm10, 1.0, %v10149_v44  ;;  %v2040_v9 = vmax.f32 %v10520_v29, 1e-16  ;;  %vm2008_vm13 = vcmp.lt.f32.partialorder %v10520_v29, 1e+30 }
 0x6bb   : > { %v3095_v57 = vmul.f32 %v8388_v11, %v8390_v50 }
 0x6bc   : > { %5353 = vrcp.f32 %v2040_v9 }
 0x6bd   : > { %v8398_v63 = vadd.f32 %v3095_v57, %v2135_v22  ;;  %v2841_v22 = vcvt.s32.f32 %v2839_v38  ;;  %5355 = vrcp.f32 %v2047_v20  ;;  %v10527_v38 = vld [vmem:[#allocation60_spill] sm:$0xff]  ;;  %v10531_v20 = vld [vmem:[#allocation27_spill] sm:$0xff] }
 0x6be   : > { %5357 = vrcp.f32 %v2048_v32  ;;  %v10533_v32 = vld [vmem:[#allocation21_spill] sm:$0xff]  ;;  %vm2975_vm4 = vcmp.lt.f32.partialorder %v10527_v38, 1e+30 }
 0x6bf   : > { %10519 = vst [vmem:[#allocation84_spill] sm:$0xff] %v8398_v63  ;;  %v2683_v63 = vshll.u32 %v2682_v30, 16  ;;  %v5352_v25 = vpop.eup %5351  ;;  %v10528_v30 = vld [vmem:[#allocation45_spill] sm:$0xff]  ;;  %vm2010_vm3 = vcmp.lt.f32.partialorder %v10533_v32, 1e+30 }
 0x6c0   : > { %v8402_v42 = vpop.xlane.xlu0 %2829  ;;  %vm2976_vm6 = vcmp.lt.f32.partialorder %v10528_v30, 1e+30 }
 0x6c1   : > { %10522 = vst [vmem:[#allocation7_spill] sm:$0xff] %v8402_v42  ;;  %vm2831_vm11 = vcmp.eq.f32.partialorder %v10523_v7, %v8402_v42 }
 0x6c2   : > { %v2832_v50 = vsel %vm2831_vm11, %v2827_v51, inf  ;;  %v5354_v9 = vpop.eup %5353  ;;  %v3008_v51 = vmax.f32 %v10528_v30, 1e-16 }
 0x6c3   : > { %2833 = vmin.xlane.f32.xlu1 %v2832_v50 }
 0x6c4   : > { %v8407_v35 = vpop.xlane.xlu2 %2843  ;;  %v2680_v57 = vpop.xlane.xlu1 %2679 }
 0x6c5   : > { %10524 = vst [vmem:[#allocation74_spill] sm:$0xff] %v8407_v35  ;;  %vm2845_vm12 = vcmp.eq.f32.partialorder %v8078_v34, %v8407_v35  ;;  %v2681_v1 = vcvt.f32.s32 %v2680_v57  ;;  %v3007_v34 = vmax.f32 %v10527_v38, 1e-16  ;;  %v8423_v57 = vsel %vm2968_vm14, %v5352_v25, 0.0  ;;  %v10536_v35 = vld [vmem:[#allocation26_spill] sm:$0xff] }
 0x6c6   : > { %v2846_v27 = vsel %vm2845_vm12, %v2841_v22, inf  ;;  %10529 = vst [vmem:[#allocation89_spill] sm:$0xff] %v8423_v57  ;;  %v3002_v42 = vmax.f32 %v10536_v35, 1e-16  ;;  %vm2970_vm10 = vcmp.lt.f32.partialorder %v10536_v35, 1e+30 }
 0x6c7   : > { %2847 = vmin.xlane.f32.xlu0 %v2846_v27  ;;  %v2684_v7 = vadd.s32 %v2683_v63, %v2681_v1  ;;  %v8425_v63 = vsel %vm2008_vm13, %v5354_v9, 0.0  ;;  %5359 = vrcp.f32 %v3007_v34  ;;  %v2780_v27 = vcvt.f32.s32 %v8095_v40  ;;  %v10537_v40 = vld [vmem:[#allocation4_spill] sm:$0xff] }
 0x6c8   : > { %v8414_v50 = vpop.xlane.xlu0 %3263  ;;  %10530 = vst [vmem:[#allocation59_spill] sm:$0xff] %v8425_v63  ;;  %v2136_v53 = vmul.f32 %v10531_v20, %v8425_v63  ;;  %5361 = vrcp.f32 %v3008_v51  ;;  %v2041_v34 = vmax.f32 %v10537_v40, 1e-16  ;;  %vm3198_vm12 = vcmp.gt.f32.partialorder %v8372_v46, 0.0  ;;  %v10555_v46 = vld [vmem:[#allocation34_spill] sm:$0xff] }
 0x6c9   : > { %vm2872_vm15 = vcmp.eq.s32.totalorder %v6120_v60, %v2684_v7  ;;  %v2042_v7 = vmax.f32 %v10533_v32, 1e-16  ;;  %vm2009_vm14 = vcmp.lt.f32.partialorder %v10537_v40, 1e+30  ;;  %v10556_v40 = vld [vmem:[#allocation15_spill] sm:$0xff] }
 0x6ca   : > { %v8421_v22 = vsel %vm2872_vm15, 1.0, %v10149_v44 }
 0x6cb   : > { %v3096_v29 = vmul.f32 %v8421_v22, %v8423_v57  ;;  %v5356_v57 = vpop.eup %5355  ;;  %5363 = vrcp.f32 %v2042_v7  ;;  %vm3192_vm7 = vcmp.gt.f32.partialorder %v8421_v22, 0.0 }
 0x6cc   : > { %v8431_v1 = vpop.xlane.xlu1 %3261  ;;  %v5358_v63 = vpop.eup %5357  ;;  %5365 = vrcp.f32 %v3002_v42 }
 0x6cd   : > { %10532 = vst [vmem:[#allocation55_spill] sm:$0xff] %v8431_v1  ;;  %vm3313_vm0 = vcmp.eq.f32.partialorder %v8107_v54, %v8431_v1  ;;  %v8440_v9 = vadd.f32 %v3096_v29, %v2136_v53  ;;  %v2781_v54 = vshll.u32 %v2780_v27, 16  ;;  %v2794_v1 = vcvt.f32.s32 %v8139_v58  ;;  %v5360_v53 = vpop.eup %5359  ;;  %v10541_v58 = vld [vmem:[#allocation102_spill] sm:$0xff] }
 0x6ce   : > { %v8438_v25 = vsel %vm3313_vm0, %v6120_v60, 128  ;;  %v8450_v29 = vsel %vm2015_vm1, %v5356_v57, 0.0  ;;  %v5362_v27 = vpop.eup %5361  ;;  %5367 = vrcp.f32 %v2041_v34  ;;  %v8462_v42 = vsel %vm2975_vm4, %v5360_v53, 0.0  ;;  %v10543_v34 = vld [vmem:[#allocation25_spill] sm:$0xff] }
 0x6cf   : > { %10534 = vst [vmem:[#allocation124_spill] sm:$0xff] %v8438_v25  ;;  %v3534_v20 = vshra.s32 %v8438_v25, 16  ;;  %v2795_v57 = vshll.u32 %v2794_v1, 16  ;;  %v3381_v53 = vcvt.s32.f32 %v3379_v0  ;;  %vm2969_vm0 = vcmp.lt.f32.partialorder %v10541_v58, 1e+30 }
 0x6d0   : > { %10535 = vst [vmem:[#allocation97_spill] sm:$0xff] %v8440_v9  ;;  %v2778_v59 = vpop.xlane.xlu0 %2777  ;;  %v8453_v9 = vsel %vm2016_vm2, %v5358_v63, 0.0  ;;  %vm3197_vm2 = vcmp.gt.f32.partialorder %v8343_v3, 0.0  ;;  %v10560_v3 = vld [vmem:[#allocation77_spill] sm:$0xff] }
 0x6d1   : > { %v2779_v51 = vcvt.f32.s32 %v2778_v59  ;;  %v8447_v23 = vcvt.s32.f32 %v3534_v20  ;;  %10539 = vst [vmem:[#allocation128_spill] sm:$0xff] %v8450_v29  ;;  %v3001_v59 = vmax.f32 %v10541_v58, 1e-16  ;;  %v2710_v20 = vcvt.f32.s32 %v8150_v15  ;;  %v5364_v1 = vpop.eup %5363 }
 0x6d2   : > { %10540 = vst [vmem:[#allocation11_spill] sm:$0xff] %v8453_v9  ;;  %v2143_v15 = vmul.f32 %v10543_v34, %v8450_v29  ;;  %v10564_v29 = vld [vmem:[#allocation75_spill] sm:$0xff] }
 0x6d3   : > { %10538 = vst [vmem:[#allocation100_spill] sm:$0xff] %v8447_v23  ;;  %v2782_v18 = vadd.s32 %v2781_v54, %v2779_v51  ;;  %3537 = vmin.xlane.f32.xlu0 %v8447_v23  ;;  %v8468_v54 = vsel %vm2976_vm6, %v5362_v27, 0.0  ;;  %5369 = vrcp.f32 %v3001_v59  ;;  %v5366_v23 = vpop.eup %5365  ;;  %v10545_v27 = vld [vmem:[#allocation90_spill] sm:$0xff]  ;;  %vm3314_vm6 = vcmp.eq.f32.partialorder %v8087_v4, %v8414_v50 }
 0x6d4   : > { %v2792_v25 = vpop.xlane.xlu2 %2791  ;;  %10542 = vst [vmem:[#allocation13_spill] sm:$0xff] %v8462_v42  ;;  %v8582_v4 = vsel %vm3314_vm6, %v6120_v60, 128 }
 0x6d5   : > { %vm2879_vm5 = vcmp.eq.s32.totalorder %v6120_v60, %v2782_v18  ;;  %v2793_v63 = vcvt.f32.s32 %v2792_v25  ;;  %10544 = vst [vmem:[#allocation19_spill] sm:$0xff] %v8468_v54  ;;  %v2711_v25 = vshll.u32 %v2710_v20, 16 }
 0x6d6   : > { %v5035_v7 = vsel %vm2879_vm5, 1.0, %v10149_v44 }
 0x6d7   : > { %v2796_v14 = vadd.s32 %v2795_v57, %v2793_v63  ;;  %v3103_v38 = vmul.f32 %v5035_v7, %v8462_v42  ;;  %v8480_v57 = vsel %vm3192_vm7, 1e+30, %v10545_v27  ;;  %v5368_v63 = vpop.eup %5367  ;;  %v10551_v27 = vld [vmem:[#allocation38_spill] sm:$0xff]  ;;  %vm3199_vm13 = vcmp.gt.f32.partialorder %v5035_v7, 0.0 }
 0x6d8   : > { %v2708_v51 = vpop.xlane.xlu1 %2707  ;;  %v8471_v18 = vpop.xlane.xlu0 %3383  ;;  %v8527_v7 = vsel %vm3198_vm12, 1e+30, %v10555_v46  ;;  %v10559_v46 = vld [vmem:[#allocation85_spill] sm:$0xff] }
 0x6d9   : > { %v2709_v30 = vcvt.f32.s32 %v2708_v51  ;;  %vm2880_vm8 = vcmp.eq.s32.totalorder %v6120_v60, %v2796_v14  ;;  %vm3385_vm9 = vcmp.eq.f32.partialorder %v8158_v2, %v8471_v18  ;;  %v8485_v0 = vadd.f32 %v3103_v38, %v2143_v15 }
 0x6da   : > { %v3386_v20 = vsel %vm3385_vm9, %v3381_v53, inf  ;;  %v8483_v34 = vsel %vm2880_vm8, 1.0, %v10149_v44  ;;  %v2144_v51 = vmul.f32 %v10547_v62, %v8453_v9  ;;  %v3365_v2 = vand.u32 65535, %v8156_v26  ;;  %v5370_v26 = vpop.eup %5369 }
 0x6db   : > { %v2712_v59 = vadd.s32 %v2711_v25, %v2709_v30  ;;  %10546 = vst [vmem:[#allocation129_spill] sm:$0xff] %v8485_v0  ;;  %3387 = vmin.xlane.f32.xlu1 %v3386_v20  ;;  %3275 = vmin.xlane.f32.xlu0 %v8480_v57  ;;  %v3104_v22 = vmul.f32 %v8483_v34, %v8468_v54  ;;  %v8496_v14 = vsel %vm2010_vm3, %v5364_v1, 0.0  ;;  %v8498_v25 = vsel %vm2970_vm10, %v5366_v23, 0.0 }
 0x6dc   : > { %10548 = vst [vmem:[#allocation64_spill] sm:$0xff] %v8496_v14  ;;  %v2694_v15 = vpop.xlane.xlu2 %2693  ;;  %v2697_v38 = vshll.u32 %v2696_v36, 16  ;;  %v2138_v20 = vmul.f32 %v10551_v27, %v8496_v14  ;;  %v3367_v62 = vcvt.s32.f32 %v3365_v2  ;;  %v8524_v2 = vsel %vm2969_vm0, %v5370_v26, 0.0 }
 0x6dd   : > { %10549 = vst [vmem:[#allocation31_spill] sm:$0xff] %v8498_v25  ;;  %vm2874_vm11 = vcmp.eq.s32.totalorder %v6120_v60, %v2712_v59  ;;  %v2695_v30 = vcvt.f32.s32 %v2694_v15  ;;  %v8504_v53 = vadd.f32 %v3104_v22, %v2144_v51  ;;  %v8520_v51 = vsel %vm2009_vm14, %v5368_v63, 0.0  ;;  %v10557_v63 = vld [vmem:[#allocation101_spill] sm:$0xff] }
 0x6de   : > { %v8502_v35 = vsel %vm2874_vm11, 1.0, %v10149_v44  ;;  %10553 = vst [vmem:[#allocation27_spill] sm:$0xff] %v8520_v51  ;;  %v8530_v15 = vsel %vm3199_vm13, 1e+30, %v10556_v40  ;;  %v3407_v26 = vand.u32 65535, %v8161_v56  ;;  %v3435_v27 = vand.u32 65535, %v8176_v28 }
 0x6df   : > { %10550 = vst [vmem:[#allocation60_spill] sm:$0xff] %v8504_v53  ;;  %v3098_v32 = vmul.f32 %v8502_v35, %v8498_v25  ;;  %v2698_v1 = vadd.s32 %v2697_v38, %v2695_v30  ;;  %v2137_v38 = vmul.f32 %v10557_v63, %v8520_v51  ;;  %v8557_v56 = vsel %vm3197_vm2, 1e+30, %v10559_v46  ;;  %v10566_v25 = vld [vmem:[#allocation103_spill] sm:$0xff] }
 0x6e0   : > { %v8510_v23 = vpop.xlane.xlu1 %3369  ;;  %v8514_v36 = vpop.xlane.xlu0 %3411  ;;  %10554 = vst [vmem:[#allocation21_spill] sm:$0xff] %v8524_v2  ;;  %v2049_v63 = vmax.f32 %v10560_v3, 1e-16  ;;  %vm3191_vm8 = vcmp.gt.f32.partialorder %v8388_v11, 0.0  ;;  %vm2017_vm11 = vcmp.lt.f32.partialorder %v10560_v3, 1e+30 }
 0x6e1   : > { %vm3371_vm15 = vcmp.eq.f32.partialorder %v8181_v41, %v8510_v23  ;;  %v8518_v59 = vadd.f32 %v3098_v32, %v2138_v20  ;;  %vm2873_vm1 = vcmp.eq.s32.totalorder %v6120_v60, %v2698_v1  ;;  %vm3413_vm3 = vcmp.eq.f32.partialorder %v8186_v6, %v8514_v36 }
 0x6e2   : > { %v3372_v22 = vsel %vm3371_vm15, %v3367_v62, inf  ;;  %v8533_v41 = vsel %vm2873_vm1, 1.0, %v10149_v44  ;;  %v3409_v62 = vcvt.s32.f32 %v3407_v26  ;;  %v3393_v6 = vand.u32 65535, %v8184_v33 }
 0x6e3   : > { %10552 = vst [vmem:[#allocation45_spill] sm:$0xff] %v8518_v59  ;;  %3373 = vmin.xlane.f32.xlu2 %v3372_v22  ;;  %3287 = vmin.xlane.f32.xlu1 %v8527_v7  ;;  %v3097_v58 = vmul.f32 %v8533_v41, %v8524_v2  ;;  %v3437_v22 = vcvt.s32.f32 %v3435_v27  ;;  %5371 = vrcp.f32 %v2049_v63  ;;  %v3548_v63 = vshra.s32 %v8582_v4, 16  ;;  %v10580_v59 = vld [vmem:[#allocation29_spill] sm:$0xff] }
 0x6e4   : > { %3289 = vmin.xlane.f32.xlu0 %v8530_v15  ;;  %v8541_v30 = vpop.xlane.xlu2 %3439  ;;  %v3414_v28 = vsel %vm3413_vm3, %v3409_v62, inf  ;;  %v3395_v33 = vcvt.s32.f32 %v3393_v6  ;;  %v3421_v6 = vand.u32 65535, %v8191_v17  ;;  %v3010_v14 = vmax.f32 %v10566_v25, 1e-16 }
 0x6e5   : > { %v8545_v20 = vadd.f32 %v3097_v58, %v2137_v38  ;;  %vm3441_vm4 = vcmp.eq.f32.partialorder %v8196_v12, %v8541_v30  ;;  %v10561_v12 = vld [vmem:[#allocation94_spill] sm:$0xff]  ;;  %vm3200_vm14 = vcmp.gt.f32.partialorder %v8483_v34, 0.0  ;;  %vm2018_vm1 = vcmp.lt.f32.partialorder %v10564_v29, 1e+30 }
 0x6e6   : > { %v3442_v40 = vsel %vm3441_vm4, %v3437_v22, inf  ;;  %v3009_v38 = vmax.f32 %v10561_v12, 1e-16  ;;  %vm2977_vm12 = vcmp.lt.f32.partialorder %v10561_v12, 1e+30  ;;  %v2822_v12 = vcvt.f32.s32 %v8294_v8  ;;  %v10573_v8 = vld [vmem:[#allocation67_spill] sm:$0xff] }
 0x6e7   : > { %10558 = vst [vmem:[#allocation26_spill] sm:$0xff] %v8545_v20  ;;  %vm2978_vm2 = vcmp.lt.f32.partialorder %v10566_v25, 1e+30  ;;  %vm3193_vm3 = vcmp.gt.f32.partialorder %v8533_v41, 0.0  ;;  %vm3194_vm6 = vcmp.gt.f32.partialorder %v8502_v35, 0.0  ;;  %v10586_v35 = vld [vmem:[#allocation51_spill] sm:$0xff] }
 0x6e8   : > { %v8552_v32 = vpop.xlane.xlu1 %3397  ;;  %v8554_v1 = vpop.xlane.xlu0 %3425  ;;  %5373 = vrcp.f32 %v3009_v38  ;;  %v2823_v2 = vshll.u32 %v2822_v12, 16 }
 0x6e9   : > { %vm3399_vm7 = vcmp.eq.f32.partialorder %v8210_v52, %v8552_v32  ;;  %v5372_v38 = vpop.eup %5371  ;;  %vm3427_vm9 = vcmp.eq.f32.partialorder %v8216_v31, %v8554_v1 }
 0x6ea   : > { %v3400_v52 = vsel %vm3399_vm7, %v3395_v33, inf  ;;  %v8606_v9 = vsel %vm2017_vm11, %v5372_v38, 0.0 }
 0x6eb   : > { %3285 = vmin.xlane.f32.xlu2 %v8557_v56  ;;  %3415 = vmin.xlane.f32.xlu1 %v3414_v28  ;;  %v10563_v28 = vld [vmem:[#allocation50_spill] sm:$0xff]  ;;  %10565 = vst [vmem:[#allocation102_spill] sm:$0xff] %v8606_v9 }
 0x6ec   : > { %3443 = vmin.xlane.f32.xlu0 %v3442_v40  ;;  %v8563_v58 = vpop.xlane.xlu2 %3267  ;;  %v8587_v40 = vsel %vm3191_vm8, 1e+30, %v10563_v28 }
 0x6ed   : > { %10562 = vst [vmem:[#allocation4_spill] sm:$0xff] %v8563_v58  ;;  %vm3316_vm5 = vcmp.eq.f32.partialorder %v8243_v16, %v8563_v58  ;;  %v2808_v16 = vcvt.f32.s32 %v8203_v49  ;;  %v3449_v49 = vand.u32 65535, %v8214_v21  ;;  %v8604_v21 = vcvt.s32.f32 %v3548_v63  ;;  %v10568_v63 = vld [vmem:[#allocation111_spill] sm:$0xff] }
 0x6ee   : > { %v8572_v26 = vsel %vm3316_vm5, %v6120_v60, 128 }
 0x6ef   : > { %v3576_v62 = vshra.s32 %v8572_v26, 16  ;;  %v2809_v42 = vshll.u32 %v2808_v16, 16  ;;  %v3423_v16 = vcvt.s32.f32 %v3421_v6  ;;  %v2145_v6 = vmul.f32 %v10568_v63, %v8606_v9 }
 0x6f0   : > { %v8574_v27 = vpop.xlane.xlu1 %3453  ;;  %v8578_v22 = vpop.xlane.xlu0 %3467 }
 0x6f1   : > { %v8584_v46 = vcvt.s32.f32 %v3576_v62  ;;  %v5374_v62 = vpop.eup %5373  ;;  %vm3455_vm10 = vcmp.eq.f32.partialorder %v8250_v19, %v8574_v27  ;;  %v3428_v19 = vsel %vm3427_vm9, %v3423_v16, inf  ;;  %v10571_v16 = vld [vmem:[#allocation76_spill] sm:$0xff]  ;;  %vm3469_vm9 = vcmp.eq.f32.partialorder %v8258_v47, %v8578_v22 }
 0x6f2   : > { %v8611_v31 = vsel %vm2977_vm12, %v5374_v62, 0.0  ;;  %vm2971_vm7 = vcmp.lt.f32.partialorder %v10571_v16, 1e+30 }
 0x6f3   : > { %3401 = vmin.xlane.f32.xlu2 %v3400_v52  ;;  %3273 = vmin.xlane.f32.xlu1 %v8587_v40  ;;  %v2050_v52 = vmax.f32 %v10564_v29, 1e-16  ;;  %10567 = vst [vmem:[#allocation25_spill] sm:$0xff] %v8611_v31 }
 0x6f4   : > { %3579 = vmin.xlane.f32.xlu0 %v8584_v46  ;;  %v2806_v11 = vpop.xlane.xlu2 %2805 }
 0x6f5   : > { %v2807_v33 = vcvt.f32.s32 %v2806_v11  ;;  %v3451_v11 = vcvt.s32.f32 %v3449_v49  ;;  %5375 = vrcp.f32 %v2050_v52 }
 0x6f6   : > { %5377 = vrcp.f32 %v3010_v14  ;;  %v8634_v14 = vsel %vm3200_vm14, 1e+30, %v10573_v8  ;;  %v10576_v8 = vld [vmem:[#allocation81_spill] sm:$0xff] }
 0x6f7   : > { %v2810_v28 = vadd.s32 %v2809_v42, %v2807_v33  ;;  %v3456_v42 = vsel %vm3455_vm10, %v3451_v11, inf  ;;  %v10570_v33 = vld [vmem:[#allocation78_spill] sm:$0xff]  ;;  %v3003_v11 = vmax.f32 %v10571_v16, 1e-16 }
 0x6f8   : > { %v8599_v54 = vpop.xlane.xlu1 %3481  ;;  %v8602_v17 = vpop.xlane.xlu0 %3495  ;;  %v2043_v62 = vmax.f32 %v10570_v33, 1e-16  ;;  %vm2011_vm5 = vcmp.lt.f32.partialorder %v10570_v33, 1e+30  ;;  %v8686_v33 = vsel %vm3194_vm6, 1e+30, %v10586_v35 }
 0x6f9   : > { %vm2881_vm13 = vcmp.eq.s32.totalorder %v6120_v60, %v2810_v28  ;;  %v3505_v35 = vand.u32 65535, %v8315_v48 }
 0x6fa   : > { %v8615_v3 = vsel %vm2881_vm13, 1.0, %v10149_v44  ;;  %5379 = vrcp.f32 %v2043_v62  ;;  %vm2012_vm13 = vcmp.lt.f32.partialorder %v10576_v8, 1e+30 }
 0x6fb   : > { %3551 = vmin.xlane.f32.xlu2 %v8604_v21  ;;  %3429 = vmin.xlane.f32.xlu1 %v3428_v19  ;;  %v3105_v49 = vmul.f32 %v8615_v3, %v8611_v31  ;;  %v5376_v52 = vpop.eup %5375  ;;  %5381 = vrcp.f32 %v3003_v11  ;;  %v2044_v11 = vmax.f32 %v10576_v8, 1e-16  ;;  %vm3201_vm12 = vcmp.gt.f32.partialorder %v8615_v3, 0.0  ;;  %v10592_v8 = vld [vmem:[#allocation82_spill] sm:$0xff] }
 0x6fc   : > { %3457 = vmin.xlane.f32.xlu0 %v3456_v42  ;;  %v8629_v42 = vpop.xlane.xlu2 %3523 }
 0x6fd   : > { %v8622_v38 = vadd.f32 %v3105_v49, %v2145_v6  ;;  %v5378_v49 = vpop.eup %5377  ;;  %5383 = vrcp.f32 %v2044_v11 }
 0x6fe   : > { %v8649_v62 = vsel %vm2978_vm2, %v5378_v49, 0.0 }
 0x6ff   : > { %10569 = vst [vmem:[#allocation90_spill] sm:$0xff] %v8622_v38  ;;  %v10579_v38 = vld [vmem:[#allocation71_spill] sm:$0xff] }
 0x700   : > { %v2820_v28 = vpop.xlane.xlu1 %2819  ;;  %v8627_v19 = vpop.xlane.xlu0 %3265  ;;  %10575 = vst [vmem:[#allocation34_spill] sm:$0xff] %v8649_v62 }
 0x701   : > { %v2821_v63 = vcvt.f32.s32 %v2820_v28  ;;  %10572 = vst [vmem:[#allocation62_spill] sm:$0xff] %v8627_v19  ;;  %vm3315_vm15 = vcmp.eq.f32.partialorder %v8318_v37, %v8627_v19  ;;  %v2724_v28 = vcvt.f32.s32 %v8321_v61  ;;  %v10577_v61 = vld [vmem:[#allocation112_spill] sm:$0xff] }
 0x702   : > { %v8637_v34 = vsel %vm3315_vm15, %v6120_v60, 128 }
 0x703   : > { %v2824_v6 = vadd.s32 %v2823_v2, %v2821_v63  ;;  %3291 = vmin.xlane.f32.xlu2 %v8634_v14  ;;  %v3562_v12 = vshra.s32 %v8637_v34, 16  ;;  %v8647_v2 = vsel %vm2018_vm1, %v5376_v52, 0.0  ;;  %v10578_v52 = vld [vmem:[#allocation63_spill] sm:$0xff]  ;;  %v2725_v49 = vshll.u32 %v2724_v28, 16 }
 0x704   : > { %10574 = vst [vmem:[#allocation38_spill] sm:$0xff] %v8647_v2  ;;  %v2146_v31 = vmul.f32 %v10577_v61, %v8647_v2  ;;  %v8666_v61 = vsel %vm3193_vm3, 1e+30, %v10580_v59  ;;  %v10584_v59 = vld [vmem:[#allocation49_spill] sm:$0xff]  ;;  %vm2972_vm14 = vcmp.lt.f32.partialorder %v10578_v52, 1e+30  ;;  %vm3497_vm1 = vcmp.eq.f32.partialorder %v8296_v45, %v8602_v17 }
 0x705   : > { %vm2882_vm0 = vcmp.eq.s32.totalorder %v6120_v60, %v2824_v6  ;;  %v8645_v37 = vcvt.s32.f32 %v3562_v12  ;;  %v5380_v6 = vpop.eup %5379  ;;  %v3004_v12 = vmax.f32 %v10578_v52, 1e-16 }
 0x706   : > { %v5038_v63 = vsel %vm2882_vm0, 1.0, %v10149_v44  ;;  %v5382_v53 = vpop.eup %5381  ;;  %v8673_v28 = vsel %vm2011_vm5, %v5380_v6, 0.0 }
 0x707   : > { %3565 = vmin.xlane.f32.xlu1 %v8645_v37  ;;  %v3106_v25 = vmul.f32 %v5038_v63, %v8649_v62  ;;  %vm3202_vm4 = vcmp.gt.f32.partialorder %v5038_v63, 0.0  ;;  %10582 = vst [vmem:[#allocation101_spill] sm:$0xff] %v8673_v28  ;;  %v2139_v62 = vmul.f32 %v10584_v59, %v8673_v28  ;;  %5385 = vrcp.f32 %v3004_v12  ;;  %v5384_v12 = vpop.eup %5383 }
 0x708   : > { %v2722_v29 = vpop.xlane.xlu1 %2721  ;;  %v8659_v51 = vpop.xlane.xlu0 %3509  ;;  %v8662_v41 = vsel %vm3202_vm4, 1e+30, %v10579_v38 }
 0x709   : > { %v2723_v9 = vcvt.f32.s32 %v2722_v29  ;;  %3295 = vmin.xlane.f32.xlu0 %v8662_v41  ;;  %v8668_v2 = vadd.f32 %v3106_v25, %v2146_v31  ;;  %v8675_v38 = vpop.xlane.xlu2 %3269  ;;  %v3463_v29 = vand.u32 65535, %v8219_v5  ;;  %v2738_v31 = vcvt.f32.s32 %v8307_v39 }
 0x70a   : > { %10583 = vst [vmem:[#allocation85_spill] sm:$0xff] %v8675_v38  ;;  %vm3317_vm10 = vcmp.eq.f32.partialorder %v8330_v43, %v8675_v38  ;;  %vm3511_vm15 = vcmp.eq.f32.partialorder %v8333_v24, %v8659_v51 }
 0x70b   : > { %10581 = vst [vmem:[#allocation15_spill] sm:$0xff] %v8668_v2  ;;  %v2726_v63 = vadd.s32 %v2725_v49, %v2723_v9  ;;  %3277 = vmin.xlane.f32.xlu2 %v8666_v61  ;;  %v8682_v9 = vsel %vm2971_vm7, %v5382_v53, 0.0  ;;  %v10587_v53 = vld [vmem:[#allocation69_spill] sm:$0xff]  ;;  %v3465_v39 = vcvt.s32.f32 %v3463_v29  ;;  %v2739_v49 = vshll.u32 %v2738_v31, 16 }
 0x70c   : > { %10585 = vst [vmem:[#allocation77_spill] sm:$0xff] %v8682_v9  ;;  %v8708_v29 = vsel %vm2012_vm13, %v5384_v12, 0.0  ;;  %v3446_v2 = vcvt.f32.s32 %v8541_v30 }
 0x70d   : > { %vm2875_vm8 = vcmp.eq.s32.totalorder %v6120_v60, %v2726_v63  ;;  %v8701_v63 = vsel %vm3317_vm10, %v6120_v60, 128  ;;  %v3470_v43 = vsel %vm3469_vm9, %v3465_v39, inf  ;;  %v5386_v59 = vpop.eup %5385  ;;  %10589 = vst [vmem:[#allocation50_spill] sm:$0xff] %v8708_v29  ;;  %v2140_v39 = vmul.f32 %v10592_v8, %v8708_v29 }
 0x70e   : > { %v5031_v11 = vsel %vm2875_vm8, 1.0, %v10149_v44  ;;  %v8714_v31 = vsel %vm2972_vm14, %v5386_v59, 0.0 }
 0x70f   : > { %v3099_v5 = vmul.f32 %v5031_v11, %v8682_v9  ;;  %vm3195_vm11 = vcmp.gt.f32.partialorder %v5031_v11, 0.0  ;;  %3279 = vmin.xlane.f32.xlu1 %v8686_v33  ;;  %10590 = vst [vmem:[#allocation75_spill] sm:$0xff] %v8714_v31 }
 0x710   : > { %v8696_v16 = vsel %vm3195_vm11, 1e+30, %v10587_v53  ;;  %v2736_v25 = vpop.xlane.xlu0 %2735  ;;  %v3507_v53 = vcvt.s32.f32 %v3505_v35  ;;  %v10595_v35 = vld [vmem:[#allocation135_spill] sm:$0xff] }
 0x711   : > { %v8698_v6 = vadd.f32 %v3099_v5, %v2139_v62  ;;  %v2737_v47 = vcvt.f32.s32 %v2736_v25  ;;  %3281 = vmin.xlane.f32.xlu0 %v8696_v16  ;;  %v3590_v62 = vshra.s32 %v8701_v63, 16  ;;  %v10591_v5 = vld [vmem:[#allocation24_spill] sm:$0xff]  ;;  %v8724_v25 = vpop.xlane.xlu1 %3271  ;;  %vm3483_vm3 = vcmp.eq.f32.partialorder %v10595_v35, %v8599_v54  ;;  %v10600_v35 = vld [vmem:[#allocation127_spill] sm:$0xff] }
 0x712   : > { %v8717_v48 = vsel %vm3201_vm12, 1e+30, %v10591_v5  ;;  %10593 = vst [vmem:[#allocation103_spill] sm:$0xff] %v8724_v25  ;;  %v3512_v24 = vsel %vm3511_vm15, %v3507_v53, inf  ;;  %vm3318_vm2 = vcmp.eq.f32.partialorder %v8357_v13, %v8724_v25  ;;  %v5214_v5 = vld [vmem:[%s9661_s4 + $0x38] sm:$0xff]  ;;  %v10596_v13 = vld [vmem:[#allocation83_spill] sm:$0xff] }
 0x713   : > { %10588 = vst [vmem:[#allocation94_spill] sm:$0xff] %v8698_v6  ;;  %3471 = vmin.xlane.f32.xlu2 %v3470_v43  ;;  %v2740_v11 = vadd.s32 %v2739_v49, %v2737_v47  ;;  %v8726_v12 = vcvt.s32.f32 %v3590_v62  ;;  %v3491_v49 = vand.u32 65535, %v8262_v55  ;;  %v3477_v43 = vand.u32 65535, %v8256_v10  ;;  %4213 = vmatpush.bf16.msra.mxu0 %v5214_v5  ;;  %v10626_v25 = vld [vmem:[#allocation20_spill] sm:$0xff] }
 0x714   : > { %5232 = vmatpush.bf16.msra.mxu3 %v5214_v5  ;;  %v10601_v5 = vld [vmem:[#allocation86_spill] sm:$0xff]  ;;  %vm2979_vm7 = vcmp.lt.f32.partialorder %v10600_v35, 1e+30 }
 0x715   : > { %vm2876_vm0 = vcmp.eq.s32.totalorder %v6120_v60, %v2740_v11  ;;  %v3493_v59 = vcvt.s32.f32 %v3491_v49  ;;  %v8740_v11 = vsel %vm3318_vm2, %v6120_v60, 128  ;;  %v3479_v62 = vcvt.s32.f32 %v3477_v43  ;;  %v5212_v49 = vld [vmem:[%s9661_s4 + $0x28] sm:$0xff] }
 0x716   : > { %v5032_v3 = vsel %vm2876_vm0, 1.0, %v10149_v44  ;;  %v3604_v53 = vshra.s32 %v8740_v11, 16  ;;  %vm2020_vm9 = vcmp.lt.f32.partialorder %v10601_v5, 1e+30 }
 0x717   : > { %3293 = vmin.xlane.f32.xlu1 %v8717_v48  ;;  %v3100_v52 = vmul.f32 %v5032_v3, %v8714_v31  ;;  %v3498_v55 = vsel %vm3497_vm1, %v3493_v59, inf  ;;  %v3484_v45 = vsel %vm3483_vm3, %v3479_v62, inf  ;;  %vm3196_vm4 = vcmp.gt.f32.partialorder %v5032_v3, 0.0  ;;  %v10598_v3 = vld [vmem:[#allocation87_spill] sm:$0xff]  ;;  %v10599_v59 = vld [vmem:[#allocation137_spill] sm:$0xff] }
 0x718   : > { %v8746_v10 = vcvt.s32.f32 %v3604_v53  ;;  %v8750_v8 = vsel %vm3196_vm4, 1e+30, %v10596_v13  ;;  %v2051_v43 = vmax.f32 %v10598_v3, 1e-16  ;;  %vm3525_vm5 = vcmp.eq.f32.partialorder %v10599_v59, %v8629_v42  ;;  %v10602_v13 = vld [vmem:[#allocation22_spill] sm:$0xff]  ;;  %v10603_v31 = vld [vmem:[#allocation7_spill] sm:$0xff] }
 0x719   : > { %3513 = vmin.xlane.f32.xlu0 %v3512_v24  ;;  %v8729_v47 = vadd.f32 %v3100_v52, %v2140_v39  ;;  %v5213_v39 = vld [vmem:[%s9661_s4 + $0x30] sm:$0xff]  ;;  %v2836_v29 = vcvt.f32.s32 %v10603_v31  ;;  %vm2019_vm6 = vcmp.lt.f32.partialorder %v10598_v3, 1e+30  ;;  %vm2980_vm11 = vcmp.lt.f32.partialorder %v10602_v13, 1e+30 }
 0x71a   : > { %v10597_v52 = vld [vmem:[#allocation96_spill] sm:$0xff]  ;;  %4214 = vmatpush.bf16.msra.mxu0 %v5213_v39  ;;  %5233 = vmatpush.bf16.msra.mxu3 %v5213_v39  ;;  %5387 = vrcp.f32 %v2051_v43  ;;  %v5211_v39 = vld [vmem:[%s9661_s4 + $0x20] sm:$0xff]  ;;  %v5210_v43 = vld [vmem:[%s9661_s4 + $0x18] sm:$0xff] }
 0x71b   : > { %10594 = vst [vmem:[#allocation111_spill] sm:$0xff] %v8729_v47  ;;  %3593 = vmin.xlane.f32.xlu2 %v8726_v12  ;;  %v3519_v24 = vand.u32 65535, %v10597_v52  ;;  %v3012_v52 = vmax.f32 %v10602_v13, 1e-16  ;;  %v10612_v13 = vld [vmem:[#allocation32_spill] sm:$0xff] }
 0x71d   : > { %v3521_v62 = vcvt.s32.f32 %v3519_v24  ;;  %v10604_v24 = vld [vmem:[#allocation74_spill] sm:$0xff] }
 0x71e   : > { %4215 = vmatpush.bf16.msra.mxu0 %v5212_v49  ;;  %5234 = vmatpush.bf16.msra.mxu3 %v5212_v49  ;;  %v2850_v49 = vcvt.f32.s32 %v10604_v24 }
 0x71f   : > { %3499 = vmin.xlane.f32.xlu1 %v3498_v55  ;;  %v3011_v55 = vmax.f32 %v10600_v35, 1e-16  ;;  %v3526_v53 = vsel %vm3525_vm5, %v3521_v62, inf  ;;  %v2837_v62 = vshll.u32 %v2836_v29, 16 }
 0x720   : > { %v5388_v9 = vpop.eup %5387  ;;  %v2851_v31 = vshll.u32 %v2850_v49, 16 }
 0x721   : > { %5389 = vrcp.f32 %v3011_v55 }
 0x722   : > { %4216 = vmatpush.bf16.msra.mxu0 %v5211_v39  ;;  %5235 = vmatpush.bf16.msra.mxu3 %v5211_v39  ;;  %v8780_v39 = vsel %vm2019_vm6, %v5388_v9, 0.0  ;;  %v10608_v9 = vld [vmem:[#allocation53_spill] sm:$0xff] }
 0x723   : > { %3485 = vmin.xlane.f32.xlu2 %v3484_v45  ;;  %v2052_v45 = vmax.f32 %v10601_v5, 1e-16  ;;  %10605 = vst [vmem:[#allocation78_spill] sm:$0xff] %v8780_v39 }
 0x725   : > { %5391 = vrcp.f32 %v2052_v45  ;;  %v5209_v45 = vld [vmem:[%s9661_s4 + $0x10] sm:$0xff] }
 0x726   : > { %5393 = vrcp.f32 %v3012_v52  ;;  %4217 = vmatpush.bf16.msra.mxu0 %v5210_v43  ;;  %5236 = vmatpush.bf16.msra.mxu3 %v5210_v43 }
 0x727   : > { %3607 = vmin.xlane.f32.xlu1 %v8746_v10  ;;  %v5390_v28 = vpop.eup %5389 }
 0x728   : > { %v8782_v24 = vsel %vm2979_vm7, %v5390_v28, 0.0 }
 0x729   : > { %10606 = vst [vmem:[#allocation76_spill] sm:$0xff] %v8782_v24 }
 0x72a   : > { %4218 = vmatpush.bf16.msra.mxu0 %v5209_v45  ;;  %5237 = vmatpush.bf16.msra.mxu3 %v5209_v45  ;;  %v5207_v45 = vld [vmem:[%s9661_s4] sm:$0xff] }
 0x72b   : > { %3283 = vmin.xlane.f32.xlu2 %v8750_v8  ;;  %v5392_v52 = vpop.eup %5391 }
 0x72c   : > { %v5394_v29 = vpop.eup %5393  ;;  %v8797_v35 = vsel %vm2020_vm9, %v5392_v52, 0.0 }
 0x72d   : > { %10609 = vst [vmem:[#allocation67_spill] sm:$0xff] %v8797_v35  ;;  %v8799_v5 = vsel %vm2980_vm11, %v5394_v29, 0.0 }
 0x72e   : > { %10610 = vst [vmem:[#allocation81_spill] sm:$0xff] %v8799_v5 }
 0x733   : > { %3527 = vmin.xlane.f32.xlu2 %v3526_v53 }
 0x736   : > { %v2834_v59 = vpop.xlane.xlu1 %2833 }
 0x737   : > { %v2835_v53 = vcvt.f32.s32 %v2834_v59 }
 0x739   : > { %v2838_v55 = vadd.s32 %v2837_v62, %v2835_v53 }
 0x73a   : > { %v2848_v6 = vpop.xlane.xlu0 %2847 }
 0x73b   : > { %v2849_v47 = vcvt.f32.s32 %v2848_v6  ;;  %vm2883_vm8 = vcmp.eq.s32.totalorder %v6120_v60, %v2838_v55  ;;  %v10607_v6 = vld [vmem:[#allocation46_spill] sm:$0xff]  ;;  %v2148_v55 = vmul.f32 %v10612_v13, %v8797_v35 }
 0x73c   : > { %v5039_v49 = vsel %vm2883_vm8, 1.0, %v10149_v44  ;;  %v2147_v43 = vmul.f32 %v10607_v6, %v8780_v39  ;;  %v3390_v6 = vcvt.f32.s32 %v8471_v18 }
 0x73d   : > { %v2852_v59 = vadd.s32 %v2851_v31, %v2849_v47  ;;  %v3107_v3 = vmul.f32 %v5039_v49, %v8782_v24  ;;  %vm3203_vm10 = vcmp.gt.f32.partialorder %v5039_v49, 0.0  ;;  %v5208_v47 = vld [vmem:[%s9661_s4 + $0x8] sm:$0xff] }
 0x73e   : > { %v8792_v28 = vsel %vm3203_vm10, 1e+30, %v10608_v9  ;;  %4219 = vmatpush.bf16.msra.mxu0 %v5208_v47  ;;  %5238 = vmatpush.bf16.msra.mxu3 %v5208_v47  ;;  %v10616_v9 = vld [vmem:[#allocation88_spill] sm:$0xff]  ;;  %v3391_v13 = vshll.u32 %v3390_v6, 16 }
 0x73f   : > { %vm2884_vm12 = vcmp.eq.s32.totalorder %v6120_v60, %v2852_v59  ;;  %3297 = vmin.xlane.f32.xlu0 %v8792_v28  ;;  %v8805_v53 = vadd.f32 %v3107_v3, %v2147_v43  ;;  %v10614_v59 = vld [vmem:[#allocation79_spill] sm:$0xff]  ;;  %v3941_v47 = vmax.f32 %v10616_v9, 1e-16  ;;  %vm3909_vm0 = vcmp.lt.f32.partialorder %v10616_v9, 1e+30 }
 0x740   : > { %v8803_v62 = vsel %vm2884_vm12, 1.0, %v10149_v44  ;;  %v3942_v49 = vmax.f32 %v10614_v59, 1e-16  ;;  %vm3910_vm14 = vcmp.lt.f32.partialorder %v10614_v59, 1e+30 }
 0x741   : > { %10611 = vst [vmem:[#allocation112_spill] sm:$0xff] %v8805_v53  ;;  %v3108_v31 = vmul.f32 %v8803_v62, %v8799_v5  ;;  %v3418_v53 = vcvt.f32.s32 %v8514_v36  ;;  %vm3204_vm9 = vcmp.gt.f32.partialorder %v8803_v62, 0.0 }
 0x742   : > { %4220 = vmatpush.bf16.msra.mxu0 %v5207_v45  ;;  %5239 = vmatpush.bf16.msra.mxu3 %v5207_v45  ;;  %5395 = vrcp.f32 %v3942_v49 }
 0x743   : > { %v8814_v52 = vadd.f32 %v3108_v31, %v2148_v55  ;;  %5397 = vrcp.f32 %v3941_v47  ;;  %v3376_v55 = vcvt.f32.s32 %v8510_v23  ;;  %v10621_v23 = vld [vmem:[#allocation125_spill] sm:$0xff] }
 0x744   : > { %vm3914_vm7 = vcmp.lt.f32.partialorder %v10621_v23, 1e+30 }
 0x745   : > { %10613 = vst [vmem:[#allocation63_spill] sm:$0xff] %v8814_v52 }
 0x746   : > { %v8816_v29 = vpop.xlane.xlu0 %3537 }
 0x748   : > { %v5396_v24 = vpop.eup %5395 }
 0x749   : > { %v8827_v18 = vsel %vm3910_vm14, %v5396_v24, 0.0  ;;  %v5398_v24 = vpop.eup %5397 }
 0x74a   : > { %10617 = vst [vmem:[#allocation29_spill] sm:$0xff] %v8827_v18 }
 0x74e   : > { %v3388_v43 = vpop.xlane.xlu1 %3387  ;;  %v8820_v3 = vpop.xlane.xlu0 %3275 }
 0x74f   : > { %10615 = vst [vmem:[#allocation71_spill] sm:$0xff] %v8820_v3  ;;  %v3389_v5 = vcvt.f32.s32 %v3388_v43  ;;  %v10620_v43 = vld [vmem:[#allocation118_spill] sm:$0xff]  ;;  %vm3320_vm11 = vcmp.eq.f32.partialorder %v8480_v57, %v8820_v3 }
 0x750   : > { %v3944_v47 = vmax.f32 %v10620_v43, 1e-16  ;;  %vm3912_vm3 = vcmp.lt.f32.partialorder %v10620_v43, 1e+30 }
 0x751   : > { %v3392_v35 = vadd.s32 %v3391_v13, %v3389_v5  ;;  %v3377_v13 = vshll.u32 %v3376_v55, 16 }
 0x752   : > { %5399 = vrcp.f32 %v3944_v47 }
 0x753   : > { %vm3814_vm13 = vcmp.eq.s32.totalorder %v6120_v60, %v3392_v35  ;;  %v3946_v35 = vmax.f32 %v10621_v23, 1e-16 }
 0x754   : > { %v5042_v31 = vsel %vm3814_vm13, 1.0, %v10149_v44 }
 0x755   : > { %v4038_v5 = vmul.f32 %v5042_v31, %v8827_v18  ;;  %v10622_v31 = vld [vmem:[#allocation104_spill] sm:$0xff]  ;;  %5401 = vrcp.f32 %v3946_v35  ;;  %v10627_v18 = vld [vmem:[#allocation35_spill] sm:$0xff] }
 0x756   : > { %v3374_v45 = vpop.xlane.xlu2 %3373  ;;  %v8829_v49 = vpop.xlane.xlu1 %3287  ;;  %vm3913_vm14 = vcmp.lt.f32.partialorder %v10627_v18, 1e+30 }
 0x757   : > { %10618 = vst [vmem:[#allocation49_spill] sm:$0xff] %v8829_v49  ;;  %v8831_v39 = vpop.xlane.xlu0 %3289  ;;  %v3375_v6 = vcvt.f32.s32 %v3374_v45  ;;  %vm3326_vm15 = vcmp.eq.f32.partialorder %v8527_v7, %v8829_v49  ;;  %v4070_v20 = vadd.f32 %v4038_v5, %v10622_v31  ;;  %v8847_v7 = vsel %vm3909_vm0, %v5398_v24, 0.0 }
 0x758   : > { %10619 = vst [vmem:[#allocation51_spill] sm:$0xff] %v8831_v39  ;;  %v8839_v59 = vsel %vm3326_vm15, %v6120_v60, 128  ;;  %v3419_v49 = vshll.u32 %v3418_v53, 16  ;;  %v3447_v5 = vshll.u32 %v3446_v2, 16  ;;  %v5400_v53 = vpop.eup %5399 }
 0x759   : > { %v3378_v52 = vadd.s32 %v3377_v13, %v3375_v6  ;;  %v3716_v45 = vshra.s32 %v8839_v59, 16  ;;  %10623 = vst [vmem:[#allocation69_spill] sm:$0xff] %v8847_v7  ;;  %v10624_v6 = vld [vmem:[#allocation123_spill] sm:$0xff] }
 0x75a   : > { %v3943_v36 = vmax.f32 %v10624_v6, 1e-16  ;;  %vm3911_vm10 = vcmp.lt.f32.partialorder %v10624_v6, 1e+30 }
 0x75b   : > { %vm3813_vm1 = vcmp.eq.s32.totalorder %v6120_v60, %v3378_v52  ;;  %v8850_v0 = vcvt.s32.f32 %v3716_v45  ;;  %v10625_v52 = vld [vmem:[#allocation124_spill] sm:$0xff] }
 0x75c   : > { %v5041_v55 = vsel %vm3813_vm1, 1.0, %v10149_v44  ;;  %v3533_v35 = vand.u32 65535, %v10625_v52  ;;  %5403 = vrcp.f32 %v3943_v36  ;;  %v3404_v52 = vcvt.f32.s32 %v8552_v32 }
 0x75d   : > { %v4037_v30 = vmul.f32 %v5041_v55, %v8847_v7  ;;  %3719 = vmin.xlane.f32.xlu1 %v8850_v0  ;;  %v5402_v7 = vpop.eup %5401 }
 0x75e   : > { %v8853_v13 = vpop.xlane.xlu2 %3285  ;;  %v3416_v9 = vpop.xlane.xlu1 %3415  ;;  %v8880_v43 = vsel %vm3914_vm7, %v5402_v7, 0.0 }
 0x75f   : > { %v3444_v47 = vpop.xlane.xlu0 %3443  ;;  %vm3325_vm2 = vcmp.eq.f32.partialorder %v8557_v56, %v8853_v13  ;;  %v3417_v24 = vcvt.f32.s32 %v3416_v9  ;;  %v4069_v38 = vadd.f32 %v4037_v30, %v10626_v25  ;;  %v3945_v56 = vmax.f32 %v10627_v18, 1e-16  ;;  %v10628_v9 = vld [vmem:[#allocation100_spill] sm:$0xff] }
 0x760   : > { %v3445_v45 = vcvt.f32.s32 %v3444_v47  ;;  %v8861_v31 = vsel %vm3325_vm2, %v6120_v60, 128  ;;  %vm3539_vm4 = vcmp.eq.f32.partialorder %v10628_v9, %v8816_v29  ;;  %v3535_v25 = vcvt.s32.f32 %v3533_v35 }
 0x761   : > { %v3702_v55 = vshra.s32 %v8861_v31, 16  ;;  %v3420_v2 = vadd.s32 %v3419_v49, %v3417_v24  ;;  %v4133_v58 = vpack.c.bf16 %v4070_v20, %v4069_v38  ;;  %v8874_v49 = vsel %vm3912_vm3, %v5400_v53, 0.0 }
 0x762   : > { %v3448_v19 = vadd.s32 %v3447_v5, %v3445_v45  ;;  %v3540_v36 = vsel %vm3539_vm4, %v3535_v25, inf  ;;  %v10629_v5 = vld [vmem:[#allocation126_spill] sm:$0xff]  ;;  %v3405_v45 = vshll.u32 %v3404_v52, 16  ;;  %v5404_v7 = vpop.eup %5403  ;;  %5405 = vrcp.f32 %v3945_v56  ;;  %v10632_v56 = vld [vmem:[#allocation41_spill] sm:$0xff] }
 0x763   : > { %v8869_v47 = vcvt.s32.f32 %v3702_v55  ;;  %vm3816_vm5 = vcmp.eq.s32.totalorder %v6120_v60, %v3420_v2  ;;  %4221 = vmatmul.bf16.vlgmr.msra.gmra.mxu0 %v4133_v58  ;;  %v3547_v53 = vand.u32 65535, %v8582_v4  ;;  %v3432_v2 = vcvt.f32.s32 %v8554_v1  ;;  %v10633_v1 = vld [vmem:[#allocation66_spill] sm:$0xff] }
 0x764   : > { %vm3818_vm6 = vcmp.eq.s32.totalorder %v6120_v60, %v3448_v19  ;;  %v5044_v20 = vsel %vm3816_vm5, 1.0, %v10149_v44  ;;  %v3947_v19 = vmax.f32 %v10629_v5, 1e-16  ;;  %v8910_v62 = vsel %vm3204_vm9, 1e+30, %v10633_v1 }
 0x765   : > { %v5046_v38 = vsel %vm3818_vm6, 1.0, %v10149_v44  ;;  %3705 = vmin.xlane.f32.xlu2 %v8869_v47  ;;  %v4040_v30 = vmul.f32 %v5044_v20, %v8874_v49  ;;  %3541 = vmin.xlane.f32.xlu1 %v3540_v36  ;;  %v10631_v20 = vld [vmem:[#allocation106_spill] sm:$0xff]  ;;  %v8912_v36 = vsel %vm3911_vm10, %v5404_v7, 0.0  ;;  %vm3915_vm0 = vcmp.lt.f32.partialorder %v10629_v5, 1e+30 }
 0x766   : > { %v3402_v32 = vpop.xlane.xlu2 %3401  ;;  %v8884_v58 = vpop.xlane.xlu1 %3273  ;;  %v4042_v24 = vmul.f32 %v5046_v38, %v8880_v43  ;;  %5407 = vrcp.f32 %v3947_v19  ;;  %vm3327_vm3 = vcmp.eq.f32.partialorder %v8530_v15, %v8831_v39  ;;  %v10636_v15 = vld [vmem:[#allocation110_spill] sm:$0xff] }
 0x767   : > { %10630 = vst [vmem:[#allocation24_spill] sm:$0xff] %v8884_v58  ;;  %v8886_v35 = vpop.xlane.xlu0 %3579  ;;  %v3403_v23 = vcvt.f32.s32 %v3402_v32  ;;  %vm3319_vm8 = vcmp.eq.f32.partialorder %v8587_v40, %v8884_v58  ;;  %v4072_v38 = vadd.f32 %v4040_v30, %v10631_v20  ;;  %v3460_v40 = vcvt.f32.s32 %v8574_v27 }
 0x768   : > { %v8892_v55 = vsel %vm3319_vm8, %v6120_v60, 128  ;;  %v8902_v52 = vadd.f32 %v4042_v24, %v10632_v56  ;;  %v3433_v27 = vshll.u32 %v3432_v2, 16  ;;  %v3549_v30 = vcvt.s32.f32 %v3547_v53  ;;  %v5406_v57 = vpop.eup %5405  ;;  %v10634_v53 = vld [vmem:[#allocation3_spill] sm:$0xff] }
 0x769   : > { %v3406_v9 = vadd.s32 %v3405_v45, %v3403_v23  ;;  %v3618_v25 = vshra.s32 %v8892_v55, 16  ;;  %v3461_v23 = vshll.u32 %v3460_v40, 16  ;;  %v8920_v24 = vsel %vm3320_vm11, %v6120_v60, 128 }
 0x76a   : > { %v8928_v58 = vsel %vm3913_vm14, %v5406_v57, 0.0  ;;  %vm3581_vm15 = vcmp.eq.f32.partialorder %v8584_v46, %v8886_v35 }
 0x76b   : > { %vm3815_vm12 = vcmp.eq.s32.totalorder %v6120_v60, %v3406_v9  ;;  %v8907_v4 = vcvt.s32.f32 %v3618_v25  ;;  %v3575_v9 = vand.u32 65535, %v8572_v26 }
 0x76c   : > { %v5043_v6 = vsel %vm3815_vm12, 1.0, %v10149_v44  ;;  %v5408_v1 = vpop.eup %5407 }
 0x76d   : > { %3299 = vmin.xlane.f32.xlu2 %v8910_v62  ;;  %v4039_v19 = vmul.f32 %v5043_v6, %v8912_v36  ;;  %3621 = vmin.xlane.f32.xlu1 %v8907_v4  ;;  %v3577_v26 = vcvt.s32.f32 %v3575_v9 }
 0x76e   : > { %v8916_v32 = vpop.xlane.xlu2 %3551  ;;  %v3430_v45 = vpop.xlane.xlu1 %3429 }
 0x76f   : > { %v3458_v7 = vpop.xlane.xlu0 %3457  ;;  %vm3553_vm13 = vcmp.eq.f32.partialorder %v8604_v21, %v8916_v32  ;;  %v3431_v2 = vcvt.f32.s32 %v3430_v45  ;;  %v4071_v56 = vadd.f32 %v4039_v19, %v10634_v53  ;;  %v3632_v21 = vshra.s32 %v8920_v24, 16 }
 0x770   : > { %v3459_v25 = vcvt.f32.s32 %v3458_v7  ;;  %v3554_v20 = vsel %vm3553_vm13, %v3549_v30, inf  ;;  %v8936_v30 = vsel %vm3915_vm0, %v5408_v1, 0.0  ;;  %v3582_v46 = vsel %vm3581_vm15, %v3577_v26, inf  ;;  %v10637_v7 = vld [vmem:[#allocation68_spill] sm:$0xff] }
 0x771   : > { %3555 = vmin.xlane.f32.xlu0 %v3554_v20  ;;  %v3434_v40 = vadd.s32 %v3433_v27, %v3431_v2  ;;  %v4134_v3 = vpack.c.bf16 %v4072_v38, %v4071_v56  ;;  %v8946_v57 = vcvt.s32.f32 %v3632_v21 }
 0x772   : > { %v3462_v6 = vadd.s32 %v3461_v23, %v3459_v25  ;;  %v8950_v23 = vsel %vm3327_vm3, %v6120_v60, 128 }
 0x773   : > { %vm3817_vm1 = vcmp.eq.s32.totalorder %v6120_v60, %v3434_v40  ;;  %4226 = vmatmul.bf16.gmra.mxu0 %v4134_v3  ;;  %v3561_v3 = vand.u32 65535, %v8637_v34  ;;  %v3730_v34 = vshra.s32 %v8950_v23, 16 }
 0x774   : > { %vm3819_vm2 = vcmp.eq.s32.totalorder %v6120_v60, %v3462_v6  ;;  %v5045_v18 = vsel %vm3817_vm1, 1.0, %v10149_v44 }
 0x775   : > { %v5047_v38 = vsel %vm3819_vm2, 1.0, %v10149_v44  ;;  %v4041_v5 = vmul.f32 %v5045_v18, %v8928_v58  ;;  %3583 = vmin.xlane.f32.xlu1 %v3582_v46  ;;  %v3563_v20 = vcvt.s32.f32 %v3561_v3  ;;  %v3474_v18 = vcvt.f32.s32 %v8578_v22  ;;  %v10643_v3 = vld [vmem:[#allocation134_spill] sm:$0xff] }
 0x776   : > { %v8942_v27 = vpop.xlane.xlu2 %3291  ;;  %v4043_v19 = vmul.f32 %v5047_v38, %v8936_v30  ;;  %vm3919_vm13 = vcmp.lt.f32.partialorder %v10643_v3, 1e+30 }
 0x777   : > { %10635 = vst [vmem:[#allocation82_spill] sm:$0xff] %v8942_v27  ;;  %v4073_v45 = vadd.f32 %v4041_v5, %v10636_v15  ;;  %vm3328_vm4 = vcmp.eq.f32.partialorder %v8634_v14, %v8942_v27  ;;  %v10640_v14 = vld [vmem:[#allocation99_spill] sm:$0xff]  ;;  %v3951_v15 = vmax.f32 %v10643_v3, 1e-16 }
 0x778   : > { %v8954_v9 = vadd.f32 %v4043_v19, %v10637_v7  ;;  %v8966_v53 = vsel %vm3328_vm4, %v6120_v60, 128  ;;  %v3948_v6 = vmax.f32 %v10640_v14, 1e-16  ;;  %vm3916_vm8 = vcmp.lt.f32.partialorder %v10640_v14, 1e+30 }
 0x779   : > { %3635 = vmin.xlane.f32.xlu0 %v8946_v57  ;;  %v4135_v2 = vpack.c.bf16 %v8902_v52, %v4073_v45  ;;  %v8975_v52 = vcvt.s32.f32 %v3730_v34  ;;  %v3475_v45 = vshll.u32 %v3474_v18, 16  ;;  %v10645_v18 = vld [vmem:[#allocation54_spill] sm:$0xff] }
 0x77a   : > { %v8960_v25 = vpop.xlane.xlu1 %3565  ;;  %5409 = vrcp.f32 %v3948_v6  ;;  %vm3918_vm15 = vcmp.lt.f32.partialorder %v10645_v18, 1e+30 }
 0x77b   : > { %vm3567_vm5 = vcmp.eq.f32.partialorder %v8645_v37, %v8960_v25  ;;  %v3744_v37 = vshra.s32 %v8966_v53, 16  ;;  %5411 = vrcp.f32 %v3951_v15 }
 0x77c   : > { %v8968_v56 = vpop.xlane.xlu0 %3295  ;;  %v3568_v1 = vsel %vm3567_vm5, %v3563_v20, inf }
 0x77d   : > { %10638 = vst [vmem:[#allocation135_spill] sm:$0xff] %v8968_v56  ;;  %3569 = vmin.xlane.f32.xlu2 %v3568_v1  ;;  %v3516_v1 = vcvt.f32.s32 %v8659_v51  ;;  %vm3330_vm11 = vcmp.eq.f32.partialorder %v8662_v41, %v8968_v56 }
 0x77e   : > { %v8970_v40 = vpop.xlane.xlu2 %3277  ;;  %v9033_v41 = vsel %vm3330_vm11, %v6120_v60, 128  ;;  %vm4497_vm11 = vcmask 64512  }
 0x77f   : > { %10639 = vst [vmem:[#allocation83_spill] sm:$0xff] %v8970_v40  ;;  %vm3321_vm6 = vcmp.eq.f32.partialorder %v8666_v61, %v8970_v40  ;;  %v8990_v61 = vcvt.s32.f32 %v3744_v37  ;;  %v3589_v37 = vand.u32 65535, %v8701_v63 }
 0x780   : > { %v8978_v21 = vsel %vm3321_vm6, %v6120_v60, 128 }
 0x781   : > { %3733 = vmin.xlane.f32.xlu0 %v8975_v52  ;;  %v3646_v26 = vshra.s32 %v8978_v21, 16 }
 0x782   : > { %v8984_v38 = vpop.xlane.xlu1 %3279 }
 0x783   : > { %10641 = vst [vmem:[#allocation96_spill] sm:$0xff] %v8984_v38  ;;  %v8986_v46 = vcvt.s32.f32 %v3646_v26  ;;  %vm3322_vm7 = vcmp.eq.f32.partialorder %v8686_v33, %v8984_v38  ;;  %4231 = vmatmul.bf16.gmra.mxu0 %v4135_v2  ;;  %v5410_v33 = vpop.eup %5409 }
 0x784   : > { %v8993_v5 = vsel %vm3322_vm7, %v6120_v60, 128  ;;  %v8995_v19 = vpop.xlane.xlu0 %3281  ;;  %v9010_v26 = vsel %vm3916_vm8, %v5410_v33, 0.0  ;;  %v5412_v27 = vpop.eup %5411 }
 0x785   : > { %10642 = vst [vmem:[#allocation87_spill] sm:$0xff] %v8995_v19  ;;  %3649 = vmin.xlane.f32.xlu1 %v8986_v46  ;;  %3747 = vmin.xlane.f32.xlu2 %v8990_v61  ;;  %v3660_v20 = vshra.s32 %v8993_v5, 16  ;;  %vm3323_vm1 = vcmp.eq.f32.partialorder %v8696_v16, %v8995_v19 }
 0x786   : > { %v3472_v22 = vpop.xlane.xlu2 %3471 }
 0x787   : > { %v3473_v7 = vcvt.f32.s32 %v3472_v22  ;;  %v9001_v34 = vcvt.s32.f32 %v3660_v20  ;;  %v3950_v22 = vmax.f32 %v10645_v18, 1e-16 }
 0x789   : > { %v3476_v2 = vadd.s32 %v3475_v45, %v3473_v7  ;;  %3663 = vmin.xlane.f32.xlu0 %v9001_v34  ;;  %v3517_v7 = vshll.u32 %v3516_v1, 16  ;;  %5413 = vrcp.f32 %v3950_v22  ;;  %v3502_v1 = vcvt.f32.s32 %v8602_v17 }
 0x78a   : > { %v9007_v6 = vpop.xlane.xlu1 %3293 }
 0x78b   : > { %vm3820_vm9 = vcmp.eq.s32.totalorder %v6120_v60, %v3476_v2  ;;  %10644 = vst [vmem:[#allocation137_spill] sm:$0xff] %v9007_v6  ;;  %vm3329_vm10 = vcmp.eq.f32.partialorder %v8717_v48, %v9007_v6  ;;  %v10646_v2 = vld [vmem:[#allocation70_spill] sm:$0xff]  ;;  %v3591_v48 = vcvt.s32.f32 %v3589_v37  ;;  %v10647_v6 = vld [vmem:[#allocation9_spill] sm:$0xff]  ;;  %v3503_v22 = vshll.u32 %v3502_v1, 16 }
 0x78c   : > { %v5048_v45 = vsel %vm3820_vm9, 1.0, %v10149_v44  ;;  %v9017_v51 = vsel %vm3329_vm10, %v6120_v60, 128  ;;  %v3514_v14 = vpop.xlane.xlu0 %3513  ;;  %v3949_v38 = vmax.f32 %v10646_v2, 1e-16  ;;  %vm3917_vm2 = vcmp.lt.f32.partialorder %v10646_v2, 1e+30 }
 0x78d   : > { %v4044_v15 = vmul.f32 %v5048_v45, %v9010_v26  ;;  %v3515_v63 = vcvt.f32.s32 %v3514_v14  ;;  %v3758_v33 = vshra.s32 %v9017_v51, 16  ;;  %vm4546_vm9 = vcmask 1043456  }
 0x78e   : > { %v9022_v20 = vpop.xlane.xlu2 %3593  ;;  %5415 = vrcp.f32 %v3949_v38  ;;  %v10648_v38 = vld [vmem:[#allocation93_spill] sm:$0xff] }
 0x78f   : > { %vm3595_vm12 = vcmp.eq.f32.partialorder %v8726_v12, %v9022_v20  ;;  %v4076_v40 = vadd.f32 %v4044_v15, %v10647_v6  ;;  %v3518_v45 = vadd.s32 %v3517_v7, %v3515_v63  ;;  %v9030_v39 = vcvt.s32.f32 %v3758_v33  ;;  %v5414_v3 = vpop.eup %5413 }
 0x790   : > { %v3596_v14 = vsel %vm3595_vm12, %v3591_v48, inf  ;;  %v9038_v12 = vsel %vm3919_vm13, %v5412_v27, 0.0  ;;  %v3488_v6 = vcvt.f32.s32 %v8599_v54  ;;  %v3603_v54 = vand.u32 65535, %v8740_v11 }
 0x791   : > { %v4136_v56 = vpack.c.bf16 %v4076_v40, %v8954_v9  ;;  %vm3823_vm14 = vcmp.eq.s32.totalorder %v6120_v60, %v3518_v45  ;;  %3597 = vmin.xlane.f32.xlu2 %v3596_v14  ;;  %3761 = vmin.xlane.f32.xlu0 %v9030_v39  ;;  %v3772_v9 = vshra.s32 %v9033_v41, 16  ;;  %v9051_v45 = vsel %vm3918_vm15, %v5414_v3, 0.0 }
 0x792   : > { %v5051_v17 = vsel %vm3823_vm14, 1.0, %v10149_v44  ;;  %v3500_v37 = vpop.xlane.xlu1 %3499  ;;  %v3489_v33 = vshll.u32 %v3488_v6, 16  ;;  %v3605_v18 = vcvt.s32.f32 %v3603_v54 }
 0x793   : > { %v3501_v15 = vcvt.f32.s32 %v3500_v37  ;;  %4236 = vmatmul.bf16.gmra.mxu0 %v4136_v56  ;;  %v4047_v40 = vmul.f32 %v5051_v17, %v9038_v12  ;;  %v9049_v1 = vcvt.s32.f32 %v3772_v9  ;;  %v9069_v9 = vsel %vm3323_vm1, %v6120_v60, 128 }
 0x794   : > { %v5416_v56 = vpop.eup %5415  ;;  %vm3922_vm1 = vcmp.lt.f32.partialorder %v8414_v50, 1e+30 }
 0x795   : > { %v3504_v7 = vadd.s32 %v3503_v22, %v3501_v15  ;;  %v4079_v27 = vadd.f32 %v4047_v40, %v10648_v38  ;;  %v9062_v37 = vsel %vm3917_vm2, %v5416_v56, 0.0  ;;  %v10649_v15 = vld [vmem:[#allocation5_spill] sm:$0xff] }
 0x796   : > { %v3486_v63 = vpop.xlane.xlu2 %3485  ;;  %v10652_v38 = vld [vmem:[#allocation61_spill] sm:$0xff] }
 0x797   : > { %v3487_v48 = vcvt.f32.s32 %v3486_v63  ;;  %vm3822_vm0 = vcmp.eq.s32.totalorder %v6120_v60, %v3504_v7  ;;  %v10651_v7 = vld [vmem:[#allocation95_spill] sm:$0xff] }
 0x798   : > { %v5050_v14 = vsel %vm3822_vm0, 1.0, %v10149_v44  ;;  %v3952_v63 = vmax.f32 %v10651_v7, 1e-16  ;;  %vm3920_vm6 = vcmp.lt.f32.partialorder %v10651_v7, 1e+30  ;;  %v3715_v7 = vand.u32 65535, %v8839_v59 }
 0x799   : > { %v3490_v17 = vadd.s32 %v3489_v33, %v3487_v48  ;;  %3775 = vmin.xlane.f32.xlu2 %v9049_v1  ;;  %v4046_v6 = vmul.f32 %v5050_v14, %v9051_v45  ;;  %v3674_v48 = vshra.s32 %v9069_v9, 16  ;;  %v3530_v14 = vcvt.f32.s32 %v8629_v42 }
 0x79a   : > { %v9060_v11 = vpop.xlane.xlu1 %3607  ;;  %5417 = vrcp.f32 %v3952_v63  ;;  %v10653_v63 = vld [vmem:[#allocation10_spill] sm:$0xff] }
 0x79b   : > { %vm3821_vm3 = vcmp.eq.s32.totalorder %v6120_v60, %v3490_v17  ;;  %vm3609_vm4 = vcmp.eq.f32.partialorder %v8746_v10, %v9060_v11  ;;  %v4078_v16 = vadd.f32 %v4046_v6, %v10649_v15  ;;  %v9086_v6 = vcvt.s32.f32 %v3674_v48  ;;  %v9100_v48 = vld [vmem:[%s9663_s6] sm:$0xff] }
 0x79c   : > { %v5049_v22 = vsel %vm3821_vm3, 1.0, %v10149_v44  ;;  %v3610_v40 = vsel %vm3609_vm4, %v3605_v18, inf  ;;  %v3531_v18 = vshll.u32 %v3530_v14, 16  ;;  %10654 = vst [vmem:[#allocation86_spill] sm:$0xff] %v9100_v48  ;;  %4701 = vmatpush.bf16.msra.mxu2 %v9100_v48  ;;  %v3717_v14 = vcvt.s32.f32 %v3715_v7 }
 0x79d   : > { %v4045_v2 = vmul.f32 %v5049_v22, %v9062_v37  ;;  %3611 = vmin.xlane.f32.xlu1 %v3610_v40  ;;  %vm4645_vm3 = vcmask 130048  }
 0x79e   : > { %v9072_v3 = vpop.xlane.xlu2 %3283 }
 0x79f   : > { %10650 = vst [vmem:[#allocation127_spill] sm:$0xff] %v9072_v3  ;;  %vm3324_vm5 = vcmp.eq.f32.partialorder %v8750_v8, %v9072_v3  ;;  %v4077_v33 = vadd.f32 %v4045_v2, %v10652_v38 }
 0x7a0   : > { %v9079_v10 = vsel %vm3324_vm5, %v6120_v60, 128  ;;  %v5418_v15 = vpop.eup %5417 }
 0x7a1   : > { %v4137_v54 = vpack.c.bf16 %v4078_v16, %v4077_v33  ;;  %v3688_v56 = vshra.s32 %v9079_v10, 16  ;;  %v9092_v42 = vsel %vm3920_vm6, %v5418_v15, 0.0  ;;  %v3701_v15 = vand.u32 65535, %v8861_v31 }
 0x7a3   : > { %v9084_v17 = vcvt.s32.f32 %v3688_v56  ;;  %4241 = vmatmul.bf16.gmra.mxu0 %v4137_v54 }
 0x7a5   : > { %3691 = vmin.xlane.f32.xlu0 %v9084_v17  ;;  %3677 = vmin.xlane.f32.xlu1 %v9086_v6 }
 0x7a6   : > { %v3528_v8 = vpop.xlane.xlu2 %3527 }
 0x7a7   : > { %v3529_v22 = vcvt.f32.s32 %v3528_v8  ;;  %v10656_v8 = vld [vmem:[#allocation55_spill] sm:$0xff] }
 0x7a8   : > { %vm3921_vm13 = vcmp.lt.f32.partialorder %v10656_v8, 1e+30 }
 0x7a9   : > { %v3532_v16 = vadd.s32 %v3531_v18, %v3529_v22  ;;  %v3953_v18 = vmax.f32 %v10656_v8, 1e-16 }
 0x7ab   : > { %vm3824_vm7 = vcmp.eq.s32.totalorder %v6120_v60, %v3532_v16  ;;  %v5216_v16 = vld [vmem:[%s9120_s11] sm:$0xff]  ;;  %5419 = vrcp.f32 %v3953_v18 }
 0x7ac   : > { %v5052_v40 = vsel %vm3824_vm7, 1.0, %v10149_v44 }
 0x7ad   : > { %v4048_v2 = vmul.f32 %v5052_v40, %v9092_v42 }
 0x7af   : > { %v4080_v38 = vadd.f32 %v4048_v2, %v10653_v63  ;;  %v3703_v63 = vcvt.s32.f32 %v3701_v15  ;;  %v10661_v15 = vld [vmem:[#allocation12_spill] sm:$0xff] }
 0x7b1   : > { %v4138_v33 = vpack.c.bf16 %v4080_v38, %v4079_v27  ;;  %v4416_v27 = vld [vmem:[%s9664_s7] sm:$0xf] }
 0x7b2   : > { %v9102_v54 = vpop.xlane.xlu0 %3297  ;;  %v4548_v59 = vsel %vm4546_vm9, %v4416_v27, 0  ;;  %v10658_v27 = vld [vmem:[#allocation52_spill] sm:$0xff] }
 0x7b3   : > { %4246 = vmatmul.bf16.gmra.mxu0 %v4138_v33  ;;  %10655 = vst [vmem:[#allocation22_spill] sm:$0xff] %v9102_v54  ;;  %vm3331_vm8 = vcmp.eq.f32.partialorder %v8792_v28, %v9102_v54  ;;  %4557 = vmatpush.bf16.msra.mxu1 %v4548_v59  ;;  %v10660_v54 = vld [vmem:[#allocation65_spill] sm:$0xff] }
 0x7b4   : > { %v9123_v28 = vsel %vm3331_vm8, %v6120_v60, 128  ;;  %5240 = vmatpush.bf16.msrb.mxu3 %v4548_v59  ;;  %v3954_v59 = vmax.f32 %v8414_v50, 1e-16  ;;  %v3141_v19 = vadd.f32 %v10661_v15, %v10660_v54 }
 0x7b5   : > { %v3786_v40 = vshra.s32 %v9123_v28, 16 }
 0x7b6   : > { %5169 = vmatmul.msk.bf16.vlgmr.msra.gmra.mxu1 %vm4497_vm11, %v5216_v16  ;;  %5421 = vrcp.f32 %v3954_v59 }
 0x7d0   : > { %v9109_v56 = vpop.xlane.xlu1 %3719 }
 0x7d1   : > { %vm3721_vm10 = vcmp.eq.f32.partialorder %v8850_v0, %v9109_v56  ;;  %v3544_v0 = vcvt.f32.s32 %v8816_v29  ;;  %v10659_v29 = vld [vmem:[#allocation14_spill] sm:$0xff] }
 0x7d2   : > { %v3722_v22 = vsel %vm3721_vm10, %v3717_v14, inf  ;;  %v9134_v14 = vcvt.s32.f32 %v3786_v40  ;;  %v3142_v18 = vadd.f32 %v10659_v29, %v10658_v27  ;;  %v10667_v27 = vld [vmem:[#allocation4_spill] sm:$0xff] }
 0x7d3   : > { %3723 = vmin.xlane.f32.xlu1 %v3722_v22  ;;  %v3545_v33 = vshll.u32 %v3544_v0, 16  ;;  %v5420_v22 = vpop.eup %5419  ;;  %v3617_v0 = vand.u32 65535, %v8892_v55  ;;  %v3956_v29 = vmax.f32 %v10667_v27, 1e-16  ;;  %vm3924_vm5 = vcmp.lt.f32.partialorder %v10667_v27, 1e+30 }
 0x7d4   : > { %10657 = vst [vmem:[#allocation7_spill] sm:$0xff] %v9134_v14 }
 0x7d5   : > { %v3619_v8 = vcvt.s32.f32 %v3617_v0  ;;  %v3586_v0 = vcvt.f32.s32 %v8886_v35 }
 0x7d8   : > { %v9129_v2 = vpop.xlane.xlu2 %3705  ;;  %v3542_v38 = vpop.xlane.xlu1 %3541 }
 0x7d9   : > { %vm3707_vm12 = vcmp.eq.f32.partialorder %v8869_v47, %v9129_v2  ;;  %v3543_v7 = vcvt.f32.s32 %v3542_v38  ;;  %v10662_v47 = vld [vmem:[#allocation29_spill] sm:$0xff]  ;;  %v9147_v38 = vsel %vm3921_vm13, %v5420_v22, 0.0  ;;  %v10669_v22 = vld [vmem:[#allocation122_spill] sm:$0xff] }
 0x7da   : > { %v3708_v31 = vsel %vm3707_vm12, %v3703_v63, inf  ;;  %v4102_v3 = vadd.f32 %v10662_v47, %v3142_v18  ;;  %v10663_v63 = vld [vmem:[#allocation69_spill] sm:$0xff]  ;;  %10664 = vst [vmem:[#allocation74_spill] sm:$0xff] %v9147_v38  ;;  %v5422_v47 = vpop.eup %5421 }
 0x7db   : > { %3709 = vmin.xlane.f32.xlu2 %v3708_v31  ;;  %v3546_v16 = vadd.s32 %v3545_v33, %v3543_v7  ;;  %3789 = vmin.xlane.f32.xlu1 %v9134_v14  ;;  %v4101_v40 = vadd.f32 %v10663_v63, %v3141_v19  ;;  %v3558_v33 = vcvt.f32.s32 %v8916_v32 }
 0x7dc   : > { %5423 = vrcp.f32 %v4102_v3 }
 0x7dd   : > { %vm3825_vm14 = vcmp.eq.s32.totalorder %v6120_v60, %v3546_v16  ;;  %5425 = vrcp.f32 %v4101_v40  ;;  %v3559_v16 = vshll.u32 %v3558_v33, 16 }
 0x7de   : > { %v5053_v31 = vsel %vm3825_vm14, 1.0, %v10149_v44  ;;  %5427 = vrcp.f32 %v3956_v29  ;;  %v3587_v29 = vshll.u32 %v3586_v0, 16 }
 0x7df   : > { %v4049_v55 = vmul.f32 %v5053_v31, %v9147_v38 }
 0x7e0   : > { %v9150_v54 = vpop.xlane.xlu2 %3299  ;;  %v4222_v7 = vpop.f32.mrf.mxu0 }
 0x7e1   : > { %10665 = vst [vmem:[#allocation46_spill] sm:$0xff] %v9150_v54  ;;  %vm3332_vm15 = vcmp.eq.f32.partialorder %v8910_v62, %v9150_v54  ;;  %v9156_v19 = vpop.xlane.xlu1 %3621  ;;  %v4081_v15 = vadd.f32 %v4049_v55, %v10669_v22  ;;  %v5217_v62 = vld [vmem:[%s9120_s11 + $0x8] sm:$0xff]  ;;  %v10670_v55 = vld [vmem:[#allocation58_spill] sm:$0xff] }
 0x7e2   : > { %10666 = vst [vmem:[#allocation53_spill] sm:$0xff] %v9156_v19  ;;  %vm3623_vm0 = vcmp.eq.f32.partialorder %v8907_v4, %v9156_v19  ;;  %v9162_v18 = vsel %vm3332_vm15, %v6120_v60, 128  ;;  %v5424_v31 = vpop.eup %5423  ;;  %v3631_v4 = vand.u32 65535, %v8920_v24  ;;  %5170 = vmatmul.msk.bf16.gmra.mxu1 %vm4497_vm11, %v5217_v62  ;;  %v10671_v22 = vld [vmem:[#allocation2_spill] sm:$0xff]  ;;  %v10673_v19 = vld [vmem:[#allocation107_spill] sm:$0xff] }
 0x7e3   : > { %10668 = vst [vmem:[#allocation32_spill] sm:$0xff] %v9162_v18  ;;  %v3624_v32 = vsel %vm3623_vm0, %v3619_v8, inf  ;;  %v3800_v40 = vshra.s32 %v9162_v18, 16  ;;  %v5426_v8 = vpop.eup %5425  ;;  %v3144_v33 = vadd.f32 %v10671_v22, %v10670_v55 }
 0x7e4   : > { %v3556_v59 = vpop.xlane.xlu0 %3555  ;;  %3625 = vmin.xlane.f32.xlu0 %v3624_v32  ;;  %v9173_v32 = vsel %vm3922_vm1, %v5422_v47, 0.0  ;;  %v3633_v22 = vcvt.s32.f32 %v3631_v4  ;;  %v5428_v18 = vpop.eup %5427 }
 0x7e5   : > { %v3557_v3 = vcvt.f32.s32 %v3556_v59  ;;  %v10672_v59 = vld [vmem:[#allocation62_spill] sm:$0xff]  ;;  %v9178_v48 = vcvt.s32.f32 %v3800_v40  ;;  %v3572_v40 = vcvt.f32.s32 %v8960_v25 }
 0x7e6   : > { %v3955_v54 = vmax.f32 %v10672_v59, 1e-16  ;;  %vm3923_vm8 = vcmp.lt.f32.partialorder %v10672_v59, 1e+30 }
 0x7e7   : > { %v3560_v63 = vadd.s32 %v3559_v16, %v3557_v3  ;;  %v4334_v16 = vmul.f32 %v5426_v8, %v4222_v7  ;;  %v4104_v7 = vadd.f32 %v8874_v49, %v3144_v33  ;;  %v9195_v49 = vsel %vm3924_vm5, %v5428_v18, 0.0 }
 0x7e8   : > { %v4224_v35 = vpop.f32.mrf.mxu0  ;;  %5429 = vrcp.f32 %v3955_v54  ;;  %v3729_v54 = vand.u32 65535, %v8950_v23  ;;  %v3743_v23 = vand.u32 65535, %v8966_v53 }
 0x7e9   : > { %vm3826_vm2 = vcmp.eq.s32.totalorder %v6120_v60, %v3560_v63  ;;  %v3584_v50 = vpop.xlane.xlu1 %3583  ;;  %v4335_v38 = vmul.f32 %v5424_v31, %v4224_v35  ;;  %v10674_v63 = vld [vmem:[#allocation109_spill] sm:$0xff]  ;;  %v10675_v31 = vld [vmem:[#allocation119_spill] sm:$0xff]  ;;  %5431 = vrcp.f32 %v4104_v7 }
 0x7ea   : > { %v5054_v3 = vsel %vm3826_vm2, 1.0, %v10149_v44  ;;  %v3585_v24 = vcvt.f32.s32 %v3584_v50  ;;  %v3143_v14 = vadd.f32 %v10674_v63, %v10673_v19  ;;  %v3731_v50 = vcvt.s32.f32 %v3729_v54 }
 0x7eb   : > { %v4050_v62 = vmul.f32 %v5054_v3, %v9173_v32  ;;  %v4366_v55 = vpack.c.bf16 %v4335_v38, %v4334_v16 }
 0x7ec   : > { %v9181_v47 = vpop.xlane.xlu0 %3635  ;;  %v3588_v0 = vadd.s32 %v3587_v29, %v3585_v24  ;;  %3803 = vmin.xlane.f32.xlu0 %v9178_v48  ;;  %v4103_v8 = vadd.f32 %v8912_v36, %v3143_v14  ;;  %v3573_v29 = vshll.u32 %v3572_v40, 16  ;;  %v10676_v14 = vld [vmem:[#allocation92_spill] sm:$0xff]  ;;  %v3745_v40 = vcvt.s32.f32 %v3743_v23 }
 0x7ed   : > { %vm3637_vm4 = vcmp.eq.f32.partialorder %v8946_v57, %v9181_v47  ;;  %5189 = vmatmul.msk.bf16.vlgmr.msra.gmra.mxu2 %vm4645_vm3, %v4366_v55  ;;  %v4082_v4 = vadd.f32 %v4050_v62, %v10675_v31  ;;  %v5218_v62 = vld [vmem:[%s9120_s11 + $0x10] sm:$0xff] }
 0x7ee   : > { %v3638_v38 = vsel %vm3637_vm4, %v3633_v22, inf  ;;  %vm3828_vm6 = vcmp.eq.s32.totalorder %v6120_v60, %v3588_v0  ;;  %5433 = vrcp.f32 %v4103_v8  ;;  %v5430_v16 = vpop.eup %5429 }
 0x7ef   : > { %3639 = vmin.xlane.f32.xlu2 %v3638_v38  ;;  %v5056_v19 = vsel %vm3828_vm6, 1.0, %v10149_v44  ;;  %v4139_v57 = vpack.c.bf16 %v4082_v4, %v4081_v15  ;;  %v3645_v15 = vand.u32 65535, %v8978_v21  ;;  %v9210_v55 = vsel %vm3923_vm8, %v5430_v16, 0.0  ;;  %v5432_v63 = vpop.eup %5431 }
 0x7f0   : > { %v4227_v25 = vpop.f32.mrf.mxu0  ;;  %v3570_v33 = vpop.xlane.xlu2 %3569  ;;  %v4052_v35 = vmul.f32 %v5056_v19, %v9195_v49  ;;  %v3659_v38 = vand.u32 65535, %v8993_v5  ;;  %v10677_v19 = vld [vmem:[#allocation108_spill] sm:$0xff] }
 0x7f1   : > { %v3571_v36 = vcvt.f32.s32 %v3570_v33  ;;  %4251 = vmatmul.bf16.gmra.mxu0 %v4139_v57  ;;  %v3647_v21 = vcvt.s32.f32 %v3645_v15  ;;  %v10678_v57 = vld [vmem:[#allocation42_spill] sm:$0xff] }
 0x7f2   : > { %v4084_v27 = vadd.f32 %v4052_v35, %v10676_v14  ;;  %5171 = vmatmul.msk.bf16.gmra.mxu1 %vm4497_vm11, %v5218_v62  ;;  %v3145_v54 = vadd.f32 %v10678_v57, %v10677_v19  ;;  %v10679_v35 = vld [vmem:[#allocation91_spill] sm:$0xff]  ;;  %v10681_v14 = vld [vmem:[#allocation105_spill] sm:$0xff]  ;;  %v3661_v15 = vcvt.s32.f32 %v3659_v38 }
 0x7f3   : > { %v3574_v18 = vadd.s32 %v3573_v29, %v3571_v36 }
 0x7f4   : > { %v9201_v3 = vpop.xlane.xlu0 %3733  ;;  %v5434_v53 = vpop.eup %5433  ;;  %v4105_v5 = vadd.f32 %v8928_v58, %v3145_v54  ;;  %v3600_v58 = vcvt.f32.s32 %v9022_v20  ;;  %v10684_v54 = vld [vmem:[#allocation43_spill] sm:$0xff] }
 0x7f5   : > { %vm3735_vm7 = vcmp.eq.f32.partialorder %v8975_v52, %v9201_v3  ;;  %vm3827_vm9 = vcmp.eq.s32.totalorder %v6120_v60, %v3574_v18  ;;  %v4336_v31 = vmul.f32 %v5434_v53, %v4227_v25  ;;  %v10682_v18 = vld [vmem:[#allocation85_spill] sm:$0xff] }
 0x7f6   : > { %v3736_v24 = vsel %vm3735_vm7, %v3731_v50, inf  ;;  %v5055_v22 = vsel %vm3827_vm9, 1.0, %v10149_v44  ;;  %v3957_v50 = vmax.f32 %v10682_v18, 1e-16  ;;  %5435 = vrcp.f32 %v4105_v5 }
 0x7f7   : > { %3737 = vmin.xlane.f32.xlu2 %v3736_v24  ;;  %v4051_v0 = vmul.f32 %v5055_v22, %v9210_v55  ;;  %v5219_v22 = vld [vmem:[%s9120_s11 + $0x18] sm:$0xff]  ;;  %vm3925_vm15 = vcmp.lt.f32.partialorder %v10682_v18, 1e+30 }
 0x7f8   : > { %v9213_v7 = vpop.xlane.xlu1 %3649  ;;  %v4229_v52 = vpop.f32.mrf.mxu0  ;;  %5437 = vrcp.f32 %v3957_v50  ;;  %v3614_v50 = vcvt.f32.s32 %v9060_v11 }
 0x7f9   : > { %vm3651_vm10 = vcmp.eq.f32.partialorder %v8986_v46, %v9213_v7  ;;  %v9219_v59 = vpop.xlane.xlu2 %3747  ;;  %v4337_v4 = vmul.f32 %v5432_v63, %v4229_v52  ;;  %v4083_v29 = vadd.f32 %v4051_v0, %v10679_v35  ;;  %v10680_v46 = vld [vmem:[#allocation44_spill] sm:$0xff] }
 0x7fa   : > { %vm3749_vm12 = vcmp.eq.f32.partialorder %v8990_v61, %v9219_v59  ;;  %v3652_v8 = vsel %vm3651_vm10, %v3647_v21, inf  ;;  %v3146_v16 = vadd.f32 %v10681_v14, %v10680_v46  ;;  %v3601_v21 = vshll.u32 %v3600_v58, 16  ;;  %v10686_v14 = vld [vmem:[#allocation113_spill] sm:$0xff] }
 0x7fb   : > { %3653 = vmin.xlane.f32.xlu0 %v3652_v8  ;;  %v3750_v33 = vsel %vm3749_vm12, %v3745_v40, inf  ;;  %v4367_v36 = vpack.c.bf16 %v4337_v4, %v4336_v31  ;;  %v4140_v25 = vpack.c.bf16 %v4084_v27, %v4083_v29  ;;  %v3757_v27 = vand.u32 65535, %v9017_v51  ;;  %v10683_v4 = vld [vmem:[#allocation103_spill] sm:$0xff] }
 0x7fc   : > { %3751 = vmin.xlane.f32.xlu1 %v3750_v33  ;;  %v9231_v61 = vpop.xlane.xlu0 %3663  ;;  %v4106_v23 = vadd.f32 %v8880_v43, %v3146_v16  ;;  %v5436_v52 = vpop.eup %5435  ;;  %v3771_v31 = vand.u32 65535, %v9033_v41  ;;  %v3958_v8 = vmax.f32 %v10683_v4, 1e-16  ;;  %v10687_v16 = vld [vmem:[#allocation57_spill] sm:$0xff]  ;;  %vm3926_vm2 = vcmp.lt.f32.partialorder %v10683_v4, 1e+30 }
 0x7fd   : > { %5190 = vmatmul.msk.bf16.gmra.mxu2 %vm4645_vm3, %v4367_v36  ;;  %vm3665_vm13 = vcmp.eq.f32.partialorder %v9001_v34, %v9231_v61  ;;  %v3759_v53 = vcvt.s32.f32 %v3757_v27  ;;  %v3147_v5 = vadd.f32 %v10687_v16, %v10686_v14  ;;  %v3615_v27 = vshll.u32 %v3614_v50, 16  ;;  %v10693_v14 = vld [vmem:[#allocation33_spill] sm:$0xff] }
 0x7fe   : > { %v3666_v24 = vsel %vm3665_vm13, %v3661_v15, inf  ;;  %5439 = vrcp.f32 %v4106_v23  ;;  %v5438_v34 = vpop.eup %5437  ;;  %v3773_v18 = vcvt.s32.f32 %v3771_v31  ;;  %v10688_v15 = vld [vmem:[#allocation6_spill] sm:$0xff]  ;;  %vm3933_vm10 = vcmp.lt.f32.partialorder %v8853_v13, 1e+30 }
 0x7ff   : > { %3667 = vmin.xlane.f32.xlu2 %v3666_v24  ;;  %v9251_v35 = vsel %vm3925_vm15, %v5438_v34, 0.0  ;;  %5441 = vrcp.f32 %v3958_v8  ;;  %v4107_v24 = vadd.f32 %v8936_v30, %v3147_v5 }
 0x800   : > { %v4232_v62 = vpop.f32.mrf.mxu0 }
 0x801   : > { %4256 = vmatmul.bf16.gmra.mxu0 %v4140_v25  ;;  %v4338_v19 = vmul.f32 %v5436_v52, %v4232_v62 }
 0x802   : > { %5172 = vmatmul.msk.bf16.gmra.mxu1 %vm4497_vm11, %v5219_v22 }
 0x804   : > { %v3598_v63 = vpop.xlane.xlu2 %3597  ;;  %v9240_v0 = vpop.xlane.xlu0 %3761 }
 0x805   : > { %v3599_v43 = vcvt.f32.s32 %v3598_v63  ;;  %vm3763_vm14 = vcmp.eq.f32.partialorder %v9030_v39, %v9240_v0  ;;  %v5440_v20 = vpop.eup %5439  ;;  %v10685_v39 = vld [vmem:[#allocation114_spill] sm:$0xff] }
 0x806   : > { %v3764_v38 = vsel %vm3763_vm14, %v3759_v53, inf  ;;  %v3148_v33 = vadd.f32 %v10685_v39, %v10684_v54  ;;  %v5442_v63 = vpop.eup %5441  ;;  %v10690_v39 = vld [vmem:[#allocation16_spill] sm:$0xff] }
 0x807   : > { %v3602_v40 = vadd.s32 %v3601_v21, %v3599_v43  ;;  %3765 = vmin.xlane.f32.xlu1 %v3764_v38  ;;  %v3687_v21 = vand.u32 65535, %v9079_v10  ;;  %v5220_v43 = vld [vmem:[%s9120_s11 + $0x20] sm:$0xff]  ;;  %v9271_v30 = vsel %vm3926_vm2, %v5442_v63, 0.0  ;;  %v10697_v63 = vld [vmem:[#allocation23_spill] sm:$0xff] }
 0x808   : > { %v4234_v51 = vpop.f32.mrf.mxu0  ;;  %v4108_v41 = vadd.f32 %v9010_v26, %v3148_v33  ;;  %v10691_v33 = vld [vmem:[#allocation72_spill] sm:$0xff] }
 0x809   : > { %vm3829_vm0 = vcmp.eq.s32.totalorder %v6120_v60, %v3602_v40  ;;  %v4339_v57 = vmul.f32 %v5440_v20, %v4234_v51  ;;  %v3689_v40 = vcvt.s32.f32 %v3687_v21 }
 0x80a   : > { %v5057_v29 = vsel %vm3829_vm0, 1.0, %v10149_v44  ;;  %5443 = vrcp.f32 %v4108_v41 }
 0x80b   : > { %v4368_v36 = vpack.c.bf16 %v4339_v57, %v4338_v19  ;;  %v4053_v46 = vmul.f32 %v5057_v29, %v9251_v35  ;;  %5445 = vrcp.f32 %v4107_v24  ;;  %v10689_v57 = vld [vmem:[#allocation136_spill] sm:$0xff]  ;;  %v3150_v29 = vadd.f32 %v10691_v33, %v10690_v39 }
 0x80c   : > { %v9258_v25 = vpop.xlane.xlu2 %3775  ;;  %v3785_v39 = vand.u32 65535, %v9123_v28  ;;  %v10700_v28 = vld [vmem:[#allocation7_spill] sm:$0xff] }
 0x80d   : > { %vm3777_vm1 = vcmp.eq.f32.partialorder %v9049_v1, %v9258_v25  ;;  %5191 = vmatmul.msk.bf16.gmra.mxu2 %vm4645_vm3, %v4368_v36  ;;  %v4085_v23 = vadd.f32 %v4053_v46, %v10688_v15  ;;  %v3673_v1 = vand.u32 65535, %v9069_v9  ;;  %v10692_v46 = vld [vmem:[#allocation37_spill] sm:$0xff]  ;;  %v4110_v5 = vadd.f32 %v9051_v45, %v3150_v29 }
 0x80e   : > { %v3778_v62 = vsel %vm3777_vm1, %v3773_v18, inf  ;;  %v5221_v18 = vld [vmem:[%s9120_s11 + $0x28] sm:$0xff] }
 0x80f   : > { %3779 = vmin.xlane.f32.xlu0 %v3778_v62  ;;  %v3675_v51 = vcvt.s32.f32 %v3673_v1  ;;  %5447 = vrcp.f32 %v4110_v5  ;;  %v10699_v5 = vld [vmem:[#allocation24_spill] sm:$0xff] }
 0x810   : > { %v3612_v58 = vpop.xlane.xlu1 %3611  ;;  %v4237_v26 = vpop.f32.mrf.mxu0  ;;  %vm3927_vm13 = vcmp.lt.f32.partialorder %v10699_v5, 1e+30 }
 0x811   : > { %v3613_v22 = vcvt.f32.s32 %v3612_v58  ;;  %v5444_v52 = vpop.eup %5443 }
 0x812   : > { %5173 = vmatmul.msk.bf16.gmra.mxu1 %vm4497_vm11, %v5220_v43  ;;  %v5446_v10 = vpop.eup %5445 }
 0x813   : > { %v3616_v11 = vadd.s32 %v3615_v27, %v3613_v22  ;;  %v4340_v31 = vmul.f32 %v5446_v10, %v4237_v26  ;;  %v10694_v26 = vld [vmem:[#allocation39_spill] sm:$0xff]  ;;  %v10696_v22 = vld [vmem:[#allocation56_spill] sm:$0xff] }
 0x815   : > { %vm3830_vm4 = vcmp.eq.s32.totalorder %v6120_v60, %v3616_v11  ;;  %v5448_v50 = vpop.eup %5447  ;;  %v3151_v11 = vadd.f32 %v10697_v63, %v10696_v22 }
 0x816   : > { %v5058_v53 = vsel %vm3830_vm4, 1.0, %v10149_v44 }
 0x817   : > { %v4054_v38 = vmul.f32 %v5058_v53, %v9271_v30  ;;  %v4111_v21 = vadd.f32 %v9038_v12, %v3151_v11 }
 0x818   : > { %v9274_v34 = vpop.xlane.xlu0 %3691  ;;  %v9278_v20 = vpop.xlane.xlu1 %3677 }
 0x819   : > { %v4239_v9 = vpop.f32.mrf.mxu0  ;;  %vm3693_vm5 = vcmp.eq.f32.partialorder %v9084_v17, %v9274_v34  ;;  %vm3679_vm6 = vcmp.eq.f32.partialorder %v9086_v6, %v9278_v20  ;;  %v4086_v54 = vadd.f32 %v4054_v38, %v10689_v57  ;;  %v3149_v17 = vadd.f32 %v10693_v14, %v10692_v46 }
 0x81a   : > { %v4341_v4 = vmul.f32 %v5444_v52, %v4239_v9  ;;  %v3694_v8 = vsel %vm3693_vm5, %v3689_v40, inf  ;;  %v3680_v19 = vsel %vm3679_vm6, %v3675_v51, inf  ;;  %v10698_v9 = vld [vmem:[#allocation49_spill] sm:$0xff]  ;;  %v3712_v57 = vcvt.f32.s32 %v9129_v2 }
 0x81b   : > { %3695 = vmin.xlane.f32.xlu1 %v3694_v8  ;;  %3681 = vmin.xlane.f32.xlu2 %v3680_v19  ;;  %v4141_v16 = vpack.c.bf16 %v4086_v54, %v4085_v23  ;;  %v4109_v6 = vadd.f32 %v9062_v37, %v3149_v17  ;;  %v10695_v23 = vld [vmem:[#allocation47_spill] sm:$0xff]  ;;  %v3966_v51 = vmax.f32 %v10698_v9, 1e-16  ;;  %vm3934_vm7 = vcmp.lt.f32.partialorder %v10698_v9, 1e+30 }
 0x81c   : > { %v4369_v36 = vpack.c.bf16 %v4341_v4, %v4340_v31  ;;  %v3152_v27 = vadd.f32 %v10695_v23, %v10694_v26  ;;  %v3965_v31 = vmax.f32 %v8853_v13, 1e-16 }
 0x81d   : > { %4261 = vmatmul.bf16.gmra.mxu0 %v4141_v16  ;;  %5449 = vrcp.f32 %v4109_v6  ;;  %v3787_v16 = vcvt.s32.f32 %v3785_v39  ;;  %v3959_v6 = vmax.f32 %v10699_v5, 1e-16  ;;  %v10710_v5 = vld [vmem:[#allocation83_spill] sm:$0xff] }
 0x81e   : > { %5192 = vmatmul.msk.bf16.gmra.mxu2 %vm4645_vm3, %v4369_v36  ;;  %v4112_v37 = vadd.f32 %v9092_v42, %v3152_v27  ;;  %v3726_v42 = vcvt.f32.s32 %v9109_v56  ;;  %v3713_v36 = vshll.u32 %v3712_v57, 16  ;;  %v10703_v27 = vld [vmem:[#allocation80_spill] sm:$0xff]  ;;  %vm3929_vm6 = vcmp.lt.f32.partialorder %v10710_v5, 1e+30 }
 0x820   : > { %5451 = vrcp.f32 %v4112_v37  ;;  %v3727_v12 = vshll.u32 %v3726_v42, 16 }
 0x821   : > { %v4242_v41 = vpop.f32.mrf.mxu0  ;;  %5453 = vrcp.f32 %v4111_v21 }
 0x822   : > { %5174 = vmatmul.msk.bf16.gmra.mxu1 %vm4497_vm11, %v5221_v18  ;;  %5455 = vrcp.f32 %v3966_v51  ;;  %v10701_v18 = vld [vmem:[#allocation116_spill] sm:$0xff]  ;;  %v3642_v51 = vcvt.f32.s32 %v9181_v47 }
 0x823   : > { %v5450_v15 = vpop.eup %5449  ;;  %5457 = vrcp.f32 %v3965_v31  ;;  %v5222_v47 = vld [vmem:[%s9120_s11 + $0x30] sm:$0xff] }
 0x824   : > { %v4342_v62 = vmul.f32 %v5450_v15, %v4242_v41  ;;  %5459 = vrcp.f32 %v3959_v6  ;;  %v3961_v6 = vmax.f32 %v10710_v5, 1e-16 }
 0x826   : > { %v5452_v1 = vpop.eup %5451 }
 0x827   : > { %v5454_v53 = vpop.eup %5453 }
 0x828   : > { %v5456_v19 = vpop.eup %5455 }
 0x829   : > { %v4244_v24 = vpop.f32.mrf.mxu0  ;;  %v9309_v33 = vsel %vm3934_vm7, %v5456_v19, 0.0  ;;  %v5458_v2 = vpop.eup %5457  ;;  %v10708_v19 = vld [vmem:[#allocation84_spill] sm:$0xff] }
 0x82a   : > { %v4343_v58 = vmul.f32 %v5448_v50, %v4244_v24  ;;  %v9321_v24 = vsel %vm3933_vm10, %v5458_v2, 0.0  ;;  %v5460_v13 = vpop.eup %5459 }
 0x82c   : > { %v4370_v45 = vpack.c.bf16 %v4343_v58, %v4342_v62  ;;  %v10702_v58 = vld [vmem:[#allocation53_spill] sm:$0xff] }
 0x82d   : > { %v3628_v26 = vcvt.f32.s32 %v10702_v58  ;;  %v10713_v58 = vld [vmem:[#allocation120_spill] sm:$0xff] }
 0x82e   : > { %5193 = vmatmul.msk.bf16.gmra.mxu2 %vm4645_vm3, %v4370_v45 }
 0x82f   : > { %v3629_v63 = vshll.u32 %v3628_v26, 16  ;;  %v10714_v26 = vld [vmem:[#allocation121_spill] sm:$0xff] }
 0x831   : > { %v4247_v43 = vpop.f32.mrf.mxu0 }
 0x832   : > { %v4344_v40 = vmul.f32 %v5454_v53, %v4247_v43  ;;  %v10704_v43 = vld [vmem:[#allocation71_spill] sm:$0xff]  ;;  %5175 = vmatmul.msk.bf16.gmra.mxu1 %vm4497_vm11, %v5222_v47 }
 0x833   : > { %v9327_v21 = vpop.f32.mrf.mxu1  ;;  %vm3928_vm0 = vcmp.lt.f32.partialorder %v10704_v43, 1e+30 }
 0x839   : > { %v4249_v52 = vpop.f32.mrf.mxu0 }
 0x83a   : > { %v4345_v38 = vmul.f32 %v5452_v1, %v4249_v52  ;;  %v3960_v1 = vmax.f32 %v10704_v43, 1e-16  ;;  %v10705_v52 = vld [vmem:[#allocation32_spill] sm:$0xff]  ;;  %v10716_v43 = vld [vmem:[#allocation97_spill] sm:$0xff] }
 0x83c   : > { %v4371_v10 = vpack.c.bf16 %v4345_v38, %v4344_v40  ;;  %v3799_v40 = vand.u32 65535, %v10705_v52  ;;  %v10706_v38 = vld [vmem:[#allocation86_spill] sm:$0xff]  ;;  %5461 = vrcp.f32 %v3960_v1 }
 0x83d   : > { %v10717_v52 = vld [vmem:[#allocation74_spill] sm:$0xff] }
 0x83e   : > { %5194 = vmatmul.msk.bf16.gmra.mxu2 %vm4645_vm3, %v4371_v10  ;;  %v9334_v10 = vsel %vm3927_vm13, %v5460_v13, 0.0 }
 0x846   : > { %v3724_v4 = vpop.xlane.xlu1 %3723 }
 0x847   : > { %v3725_v8 = vcvt.f32.s32 %v3724_v4  ;;  %v3801_v4 = vcvt.s32.f32 %v3799_v40 }
 0x849   : > { %v3728_v54 = vadd.s32 %v3727_v12, %v3725_v8  ;;  %v10707_v12 = vld [vmem:[#allocation51_spill] sm:$0xff] }
 0x84a   : > { %v3967_v8 = vmax.f32 %v10707_v12, 1e-16  ;;  %vm3935_vm2 = vcmp.lt.f32.partialorder %v10707_v12, 1e+30  ;;  %v3670_v12 = vcvt.f32.s32 %v9231_v61 }
 0x84b   : > { %vm3838_vm8 = vcmp.eq.s32.totalorder %v6120_v60, %v3728_v54 }
 0x84c   : > { %v5066_v56 = vsel %vm3838_vm8, 1.0, %v10149_v44  ;;  %5463 = vrcp.f32 %v3967_v8 }
 0x84d   : > { %v4062_v14 = vmul.f32 %v5066_v56, %v9309_v33  ;;  %v3643_v56 = vshll.u32 %v3642_v51, 16 }
 0x84e   : > { %v3710_v29 = vpop.xlane.xlu2 %3709  ;;  %v9313_v17 = vpop.xlane.xlu1 %3789 }
 0x84f   : > { %v3711_v46 = vcvt.f32.s32 %v3710_v29  ;;  %vm3791_vm9 = vcmp.eq.f32.partialorder %v10700_v28, %v9313_v17  ;;  %v4094_v50 = vadd.f32 %v4062_v14, %v10701_v18  ;;  %v10709_v14 = vld [vmem:[#allocation82_spill] sm:$0xff] }
 0x850   : > { %v3792_v15 = vsel %vm3791_vm9, %v3787_v16, inf  ;;  %v3968_v16 = vmax.f32 %v10709_v14, 1e-16  ;;  %v10711_v28 = vld [vmem:[#allocation98_spill] sm:$0xff]  ;;  %vm3936_vm5 = vcmp.lt.f32.partialorder %v10709_v14, 1e+30 }
 0x851   : > { %v3714_v41 = vadd.s32 %v3713_v36, %v3711_v46  ;;  %3793 = vmin.xlane.f32.xlu0 %v3792_v15  ;;  %v9345_v36 = vpop.f32.mrf.mxu1  ;;  %v5462_v46 = vpop.eup %5461  ;;  %v10719_v14 = vld [vmem:[#allocation129_spill] sm:$0xff]  ;;  %vm4851_vm9 = vcmask 261120  }
 0x852   : > { %5465 = vrcp.f32 %v3968_v16 }
 0x853   : > { %vm3837_vm12 = vcmp.eq.s32.totalorder %v6120_v60, %v3714_v41  ;;  %v10712_v41 = vld [vmem:[#allocation30_spill] sm:$0xff]  ;;  %5467 = vrcp.f32 %v3961_v6 }
 0x854   : > { %v5065_v62 = vsel %vm3837_vm12, 1.0, %v10149_v44  ;;  %v3154_v18 = vadd.f32 %v10712_v41, %v10711_v28  ;;  %v10718_v28 = vld [vmem:[#allocation137_spill] sm:$0xff] }
 0x855   : > { %v4061_v23 = vmul.f32 %v5065_v62, %v9321_v24  ;;  %v3969_v41 = vmax.f32 %v10718_v28, 1e-16  ;;  %vm3937_vm13 = vcmp.lt.f32.partialorder %v10718_v28, 1e+30 }
 0x857   : > { %v4093_v45 = vadd.f32 %v4061_v23, %v10703_v27  ;;  %v3626_v22 = vpop.xlane.xlu0 %3625  ;;  %v3153_v23 = vadd.f32 %v10714_v26, %v10713_v58  ;;  %v4114_v27 = vadd.f32 %v9173_v32, %v3154_v18 }
 0x858   : > { %v3627_v11 = vcvt.f32.s32 %v3626_v22 }
 0x859   : > { %v4145_v37 = vpack.c.bf16 %v4094_v50, %v4093_v45  ;;  %v9356_v50 = vsel %vm3928_vm0, %v5462_v46, 0.0  ;;  %v10715_v45 = vld [vmem:[#allocation96_spill] sm:$0xff]  ;;  %v4113_v40 = vadd.f32 %v10717_v52, %v3153_v23  ;;  %5469 = vrcp.f32 %v4114_v27  ;;  %v5223_v23 = vld [vmem:[%s9120_s11 + $0x38] sm:$0xff] }
 0x85a   : > { %v3630_v53 = vadd.s32 %v3629_v63, %v3627_v11  ;;  %v5464_v63 = vpop.eup %5463  ;;  %5176 = vmatmul.msk.bf16.gmra.mxu1 %vm4497_vm11, %v5223_v23  ;;  %vm3930_vm10 = vcmp.lt.f32.partialorder %v10715_v45, 1e+30 }
 0x85b   : > { %4281 = vmatmul.bf16.vlgmr.msra.gmra.mxu3 %v4145_v37  ;;  %v3656_v37 = vcvt.f32.s32 %v9213_v7  ;;  %v9371_v51 = vsel %vm3935_vm2, %v5464_v63, 0.0 }
 0x85c   : > { %5241 = vmatpush.bf16.msra.mxu3 %v10706_v38  ;;  %vm3831_vm14 = vcmp.eq.s32.totalorder %v6120_v60, %v3630_v53  ;;  %v3754_v53 = vcvt.f32.s32 %v9219_v59 }
 0x85d   : > { %v5059_v9 = vsel %vm3831_vm14, 1.0, %v10149_v44  ;;  %v3657_v7 = vshll.u32 %v3656_v37, 16 }
 0x85e   : > { %v4055_v42 = vmul.f32 %v5059_v9, %v9334_v10 }
 0x85f   : > { %v9339_v31 = vpop.xlane.xlu0 %3803  ;;  %v9369_v32 = vpop.f32.mrf.mxu1 }
 0x860   : > { %vm3805_vm15 = vcmp.eq.f32.partialorder %v9178_v48, %v9339_v31  ;;  %v4087_v57 = vadd.f32 %v4055_v42, %v10708_v19  ;;  %v3740_v48 = vcvt.f32.s32 %v9201_v3  ;;  %v3962_v3 = vmax.f32 %v10715_v45, 1e-16 }
 0x861   : > { %v3806_v54 = vsel %vm3805_vm15, %v3801_v4, inf  ;;  %v5466_v4 = vpop.eup %5465 }
 0x862   : > { %v3640_v39 = vpop.xlane.xlu2 %3639  ;;  %3807 = vmin.xlane.f32.xlu2 %v3806_v54  ;;  %v3741_v11 = vshll.u32 %v3740_v48, 16  ;;  %5471 = vrcp.f32 %v3962_v3  ;;  %v5468_v54 = vpop.eup %5467 }
 0x863   : > { %v3641_v29 = vcvt.f32.s32 %v3640_v39  ;;  %v3755_v39 = vshll.u32 %v3754_v53, 16  ;;  %5473 = vrcp.f32 %v4113_v40  ;;  %v9387_v48 = vsel %vm3929_vm6, %v5468_v54, 0.0  ;;  %v10722_v40 = vld [vmem:[#allocation26_spill] sm:$0xff] }
 0x864   : > { %5475 = vrcp.f32 %v3969_v41  ;;  %v3768_v54 = vcvt.f32.s32 %v9240_v0 }
 0x865   : > { %v3644_v2 = vadd.s32 %v3643_v56, %v3641_v29  ;;  %v9379_v29 = vld [vmem:[%s9665_s8] ss:$0 sm:$0xff] }
 0x867   : > { %vm3832_vm1 = vcmp.eq.s32.totalorder %v6120_v60, %v3644_v2  ;;  %v9383_v2 = vsel %vm3936_vm5, %v5466_v4, 0.0 }
 0x868   : > { %v5060_v15 = vsel %vm3832_vm1, 1.0, %v10149_v44 }
 0x869   : > { %v4056_v62 = vmul.f32 %v5060_v15, %v9356_v50  ;;  %v5470_v15 = vpop.eup %5469 }
 0x86a   : > { %v3738_v22 = vpop.xlane.xlu2 %3737  ;;  %v5472_v27 = vpop.eup %5471 }
 0x86b   : > { %v3739_v13 = vcvt.f32.s32 %v3738_v22  ;;  %v4088_v1 = vadd.f32 %v4056_v62, %v10716_v43  ;;  %v3671_v62 = vshll.u32 %v3670_v12, 16  ;;  %v5474_v37 = vpop.eup %5473  ;;  %v10721_v43 = vld [vmem:[#allocation36_spill] sm:$0xff] }
 0x86d   : > { %v3742_v38 = vadd.s32 %v3741_v11, %v3739_v13  ;;  %v4142_v9 = vpack.c.bf16 %v4088_v1, %v4087_v57  ;;  %v10720_v13 = vld [vmem:[#allocation8_spill] sm:$0xff] }
 0x86e   : > { %v3654_v42 = vpop.xlane.xlu0 %3653  ;;  %v4252_v8 = vpop.f32.mrf.mxu0  ;;  %v3156_v1 = vadd.f32 %v10721_v43, %v10720_v13 }
 0x86f   : > { %vm3839_vm4 = vcmp.eq.s32.totalorder %v6120_v60, %v3742_v38  ;;  %v3655_v19 = vcvt.f32.s32 %v3654_v42  ;;  %v3752_v59 = vpop.xlane.xlu1 %3751  ;;  %4266 = vmatmul.bf16.gmra.mxu0 %v4142_v9  ;;  %v9409_v9 = vpop.f32.mrf.mxu1  ;;  %v4346_v42 = vmul.f32 %v5474_v37, %v4252_v8  ;;  %v10724_v8 = vld [vmem:[#allocation73_spill] sm:$0xff] }
 0x870   : > { %v5067_v57 = vsel %vm3839_vm4, 1.0, %v10149_v44  ;;  %v3753_v56 = vcvt.f32.s32 %v3752_v59  ;;  %v4703_v46 = vpop.f32.mrf.mxu2  ;;  %v9415_v59 = vsel %vm3930_vm10, %v5472_v27, 0.0 }
 0x871   : > { %v3658_v47 = vadd.s32 %v3657_v7, %v3655_v19  ;;  %v4063_v16 = vmul.f32 %v5067_v57, %v9371_v51  ;;  %v4704_v6 = vadd.f32 %v4703_v46, %v9327_v21  ;;  %v10723_v7 = vld [vmem:[#allocation60_spill] sm:$0xff] }
 0x872   : > { %v3756_v61 = vadd.s32 %v3755_v39, %v3753_v56  ;;  %v3668_v5 = vpop.xlane.xlu2 %3667 }
 0x873   : > { %vm3833_vm7 = vcmp.eq.s32.totalorder %v6120_v60, %v3658_v47  ;;  %v4095_v18 = vadd.f32 %v4063_v16, %v10719_v14  ;;  %v4787_v26 = vadd.f32 %v9379_v29, %v4704_v6  ;;  %v3669_v3 = vcvt.f32.s32 %v3668_v5  ;;  %v10725_v47 = vld [vmem:[#allocation130_spill] sm:$0xff]  ;;  %v10726_v6 = vld [vmem:[#allocation135_spill] sm:$0xff]  ;;  %v5476_v5 = vpop.eup %5475 }
 0x874   : > { %v5061_v58 = vsel %vm3833_vm7, 1.0, %v10149_v44  ;;  %vm3840_vm8 = vcmp.eq.s32.totalorder %v6120_v60, %v3756_v61  ;;  %v3155_v46 = vadd.f32 %v10725_v47, %v10724_v8  ;;  %v4116_v16 = vadd.f32 %v9195_v49, %v3156_v1 }
 0x875   : > { %v5068_v21 = vsel %vm3840_vm8, 1.0, %v10149_v44  ;;  %v4057_v22 = vmul.f32 %v5061_v58, %v9387_v48  ;;  %v4819_v63 = vmax.f32 %v4787_v26, 0.0  ;;  %v3672_v53 = vadd.s32 %v3671_v62, %v3669_v3  ;;  %v10727_v62 = vld [vmem:[#allocation45_spill] sm:$0xff] }
 0x876   : > { %v4064_v11 = vmul.f32 %v5068_v21, %v9383_v2  ;;  %v4254_v52 = vpop.f32.mrf.mxu0  ;;  %v3970_v41 = vmax.f32 %v10726_v6, 1e-16  ;;  %5477 = vrcp.f32 %v4116_v16  ;;  %v3782_v21 = vcvt.f32.s32 %v9258_v25 }
 0x877   : > { %v4089_v38 = vadd.f32 %v4057_v22, %v10722_v40  ;;  %4852 = vst.msk [vmem:[%s9400_s16] sm:$0xff] %vm4851_vm9, %v4819_v63  ;;  %v4347_v4 = vmul.f32 %v5470_v15, %v4254_v52  ;;  %vm3834_vm12 = vcmp.eq.s32.totalorder %v6120_v60, %v3672_v53  ;;  %v4115_v15 = vadd.f32 %v9210_v55, %v3155_v46  ;;  %v4569_v3 = vpop.f32.mrf.mxu1  ;;  %v10728_v53 = vld [vmem:[#allocation90_spill] sm:$0xff] }
 0x878   : > { %v4096_v19 = vadd.f32 %v4064_v11, %v10723_v7  ;;  %v4705_v39 = vpop.f32.mrf.mxu2  ;;  %v5062_v12 = vsel %vm3834_vm12, 1.0, %v10149_v44  ;;  %5479 = vrcp.f32 %v3970_v41  ;;  %v9435_v22 = vsel %vm3937_vm13, %v5476_v5, 0.0  ;;  %v10729_v7 = vld [vmem:[#allocation127_spill] sm:$0xff] }
 0x879   : > { %v4372_v57 = vpack.c.bf16 %v4347_v4, %v4346_v42  ;;  %v4706_v56 = vadd.f32 %v4705_v39, %v9345_v36  ;;  %v4058_v61 = vmul.f32 %v5062_v12, %v9415_v59  ;;  %v3769_v36 = vshll.u32 %v3768_v54, 16  ;;  %v10730_v54 = vld [vmem:[#allocation87_spill] sm:$0xff] }
 0x87a   : > { %v4146_v45 = vpack.c.bf16 %v4096_v19, %v4095_v18  ;;  %v3766_v14 = vpop.xlane.xlu1 %3765  ;;  %5481 = vrcp.f32 %v4115_v15  ;;  %v3783_v13 = vshll.u32 %v3782_v21, 16  ;;  %vm3938_vm15 = vcmp.lt.f32.partialorder %v10726_v6, 1e+30 }
 0x87b   : > { %v4788_v0 = vadd.f32 %v9379_v29, %v4706_v56  ;;  %5195 = vmatmul.msk.bf16.gmra.mxu2 %vm4645_vm3, %v4372_v57  ;;  %v3767_v18 = vcvt.f32.s32 %v3766_v14  ;;  %v4090_v58 = vadd.f32 %v4058_v61, %v10727_v62  ;;  %v3964_v19 = vmax.f32 %v10729_v7, 1e-16  ;;  %v10731_v14 = vld [vmem:[#allocation15_spill] sm:$0xff] }
 0x87c   : > { %4286 = vmatmul.bf16.gmra.mxu3 %v4146_v45  ;;  %v5478_v28 = vpop.eup %5477  ;;  %v3963_v39 = vmax.f32 %v10730_v54, 1e-16  ;;  %v3698_v61 = vcvt.f32.s32 %v9274_v34  ;;  %v3684_v41 = vcvt.f32.s32 %v9278_v20  ;;  %vm3931_vm1 = vcmp.lt.f32.partialorder %v10730_v54, 1e+30  ;;  %v10737_v54 = vld [vmem:[#allocation94_spill] sm:$0xff] }
 0x87d   : > { %v4820_v26 = vmax.f32 %v4788_v0, 0.0  ;;  %v3770_v49 = vadd.s32 %v3769_v36, %v3767_v18  ;;  %v4143_v27 = vpack.c.bf16 %v4090_v58, %v4089_v38  ;;  %5483 = vrcp.f32 %v3964_v19  ;;  %v10736_v19 = vld [vmem:[#allocation132_spill] sm:$0xff] }
 0x87e   : > { %v4257_v23 = vpop.f32.mrf.mxu0  ;;  %v5480_v40 = vpop.eup %5479  ;;  %5485 = vrcp.f32 %v3963_v39  ;;  %v3699_v62 = vshll.u32 %v3698_v61, 16  ;;  %v3685_v5 = vshll.u32 %v3684_v41, 16  ;;  %vm3932_vm2 = vcmp.lt.f32.partialorder %v10729_v7, 1e+30  ;;  %v10735_v7 = vld [vmem:[#allocation133_spill] sm:$0xff] }
 0x87f   : > { %4853 = vst.msk [vmem:[%s9400_s16 + $0x8] sm:$0xff] %vm4851_vm9, %v4820_v26  ;;  %vm3841_vm14 = vcmp.eq.s32.totalorder %v6120_v60, %v3770_v49  ;;  %4271 = vmatmul.bf16.gmra.mxu0 %v4143_v27  ;;  %v9448_v56 = vsel %vm3938_vm15, %v5480_v40, 0.0  ;;  %v4571_v6 = vpop.f32.mrf.mxu1  ;;  %v5224_v49 = vld [vmem:[%s9120_s11 + $0x40] sm:$0xff]  ;;  %v10733_v40 = vld [vmem:[#allocation17_spill] sm:$0xff] }
 0x880   : > { %v4708_v55 = vpop.f32.mrf.mxu2  ;;  %v5069_v63 = vsel %vm3841_vm14, 1.0, %v10149_v44  ;;  %v5482_v4 = vpop.eup %5481  ;;  %5177 = vmatmul.msk.bf16.gmra.mxu1 %vm4497_vm11, %v5224_v49 }
 0x881   : > { %v4709_v11 = vadd.f32 %v4708_v55, %v9369_v32  ;;  %v4065_v25 = vmul.f32 %v5069_v63, %v9435_v22  ;;  %v4348_v12 = vmul.f32 %v5482_v4, %v4257_v23 }
 0x882   : > { %v3780_v37 = vpop.xlane.xlu0 %3779 }
 0x883   : > { %v4789_v43 = vadd.f32 %v9379_v29, %v4709_v11  ;;  %v3781_v1 = vcvt.f32.s32 %v3780_v37  ;;  %v4097_v52 = vadd.f32 %v4065_v25, %v10728_v53  ;;  %v5484_v23 = vpop.eup %5483 }
 0x884   : > { %v5486_v21 = vpop.eup %5485  ;;  %v9465_v11 = vsel %vm3932_vm2, %v5484_v23, 0.0 }
 0x885   : > { %v4821_v38 = vmax.f32 %v4789_v43, 0.0  ;;  %v3784_v42 = vadd.s32 %v3783_v13, %v3781_v1  ;;  %v9470_v13 = vsel %vm3931_vm1, %v5486_v21, 0.0 }
 0x886   : > { %v4259_v32 = vpop.f32.mrf.mxu0 }
 0x887   : > { %4854 = vst.msk [vmem:[%s9400_s16 + $0x10] sm:$0xff] %vm4851_vm9, %v4821_v38  ;;  %vm3842_vm0 = vcmp.eq.s32.totalorder %v6120_v60, %v3784_v42  ;;  %v4349_v57 = vmul.f32 %v5478_v28, %v4259_v32  ;;  %v4574_v1 = vpop.f32.mrf.mxu1  ;;  %v10734_v42 = vld [vmem:[#allocation111_spill] sm:$0xff]  ;;  %v3158_v32 = vadd.f32 %v10736_v19, %v10735_v7 }
 0x888   : > { %v5070_v45 = vsel %vm3842_vm0, 1.0, %v10149_v44  ;;  %v4710_v8 = vpop.f32.mrf.mxu2 }
 0x889   : > { %v4373_v47 = vpack.c.bf16 %v4349_v57, %v4348_v12  ;;  %v4711_v46 = vadd.f32 %v4710_v8, %v9409_v9  ;;  %v4066_v16 = vmul.f32 %v5070_v45, %v9448_v56  ;;  %v4118_v45 = vadd.f32 %v9271_v30, %v3158_v32 }
 0x88b   : > { %v4790_v0 = vadd.f32 %v9379_v29, %v4711_v46  ;;  %5196 = vmatmul.msk.bf16.gmra.mxu2 %vm4645_vm3, %v4373_v47  ;;  %v4098_v15 = vadd.f32 %v4066_v16, %v10731_v14 }
 0x88d   : > { %v4822_v36 = vmax.f32 %v4790_v0, 0.0  ;;  %v4147_v9 = vpack.c.bf16 %v4098_v15, %v4097_v52  ;;  %v10732_v52 = vld [vmem:[#allocation131_spill] sm:$0xff] }
 0x88e   : > { %v3696_v18 = vpop.xlane.xlu1 %3695  ;;  %v3682_v26 = vpop.xlane.xlu2 %3681  ;;  %v3157_v38 = vadd.f32 %v10733_v40, %v10732_v52  ;;  %v3796_v40 = vcvt.f32.s32 %v9313_v17 }
 0x88f   : > { %v3697_v58 = vcvt.f32.s32 %v3696_v18  ;;  %4855 = vst.msk [vmem:[%s9400_s16 + $0x18] sm:$0xff] %vm4851_vm9, %v4822_v36  ;;  %v3683_v34 = vcvt.f32.s32 %v3682_v26  ;;  %4291 = vmatmul.bf16.gmra.mxu3 %v4147_v9  ;;  %v4576_v41 = vpop.f32.mrf.mxu1 }
 0x890   : > { %v4713_v27 = vpop.f32.mrf.mxu2  ;;  %v4117_v12 = vadd.f32 %v9251_v35, %v3157_v38  ;;  %v3797_v7 = vshll.u32 %v3796_v40, 16  ;;  %v10747_v40 = vld [vmem:[#allocation21_spill] sm:$0xff] }
 0x891   : > { %v3700_v20 = vadd.s32 %v3699_v62, %v3697_v58  ;;  %v3686_v55 = vadd.s32 %v3685_v5, %v3683_v34  ;;  %v4714_v63 = vadd.f32 %v4713_v27, %v4569_v3 }
 0x892   : > { %5487 = vrcp.f32 %v4117_v12 }
 0x893   : > { %vm3836_vm4 = vcmp.eq.s32.totalorder %v6120_v60, %v3700_v20  ;;  %vm3835_vm5 = vcmp.eq.s32.totalorder %v6120_v60, %v3686_v55  ;;  %v4791_v25 = vadd.f32 %v9379_v29, %v4714_v63  ;;  %5489 = vrcp.f32 %v4118_v45 }
 0x894   : > { %v5064_v37 = vsel %vm3836_vm4, 1.0, %v10149_v44  ;;  %v5063_v3 = vsel %vm3835_vm5, 1.0, %v10149_v44 }
 0x895   : > { %v4060_v43 = vmul.f32 %v5064_v37, %v9465_v11  ;;  %v4823_v28 = vmax.f32 %v4791_v25, 0.0  ;;  %v4059_v53 = vmul.f32 %v5063_v3, %v9470_v13 }
 0x897   : > { %v4092_v4 = vadd.f32 %v4060_v43, %v10734_v42  ;;  %4856 = vst.msk [vmem:[%s9400_s16 + $0x20] sm:$0xff] %vm4851_vm9, %v4823_v28  ;;  %v4091_v39 = vadd.f32 %v4059_v53, %v10737_v54  ;;  %v4579_v26 = vpop.f32.mrf.mxu1 }
 0x898   : > { %v4715_v57 = vpop.f32.mrf.mxu2  ;;  %v5488_v35 = vpop.eup %5487 }
 0x899   : > { %v4716_v8 = vadd.f32 %v4715_v57, %v4571_v6  ;;  %v4144_v47 = vpack.c.bf16 %v4092_v4, %v4091_v39  ;;  %v5490_v15 = vpop.eup %5489 }
 0x89a   : > { %v4262_v16 = vpop.f32.mrf.mxu0 }
 0x89b   : > { %v4792_v46 = vadd.f32 %v9379_v29, %v4716_v8  ;;  %4276 = vmatmul.bf16.gmra.mxu0 %v4144_v47  ;;  %v4350_v36 = vmul.f32 %v5488_v35, %v4262_v16  ;;  %v10739_v16 = vld [vmem:[#allocation46_spill] sm:$0xff] }
 0x89c   : > { %vm3940_vm8 = vcmp.lt.f32.partialorder %v10739_v16, 1e+30 }
 0x89d   : > { %v4824_v61 = vmax.f32 %v4792_v46, 0.0 }
 0x89f   : > { %4857 = vst.msk [vmem:[%s9400_s16 + $0x28] sm:$0xff] %vm4851_vm9, %v4824_v61  ;;  %v4581_v27 = vpop.f32.mrf.mxu1  ;;  %v3972_v61 = vmax.f32 %v10739_v16, 1e-16 }
 0x8a1   : > { %v4718_v0 = vpop.f32.mrf.mxu2 }
 0x8a2   : > { %v4719_v14 = vadd.f32 %v4718_v0, %v4574_v1  ;;  %v4264_v6 = vpop.f32.mrf.mxu0  ;;  %v10738_v1 = vld [vmem:[#allocation22_spill] sm:$0xff] }
 0x8a3   : > { %v4351_v18 = vmul.f32 %v5490_v15, %v4264_v6  ;;  %v3971_v28 = vmax.f32 %v10738_v1, 1e-16  ;;  %vm3939_vm6 = vcmp.lt.f32.partialorder %v10738_v1, 1e+30 }
 0x8a4   : > { %v4793_v30 = vadd.f32 %v9379_v29, %v4719_v14  ;;  %v3810_v14 = vcvt.f32.s32 %v9339_v31 }
 0x8a5   : > { %v4374_v62 = vpack.c.bf16 %v4351_v18, %v4350_v36  ;;  %5491 = vrcp.f32 %v3971_v28 }
 0x8a6   : > { %v4825_v9 = vmax.f32 %v4793_v30, 0.0  ;;  %5493 = vrcp.f32 %v3972_v61  ;;  %v3811_v15 = vshll.u32 %v3810_v14, 16 }
 0x8a7   : > { %5197 = vmatmul.msk.bf16.gmra.mxu2 %vm4645_vm3, %v4374_v62  ;;  %v4584_v3 = vpop.f32.mrf.mxu1 }
 0x8a8   : > { %4858 = vst.msk [vmem:[%s9400_s16 + $0x30] sm:$0xff] %vm4851_vm9, %v4825_v9 }
 0x8a9   : > { %v4720_v58 = vpop.f32.mrf.mxu2 }
 0x8aa   : > { %v4721_v5 = vadd.f32 %v4720_v58, %v4576_v41  ;;  %v10740_v41 = vld [vmem:[#allocation112_spill] sm:$0xff]  ;;  %v10741_v58 = vld [vmem:[#allocation63_spill] sm:$0xff] }
 0x8ab   : > { %v5492_v54 = vpop.eup %5491 }
 0x8ac   : > { %v4794_v34 = vadd.f32 %v9379_v29, %v4721_v5  ;;  %v9508_v45 = vsel %vm3939_vm6, %v5492_v54, 0.0  ;;  %v5494_v6 = vpop.eup %5493  ;;  %v5225_v5 = vld [vmem:[%s9120_s11 + $0x48] sm:$0xff] }
 0x8ad   : > { %v9520_v18 = vsel %vm3940_vm8, %v5494_v6, 0.0  ;;  %5178 = vmatmul.msk.bf16.gmra.mxu1 %vm4497_vm11, %v5225_v5 }
 0x8ae   : > { %v4826_v49 = vmax.f32 %v4794_v34, 0.0  ;;  %v10742_v34 = vld [vmem:[#allocation59_spill] sm:$0xff] }
 0x8af   : > { %v4586_v32 = vpop.f32.mrf.mxu1 }
 0x8b0   : > { %4859 = vst.msk [vmem:[%s9400_s16 + $0x38] sm:$0xff] %vm4851_vm9, %v4826_v49  ;;  %v10743_v49 = vld [vmem:[#allocation89_spill] sm:$0xff] }
 0x8b1   : > { %v4723_v23 = vpop.f32.mrf.mxu2 }
 0x8b2   : > { %v4724_v20 = vadd.f32 %v4723_v23, %v4579_v26  ;;  %v3160_v23 = vadd.f32 %v10743_v49, %v10742_v34  ;;  %v10752_v49 = vld [vmem:[#allocation128_spill] sm:$0xff] }
 0x8b4   : > { %v4795_v21 = vadd.f32 %v9379_v29, %v4724_v20  ;;  %v10744_v20 = vld [vmem:[#allocation18_spill] sm:$0xff] }
 0x8b6   : > { %v4827_v55 = vmax.f32 %v4795_v21, 0.0  ;;  %v4120_v21 = vadd.f32 %v9356_v50, %v3160_v23  ;;  %v10746_v50 = vld [vmem:[#allocation27_spill] sm:$0xff]  ;;  %v10753_v23 = vld [vmem:[#allocation13_spill] sm:$0xff] }
 0x8b8   : > { %4860 = vst.msk [vmem:[%s9400_s16 + $0x40] sm:$0xff] %vm4851_vm9, %v4827_v55  ;;  %5495 = vrcp.f32 %v4120_v21  ;;  %v10754_v21 = vld [vmem:[#allocation101_spill] sm:$0xff] }
 0x8b9   : > { %v4725_v63 = vpop.f32.mrf.mxu2 }
 0x8ba   : > { %v4726_v37 = vadd.f32 %v4725_v63, %v4581_v27  ;;  %v5229_v63 = vld [vmem:[%s9120_s11 + $0x68] sm:$0xff] }
 0x8bc   : > { %v4796_v25 = vadd.f32 %v9379_v29, %v4726_v37  ;;  %v5226_v37 = vld [vmem:[%s9120_s11 + $0x50] sm:$0xff] }
 0x8bd   : > { %5179 = vmatmul.msk.bf16.gmra.mxu1 %vm4497_vm11, %v5226_v37 }
 0x8be   : > { %v4828_v43 = vmax.f32 %v4796_v25, 0.0  ;;  %v5496_v25 = vpop.eup %5495 }
 0x8c0   : > { %4861 = vst.msk [vmem:[%s9400_s16 + $0x48] sm:$0xff] %vm4851_vm9, %v4828_v43 }
 0x8c1   : > { %v4728_v53 = vpop.f32.mrf.mxu2 }
 0x8c2   : > { %v4729_v52 = vadd.f32 %v4728_v53, %v4584_v3 }
 0x8c4   : > { %v4797_v38 = vadd.f32 %v9379_v29, %v4729_v52  ;;  %v3794_v4 = vpop.xlane.xlu0 %3793  ;;  %v4589_v52 = vpop.f32.mrf.mxu1 }
 0x8c5   : > { %v3795_v19 = vcvt.f32.s32 %v3794_v4 }
 0x8c6   : > { %v4829_v42 = vmax.f32 %v4797_v38, 0.0  ;;  %v10748_v38 = vld [vmem:[#allocation64_spill] sm:$0xff] }
 0x8c7   : > { %v3798_v39 = vadd.s32 %v3797_v7, %v3795_v19 }
 0x8c8   : > { %4862 = vst.msk [vmem:[%s9400_s16 + $0x50] sm:$0xff] %vm4851_vm9, %v4829_v42  ;;  %v10749_v42 = vld [vmem:[#allocation31_spill] sm:$0xff] }
 0x8c9   : > { %v4730_v12 = vpop.f32.mrf.mxu2  ;;  %vm3843_vm7 = vcmp.eq.s32.totalorder %v6120_v60, %v3798_v39  ;;  %v3162_v4 = vadd.f32 %v10749_v42, %v10748_v38  ;;  %v5228_v42 = vld [vmem:[%s9120_s11 + $0x60] sm:$0xff] }
 0x8ca   : > { %v4731_v57 = vadd.f32 %v4730_v12, %v4586_v32  ;;  %v5071_v17 = vsel %vm3843_vm7, 1.0, %v10149_v44  ;;  %v5230_v12 = vld [vmem:[%s9120_s11 + $0x70] sm:$0xff] }
 0x8cb   : > { %v4067_v47 = vmul.f32 %v5071_v17, %v9508_v45  ;;  %v4122_v19 = vadd.f32 %v9415_v59, %v3162_v4 }
 0x8cc   : > { %v4798_v8 = vadd.f32 %v9379_v29, %v4731_v57  ;;  %v4591_v17 = vpop.f32.mrf.mxu1 }
 0x8cd   : > { %v4099_v0 = vadd.f32 %v4067_v47, %v10740_v41 }
 0x8ce   : > { %v4830_v46 = vmax.f32 %v4798_v8, 0.0 }
 0x8d0   : > { %4863 = vst.msk [vmem:[%s9400_s16 + $0x58] sm:$0xff] %vm4851_vm9, %v4830_v46 }
 0x8d5   : > { %v3808_v35 = vpop.xlane.xlu2 %3807 }
 0x8d6   : > { %v3809_v30 = vcvt.f32.s32 %v3808_v35 }
 0x8d8   : > { %v3812_v36 = vadd.s32 %v3811_v15, %v3809_v30  ;;  %v4594_v30 = vpop.f32.mrf.mxu1 }
 0x8da   : > { %vm3844_vm10 = vcmp.eq.s32.totalorder %v6120_v60, %v3812_v36  ;;  %v10745_v60 = vld [vmem:[#allocation117_spill] sm:$0xff] }
 0x8db   : > { %v5072_v9 = vsel %vm3844_vm10, 1.0, %v10149_v44  ;;  %v3159_v27 = vadd.f32 %v10745_v60, %v10744_v20  ;;  %v3167_v20 = vadd.f32 %v10753_v23, %v10752_v49 }
 0x8dc   : > { %v4068_v62 = vmul.f32 %v5072_v9, %v9520_v18  ;;  %v5227_v9 = vld [vmem:[%s9120_s11 + $0x58] sm:$0xff] }
 0x8dd   : > { %v4119_v55 = vadd.f32 %v9334_v10, %v3159_v27  ;;  %v3161_v10 = vadd.f32 %v10747_v40, %v10746_v50  ;;  %5180 = vmatmul.msk.bf16.gmra.mxu1 %vm4497_vm11, %v5227_v9 }
 0x8de   : > { %v4100_v26 = vadd.f32 %v4068_v62, %v10741_v58  ;;  %v9544_v32 = vpop.f32.mrf.mxu3  ;;  %v5231_v58 = vld [vmem:[%s9120_s11 + $0x78] sm:$0xff] }
 0x8df   : > { %5497 = vrcp.f32 %v4119_v55  ;;  %v4121_v7 = vadd.f32 %v9387_v48, %v3161_v10  ;;  %v10755_v55 = vld [vmem:[#allocation77_spill] sm:$0xff] }
 0x8e0   : > { %v4148_v31 = vpack.c.bf16 %v4100_v26, %v4099_v0  ;;  %v10750_v26 = vld [vmem:[#allocation11_spill] sm:$0xff] }
 0x8e1   : > { %5499 = vrcp.f32 %v4121_v7 }
 0x8e2   : > { %4296 = vmatmul.bf16.gmra.mxu3 %v4148_v31  ;;  %5501 = vrcp.f32 %v4122_v19  ;;  %v10751_v31 = vld [vmem:[#allocation19_spill] sm:$0xff] }
 0x8e3   : > { %v3168_v5 = vadd.f32 %v10751_v31, %v10750_v26 }
 0x8e5   : > { %v5498_v3 = vpop.eup %5497  ;;  %v4128_v60 = vadd.f32 %v9383_v2, %v3168_v5 }
 0x8e6   : > { %v9549_v16 = vpop.f32.mrf.mxu3 }
 0x8e7   : > { %v5500_v46 = vpop.eup %5499  ;;  %5503 = vrcp.f32 %v4128_v60 }
 0x8e8   : > { %v5502_v48 = vpop.eup %5501 }
 0x8ec   : > { %v4267_v44 = vpop.f32.mrf.mxu0 }
 0x8ed   : > { %v4352_v1 = vmul.f32 %v5498_v3, %v4267_v44  ;;  %v3163_v44 = vadd.f32 %v10755_v55, %v10754_v21  ;;  %v10757_v3 = vld [vmem:[#allocation75_spill] sm:$0xff]  ;;  %v5504_v10 = vpop.eup %5503  ;;  %5181 = vmatmul.msk.bf16.gmra.mxu1 %vm4497_vm11, %v5228_v42 }
 0x8f2   : > { %5182 = vmatmul.msk.bf16.vlgmr.msrb.gmra.mxu3 %vm4497_vm11, %v5229_v63  ;;  %v4127_v63 = vadd.f32 %v9371_v51, %v3167_v20 }
 0x8f4   : > { %v4269_v43 = vpop.f32.mrf.mxu0  ;;  %5505 = vrcp.f32 %v4127_v63 }
 0x8f5   : > { %v4353_v28 = vmul.f32 %v5496_v25, %v4269_v43  ;;  %v10756_v25 = vld [vmem:[#allocation50_spill] sm:$0xff] }
 0x8f6   : > { %v3164_v43 = vadd.f32 %v10757_v3, %v10756_v25 }
 0x8f7   : > { %v4375_v53 = vpack.c.bf16 %v4353_v28, %v4352_v1  ;;  %v4596_v1 = vpop.f32.mrf.mxu1  ;;  %v4123_v28 = vadd.f32 %v9470_v13, %v3163_v44 }
 0x8f8   : > { %v4124_v2 = vadd.f32 %v9465_v11, %v3164_v43  ;;  %v10759_v11 = vld [vmem:[#allocation34_spill] sm:$0xff] }
 0x8f9   : > { %5198 = vmatmul.msk.bf16.gmra.mxu2 %vm4645_vm3, %v4375_v53  ;;  %5507 = vrcp.f32 %v4123_v28 }
 0x8fa   : > { %5509 = vrcp.f32 %v4124_v2  ;;  %v5506_v7 = vpop.eup %5505  ;;  %v10768_v2 = vld [vmem:[#allocation67_spill] sm:$0xff] }
 0x8fc   : > { %v4272_v54 = vpop.f32.mrf.mxu0 }
 0x8fd   : > { %v4354_v61 = vmul.f32 %v5500_v46, %v4272_v54  ;;  %v10758_v54 = vld [vmem:[#allocation38_spill] sm:$0xff]  ;;  %v10761_v46 = vld [vmem:[#allocation25_spill] sm:$0xff] }
 0x8fe   : > { %v4733_v39 = vpop.f32.mrf.mxu2 }
 0x8ff   : > { %v4734_v57 = vadd.f32 %v4733_v39, %v4589_v52  ;;  %v4287_v36 = vpop.f32.mrf.mxu3  ;;  %v5508_v19 = vpop.eup %5507  ;;  %v3170_v39 = vadd.f32 %v10759_v11, %v10758_v54 }
 0x900   : > { %v4360_v13 = vmul.f32 %v5506_v7, %v4287_v36  ;;  %v10765_v36 = vld [vmem:[#allocation28_spill] sm:$0xff] }
 0x901   : > { %v4799_v8 = vadd.f32 %v9379_v29, %v4734_v57  ;;  %v5510_v57 = vpop.eup %5509 }
 0x902   : > { %5183 = vmatmul.msk.bf16.gmra.mxu3 %vm4497_vm11, %v5230_v12 }
 0x903   : > { %v4831_v47 = vmax.f32 %v4799_v8, 0.0 }
 0x904   : > { %v4274_v59 = vpop.f32.mrf.mxu0 }
 0x905   : > { %4864 = vst.msk [vmem:[%s9400_s16 + $0x60] sm:$0xff] %vm4851_vm9, %v4831_v47  ;;  %v4355_v41 = vmul.f32 %v5502_v48, %v4274_v59  ;;  %v10760_v47 = vld [vmem:[#allocation102_spill] sm:$0xff]  ;;  %v4130_v59 = vadd.f32 %v9448_v56, %v3170_v39 }
 0x906   : > { %v4735_v0 = vpop.f32.mrf.mxu2  ;;  %v3169_v48 = vadd.f32 %v10761_v46, %v10760_v47 }
 0x907   : > { %v4736_v14 = vadd.f32 %v4735_v0, %v4591_v17  ;;  %v4376_v35 = vpack.c.bf16 %v4355_v41, %v4354_v61  ;;  %v4289_v52 = vpop.f32.mrf.mxu3  ;;  %v10762_v0 = vld [vmem:[#allocation115_spill] sm:$0xff]  ;;  %5511 = vrcp.f32 %v4130_v59 }
 0x908   : > { %v4361_v4 = vmul.f32 %v5504_v10, %v4289_v52 }
 0x909   : > { %v4800_v15 = vadd.f32 %v9379_v29, %v4736_v14  ;;  %5199 = vmatmul.msk.bf16.gmra.mxu2 %vm4645_vm3, %v4376_v35  ;;  %v10763_v14 = vld [vmem:[#allocation40_spill] sm:$0xff] }
 0x90a   : > { %v4379_v17 = vpack.c.bf16 %v4361_v4, %v4360_v13  ;;  %v3166_v35 = vadd.f32 %v10763_v14, %v10762_v0 }
 0x90b   : > { %v4832_v6 = vmax.f32 %v4800_v15, 0.0  ;;  %v4129_v15 = vadd.f32 %v9435_v22, %v3169_v48 }
 0x90d   : > { %4865 = vst.msk [vmem:[%s9400_s16 + $0x68] sm:$0xff] %vm4851_vm9, %v4832_v6  ;;  %v10764_v6 = vld [vmem:[#allocation48_spill] sm:$0xff]  ;;  %5513 = vrcp.f32 %v4129_v15  ;;  %v5512_v31 = vpop.eup %5511 }
 0x90e   : > { %v4738_v62 = vpop.f32.mrf.mxu2  ;;  %v3165_v9 = vadd.f32 %v10765_v36, %v10764_v6 }
 0x90f   : > { %v4739_v34 = vadd.f32 %v4738_v62, %v4594_v30  ;;  %v4126_v62 = vadd.f32 %v9309_v33, %v3166_v35 }
 0x910   : > { %v4125_v56 = vadd.f32 %v9321_v24, %v3165_v9 }
 0x911   : > { %v4801_v27 = vadd.f32 %v9379_v29, %v4739_v34  ;;  %5515 = vrcp.f32 %v4126_v62 }
 0x912   : > { %5184 = vmatmul.msk.bf16.gmra.mxu3 %vm4497_vm11, %v5231_v58  ;;  %v4292_v12 = vpop.f32.mrf.mxu3  ;;  %v4599_v58 = vpop.f32.mrf.mxu1  ;;  %5517 = vrcp.f32 %v4125_v56 }
 0x913   : > { %v4833_v37 = vmax.f32 %v4801_v27, 0.0  ;;  %v5514_v49 = vpop.eup %5513 }
 0x914   : > { %v4362_v20 = vmul.f32 %v5514_v49, %v4292_v12 }
 0x915   : > { %4866 = vst.msk [vmem:[%s9400_s16 + $0x70] sm:$0xff] %vm4851_vm9, %v4833_v37 }
 0x916   : > { %v4740_v53 = vpop.f32.mrf.mxu2 }
 0x917   : > { %v4741_v50 = vadd.f32 %v4740_v53, %v4596_v1  ;;  %v5516_v23 = vpop.eup %5515  ;;  %v10767_v1 = vld [vmem:[#allocation76_spill] sm:$0xff] }
 0x918   : > { %v4277_v40 = vpop.f32.mrf.mxu0  ;;  %v4359_v60 = vmul.f32 %v5516_v23, %v9549_v16  ;;  %v5518_v27 = vpop.eup %5517  ;;  %v10766_v16 = vld [vmem:[#allocation78_spill] sm:$0xff] }
 0x919   : > { %v4802_v51 = vadd.f32 %v9379_v29, %v4741_v50  ;;  %v4356_v61 = vmul.f32 %v5508_v19, %v4277_v40  ;;  %v4358_v55 = vmul.f32 %v5518_v27, %v9544_v32  ;;  %v3171_v28 = vadd.f32 %v10767_v1, %v10766_v16  ;;  %v10769_v32 = vld [vmem:[#allocation81_spill] sm:$0xff] }
 0x91a   : > { %v4294_v26 = vpop.f32.mrf.mxu3  ;;  %v4601_v44 = vpop.f32.mrf.mxu1  ;;  %v3172_v53 = vadd.f32 %v10769_v32, %v10768_v2 }
 0x91b   : > { %v4834_v38 = vmax.f32 %v4802_v51, 0.0  ;;  %v4363_v22 = vmul.f32 %v5512_v31, %v4294_v26  ;;  %v4378_v63 = vpack.c.bf16 %v4359_v60, %v4358_v55  ;;  %v4131_v52 = vadd.f32 %v9508_v45, %v3171_v28 }
 0x91c   : > { %v4132_v50 = vadd.f32 %v9520_v18, %v3172_v53 }
 0x91d   : > { %4867 = vst.msk [vmem:[%s9400_s16 + $0x78] sm:$0xff] %vm4851_vm9, %v4834_v38  ;;  %v4380_v24 = vpack.c.bf16 %v4363_v22, %v4362_v20  ;;  %5519 = vrcp.f32 %v4131_v52 }
 0x91e   : > { %5521 = vrcp.f32 %v4132_v50 }
 0x920   : > { %v4279_v8 = vpop.f32.mrf.mxu0 }
 0x921   : > { %v4357_v41 = vmul.f32 %v5510_v57, %v4279_v8 }
 0x922   : > { %5202 = vmatmul.msk.bf16.vlgmr.msra.gmra.mxu3 %vm4645_vm3, %v4379_v17 }
 0x923   : > { %v4377_v30 = vpack.c.bf16 %v4357_v41, %v4356_v61  ;;  %v5520_v51 = vpop.eup %5519 }
 0x924   : > { %v5522_v10 = vpop.eup %5521 }
 0x925   : > { %5200 = vmatmul.msk.bf16.gmra.mxu2 %vm4645_vm3, %v4377_v30 }
 0x92a   : > { %v4743_v5 = vpop.f32.mrf.mxu2  ;;  %v4604_v19 = vpop.f32.mrf.mxu1 }
 0x92b   : > { %v4744_v34 = vadd.f32 %v4743_v5, %v4599_v58 }
 0x92d   : > { %v4803_v33 = vadd.f32 %v9379_v29, %v4744_v34 }
 0x92f   : > { %v4835_v21 = vmax.f32 %v4803_v33, 0.0 }
 0x931   : > { %4868 = vst.msk [vmem:[%s9400_s16 + $0x80] sm:$0xff] %vm4851_vm9, %v4835_v21 }
 0x932   : > { %5203 = vmatmul.msk.bf16.gmra.mxu3 %vm4645_vm3, %v4380_v24  ;;  %v4745_v37 = vpop.f32.mrf.mxu2  ;;  %v4606_v39 = vpop.f32.mrf.mxu1 }
 0x933   : > { %v4746_v25 = vadd.f32 %v4745_v37, %v4601_v44 }
 0x935   : > { %5201 = vmatmul.msk.bf16.gmra.mxu2 %vm4645_vm3, %v4378_v63  ;;  %v4804_v3 = vadd.f32 %v9379_v29, %v4746_v25 }
 0x937   : > { %v4836_v43 = vmax.f32 %v4804_v3, 0.0 }
 0x939   : > { %4869 = vst.msk [vmem:[%s9400_s16 + $0x88] sm:$0xff] %vm4851_vm9, %v4836_v43 }
 0x93a   : > { %v4609_v48 = vpop.f32.mrf.mxu1 }
 0x942   : > { %v4611_v35 = vpop.f32.mrf.mxu1 }
 0x95a   : > { %v4614_v56 = vpop.f32.mrf.mxu1 }
 0x962   : > { %v4616_v49 = vpop.f32.mrf.mxu1 }
 0x965   : > { %v4297_v40 = vpop.f32.mrf.mxu3 }
 0x966   : > { %v4364_v42 = vmul.f32 %v5520_v51, %v4297_v40 }
 0x96a   : > { %v4619_v63 = vpop.f32.mrf.mxu1 }
 0x96d   : > { %v4299_v38 = vpop.f32.mrf.mxu3 }
 0x96e   : > { %v4365_v4 = vmul.f32 %v5522_v10, %v4299_v38 }
 0x970   : > { %v4381_v7 = vpack.c.bf16 %v4365_v4, %v4364_v42 }
 0x972   : > { %5204 = vmatmul.msk.bf16.gmra.mxu3 %vm4645_vm3, %v4381_v7  ;;  %v4621_v50 = vpop.f32.mrf.mxu1 }
 0x975   : > { %v4624_v13 = vpop.f32.mrf.mxu3 }
 0x97c   : > { %v4748_v54 = vpop.f32.mrf.mxu2 }
 0x97d   : > { %v4749_v11 = vadd.f32 %v4748_v54, %v4604_v19  ;;  %v4626_v45 = vpop.f32.mrf.mxu3 }
 0x97f   : > { %v4805_v18 = vadd.f32 %v9379_v29, %v4749_v11 }
 0x981   : > { %v4837_v12 = vmax.f32 %v4805_v18, 0.0 }
 0x983   : > { %4870 = vst.msk [vmem:[%s9400_s16 + $0x90] sm:$0xff] %vm4851_vm9, %v4837_v12 }
 0x984   : > { %v4750_v57 = vpop.f32.mrf.mxu2 }
 0x985   : > { %v4751_v17 = vadd.f32 %v4750_v57, %v4606_v39  ;;  %v4629_v8 = vpop.f32.mrf.mxu3 }
 0x987   : > { %v4806_v47 = vadd.f32 %v9379_v29, %v4751_v17 }
 0x989   : > { %v4838_v46 = vmax.f32 %v4806_v47, 0.0 }
 0x98b   : > { %4871 = vst.msk [vmem:[%s9400_s16 + $0x98] sm:$0xff] %vm4851_vm9, %v4838_v46 }
 0x98c   : > { %v4753_v61 = vpop.f32.mrf.mxu2 }
 0x98d   : > { %v4631_v59 = vpop.f32.mrf.mxu3  ;;  %v4754_v41 = vadd.f32 %v4753_v61, %v4609_v48 }
 0x98f   : > { %v4807_v0 = vadd.f32 %v9379_v29, %v4754_v41 }
 0x991   : > { %v4839_v14 = vmax.f32 %v4807_v0, 0.0 }
 0x993   : > { %4872 = vst.msk [vmem:[%s9400_s16 + $0xa0] sm:$0xff] %vm4851_vm9, %v4839_v14 }
 0x994   : > { %v4755_v30 = vpop.f32.mrf.mxu2 }
 0x995   : > { %v4634_v15 = vpop.f32.mrf.mxu3  ;;  %v4756_v6 = vadd.f32 %v4755_v30, %v4611_v35 }
 0x997   : > { %v4808_v36 = vadd.f32 %v9379_v29, %v4756_v6 }
 0x999   : > { %v4840_v9 = vmax.f32 %v4808_v36, 0.0 }
 0x99b   : > { %4873 = vst.msk [vmem:[%s9400_s16 + $0xa8] sm:$0xff] %vm4851_vm9, %v4840_v9 }
 0x99d   : > { %v4636_v62 = vpop.f32.mrf.mxu3 }
 0x9a5   : > { %v4768_v58 = vpop.f32.mrf.mxu3 }
 0x9a6   : > { %v4769_v26 = vadd.f32 %v4768_v58, %v4624_v13 }
 0x9a8   : > { %v4813_v31 = vadd.f32 %v9379_v29, %v4769_v26  ;;  %v4758_v5 = vpop.f32.mrf.mxu2 }
 0x9a9   : > { %v4759_v22 = vadd.f32 %v4758_v5, %v4614_v56 }
 0x9aa   : > { %v4845_v34 = vmax.f32 %v4813_v31, 0.0 }
 0x9ab   : > { %v4809_v23 = vadd.f32 %v9379_v29, %v4759_v22 }
 0x9ac   : > { %4878 = vst.msk [vmem:[%s9400_s16 + $0xd0] sm:$0xff] %vm4851_vm9, %v4845_v34 }
 0x9ad   : > { %v4841_v20 = vmax.f32 %v4809_v23, 0.0  ;;  %v4770_v33 = vpop.f32.mrf.mxu3 }
 0x9ae   : > { %v4771_v60 = vadd.f32 %v4770_v33, %v4626_v45 }
 0x9af   : > { %4874 = vst.msk [vmem:[%s9400_s16 + $0xb0] sm:$0xff] %vm4851_vm9, %v4841_v20 }
 0x9b0   : > { %v4814_v27 = vadd.f32 %v9379_v29, %v4771_v60  ;;  %v4760_v24 = vpop.f32.mrf.mxu2 }
 0x9b1   : > { %v4761_v21 = vadd.f32 %v4760_v24, %v4616_v49 }
 0x9b2   : > { %v4846_v55 = vmax.f32 %v4814_v27, 0.0 }
 0x9b3   : > { %v4810_v44 = vadd.f32 %v9379_v29, %v4761_v21 }
 0x9b4   : > { %4879 = vst.msk [vmem:[%s9400_s16 + $0xd8] sm:$0xff] %vm4851_vm9, %v4846_v55 }
 0x9b5   : > { %v4842_v37 = vmax.f32 %v4810_v44, 0.0  ;;  %v4773_v25 = vpop.f32.mrf.mxu3 }
 0x9b6   : > { %v4774_v3 = vadd.f32 %v4773_v25, %v4629_v8 }
 0x9b7   : > { %4875 = vst.msk [vmem:[%s9400_s16 + $0xb8] sm:$0xff] %vm4851_vm9, %v4842_v37 }
 0x9b8   : > { %v4815_v43 = vadd.f32 %v9379_v29, %v4774_v3  ;;  %v4763_v16 = vpop.f32.mrf.mxu2 }
 0x9b9   : > { %v4764_v1 = vadd.f32 %v4763_v16, %v4619_v63 }
 0x9ba   : > { %v4847_v28 = vmax.f32 %v4815_v43, 0.0 }
 0x9bb   : > { %v4811_v2 = vadd.f32 %v9379_v29, %v4764_v1 }
 0x9bc   : > { %4880 = vst.msk [vmem:[%s9400_s16 + $0xe0] sm:$0xff] %vm4851_vm9, %v4847_v28 }
 0x9bd   : > { %v4843_v32 = vmax.f32 %v4811_v2, 0.0  ;;  %v4775_v53 = vpop.f32.mrf.mxu3 }
 0x9be   : > { %v4776_v52 = vadd.f32 %v4775_v53, %v4631_v59 }
 0x9bf   : > { %4876 = vst.msk [vmem:[%s9400_s16 + $0xc0] sm:$0xff] %vm4851_vm9, %v4843_v32 }
 0x9c0   : > { %v4816_v40 = vadd.f32 %v9379_v29, %v4776_v52  ;;  %v4765_v51 = vpop.f32.mrf.mxu2 }
 0x9c1   : > { %v4766_v10 = vadd.f32 %v4765_v51, %v4621_v50 }
 0x9c2   : > { %v4848_v38 = vmax.f32 %v4816_v40, 0.0 }
 0x9c3   : > { %v4812_v42 = vadd.f32 %v9379_v29, %v4766_v10 }
 0x9c4   : > { %4881 = vst.msk [vmem:[%s9400_s16 + $0xe8] sm:$0xff] %vm4851_vm9, %v4848_v38 }
 0x9c5   : > { %v4844_v4 = vmax.f32 %v4812_v42, 0.0 }
 0x9c7   : > { %4877 = vst.msk [vmem:[%s9400_s16 + $0xc8] sm:$0xff] %vm4851_vm9, %v4844_v4 }
 0x9f5   : > { %v4778_v7 = vpop.f32.mrf.mxu3 }
 0x9f6   : > { %v4779_v13 = vadd.f32 %v4778_v7, %v4634_v15 }
 0x9f8   : > { %v4817_v19 = vadd.f32 %v9379_v29, %v4779_v13 }
 0x9fa   : > { %v4849_v54 = vmax.f32 %v4817_v19, 0.0 }
 0x9fc   : > { %4882 = vst.msk [vmem:[%s9400_s16 + $0xf0] sm:$0xff] %vm4851_vm9, %v4849_v54 }
 0x9fd   : > { %v4780_v11 = vpop.f32.mrf.mxu3 }
 0x9fe   : > { %v4781_v45 = vadd.f32 %v4780_v11, %v4636_v62 }
 0xa00   : > { %v4818_v18 = vadd.f32 %v9379_v29, %v4781_v45 }
 0xa02   : > { %v4850_v39 = vmax.f32 %v4818_v18, 0.0 }
 0xa04   : > { %4883 = vst.msk [vmem:[%s9400_s16 + $0xf8] sm:$0xff] %vm4851_vm9, %v4850_v39 }
 0xa05 PF: > { %s19_s30 = sadd.s32 1, %s5530_s30  }
 0xa06   : > { %p16_p4 = scmp.ge.s32.totalorder %s19_s30, 4  }
 0xa08   :  { %18 = sbr.rel (!%p16_p4) target bundleno = 1 (0x1), region = 92 }

</bundles_post_ra>
